<compile_context>
chip_gen: v6e
topology: v6e:2x2x1
jax: 0.10.0
libtpu: 0.0.40
codegen_flags: <defaults>
</compile_context>

<pallas_src>
import jax
import jax.numpy as jnp
from jax import lax
from jax.experimental import pallas as pl
from jax.experimental.pallas import tpu as pltpu

HIDDEN = 32          # hidden_size
SEG = 128            # lane-tile aligned segment width for each of Q / K / V
LN_EPS = 1e-5        # torch.nn.LayerNorm default eps
MAX_TB = 512         # row-tile cap: keeps the double-buffered footprint well
                     # under the scoped VMEM default on every generation
                     # (16 MiB v5e, 32 MiB v6e/v7x; v7x only has 64 MiB total).


def tft_kernel(x_ref, wqkv_ref, bqkv_ref, wstack_ref, vecs_ref, o_ref):
    TB, S, Din = x_ref.shape
    H = HIDDEN

    # Fused embedding + (scaled Q)/K/V projection: ONE MXU matmul, bf16 in,
    # f32 accumulate.  Bias add stays f32 on the VPU.
    x2 = x_ref[...].reshape(TB * S, Din).astype(jnp.bfloat16)
    qkv = jnp.dot(x2, wqkv_ref[...], preferred_element_type=jnp.float32)
    qkv = (qkv + bqkv_ref[...]).reshape(TB, S, 3 * SEG)

    # 128-aligned lane segments -> tile-aligned slices (no lane-rotate relayout).
    q_last = qkv[:, S - 1, 0:H]                      # (TB, H): only row S-1's Q is used
    k = qkv[:, :, SEG:SEG + H]                       # (TB, S, H)
    v = qkv[:, :, 2 * SEG:2 * SEG + H]               # (TB, S, H)

    # Attention for the last query row done on VPU (broadcast mul) + XLU
    # (reduces) -- no batched M=1 MXU matmuls.  keepdims keeps S on the sublane
    # axis so the weighted sum over S needs no lane<->sublane relayout.
    s = jnp.sum(q_last[:, None, :] * k, axis=-1, keepdims=True)   # (TB, S, 1)
    s = s - jnp.max(s, axis=1, keepdims=True)
    e = jnp.exp(s)
    attn = e * pl.reciprocal(jnp.sum(e, axis=1, keepdims=True), approx=True)
    ctx = jnp.sum(attn * v, axis=1)                  # (TB, H)

    vec = vecs_ref[...]                              # (7, H) packed f32 params
    b_a, b_g = vec[0:1, :], vec[1:2, :]
    gamma, beta = vec[2:3, :], vec[3:4, :]
    b_1, w2_row = vec[4:5, :], vec[5:6, :]
    b_2 = vec[6:7, 0:1]                              # (1, 1)

    # transform: Linear(H,2H) as two (H,H) bf16 matmuls -> GLU -> LayerNorm (f32).
    ctx16 = ctx.astype(jnp.bfloat16)
    a = jnp.dot(ctx16, wstack_ref[0], preferred_element_type=jnp.float32) + b_a
    g = jnp.dot(ctx16, wstack_ref[1], preferred_element_type=jnp.float32) + b_g
    glu = a * jax.nn.sigmoid(g)                      # (TB, H)
    mu = jnp.mean(glu, axis=-1, keepdims=True)
    var = jnp.mean((glu - mu) ** 2, axis=-1, keepdims=True)
    ln = (glu - mu) * lax.rsqrt(var + LN_EPS) * gamma + beta
    # TODO(synk): nn.Dropout implemented as eval-mode identity (no stochastic drop).

    # output head: Linear(H,H) -> ReLU -> Linear(H,1) as a VPU lane-reduce.
    o1 = jnp.maximum(
        jnp.dot(ln.astype(jnp.bfloat16), wstack_ref[2],
                preferred_element_type=jnp.float32) + b_1,
        0.0)                                         # (TB, H)
    dotv = jnp.sum(o1 * w2_row, axis=-1)             # (TB,)
    # Lane-dense store: TB is a multiple of 128 -> unmasked vst.  The single
    # small sublane->lane relayout of dotv is cheap; if the XLU ever became the
    # binding unit, switch to a (tiles, tb, 1) sublane-oriented output instead.
    o_ref[...] = dotv.reshape(1, 1, TB) + b_2


def _pick_tile(batch):
    """128-aligned row tile, capped at MAX_TB, balanced across tiles."""
    b128 = pl.cdiv(batch, 128) * 128
    n_tiles = pl.cdiv(b128, MAX_TB)
    tb = pl.cdiv(b128 // 128, n_tiles) * 128
    return tb, pl.cdiv(b128, tb)


def enhanced_tft_forward(x, kernel_params):
    B, S, Din = x.shape
    tb, num_tiles = _pick_tile(B)        # B=2 -> tb=128, num_tiles=1 (one step)
    b_pad = num_tiles * tb
    if b_pad != B:
        x = jnp.pad(x, ((0, b_pad - B), (0, 0), (0, 0)))

    wqkv, bqkv, wstack, vecs = kernel_params

    out = pl.pallas_call(
        tft_kernel,
        out_shape=jax.ShapeDtypeStruct((num_tiles, 1, tb), jnp.float32),
        grid=(num_tiles,),
        in_specs=[
            pl.BlockSpec((tb, S, Din), lambda b: (b, 0, 0)),
            pl.BlockSpec(wqkv.shape, lambda b: (0, 0)),
            pl.BlockSpec(bqkv.shape, lambda b: (0, 0)),
            pl.BlockSpec(wstack.shape, lambda b: (0, 0, 0)),
            pl.BlockSpec(vecs.shape, lambda b: (0, 0)),
        ],
        out_specs=pl.BlockSpec((1, 1, tb), lambda b: (b, 0, 0)),
        compiler_params=pltpu.CompilerParams(
            dimension_semantics=("parallel",),   # tiles shard across v7x's 2 TCs
            vmem_limit_bytes=32 * 1024 * 1024),  # covers tb=512 worst case
    )(x, wqkv, bqkv, wstack, vecs)
    return out.reshape(b_pad)[:B].reshape(B, 1)


def init_params(key, input_size, hidden):
    """Raw params, PyTorch-equivalent layout (weights stored as (in, out))."""
    ks = jax.random.split(key, 12)
    n = lambda k, shape, s=0.05: (jax.random.normal(k, shape, jnp.float32) * s)
    we = n(ks[0], (input_size, hidden)); be = n(ks[1], (1, hidden))
    wq = n(ks[2], (hidden, hidden));     bq = n(ks[3], (1, hidden))
    wk = n(ks[4], (hidden, hidden));     bk = n(ks[5], (1, hidden))
    wv = n(ks[6], (hidden, hidden));     bv = n(ks[7], (1, hidden))
    wt = n(ks[8], (hidden, 2 * hidden)); bt = n(ks[9], (1, 2 * hidden))
    gam = jnp.ones((1, hidden), jnp.float32)   # LayerNorm default init
    bet = jnp.zeros((1, hidden), jnp.float32)
    w1 = n(ks[10], (hidden, hidden));    b1 = jnp.zeros((1, hidden), jnp.float32)
    w2 = n(ks[11], (hidden, 1));         b2 = jnp.zeros((1, 1), jnp.float32)
    return [we, be, wq, bq, wk, bk, wv, bv, wt, bt, gam, bet, w1, b1, w2, b2]


def prepare_kernel_params(params):
    """Offline weight transforms: fuse embedding into QKV, fold the 1/sqrt(H)
    scale into Q, pad each Q/K/V segment to its own 128-lane group, split the
    GLU weight, pack small vectors, and store MXU operands as bf16."""
    (we, be, wq, bq, wk, bk, wv, bv, wt, bt,
     gam, bet, w1, b1, w2, b2) = params
    H = HIDDEN
    din = we.shape[0]
    scale = 1.0 / (H ** 0.5)
    wq_f = (we @ wq) * scale
    bq_f = (be @ wq + bq) * scale
    wk_f = we @ wk
    bk_f = be @ wk + bk
    wv_f = we @ wv
    bv_f = be @ wv + bv

    w_qkv = jnp.zeros((din, 3 * SEG), jnp.float32)
    w_qkv = (w_qkv.at[:, 0:H].set(wq_f)
                  .at[:, SEG:SEG + H].set(wk_f)
                  .at[:, 2 * SEG:2 * SEG + H].set(wv_f))
    b_qkv = jnp.zeros((1, 3 * SEG), jnp.float32)
    b_qkv = (b_qkv.at[:, 0:H].set(bq_f)
                  .at[:, SEG:SEG + H].set(bk_f)
                  .at[:, 2 * SEG:2 * SEG + H].set(bv_f))

    wa, wg = wt[:, :H], wt[:, H:]
    ba, bg = bt[:, :H], bt[:, H:]
    w_stack = jnp.stack([wa, wg, w1], axis=0)                # (3, H, H)

    b2_row = jnp.zeros((H,), jnp.float32).at[0].set(b2[0, 0])
    vecs = jnp.stack([ba[0], bg[0], gam[0], bet[0],
                      b1[0], w2[:, 0], b2_row], axis=0)      # (7, H) f32
    # MXU operands in bf16; biases / LN params / head vectors stay f32.
    return (w_qkv.astype(jnp.bfloat16), b_qkv,
            w_stack.astype(jnp.bfloat16), vecs)


def ref_forward(x, params):
    """Pure-JAX f32 reference on the raw (unfused) parameters."""
    (we, be, wq, bq, wk, bk, wv, bv, wt, bt,
     gam, bet, w1, b1, w2, b2) = params
    h = x @ we + be[0]
    q = h @ wq + bq[0]
    k = h @ wk + bk[0]
    v = h @ wv + bv[0]
    scores = jnp.einsum('bqh,bkh->bqk', q, k) / (HIDDEN ** 0.5)
    attn = jax.nn.softmax(scores, axis=-1)
    ctx = jnp.einsum('bqk,bkh->bqh', attn, v)
    t = ctx @ wt + bt[0]
    glu = t[..., :HIDDEN] * jax.nn.sigmoid(t[..., HIDDEN:])
    mu = jnp.mean(glu, axis=-1, keepdims=True)
    var = jnp.mean((glu - mu) ** 2, axis=-1, keepdims=True)
    ln = (glu - mu) / jnp.sqrt(var + LN_EPS) * gam[0] + bet[0]
    last = ln[:, -1, :]
    o1 = jnp.maximum(last @ w1 + b1[0], 0.0)
    return o1 @ w2 + b2[0]


if __name__ == "__main__":
    B, S, INPUT_SIZE = 2, 8, 16
    key = jax.random.PRNGKey(0)
    k_x, k_p = jax.random.split(key)
    x = jax.random.normal(k_x, (B, S, INPUT_SIZE), jnp.float32)
    raw_params = init_params(k_p, INPUT_SIZE, HIDDEN)
    kernel_params = prepare_kernel_params(raw_params)

    out = enhanced_tft_forward(x, kernel_params)
    out = jax.block_until_ready(out)

    ref = ref_forward(x, raw_params)
    assert out.shape == (B, 1), out.shape
    # 1e-2 tolerance: bf16 MXU operands (~2^-8 relative) plus the EUP
    # approximate reciprocal (~2^-12) in the softmax denominator; everything
    # else is an exact algebraic refactor of the reference.
    assert jnp.allclose(out, ref, rtol=1e-2, atol=1e-2), (out, ref)
    print("KERNEL_OK")
</pallas_src>

<mosaic_0001>
module attributes {stable_mosaic.version = 11 : i64} {
  func.func @tft_kernel(%arg0: i32, %arg1: memref<128x8x16xf32, #tpu.memory_space<vmem>>, %arg2: memref<16x384xbf16, #tpu.memory_space<vmem>>, %arg3: memref<1x384xf32, #tpu.memory_space<vmem>>, %arg4: memref<3x32x32xbf16, #tpu.memory_space<vmem>>, %arg5: memref<7x32xf32, #tpu.memory_space<vmem>>, %arg6: memref<1x1x128xf32, #tpu.memory_space<vmem>>) attributes {dimension_semantics = [#tpu.dimension_semantics<parallel>], iteration_bounds = array<i64: 1>, scalar_prefetch = 0 : i64, scratch_operands = 0 : i64, tpu.core_type = #tpu.core_type<tc>, window_params = [{transform_indices = @transform_0, window_bounds = array<i64: 128, 8, 16>}, {pipeline_mode = #tpu.pipeline_mode<synchronous>, transform_indices = @transform_1, window_bounds = array<i64: 16, 384>}, {pipeline_mode = #tpu.pipeline_mode<synchronous>, transform_indices = @transform_2, window_bounds = array<i64: 1, 384>}, {pipeline_mode = #tpu.pipeline_mode<synchronous>, transform_indices = @transform_3, window_bounds = array<i64: 3, 32, 32>}, {pipeline_mode = #tpu.pipeline_mode<synchronous>, transform_indices = @transform_4, window_bounds = array<i64: 7, 32>}, {transform_indices = @transform_5, window_bounds = array<i64: 1, 1, 128>}]} {
    %c0 = arith.constant 0 : index
    %c0_0 = arith.constant 0 : index
    %c0_1 = arith.constant 0 : index
    %0 = vector.load %arg1[%c0, %c0_0, %c0_1] : memref<128x8x16xf32, #tpu.memory_space<vmem>>, vector<128x8x16xf32>
    %1 = vector.shape_cast %0 : vector<128x8x16xf32> to vector<1024x16xf32>
    %2 = arith.truncf %1 : vector<1024x16xf32> to vector<1024x16xbf16>
    %c0_2 = arith.constant 0 : index
    %c0_3 = arith.constant 0 : index
    %3 = vector.load %arg2[%c0_2, %c0_3] : memref<16x384xbf16, #tpu.memory_space<vmem>>, vector<16x384xbf16>
    %cst = arith.constant dense<0.000000e+00> : vector<1024x384xf32>
    %4 = tpu.matmul %2, %3, %cst {dimension_numbers = #tpu.dot_dimension_numbers<[1], [0], [0], [1], [0, 0, 1, 1], [], []>} : vector<1024x16xbf16>, vector<16x384xbf16>, vector<1024x384xf32> -> vector<1024x384xf32>
    %c0_4 = arith.constant 0 : index
    %c0_5 = arith.constant 0 : index
    %5 = vector.load %arg3[%c0_4, %c0_5] : memref<1x384xf32, #tpu.memory_space<vmem>>, vector<1x384xf32>
    %6 = vector.broadcast %5 : vector<1x384xf32> to vector<1024x384xf32>
    %7 = arith.addf %4, %6 : vector<1024x384xf32>
    %8 = vector.shape_cast %7 : vector<1024x384xf32> to vector<128x8x384xf32>
    %9 = vector.extract_strided_slice %8 {offsets = [0, 7, 0], sizes = [128, 1, 32], strides = [1, 1, 1]} : vector<128x8x384xf32> to vector<128x1x32xf32>
    %10 = vector.shape_cast %9 : vector<128x1x32xf32> to vector<128x32xf32>
    %11 = vector.extract_strided_slice %8 {offsets = [0, 0, 128], sizes = [128, 8, 32], strides = [1, 1, 1]} : vector<128x8x384xf32> to vector<128x8x32xf32>
    %12 = vector.extract_strided_slice %8 {offsets = [0, 0, 256], sizes = [128, 8, 32], strides = [1, 1, 1]} : vector<128x8x384xf32> to vector<128x8x32xf32>
    %13 = vector.shape_cast %10 : vector<128x32xf32> to vector<128x1x32xf32>
    %14 = vector.broadcast %13 : vector<128x1x32xf32> to vector<128x8x32xf32>
    %15 = arith.mulf %14, %11 : vector<128x8x32xf32>
    %cst_6 = arith.constant dense<0.000000e+00> : vector<128x8xf32>
    %16 = vector.multi_reduction <add>, %15, %cst_6 [2] : vector<128x8x32xf32> to vector<128x8xf32>
    %17 = vector.shape_cast %16 : vector<128x8xf32> to vector<128x8x1xf32>
    %cst_7 = arith.constant dense<0xFF800000> : vector<128x1xf32>
    %18 = vector.multi_reduction <maximumf>, %17, %cst_7 [1] : vector<128x8x1xf32> to vector<128x1xf32>
    %19 = vector.shape_cast %18 : vector<128x1xf32> to vector<128x1x1xf32>
    %20 = vector.broadcast %19 : vector<128x1x1xf32> to vector<128x8x1xf32>
    %21 = arith.subf %17, %20 : vector<128x8x1xf32>
    %22 = math.exp %21 : vector<128x8x1xf32>
    %cst_8 = arith.constant dense<0.000000e+00> : vector<128x1xf32>
    %23 = vector.multi_reduction <add>, %22, %cst_8 [1] : vector<128x8x1xf32> to vector<128x1xf32>
    %24 = vector.shape_cast %23 : vector<128x1xf32> to vector<128x1x1xf32>
    %25 = tpu.reciprocal %24 {approx = true} : vector<128x1x1xf32> -> vector<128x1x1xf32>
    %26 = vector.broadcast %25 : vector<128x1x1xf32> to vector<128x8x1xf32>
    %27 = arith.mulf %22, %26 : vector<128x8x1xf32>
    %28 = vector.broadcast %27 : vector<128x8x1xf32> to vector<128x8x32xf32>
    %29 = arith.mulf %28, %12 : vector<128x8x32xf32>
    %cst_9 = arith.constant dense<0.000000e+00> : vector<128x32xf32>
    %30 = vector.multi_reduction <add>, %29, %cst_9 [1] : vector<128x8x32xf32> to vector<128x32xf32>
    %c0_10 = arith.constant 0 : index
    %c0_11 = arith.constant 0 : index
    %31 = vector.load %arg5[%c0_10, %c0_11] : memref<7x32xf32, #tpu.memory_space<vmem>>, vector<7x32xf32>
    %32 = vector.extract_strided_slice %31 {offsets = [0, 0], sizes = [1, 32], strides = [1, 1]} : vector<7x32xf32> to vector<1x32xf32>
    %33 = vector.extract_strided_slice %31 {offsets = [1, 0], sizes = [1, 32], strides = [1, 1]} : vector<7x32xf32> to vector<1x32xf32>
    %34 = vector.extract_strided_slice %31 {offsets = [2, 0], sizes = [1, 32], strides = [1, 1]} : vector<7x32xf32> to vector<1x32xf32>
    %35 = vector.extract_strided_slice %31 {offsets = [3, 0], sizes = [1, 32], strides = [1, 1]} : vector<7x32xf32> to vector<1x32xf32>
    %36 = vector.extract_strided_slice %31 {offsets = [4, 0], sizes = [1, 32], strides = [1, 1]} : vector<7x32xf32> to vector<1x32xf32>
    %37 = vector.extract_strided_slice %31 {offsets = [5, 0], sizes = [1, 32], strides = [1, 1]} : vector<7x32xf32> to vector<1x32xf32>
    %38 = vector.extract_strided_slice %31 {offsets = [6, 0], sizes = [1, 1], strides = [1, 1]} : vector<7x32xf32> to vector<1x1xf32>
    %39 = arith.truncf %30 : vector<128x32xf32> to vector<128x32xbf16>
    %c0_12 = arith.constant 0 : index
    %c0_13 = arith.constant 0 : index
    %c0_14 = arith.constant 0 : index
    %40 = vector.load %arg4[%c0_12, %c0_13, %c0_14] : memref<3x32x32xbf16, #tpu.memory_space<vmem>>, vector<1x32x32xbf16>
    %41 = vector.shape_cast %40 : vector<1x32x32xbf16> to vector<32x32xbf16>
    %cst_15 = arith.constant dense<0.000000e+00> : vector<128x32xf32>
    %42 = tpu.matmul %39, %41, %cst_15 {dimension_numbers = #tpu.dot_dimension_numbers<[1], [0], [0], [1], [0, 0, 1, 1], [], []>} : vector<128x32xbf16>, vector<32x32xbf16>, vector<128x32xf32> -> vector<128x32xf32>
    %43 = vector.broadcast %32 : vector<1x32xf32> to vector<128x32xf32>
    %44 = arith.addf %42, %43 : vector<128x32xf32>
    %c1 = arith.constant 1 : index
    %c0_16 = arith.constant 0 : index
    %c0_17 = arith.constant 0 : index
    %45 = vector.load %arg4[%c1, %c0_16, %c0_17] : memref<3x32x32xbf16, #tpu.memory_space<vmem>>, vector<1x32x32xbf16>
    %46 = vector.shape_cast %45 : vector<1x32x32xbf16> to vector<32x32xbf16>
    %cst_18 = arith.constant dense<0.000000e+00> : vector<128x32xf32>
    %47 = tpu.matmul %39, %46, %cst_18 {dimension_numbers = #tpu.dot_dimension_numbers<[1], [0], [0], [1], [0, 0, 1, 1], [], []>} : vector<128x32xbf16>, vector<32x32xbf16>, vector<128x32xf32> -> vector<128x32xf32>
    %48 = vector.broadcast %33 : vector<1x32xf32> to vector<128x32xf32>
    %49 = arith.addf %47, %48 : vector<128x32xf32>
    %50 = arith.negf %49 : vector<128x32xf32>
    %51 = math.exp %50 : vector<128x32xf32>
    %cst_19 = arith.constant 1.000000e+00 : f32
    %52 = vector.broadcast %cst_19 : f32 to vector<128x32xf32>
    %53 = arith.addf %52, %51 : vector<128x32xf32>
    %54 = arith.divf %52, %53 : vector<128x32xf32>
    %55 = arith.mulf %44, %54 : vector<128x32xf32>
    %cst_20 = arith.constant dense<0.000000e+00> : vector<128xf32>
    %56 = vector.multi_reduction <add>, %55, %cst_20 [1] : vector<128x32xf32> to vector<128xf32>
    %57 = vector.shape_cast %56 : vector<128xf32> to vector<128x1xf32>
    %cst_21 = arith.constant 3.200000e+01 : f32
    %58 = vector.broadcast %cst_21 : f32 to vector<128x1xf32>
    %59 = arith.divf %57, %58 : vector<128x1xf32>
    %60 = vector.broadcast %59 : vector<128x1xf32> to vector<128x32xf32>
    %61 = arith.subf %55, %60 : vector<128x32xf32>
    %62 = arith.mulf %61, %61 : vector<128x32xf32>
    %cst_22 = arith.constant dense<0.000000e+00> : vector<128xf32>
    %63 = vector.multi_reduction <add>, %62, %cst_22 [1] : vector<128x32xf32> to vector<128xf32>
    %64 = vector.shape_cast %63 : vector<128xf32> to vector<128x1xf32>
    %cst_23 = arith.constant 3.200000e+01 : f32
    %65 = vector.broadcast %cst_23 : f32 to vector<128x1xf32>
    %66 = arith.divf %64, %65 : vector<128x1xf32>
    %67 = vector.broadcast %59 : vector<128x1xf32> to vector<128x32xf32>
    %68 = arith.subf %55, %67 : vector<128x32xf32>
    %cst_24 = arith.constant 9.99999974E-6 : f32
    %69 = vector.broadcast %cst_24 : f32 to vector<128x1xf32>
    %70 = arith.addf %66, %69 : vector<128x1xf32>
    %71 = math.rsqrt %70 : vector<128x1xf32>
    %72 = vector.broadcast %71 : vector<128x1xf32> to vector<128x32xf32>
    %73 = arith.mulf %68, %72 : vector<128x32xf32>
    %74 = vector.broadcast %34 : vector<1x32xf32> to vector<128x32xf32>
    %75 = arith.mulf %73, %74 : vector<128x32xf32>
    %76 = vector.broadcast %35 : vector<1x32xf32> to vector<128x32xf32>
    %77 = arith.addf %75, %76 : vector<128x32xf32>
    %78 = arith.truncf %77 : vector<128x32xf32> to vector<128x32xbf16>
    %c2 = arith.constant 2 : index
    %c0_25 = arith.constant 0 : index
    %c0_26 = arith.constant 0 : index
    %79 = vector.load %arg4[%c2, %c0_25, %c0_26] : memref<3x32x32xbf16, #tpu.memory_space<vmem>>, vector<1x32x32xbf16>
    %80 = vector.shape_cast %79 : vector<1x32x32xbf16> to vector<32x32xbf16>
    %cst_27 = arith.constant dense<0.000000e+00> : vector<128x32xf32>
    %81 = tpu.matmul %78, %80, %cst_27 {dimension_numbers = #tpu.dot_dimension_numbers<[1], [0], [0], [1], [0, 0, 1, 1], [], []>} : vector<128x32xbf16>, vector<32x32xbf16>, vector<128x32xf32> -> vector<128x32xf32>
    %82 = vector.broadcast %36 : vector<1x32xf32> to vector<128x32xf32>
    %83 = arith.addf %81, %82 : vector<128x32xf32>
    %cst_28 = arith.constant 0.000000e+00 : f32
    %84 = vector.broadcast %cst_28 : f32 to vector<128x32xf32>
    %85 = arith.maximumf %83, %84 : vector<128x32xf32>
    %86 = vector.broadcast %37 : vector<1x32xf32> to vector<128x32xf32>
    %87 = arith.mulf %85, %86 : vector<128x32xf32>
    %cst_29 = arith.constant dense<0.000000e+00> : vector<128xf32>
    %88 = vector.multi_reduction <add>, %87, %cst_29 [1] : vector<128x32xf32> to vector<128xf32>
    %89 = vector.shape_cast %88 : vector<128xf32> to vector<1x1x128xf32>
    %90 = vector.shape_cast %38 : vector<1x1xf32> to vector<1x1x1xf32>
    %91 = vector.broadcast %90 : vector<1x1x1xf32> to vector<1x1x128xf32>
    %92 = arith.addf %89, %91 : vector<1x1x128xf32>
    %c0_30 = arith.constant 0 : index
    %c0_31 = arith.constant 0 : index
    %c0_32 = arith.constant 0 : index
    %93 = vector.load %arg6[%c0_30, %c0_31, %c0_32] : memref<1x1x128xf32, #tpu.memory_space<vmem>>, vector<1x1x128xf32>
    tpu.vector_store %arg6[%c0_30, %c0_31, %c0_32], %92 {strides = array<i32>} : memref<1x1x128xf32, #tpu.memory_space<vmem>>, vector<1x1x128xf32>,
    return
  }
  func.func @transform_0(%arg0: i32) -> (i32, i32, i32) {
    %c0_i32 = arith.constant 0 : i32
    %c0_i32_0 = arith.constant 0 : i32
    %c0_i32_1 = arith.constant 0 : i32
    return %arg0, %c0_i32, %c0_i32_0 : i32, i32, i32
  }
  func.func @transform_1(%arg0: i32) -> (i32, i32) {
    %c0_i32 = arith.constant 0 : i32
    %c0_i32_0 = arith.constant 0 : i32
    %c0_i32_1 = arith.constant 0 : i32
    return %c0_i32, %c0_i32_0 : i32, i32
  }
  func.func @transform_2(%arg0: i32) -> (i32, i32) {
    %c0_i32 = arith.constant 0 : i32
    %c0_i32_0 = arith.constant 0 : i32
    %c0_i32_1 = arith.constant 0 : i32
    return %c0_i32, %c0_i32_0 : i32, i32
  }
  func.func @transform_3(%arg0: i32) -> (i32, i32, i32) {
    %c0_i32 = arith.constant 0 : i32
    %c0_i32_0 = arith.constant 0 : i32
    %c0_i32_1 = arith.constant 0 : i32
    %c0_i32_2 = arith.constant 0 : i32
    return %c0_i32, %c0_i32_0, %c0_i32_1 : i32, i32, i32
  }
  func.func @transform_4(%arg0: i32) -> (i32, i32) {
    %c0_i32 = arith.constant 0 : i32
    %c0_i32_0 = arith.constant 0 : i32
    %c0_i32_1 = arith.constant 0 : i32
    return %c0_i32, %c0_i32_0 : i32, i32
  }
  func.func @transform_5(%arg0: i32) -> (i32, i32, i32) {
    %c0_i32 = arith.constant 0 : i32
    %c0_i32_0 = arith.constant 0 : i32
    %c0_i32_1 = arith.constant 0 : i32
    return %arg0, %c0_i32, %c0_i32_0 : i32, i32, i32
  }
}

</mosaic_0001>

<bundles_post_ra>
// kernel: tpu_custom_call.1
= control target key start
LH: loop header
LB: loop body
LE: loop exit
PB: predicated region body
PF: predicated region fallthrough
CT: control target
= control target key end

     0   :  { %v13858_v2 = vmov 0   ;;  %vm251_vm0 = vcmask 130048   ;;  %s13848_s0 = inlined_call_operand.vmem [shape: f32[128,8,16], index: 0, kind: input, shape index: {}]   ;;  %s13849_s1 = inlined_call_operand.vmem [shape: bf16[16,384], index: 1, kind: input, shape index: {}]   ;;  %s13850_s2 = inlined_call_operand.vmem [shape: f32[1,384], index: 2, kind: input, shape index: {}]   ;;  %s13851_s3 = inlined_call_operand.vmem [shape: bf16[3,32,32], index: 3, kind: input, shape index: {}]   ;;  %s13852_s4 = inlined_call_operand.vmem [shape: f32[7,32], index: 4, kind: input, shape index: {}]   ;;  %s13853_s5 = inlined_call_operand.hbm [shape: f32[1,1,128], index: 5, kind: output, shape index: {}]  }
   0x1   :  { %v7945_v0 = vld [vmem:[%s13849_s1 + $0x4] ss:$12 sps:$4 sm:$0xff]   ;;  %v7947_v1 = vld [vmem:[%s13849_s1] ss:$12 sps:$4 sm:$0xff]   ;;  %476 = vmatprep.mubr.bf16.mxu0 %v13858_v2  ;;  %1016 = vmatprep.mubr.bf16.mxu1 %v13858_v2  ;;  %v25_v10 = vld [vmem:[%s13848_s0 + $0x18] sm:$0xff] }
   0x2   :  { %v22_v3 = vld [vmem:[%s13848_s0] sm:$0xff]  ;;  %v23_v4 = vld [vmem:[%s13848_s0 + $0x8] sm:$0xff]  ;;  %458 = vmatprep.subr.bf16.mxu0 %v7945_v0  ;;  %7939 = vmatprep.subr.bf16.mxu1 %v7945_v0  ;;  %v24_v9 = vld [vmem:[%s13848_s0 + $0x10] sm:$0xff] }
   0x3   :  { %v8633_v5 = vpack.c.bf16 %v23_v4, %v22_v3  ;;  %v130_v6 = vld [vmem:[%s13848_s0 + $0x360] sm:$0xff]  ;;  %v131_v7 = vld [vmem:[%s13848_s0 + $0x368] sm:$0xff]  ;;  %459 = vmatpush1.bf16.msra.mxu0 %v7947_v1  ;;  %7940 = vmatpush1.bf16.msra.mxu1 %v7947_v1  ;;  %v132_v11 = vld [vmem:[%s13848_s0 + $0x370] sm:$0xff]  ;;  %v8663_v13 = vpack.c.bf16 %v25_v10, %v24_v9 }
   0x4   :  { %v8641_v8 = vpack.c.bf16 %v131_v7, %v130_v6  ;;  %7943 = vset.pattern.permute.xlu1 %v13858_v2  ;;  %7944 = vset.pattern.permute.xlu0 %v13858_v2  ;;  %v133_v12 = vld [vmem:[%s13848_s0 + $0x378] sm:$0xff]  ;;  %v26_v15 = vld [vmem:[%s13848_s0 + $0x20] sm:$0xff]  ;;  %v27_v16 = vld [vmem:[%s13848_s0 + $0x28] sm:$0xff] }
   0x5   :  { %v8665_v14 = vpack.c.bf16 %v133_v12, %v132_v11  ;;  %v134_v17 = vld [vmem:[%s13848_s0 + $0x380] sm:$0xff]  ;;  %v135_v18 = vld [vmem:[%s13848_s0 + $0x388] sm:$0xff]  ;;  %v8685_v19 = vpack.c.bf16 %v27_v16, %v26_v15  ;;  %v28_v22 = vld [vmem:[%s13848_s0 + $0x30] sm:$0xff] }
   0x6   :  { %7472 = vmatmul.mubr.msk.bf16.vlgmr.msra.gmra.mxu0 %vm251_vm0, %v8633_v5  ;;  %7526 = vmatmul.mubr.msk.bf16.vlgmr.msra.gmra.mxu1 %vm251_vm0, %v8641_v8  ;;  %v8687_v20 = vpack.c.bf16 %v135_v18, %v134_v17  ;;  %v7948_v21 = vld [vmem:[%s13849_s1 + $0x8] ss:$12 sps:$4 sm:$0xff]   ;;  %v29_v23 = vld [vmem:[%s13848_s0 + $0x38] sm:$0xff] }
   0x7   :  { %486 = vmatprep.mubr.bf16.mxu0 %v13858_v2  ;;  %1026 = vmatprep.mubr.bf16.mxu1 %v13858_v2  ;;  %v136_v24 = vld [vmem:[%s13848_s0 + $0x390] sm:$0xff]  ;;  %v137_v25 = vld [vmem:[%s13848_s0 + $0x398] sm:$0xff]  ;;  %v8710_v26 = vpack.c.bf16 %v29_v23, %v28_v22 }
   0x8   :  { %7749 = vmatprep.subr.bf16.mxu1 %v7948_v21  ;;  %v8712_v27 = vpack.c.bf16 %v137_v25, %v136_v24 }
   0x9   :  { %7750 = vmatpush3.bf16.msra.mxu1 %v7948_v21 }
   0xe   :  { %7473 = vmatmul.mubr.msk.bf16.gmra.mxu0 %vm251_vm0, %v8663_v13  ;;  %7527 = vmatmul.mubr.msk.bf16.gmra.mxu1 %vm251_vm0, %v8665_v14 }
   0xf   :  { %496 = vmatprep.mubr.bf16.mxu0 %v13858_v2  ;;  %1036 = vmatprep.mubr.bf16.mxu1 %v13858_v2 }
  0x16   :  { %7474 = vmatmul.mubr.msk.bf16.gmra.mxu0 %vm251_vm0, %v8685_v19  ;;  %7528 = vmatmul.mubr.msk.bf16.gmra.mxu1 %vm251_vm0, %v8687_v20 }
  0x17   :  { %506 = vmatprep.mubr.bf16.mxu0 %v13858_v2  ;;  %1046 = vmatprep.mubr.bf16.mxu1 %v13858_v2 }
  0x18   :  { %10 = vsyncpa [#allocation3], 0  ;;  %v30_v28 = vld [vmem:[%s13848_s0 + $0x40] sm:$0xff]  ;;  %v31_v29 = vld [vmem:[%s13848_s0 + $0x48] sm:$0xff]  ;;  %vm2302_vm1 = vcmask 261120   ;;  %vm6280_vm2 = vcmask 1041409  }
  0x19   :  { %v138_v30 = vld [vmem:[%s13848_s0 + $0x3a0] sm:$0xff]  ;;  %v139_v31 = vld [vmem:[%s13848_s0 + $0x3a8] sm:$0xff]  ;;  %v8732_v32 = vpack.c.bf16 %v31_v29, %v30_v28  ;;  %v32_v34 = vld [vmem:[%s13848_s0 + $0x50] sm:$0xff]  ;;  %vm6282_vm3 = vcmask 1042434   ;;  %vm6284_vm4 = vcmask 1043459   ;;  %vm6286_vm5 = vcmask 1044484  }
  0x1a   :  { %v8734_v33 = vpack.c.bf16 %v139_v31, %v138_v30  ;;  %v33_v35 = vld [vmem:[%s13848_s0 + $0x58] sm:$0xff]  ;;  %v140_v36 = vld [vmem:[%s13848_s0 + $0x3b0] sm:$0xff]  ;;  %v34_v40 = vld [vmem:[%s13848_s0 + $0x60] sm:$0xff]  ;;  %vm6288_vm6 = vcmask 1045509   ;;  %vm6290_vm7 = vcmask 1046534   ;;  %vm6292_vm8 = vcmask 1047559  }
  0x1b   :  { %v141_v37 = vld [vmem:[%s13848_s0 + $0x3b8] sm:$0xff]  ;;  %v8754_v38 = vpack.c.bf16 %v33_v35, %v32_v34  ;;  %v35_v41 = vld [vmem:[%s13848_s0 + $0x68] sm:$0xff]  ;;  %v142_v42 = vld [vmem:[%s13848_s0 + $0x3c0] sm:$0xff]  ;;  %vm7353_vm9 = vcmask 130112   ;;  %vm7360_vm10 = vcmask 195712   ;;  %vm7367_vm11 = vcmask 261312  }
  0x1c   :  { %v8756_v39 = vpack.c.bf16 %v141_v37, %v140_v36  ;;  %v143_v43 = vld [vmem:[%s13848_s0 + $0x3c8] sm:$0xff]  ;;  %v156_v44 = vpack.c.bf16 %v35_v41, %v34_v40  ;;  %v36_v46 = vld [vmem:[%s13848_s0 + $0x70] sm:$0xff]  ;;  %v37_v47 = vld [vmem:[%s13848_s0 + $0x78] sm:$0xff]  ;;  %vm7374_vm12 = vcmask 326912   ;;  %vm7381_vm13 = vcmask 392512  }
  0x1d   :  { %v8776_v45 = vpack.c.bf16 %v143_v43, %v142_v42  ;;  %v144_v48 = vld [vmem:[%s13848_s0 + $0x3d0] sm:$0xff]  ;;  %v145_v49 = vld [vmem:[%s13848_s0 + $0x3d8] sm:$0xff]  ;;  %v157_v50 = vpack.c.bf16 %v37_v47, %v36_v46  ;;  %v38_v52 = vld [vmem:[%s13848_s0 + $0x80] sm:$0xff]  ;;  %vm7388_vm14 = vcmask 458112   ;;  %vm7395_vm15 = vcmask 523712  }
  0x1e   :  { %7475 = vmatmul.mubr.msk.bf16.gmra.mxu0 %vm251_vm0, %v8710_v26  ;;  %7529 = vmatmul.mubr.msk.bf16.gmra.mxu1 %vm251_vm0, %v8712_v27  ;;  %v8795_v51 = vpack.c.bf16 %v145_v49, %v144_v48  ;;  %v39_v53 = vld [vmem:[%s13848_s0 + $0x88] sm:$0xff]  ;;  %v146_v54 = vld [vmem:[%s13848_s0 + $0x3e0] sm:$0xff]  ;;  %v40_v58 = vld [vmem:[%s13848_s0 + $0x90] sm:$0xff] }
  0x1f   :  { %516 = vmatprep.mubr.bf16.mxu0 %v13858_v2  ;;  %1056 = vmatprep.mubr.bf16.mxu1 %v13858_v2  ;;  %v147_v55 = vld [vmem:[%s13848_s0 + $0x3e8] sm:$0xff]  ;;  %v158_v56 = vpack.c.bf16 %v39_v53, %v38_v52  ;;  %v41_v59 = vld [vmem:[%s13848_s0 + $0x98] sm:$0xff]  ;;  %v148_v60 = vld [vmem:[%s13848_s0 + $0x3f0] sm:$0xff] }
  0x20   :  { %v8814_v57 = vpack.c.bf16 %v147_v55, %v146_v54  ;;  %v149_v61 = vld [vmem:[%s13848_s0 + $0x3f8] sm:$0xff]  ;;  %v159_v62 = vpack.c.bf16 %v41_v59, %v40_v58  ;;  %v42_v0 = vld [vmem:[%s13848_s0 + $0xa0] sm:$0xff]  ;;  %v43_v1 = vld [vmem:[%s13848_s0 + $0xa8] sm:$0xff] }
  0x21   :  { %v8833_v63 = vpack.c.bf16 %v149_v61, %v148_v60  ;;  %v160_v3 = vpack.c.bf16 %v43_v1, %v42_v0  ;;  %v44_v4 = vld [vmem:[%s13848_s0 + $0xb0] sm:$0xff]  ;;  %v45_v6 = vld [vmem:[%s13848_s0 + $0xb8] sm:$0xff]  ;;  %v46_v7 = vld [vmem:[%s13848_s0 + $0xc0] sm:$0xff]  ;;  %v13854_v61 = vlaneseq }
  0x22   :  { %v47_v9 = vld [vmem:[%s13848_s0 + $0xc8] sm:$0xff]  ;;  %v48_v11 = vld [vmem:[%s13848_s0 + $0xd0] sm:$0xff]  ;;  %v49_v12 = vld [vmem:[%s13848_s0 + $0xd8] sm:$0xff] }
  0x23   :  { %v162_v10 = vpack.c.bf16 %v47_v9, %v46_v7  ;;  %v50_v15 = vld [vmem:[%s13848_s0 + $0xe0] sm:$0xff]  ;;  %v51_v16 = vld [vmem:[%s13848_s0 + $0xe8] sm:$0xff]  ;;  %v52_v18 = vld [vmem:[%s13848_s0 + $0xf0] sm:$0xff] }
  0x24   :  { %v164_v17 = vpack.c.bf16 %v51_v16, %v50_v15  ;;  %v54_v22 = vld [vmem:[%s13848_s0 + $0x100] sm:$0xff]  ;;  %v55_v23 = vld [vmem:[%s13848_s0 + $0x108] sm:$0xff]  ;;  %v56_v25 = vld [vmem:[%s13848_s0 + $0x110] sm:$0xff] }
  0x25   :  { %v166_v24 = vpack.c.bf16 %v55_v23, %v54_v22  ;;  %v58_v29 = vld [vmem:[%s13848_s0 + $0x120] sm:$0xff]  ;;  %v59_v30 = vld [vmem:[%s13848_s0 + $0x128] sm:$0xff]  ;;  %v61_v34 = vld [vmem:[%s13848_s0 + $0x138] sm:$0xff] }
  0x26   :  { %7476 = vmatmul.mubr.msk.bf16.gmra.mxu0 %vm251_vm0, %v8732_v32  ;;  %7530 = vmatmul.mubr.msk.bf16.gmra.mxu1 %vm251_vm0, %v8734_v33  ;;  %v168_v31 = vpack.c.bf16 %v59_v30, %v58_v29  ;;  %v62_v36 = vld [vmem:[%s13848_s0 + $0x140] sm:$0xff]  ;;  %v63_v37 = vld [vmem:[%s13848_s0 + $0x148] sm:$0xff]  ;;  %v64_v40 = vld [vmem:[%s13848_s0 + $0x150] sm:$0xff] }
  0x27   :  { %526 = vmatprep.mubr.bf16.mxu0 %v13858_v2  ;;  %1066 = vmatprep.mubr.bf16.mxu1 %v13858_v2  ;;  %v65_v41 = vld [vmem:[%s13848_s0 + $0x158] sm:$0xff]  ;;  %v66_v42 = vld [vmem:[%s13848_s0 + $0x160] sm:$0xff]  ;;  %v67_v43 = vld [vmem:[%s13848_s0 + $0x168] sm:$0xff] }
  0x28   :  { %v172_v46 = vpack.c.bf16 %v67_v43, %v66_v42  ;;  %v68_v47 = vld [vmem:[%s13848_s0 + $0x170] sm:$0xff]  ;;  %v69_v48 = vld [vmem:[%s13848_s0 + $0x178] sm:$0xff]  ;;  %v70_v49 = vld [vmem:[%s13848_s0 + $0x180] sm:$0xff] }
  0x29   :  { %v173_v52 = vpack.c.bf16 %v69_v48, %v68_v47  ;;  %v72_v54 = vld [vmem:[%s13848_s0 + $0x190] sm:$0xff]  ;;  %v73_v55 = vld [vmem:[%s13848_s0 + $0x198] sm:$0xff]  ;;  %v75_v58 = vld [vmem:[%s13848_s0 + $0x1a8] sm:$0xff] }
  0x2a   :  { %v8996_v59 = vpack.c.bf16 %v73_v55, %v72_v54  ;;  %v77_v0 = vld [vmem:[%s13848_s0 + $0x1b8] sm:$0xff]  ;;  %v78_v1 = vld [vmem:[%s13848_s0 + $0x1c0] sm:$0xff]  ;;  %v80_v9 = vld [vmem:[%s13848_s0 + $0x1d0] sm:$0xff] }
  0x2b   :  { %v84_v29 = vld [vmem:[%s13848_s0 + $0x1f0] sm:$0xff] }
  0x2e   :  { %7477 = vmatmul.mubr.msk.bf16.gmra.mxu0 %vm251_vm0, %v8754_v38  ;;  %7531 = vmatmul.mubr.msk.bf16.gmra.mxu1 %vm251_vm0, %v8756_v39 }
  0x2f   :  { %536 = vmatprep.mubr.bf16.mxu0 %v13858_v2  ;;  %1076 = vmatprep.mubr.bf16.mxu1 %v13858_v2 }
  0x36   :  { %7478 = vmatmul.mubr.msk.bf16.gmra.mxu0 %vm251_vm0, %v156_v44  ;;  %7532 = vmatmul.mubr.msk.bf16.gmra.mxu1 %vm251_vm0, %v8776_v45 }
  0x37   :  { %546 = vmatprep.mubr.bf16.mxu0 %v13858_v2  ;;  %1086 = vmatprep.mubr.bf16.mxu1 %v13858_v2 }
  0x3e   :  { %7479 = vmatmul.mubr.msk.bf16.gmra.mxu0 %vm251_vm0, %v157_v50  ;;  %7533 = vmatmul.mubr.msk.bf16.gmra.mxu1 %vm251_vm0, %v8795_v51 }
  0x3f   :  { %556 = vmatprep.mubr.bf16.mxu0 %v13858_v2  ;;  %1096 = vmatprep.mubr.bf16.mxu1 %v13858_v2 }
  0x46   :  { %7480 = vmatmul.mubr.msk.bf16.gmra.mxu0 %vm251_vm0, %v158_v56  ;;  %7534 = vmatmul.mubr.msk.bf16.gmra.mxu1 %vm251_vm0, %v8814_v57 }
  0x47   :  { %566 = vmatprep.mubr.bf16.mxu0 %v13858_v2  ;;  %1106 = vmatprep.mubr.bf16.mxu1 %v13858_v2 }
  0x4e   :  { %7481 = vmatmul.mubr.msk.bf16.gmra.mxu0 %vm251_vm0, %v159_v62  ;;  %7535 = vmatmul.mubr.msk.bf16.gmra.mxu1 %vm251_vm0, %v8833_v63 }
  0x4f   :  { %576 = vmatprep.mubr.bf16.mxu0 %v13858_v2  ;;  %7751 = vmatprep.mubr.msk.bf16.mxu1 %vm251_vm0, %v8633_v5  ;;  %v161_v5 = vpack.c.bf16 %v45_v6, %v44_v4  ;;  %v9021_v6 = vshrl.u32 %v13854_v61, 7 }
  0x51   :  { %13959 = vst [vmem:[#allocation5_spill] sm:$0xff] %v9021_v6  ;;  %v13855_v7 = vsub.s32 0, %v9021_v6  ;;  %v13856_v15 = vsub.s32 1, %v9021_v6 }
  0x56   :  { %7482 = vmatmul.mubr.msk.bf16.gmra.mxu0 %vm251_vm0, %v160_v3  ;;  %7752 = vmatmul.mubr.msk.bf16.vlgmr.msra.gmra.mxu1 %vm251_vm0, %v8663_v13  ;;  %v163_v13 = vpack.c.bf16 %v49_v12, %v48_v11  ;;  %v218_v11 = vld [vmem:[%s13850_s2] sm:$0x7] }
  0x57   :  { %586 = vmatprep.mubr.bf16.mxu0 %v13858_v2  ;;  %7755 = vmatprep.mubr.msk.bf16.mxu1 %vm251_vm0, %v8685_v19  ;;  %v53_v19 = vld [vmem:[%s13848_s0 + $0xf8] sm:$0xff]  ;;  %v82_v12 = vld [vmem:[%s13848_s0 + $0x1e0] sm:$0xff] }
  0x58   :  { %v165_v21 = vpack.c.bf16 %v53_v19, %v52_v18  ;;  %v9057_v19 = vsub.s32 7, %v9021_v6 }
  0x5e   :  { %7483 = vmatmul.mubr.msk.bf16.gmra.mxu0 %vm251_vm0, %v161_v5  ;;  %7756 = vmatmul.mubr.msk.bf16.gmra.mxu1 %vm251_vm0, %v8710_v26  ;;  %v57_v26 = vld [vmem:[%s13848_s0 + $0x118] sm:$0xff] }
  0x5f   :  { %596 = vmatprep.mubr.bf16.mxu0 %v13858_v2  ;;  %7759 = vmatprep.mubr.msk.bf16.mxu1 %vm251_vm0, %v8732_v32  ;;  %v167_v28 = vpack.c.bf16 %v57_v26, %v56_v25  ;;  %v60_v32 = vld [vmem:[%s13848_s0 + $0x130] sm:$0xff] }
  0x60   :  { %v169_v35 = vpack.c.bf16 %v61_v34, %v60_v32 }
  0x66   :  { %7484 = vmatmul.mubr.msk.bf16.gmra.mxu0 %vm251_vm0, %v162_v10  ;;  %7760 = vmatmul.mubr.msk.bf16.gmra.mxu1 %vm251_vm0, %v8754_v38  ;;  %v170_v38 = vpack.c.bf16 %v63_v37, %v62_v36  ;;  %v86_v36 = vld [vmem:[%s13848_s0 + $0x200] sm:$0xff]  ;;  %v87_v37 = vld [vmem:[%s13848_s0 + $0x208] sm:$0xff] }
  0x67   :  { %606 = vmatprep.mubr.bf16.mxu0 %v13858_v2  ;;  %7763 = vmatprep.mubr.msk.bf16.mxu1 %vm251_vm0, %v156_v44  ;;  %v171_v44 = vpack.c.bf16 %v65_v41, %v64_v40 }
  0x6e   :  { %7485 = vmatmul.mubr.msk.bf16.gmra.mxu0 %vm251_vm0, %v163_v13  ;;  %7764 = vmatmul.mubr.msk.bf16.gmra.mxu1 %vm251_vm0, %v157_v50  ;;  %v71_v50 = vld [vmem:[%s13848_s0 + $0x188] sm:$0xff] }
  0x6f   :  { %616 = vmatprep.mubr.bf16.mxu0 %v13858_v2  ;;  %7767 = vmatprep.mubr.msk.bf16.mxu1 %vm251_vm0, %v158_v56  ;;  %v174_v53 = vpack.c.bf16 %v71_v50, %v70_v49  ;;  %v74_v56 = vld [vmem:[%s13848_s0 + $0x1a0] sm:$0xff]  ;;  %v9091_v49 = vpack.c.bf16 %v87_v37, %v86_v36 }
  0x70   :  { %v8998_v60 = vpack.c.bf16 %v75_v58, %v74_v56 }
  0x76   :  { %7486 = vmatmul.mubr.msk.bf16.gmra.mxu0 %vm251_vm0, %v164_v17  ;;  %7768 = vmatmul.mubr.msk.bf16.gmra.mxu1 %vm251_vm0, %v159_v62  ;;  %v76_v62 = vld [vmem:[%s13848_s0 + $0x1b0] sm:$0xff] }
  0x77   :  { %626 = vmatprep.mubr.bf16.mxu0 %v13858_v2  ;;  %7771 = vmatprep.mubr.msk.bf16.mxu1 %vm251_vm0, %v160_v3  ;;  %v79_v3 = vld [vmem:[%s13848_s0 + $0x1c8] sm:$0xff]  ;;  %v9018_v4 = vpack.c.bf16 %v77_v0, %v76_v62 }
  0x7e   :  { %7487 = vmatmul.mubr.msk.bf16.gmra.mxu0 %vm251_vm0, %v165_v21  ;;  %7772 = vmatmul.mubr.msk.bf16.gmra.mxu1 %vm251_vm0, %v161_v5  ;;  %v9023_v5 = vpack.c.bf16 %v79_v3, %v78_v1 }
  0x7f   :  { %636 = vmatprep.mubr.bf16.mxu0 %v13858_v2  ;;  %7775 = vmatprep.mubr.msk.bf16.mxu1 %vm251_vm0, %v162_v10  ;;  %v81_v10 = vld [vmem:[%s13848_s0 + $0x1d8] sm:$0xff] }
  0x80   :  { %v9048_v16 = vpack.c.bf16 %v81_v10, %v80_v9 }
  0x86   :  { %7488 = vmatmul.mubr.msk.bf16.gmra.mxu0 %vm251_vm0, %v166_v24  ;;  %7776 = vmatmul.mubr.msk.bf16.gmra.mxu1 %vm251_vm0, %v163_v13  ;;  %v83_v13 = vld [vmem:[%s13848_s0 + $0x1e8] sm:$0xff] }
  0x87   :  { %646 = vmatprep.mubr.bf16.mxu0 %v13858_v2  ;;  %7779 = vmatprep.mubr.msk.bf16.mxu1 %vm251_vm0, %v164_v17  ;;  %v9052_v17 = vrot.slane %v218_v11, %v13855_v7  ;;  %v9054_v18 = vpack.c.bf16 %v83_v13, %v82_v12 }
  0x8e   :  { %7489 = vmatmul.mubr.msk.bf16.gmra.mxu0 %vm251_vm0, %v167_v28  ;;  %7780 = vmatmul.mubr.msk.bf16.gmra.mxu1 %vm251_vm0, %v165_v21  ;;  %v9061_v21 = vrot.slane %v218_v11, %v13856_v15 }
  0x8f   :  { %656 = vmatprep.mubr.bf16.mxu0 %v13858_v2  ;;  %7783 = vmatprep.mubr.msk.bf16.mxu1 %vm251_vm0, %v166_v24 }
  0x96   :  { %7490 = vmatmul.mubr.msk.bf16.gmra.mxu0 %vm251_vm0, %v168_v31  ;;  %7784 = vmatmul.mubr.msk.bf16.gmra.mxu1 %vm251_vm0, %v167_v28 }
  0x97   :  { %666 = vmatprep.mubr.bf16.mxu0 %v13858_v2  ;;  %7787 = vmatprep.mubr.msk.bf16.mxu1 %vm251_vm0, %v168_v31 }
  0x9e   :  { %7491 = vmatmul.mubr.msk.bf16.gmra.mxu0 %vm251_vm0, %v169_v35  ;;  %7788 = vmatmul.mubr.msk.bf16.gmra.mxu1 %vm251_vm0, %v169_v35  ;;  %v85_v35 = vld [vmem:[%s13848_s0 + $0x1f8] sm:$0xff] }
  0x9f   :  { %676 = vmatprep.mubr.bf16.mxu0 %v13858_v2  ;;  %7791 = vmatprep.mubr.msk.bf16.mxu1 %vm251_vm0, %v170_v38  ;;  %v9089_v48 = vpack.c.bf16 %v85_v35, %v84_v29 }
  0xa6   :  { %7492 = vmatmul.mubr.msk.bf16.gmra.mxu0 %vm251_vm0, %v170_v38  ;;  %7792 = vmatmul.mubr.msk.bf16.gmra.mxu1 %vm251_vm0, %v171_v44 }
  0xa7   :  { %686 = vmatprep.mubr.bf16.mxu0 %v13858_v2  ;;  %7795 = vmatprep.mubr.msk.bf16.mxu1 %vm251_vm0, %v172_v46 }
  0xae   :  { %7493 = vmatmul.mubr.msk.bf16.gmra.mxu0 %vm251_vm0, %v171_v44  ;;  %7796 = vmatmul.mubr.msk.bf16.gmra.mxu1 %vm251_vm0, %v173_v52 }
  0xaf   :  { %696 = vmatprep.mubr.bf16.mxu0 %v13858_v2  ;;  %7799 = vmatprep.mubr.msk.bf16.mxu1 %vm251_vm0, %v174_v53 }
  0xb6   :  { %7494 = vmatmul.mubr.msk.bf16.gmra.mxu0 %vm251_vm0, %v172_v46  ;;  %7800 = vmatmul.mubr.msk.bf16.gmra.mxu1 %vm251_vm0, %v8996_v59 }
  0xb7   :  { %706 = vmatprep.mubr.bf16.mxu0 %v13858_v2  ;;  %7803 = vmatprep.mubr.msk.bf16.mxu1 %vm251_vm0, %v8998_v60 }
  0xbe   :  { %7495 = vmatmul.mubr.msk.bf16.gmra.mxu0 %vm251_vm0, %v173_v52  ;;  %7804 = vmatmul.mubr.msk.bf16.gmra.mxu1 %vm251_vm0, %v9018_v4 }
  0xbf   :  { %716 = vmatprep.mubr.bf16.mxu0 %v13858_v2  ;;  %7807 = vmatprep.mubr.msk.bf16.mxu1 %vm251_vm0, %v9023_v5 }
  0xc6   :  { %v478_v22 = vpop.f32.mrf.mxu0  ;;  %7496 = vmatmul.mubr.msk.bf16.gmra.mxu0 %vm251_vm0, %v174_v53  ;;  %v1018_v23 = vpop.f32.mrf.mxu1  ;;  %7808 = vmatmul.mubr.msk.bf16.gmra.mxu1 %vm251_vm0, %v9048_v16 }
  0xc7   :  { %v479_v24 = vadd.f32 %v478_v22, %v9052_v17  ;;  %v1019_v25 = vadd.f32 %v1018_v23, %v9052_v17  ;;  %726 = vmatprep.mubr.bf16.mxu0 %v13858_v2  ;;  %7811 = vmatprep.mubr.msk.bf16.mxu1 %vm251_vm0, %v9054_v18 }
  0xc8   :  { %v480_v26 = vpop.f32.mrf.mxu0  ;;  %v1020_v28 = vpop.f32.mrf.mxu1 }
  0xc9   :  { %v1665_v30 = vrot.slane %v479_v24, %v9057_v19  ;;  %v481_v31 = vadd.f32 %v480_v26, %v9061_v21  ;;  %v2097_v32 = vrot.slane %v1019_v25, %v9057_v19  ;;  %v1021_v34 = vadd.f32 %v1020_v28, %v9061_v21  ;;  %v89_v24 = vld [vmem:[%s13848_s0 + $0x218] sm:$0xff]  ;;  %v90_v25 = vld [vmem:[%s13848_s0 + $0x220] sm:$0xff]  ;;  %v91_v26 = vld [vmem:[%s13848_s0 + $0x228] sm:$0xff] }
  0xca   :  { %v482_v38 = vpop.f32.mrf.mxu0  ;;  %v1022_v40 = vpop.f32.mrf.mxu1 }
  0xcb   :  { %v483_v41 = vadd.f32 %v482_v38, %v9052_v17  ;;  %v1023_v42 = vadd.f32 %v1022_v40, %v9052_v17  ;;  %v2174_v43 = vmul.f32 %v1665_v30, %v481_v31  ;;  %v2282_v44 = vmul.f32 %v2097_v32, %v1021_v34 }
  0xcc   :  { %v484_v46 = vpop.f32.mrf.mxu0  ;;  %v1024_v47 = vpop.f32.mrf.mxu1 }
  0xcd   :  { %v1669_v50 = vrot.slane %v483_v41, %v9057_v19  ;;  %v485_v52 = vadd.f32 %v484_v46, %v9061_v21  ;;  %v2101_v53 = vrot.slane %v1023_v42, %v9057_v19  ;;  %v2303_v54 = vsel %vm2302_vm1, %v2174_v43, 0.0 }
  0xce   :  { %v488_v55 = vpop.f32.mrf.mxu0  ;;  %7497 = vmatmul.mubr.msk.bf16.gmra.mxu0 %vm251_vm0, %v8996_v59  ;;  %2304 = vadd.xlane.f32.xlu0 %v2303_v54  ;;  %v1025_v56 = vadd.f32 %v1024_v47, %v9061_v21  ;;  %v1028_v58 = vpop.f32.mrf.mxu1  ;;  %v2627_v62 = vsel %vm2302_vm1, %v2282_v44, 0.0  ;;  %v88_v59 = vld [vmem:[%s13848_s0 + $0x210] sm:$0xff]  ;;  %v9130_v41 = vpack.c.bf16 %v91_v26, %v90_v25 }
  0xcf   :  { %v489_v0 = vadd.f32 %v488_v55, %v9052_v17  ;;  %v1029_v1 = vadd.f32 %v1028_v58, %v9052_v17  ;;  %v2175_v3 = vmul.f32 %v1669_v50, %v485_v52  ;;  %736 = vmatprep.mubr.bf16.mxu0 %v13858_v2  ;;  %2628 = vadd.xlane.f32.xlu1 %v2627_v62 }
  0xd0   :  { %v490_v9 = vpop.f32.mrf.mxu0  ;;  %v1030_v10 = vpop.f32.mrf.mxu1  ;;  %v2283_v11 = vmul.f32 %v2101_v53, %v1025_v56  ;;  %7812 = vmatmul.mubr.msk.bf16.gmra.mxu1 %vm251_vm0, %v9089_v48  ;;  %v9128_v40 = vpack.c.bf16 %v89_v24, %v88_v59  ;;  %v94_v59 = vld [vmem:[%s13848_s0 + $0x240] sm:$0xff] }
  0xd1   :  { %v1673_v12 = vrot.slane %v489_v0, %v9057_v19  ;;  %v491_v13 = vadd.f32 %v490_v9, %v9061_v21  ;;  %v2105_v22 = vrot.slane %v1029_v1, %v9057_v19  ;;  %v2306_v23 = vsel %vm2302_vm1, %v2175_v3, 0.0  ;;  %7815 = vmatprep.mubr.msk.bf16.mxu1 %vm251_vm0, %v9091_v49 }
  0xd2   :  { %v492_v28 = vpop.f32.mrf.mxu0  ;;  %2307 = vadd.xlane.f32.xlu0 %v2306_v23  ;;  %v1031_v29 = vadd.f32 %v1030_v10, %v9061_v21  ;;  %v1032_v30 = vpop.f32.mrf.mxu1  ;;  %v2630_v31 = vsel %vm2302_vm1, %v2283_v11, 0.0  ;;  %v93_v11 = vld [vmem:[%s13848_s0 + $0x238] sm:$0xff] }
  0xd3   :  { %v493_v32 = vadd.f32 %v492_v28, %v9052_v17  ;;  %v1033_v34 = vadd.f32 %v1032_v30, %v9052_v17  ;;  %v2176_v35 = vmul.f32 %v1673_v12, %v491_v13  ;;  %2631 = vadd.xlane.f32.xlu1 %v2630_v31  ;;  %v95_v12 = vld [vmem:[%s13848_s0 + $0x248] sm:$0xff] }
  0xd4   :  { %v494_v36 = vpop.f32.mrf.mxu0  ;;  %v1034_v37 = vpop.f32.mrf.mxu1  ;;  %v2284_v38 = vmul.f32 %v2105_v22, %v1031_v29 }
  0xd5   :  { %v1677_v42 = vrot.slane %v493_v32, %v9057_v19  ;;  %v495_v43 = vadd.f32 %v494_v36, %v9061_v21  ;;  %v2109_v44 = vrot.slane %v1033_v34, %v9057_v19  ;;  %v2309_v46 = vsel %vm2302_vm1, %v2176_v35, 0.0 }
  0xd6   :  { %v498_v47 = vpop.f32.mrf.mxu0  ;;  %7498 = vmatmul.mubr.msk.bf16.gmra.mxu0 %vm251_vm0, %v8998_v60  ;;  %2310 = vadd.xlane.f32.xlu0 %v2309_v46  ;;  %v1035_v50 = vadd.f32 %v1034_v37, %v9061_v21  ;;  %v1038_v52 = vpop.f32.mrf.mxu1  ;;  %v2633_v53 = vsel %vm2302_vm1, %v2284_v38, 0.0  ;;  %v92_v60 = vld [vmem:[%s13848_s0 + $0x230] sm:$0xff]  ;;  %v9169_v34 = vpack.c.bf16 %v95_v12, %v94_v59 }
  0xd7   :  { %v499_v54 = vadd.f32 %v498_v47, %v9052_v17  ;;  %v1039_v55 = vadd.f32 %v1038_v52, %v9052_v17  ;;  %v2177_v56 = vmul.f32 %v1677_v42, %v495_v43  ;;  %746 = vmatprep.mubr.bf16.mxu0 %v13858_v2  ;;  %2634 = vadd.xlane.f32.xlu1 %v2633_v53 }
  0xd8   :  { %v500_v58 = vpop.f32.mrf.mxu0  ;;  %v1040_v62 = vpop.f32.mrf.mxu1  ;;  %v2285_v0 = vmul.f32 %v2109_v44, %v1035_v50  ;;  %7816 = vmatmul.mubr.msk.bf16.gmra.mxu1 %vm251_vm0, %v9128_v40  ;;  %v9167_v32 = vpack.c.bf16 %v93_v11, %v92_v60 }
  0xd9   :  { %v1681_v1 = vrot.slane %v499_v54, %v9057_v19  ;;  %v501_v3 = vadd.f32 %v500_v58, %v9061_v21  ;;  %v2113_v9 = vrot.slane %v1039_v55, %v9057_v19  ;;  %v2312_v10 = vsel %vm2302_vm1, %v2177_v56, 0.0  ;;  %7819 = vmatprep.mubr.msk.bf16.mxu1 %vm251_vm0, %v9130_v41  ;;  %v96_v58 = vld [vmem:[%s13848_s0 + $0x250] sm:$0xff] }
  0xda   :  { %v502_v13 = vpop.f32.mrf.mxu0  ;;  %2313 = vadd.xlane.f32.xlu0 %v2312_v10  ;;  %v1041_v22 = vadd.f32 %v1040_v62, %v9061_v21  ;;  %v1042_v23 = vpop.f32.mrf.mxu1  ;;  %v2636_v24 = vsel %vm2302_vm1, %v2285_v0, 0.0  ;;  %v97_v62 = vld [vmem:[%s13848_s0 + $0x258] sm:$0xff] }
  0xdb   :  { %v503_v25 = vadd.f32 %v502_v13, %v9052_v17  ;;  %v1043_v26 = vadd.f32 %v1042_v23, %v9052_v17  ;;  %v2178_v28 = vmul.f32 %v1681_v1, %v501_v3  ;;  %2637 = vadd.xlane.f32.xlu1 %v2636_v24  ;;  %v98_v3 = vld [vmem:[%s13848_s0 + $0x260] sm:$0xff]  ;;  %v9203_v13 = vpack.c.bf16 %v97_v62, %v96_v58 }
  0xdc   :  { %v504_v29 = vpop.f32.mrf.mxu0  ;;  %v1044_v30 = vpop.f32.mrf.mxu1  ;;  %v2286_v31 = vmul.f32 %v2113_v9, %v1041_v22  ;;  %v99_v9 = vld [vmem:[%s13848_s0 + $0x268] sm:$0xff] }
  0xdd   :  { %v1685_v35 = vrot.slane %v503_v25, %v9057_v19  ;;  %v505_v36 = vadd.f32 %v504_v29, %v9061_v21  ;;  %v2117_v37 = vrot.slane %v1043_v26, %v9057_v19  ;;  %v2315_v38 = vsel %vm2302_vm1, %v2178_v28, 0.0 }
  0xde   :  { %v508_v42 = vpop.f32.mrf.mxu0  ;;  %7499 = vmatmul.mubr.msk.bf16.gmra.mxu0 %vm251_vm0, %v9018_v4  ;;  %2316 = vadd.xlane.f32.xlu0 %v2315_v38  ;;  %v1045_v43 = vadd.f32 %v1044_v30, %v9061_v21  ;;  %v1048_v44 = vpop.f32.mrf.mxu1  ;;  %v2639_v47 = vsel %vm2302_vm1, %v2286_v31, 0.0  ;;  %v9206_v24 = vpack.c.bf16 %v99_v9, %v98_v3 }
  0xdf   :  { %v509_v46 = vadd.f32 %v508_v42, %v9052_v17  ;;  %756 = vmatprep.mubr.bf16.mxu0 %v13858_v2  ;;  %v1049_v52 = vadd.f32 %v1048_v44, %v9052_v17  ;;  %v2179_v56 = vmul.f32 %v1685_v35, %v505_v36 }
  0xe0   :  { %v510_v50 = vpop.f32.mrf.mxu0  ;;  %v1050_v53 = vpop.f32.mrf.mxu1  ;;  %v2287_v54 = vmul.f32 %v2117_v37, %v1045_v43  ;;  %7820 = vmatmul.mubr.msk.bf16.gmra.mxu1 %vm251_vm0, %v9167_v32  ;;  %v101_v43 = vld [vmem:[%s13848_s0 + $0x278] sm:$0xff] }
  0xe1   :  { %v1689_v4 = vrot.slane %v509_v46, %v9057_v19  ;;  %v511_v55 = vadd.f32 %v510_v50, %v9061_v21  ;;  %7823 = vmatprep.mubr.msk.bf16.mxu1 %vm251_vm0, %v9169_v34  ;;  %v2121_v10 = vrot.slane %v1049_v52, %v9057_v19  ;;  %v1051_v59 = vadd.f32 %v1050_v53, %v9061_v21 }
  0xe2   :  { %v512_v0 = vpop.f32.mrf.mxu0  ;;  %2640 = vadd.xlane.f32.xlu0 %v2639_v47  ;;  %v1052_v60 = vpop.f32.mrf.mxu1  ;;  %v2642_v1 = vsel %vm2302_vm1, %v2287_v54, 0.0  ;;  %v2318_v22 = vsel %vm2302_vm1, %v2179_v56, 0.0  ;;  %v102_v54 = vld [vmem:[%s13848_s0 + $0x280] sm:$0xff] }
  0xe3   :  { %2643 = vadd.xlane.f32.xlu1 %v2642_v1  ;;  %v2180_v23 = vmul.f32 %v1689_v4, %v511_v55  ;;  %v513_v25 = vadd.f32 %v512_v0, %v9052_v17  ;;  %v1053_v26 = vadd.f32 %v1052_v60, %v9052_v17  ;;  %v2288_v36 = vmul.f32 %v2121_v10, %v1051_v59  ;;  %v103_v4 = vld [vmem:[%s13848_s0 + $0x288] sm:$0xff] }
  0xe4   :  { %v514_v11 = vpop.f32.mrf.mxu0  ;;  %v1054_v12 = vpop.f32.mrf.mxu1 }
  0xe5   :  { %v2321_v42 = vsel %vm2302_vm1, %v2180_v23, 0.0  ;;  %v1693_v44 = vrot.slane %v513_v25, %v9057_v19  ;;  %v515_v46 = vadd.f32 %v514_v11, %v9061_v21  ;;  %v2125_v47 = vrot.slane %v1053_v26, %v9057_v19 }
  0xe6   :  { %v518_v28 = vpop.f32.mrf.mxu0  ;;  %7500 = vmatmul.mubr.msk.bf16.gmra.mxu0 %vm251_vm0, %v9023_v5  ;;  %2319 = vadd.xlane.f32.xlu0 %v2318_v22  ;;  %v1058_v29 = vpop.f32.mrf.mxu1  ;;  %v100_v5 = vld [vmem:[%s13848_s0 + $0x270] sm:$0xff]  ;;  %v1055_v50 = vadd.f32 %v1054_v12, %v9061_v21  ;;  %v2645_v0 = vsel %vm2302_vm1, %v2288_v36, 0.0  ;;  %v9245_v11 = vpack.c.bf16 %v103_v4, %v102_v54 }
  0xe7   :  { %v519_v30 = vadd.f32 %v518_v28, %v9052_v17  ;;  %766 = vmatprep.mubr.bf16.mxu0 %v13858_v2  ;;  %v1059_v58 = vadd.f32 %v1058_v29, %v9052_v17  ;;  %v9240_v1 = vpack.c.bf16 %v101_v43, %v100_v5  ;;  %v2181_v22 = vmul.f32 %v1693_v44, %v515_v46 }
  0xe8   :  { %v520_v31 = vpop.f32.mrf.mxu0  ;;  %v1060_v35 = vpop.f32.mrf.mxu1  ;;  %7824 = vmatmul.mubr.msk.bf16.gmra.mxu1 %vm251_vm0, %v9203_v13  ;;  %v2289_v23 = vmul.f32 %v2125_v47, %v1055_v50 }
  0xe9   :  { %v1697_v37 = vrot.slane %v519_v30, %v9057_v19  ;;  %v521_v38 = vadd.f32 %v520_v31, %v9061_v21  ;;  %7827 = vmatprep.mubr.msk.bf16.mxu1 %vm251_vm0, %v9206_v24  ;;  %v2129_v29 = vrot.slane %v1059_v58, %v9057_v19  ;;  %v1061_v30 = vadd.f32 %v1060_v35, %v9061_v21 }
  0xea   :  { %v522_v52 = vpop.f32.mrf.mxu0  ;;  %2322 = vadd.xlane.f32.xlu0 %v2321_v42  ;;  %v1062_v53 = vpop.f32.mrf.mxu1  ;;  %v2324_v46 = vsel %vm2302_vm1, %v2181_v22, 0.0 }
  0xeb   :  { %v523_v55 = vadd.f32 %v522_v52, %v9052_v17  ;;  %v2182_v56 = vmul.f32 %v1697_v37, %v521_v38  ;;  %v1063_v31 = vadd.f32 %v1062_v53, %v9052_v17  ;;  %v104_v37 = vld [vmem:[%s13848_s0 + $0x290] sm:$0xff]  ;;  %v105_v38 = vld [vmem:[%s13848_s0 + $0x298] sm:$0xff]  ;;  %v106_v52 = vld [vmem:[%s13848_s0 + $0x2a0] sm:$0xff] }
  0xec   :  { %v524_v62 = vpop.f32.mrf.mxu0  ;;  %v1064_v60 = vpop.f32.mrf.mxu1  ;;  %v107_v53 = vld [vmem:[%s13848_s0 + $0x2a8] sm:$0xff] }
  0xed   :  { %v1701_v3 = vrot.slane %v523_v55, %v9057_v19  ;;  %v525_v9 = vadd.f32 %v524_v62, %v9061_v21  ;;  %v2327_v10 = vsel %vm2302_vm1, %v2182_v56, 0.0  ;;  %v2648_v55 = vsel %vm2302_vm1, %v2289_v23, 0.0 }
  0xee   :  { %v528_v59 = vpop.f32.mrf.mxu0  ;;  %7501 = vmatmul.mubr.msk.bf16.gmra.mxu0 %vm251_vm0, %v9048_v16  ;;  %2328 = vadd.xlane.f32.xlu1 %v2327_v10  ;;  %v1068_v12 = vpop.f32.mrf.mxu1  ;;  %v9281_v56 = vpack.c.bf16 %v105_v38, %v104_v37  ;;  %v2133_v58 = vrot.slane %v1063_v31, %v9057_v19  ;;  %v1065_v62 = vadd.f32 %v1064_v60, %v9061_v21 }
  0xef   :  { %v529_v25 = vadd.f32 %v528_v59, %v9052_v17  ;;  %2646 = vadd.xlane.f32.xlu0 %v2645_v0  ;;  %v1069_v26 = vadd.f32 %v1068_v12, %v9052_v17  ;;  %v2183_v28 = vmul.f32 %v1701_v3, %v525_v9  ;;  %776 = vmatprep.mubr.bf16.mxu0 %v13858_v2 }
  0xf0   :  { %v530_v36 = vpop.f32.mrf.mxu0  ;;  %v1070_v16 = vpop.f32.mrf.mxu1  ;;  %7828 = vmatmul.mubr.msk.bf16.gmra.mxu1 %vm251_vm0, %v9240_v1  ;;  %v2290_v10 = vmul.f32 %v2129_v29, %v1061_v30 }
  0xf1   :  { %v1705_v42 = vrot.slane %v529_v25, %v9057_v19  ;;  %v531_v5 = vadd.f32 %v530_v36, %v9061_v21  ;;  %v2137_v35 = vrot.slane %v1069_v26, %v9057_v19  ;;  %v2330_v43 = vsel %vm2302_vm1, %v2183_v28, 0.0  ;;  %7831 = vmatprep.mubr.msk.bf16.mxu1 %vm251_vm0, %v9245_v11 }
  0xf2   :  { %v532_v44 = vpop.f32.mrf.mxu0  ;;  %2331 = vadd.xlane.f32.xlu1 %v2330_v43  ;;  %v1071_v47 = vadd.f32 %v1070_v16, %v9061_v21  ;;  %v9271_v50 = vpop.f32.mrf.mxu1  ;;  %v9292_v25 = vpack.c.bf16 %v107_v53, %v106_v52  ;;  %v2651_v36 = vsel %vm2302_vm1, %v2290_v10, 0.0  ;;  %v2291_v16 = vmul.f32 %v2133_v58, %v1065_v62  ;;  %v110_v43 = vld [vmem:[%s13848_s0 + $0x2c0] sm:$0xff] }
  0xf3   :  { %v533_v54 = vadd.f32 %v532_v44, %v9052_v17  ;;  %2325 = vadd.xlane.f32.xlu0 %v2324_v46  ;;  %v2184_v4 = vmul.f32 %v1705_v42, %v531_v5  ;;  %v111_v44 = vld [vmem:[%s13848_s0 + $0x2c8] sm:$0xff] }
  0xf4   :  { %v534_v0 = vpop.f32.mrf.mxu0  ;;  %v9285_v3 = vmul.f32 %v2137_v35, %v1071_v47  ;;  %v9287_v9 = vpop.f32.mrf.mxu1  ;;  %v109_v35 = vld [vmem:[%s13848_s0 + $0x2b8] sm:$0xff]  ;;  %v2654_v62 = vsel %vm2302_vm1, %v2291_v16, 0.0 }
  0xf5   :  { %v1709_v59 = vrot.slane %v533_v54, %v9057_v19  ;;  %v535_v12 = vadd.f32 %v534_v0, %v9061_v21  ;;  %v2333_v22 = vsel %vm2302_vm1, %v2184_v4, 0.0 }
  0xf6   :  { %13960 = vst [vmem:[#allocation6_spill] sm:$0xff] %v9285_v3  ;;  %v538_v23 = vpop.f32.mrf.mxu0  ;;  %7502 = vmatmul.mubr.msk.bf16.gmra.mxu0 %vm251_vm0, %v9054_v18  ;;  %2334 = vadd.xlane.f32.xlu1 %v2333_v22  ;;  %v1078_v60 = vpop.f32.mrf.mxu1  ;;  %v108_v18 = vld [vmem:[%s13848_s0 + $0x2b0] sm:$0xff] }
  0xf7   :  { %v539_v26 = vadd.f32 %v538_v23, %v9052_v17  ;;  %v1079_v28 = vadd.f32 %v1078_v60, %v9052_v17  ;;  %v2185_v31 = vmul.f32 %v1709_v59, %v535_v12  ;;  %786 = vmatprep.mubr.bf16.mxu0 %v13858_v2  ;;  %2649 = vadd.xlane.f32.xlu0 %v2648_v55 }
  0xf8   :  { %v540_v29 = vpop.f32.mrf.mxu0  ;;  %v1080_v30 = vpop.f32.mrf.mxu1  ;;  %7832 = vmatmul.mubr.msk.bf16.gmra.mxu1 %vm251_vm0, %v9281_v56  ;;  %v9324_v10 = vpack.c.bf16 %v109_v35, %v108_v18  ;;  %v9326_v59 = vpack.c.bf16 %v111_v44, %v110_v43  ;;  %v112_v35 = vld [vmem:[%s13848_s0 + $0x2d0] sm:$0xff]  ;;  %v113_v43 = vld [vmem:[%s13848_s0 + $0x2d8] sm:$0xff] }
  0xf9   :  { %v1713_v37 = vrot.slane %v539_v26, %v9057_v19  ;;  %v541_v38 = vadd.f32 %v540_v29, %v9061_v21  ;;  %v2145_v42 = vrot.slane %v1079_v28, %v9057_v19  ;;  %v2336_v5 = vsel %vm2302_vm1, %v2185_v31, 0.0  ;;  %7835 = vmatprep.mubr.msk.bf16.mxu1 %vm251_vm0, %v9292_v25 }
  0xfa   :  { %v542_v46 = vpop.f32.mrf.mxu0  ;;  %2337 = vadd.xlane.f32.xlu1 %v2336_v5  ;;  %v1081_v47 = vadd.f32 %v1080_v30, %v9061_v21  ;;  %v1082_v52 = vpop.f32.mrf.mxu1 }
  0xfb   :  { %v543_v53 = vadd.f32 %v542_v46, %v9052_v17  ;;  %v1083_v54 = vadd.f32 %v1082_v52, %v9052_v17  ;;  %v2186_v4 = vmul.f32 %v1713_v37, %v541_v38  ;;  %2652 = vadd.xlane.f32.xlu0 %v2651_v36  ;;  %v115_v52 = vld [vmem:[%s13848_s0 + $0x2e8] sm:$0xff] }
  0xfc   :  { %v544_v55 = vpop.f32.mrf.mxu0  ;;  %v1084_v58 = vpop.f32.mrf.mxu1  ;;  %v2294_v0 = vmul.f32 %v2145_v42, %v1081_v47  ;;  %v114_v47 = vld [vmem:[%s13848_s0 + $0x2e0] sm:$0xff] }
  0xfd   :  { %v1717_v12 = vrot.slane %v543_v53, %v9057_v19  ;;  %v545_v22 = vadd.f32 %v544_v55, %v9061_v21  ;;  %v2149_v23 = vrot.slane %v1083_v54, %v9057_v19  ;;  %v2339_v60 = vsel %vm2302_vm1, %v2186_v4, 0.0 }
  0xfe   :  { %v548_v26 = vpop.f32.mrf.mxu0  ;;  %7503 = vmatmul.mubr.msk.bf16.gmra.mxu0 %vm251_vm0, %v9089_v48  ;;  %2340 = vadd.xlane.f32.xlu1 %v2339_v60  ;;  %v1085_v28 = vadd.f32 %v1084_v58, %v9061_v21  ;;  %v1088_v31 = vpop.f32.mrf.mxu1  ;;  %v2663_v38 = vsel %vm2302_vm1, %v2294_v0, 0.0  ;;  %v9362_v0 = vpack.c.bf16 %v113_v43, %v112_v35 }
  0xff   :  { %v549_v29 = vadd.f32 %v548_v26, %v9052_v17  ;;  %v2187_v30 = vmul.f32 %v1717_v12, %v545_v22  ;;  %796 = vmatprep.mubr.bf16.mxu0 %v13858_v2  ;;  %v1089_v36 = vadd.f32 %v1088_v31, %v9052_v17  ;;  %2655 = vadd.xlane.f32.xlu0 %v2654_v62 }
 0x100   :  { %v550_v16 = vpop.f32.mrf.mxu0  ;;  %v2295_v18 = vmul.f32 %v2149_v23, %v1085_v28  ;;  %v1090_v37 = vpop.f32.mrf.mxu1  ;;  %7836 = vmatmul.mubr.msk.bf16.gmra.mxu1 %vm251_vm0, %v9324_v10  ;;  %v9364_v22 = vpack.c.bf16 %v115_v52, %v114_v47  ;;  %v119_v47 = vld [vmem:[%s13848_s0 + $0x308] sm:$0xff] }
 0x101   :  { %v1721_v48 = vrot.slane %v549_v29, %v9057_v19  ;;  %v551_v42 = vadd.f32 %v550_v16, %v9061_v21  ;;  %v2342_v5 = vsel %vm2302_vm1, %v2187_v30, 0.0  ;;  %7839 = vmatprep.mubr.msk.bf16.mxu1 %vm251_vm0, %v9326_v59  ;;  %v2153_v53 = vrot.slane %v1089_v36, %v9057_v19 }
 0x102   :  { %v552_v44 = vpop.f32.mrf.mxu0  ;;  %2343 = vadd.xlane.f32.xlu1 %v2342_v5  ;;  %v1092_v46 = vpop.f32.mrf.mxu1  ;;  %v2666_v54 = vsel %vm2302_vm1, %v2295_v18, 0.0  ;;  %v1091_v4 = vadd.f32 %v1090_v37, %v9061_v21 }
 0x103   :  { %2664 = vadd.xlane.f32.xlu0 %v2663_v38  ;;  %v553_v55 = vadd.f32 %v552_v44, %v9052_v17  ;;  %v2188_v12 = vmul.f32 %v1721_v48, %v551_v42  ;;  %v1093_v60 = vadd.f32 %v1092_v46, %v9052_v17  ;;  %v116_v38 = vld [vmem:[%s13848_s0 + $0x2f0] sm:$0xff]  ;;  %v117_v48 = vld [vmem:[%s13848_s0 + $0x2f8] sm:$0xff]  ;;  %v118_v46 = vld [vmem:[%s13848_s0 + $0x300] sm:$0xff] }
 0x104   :  { %v554_v58 = vpop.f32.mrf.mxu0  ;;  %v1094_v62 = vpop.f32.mrf.mxu1  ;;  %v2296_v31 = vmul.f32 %v2153_v53, %v1091_v4 }
 0x105   :  { %v1725_v29 = vrot.slane %v553_v55, %v9057_v19  ;;  %v555_v16 = vadd.f32 %v554_v58, %v9061_v21  ;;  %v2345_v37 = vsel %vm2302_vm1, %v2188_v12, 0.0  ;;  %v2157_v5 = vrot.slane %v1093_v60, %v9057_v19 }
 0x106   :  { %v558_v23 = vpop.f32.mrf.mxu0  ;;  %7504 = vmatmul.mubr.msk.bf16.gmra.mxu0 %vm251_vm0, %v9091_v49  ;;  %2667 = vadd.xlane.f32.xlu1 %v2666_v54  ;;  %v1098_v26 = vpop.f32.mrf.mxu1  ;;  %v1095_v35 = vadd.f32 %v1094_v62, %v9061_v21  ;;  %v2669_v52 = vsel %vm2302_vm1, %v2296_v31, 0.0  ;;  %v9396_v55 = vpack.c.bf16 %v117_v48, %v116_v38  ;;  %v9399_v12 = vpack.c.bf16 %v119_v47, %v118_v46 }
 0x107   :  { %v559_v28 = vadd.f32 %v558_v23, %v9052_v17  ;;  %806 = vmatprep.mubr.bf16.mxu0 %v13858_v2  ;;  %v1099_v43 = vadd.f32 %v1098_v26, %v9052_v17  ;;  %v2189_v62 = vmul.f32 %v1725_v29, %v555_v16 }
 0x108   :  { %v560_v30 = vpop.f32.mrf.mxu0  ;;  %v1100_v36 = vpop.f32.mrf.mxu1  ;;  %7840 = vmatmul.mubr.msk.bf16.gmra.mxu1 %vm251_vm0, %v9362_v0  ;;  %v2297_v26 = vmul.f32 %v2157_v5, %v1095_v35  ;;  %v122_v5 = vld [vmem:[%s13848_s0 + $0x320] sm:$0xff]  ;;  %v123_v35 = vld [vmem:[%s13848_s0 + $0x328] sm:$0xff] }
 0x109   :  { %v1729_v49 = vrot.slane %v559_v28, %v9057_v19  ;;  %v561_v18 = vadd.f32 %v560_v30, %v9061_v21  ;;  %7843 = vmatprep.mubr.msk.bf16.mxu1 %vm251_vm0, %v9364_v22  ;;  %v2161_v60 = vrot.slane %v1099_v43, %v9057_v19  ;;  %v1101_v30 = vadd.f32 %v1100_v36, %v9061_v21 }
 0x10a   :  { %v562_v42 = vpop.f32.mrf.mxu0  ;;  %2346 = vadd.xlane.f32.xlu1 %v2345_v37  ;;  %v1102_v44 = vpop.f32.mrf.mxu1  ;;  %v2348_v36 = vsel %vm2302_vm1, %v2189_v62, 0.0 }
 0x10b   :  { %v2190_v53 = vmul.f32 %v1729_v49, %v561_v18  ;;  %v563_v16 = vadd.f32 %v562_v42, %v9052_v17  ;;  %v120_v18 = vld [vmem:[%s13848_s0 + $0x310] sm:$0xff]  ;;  %v121_v42 = vld [vmem:[%s13848_s0 + $0x318] sm:$0xff]  ;;  %v1103_v46 = vadd.f32 %v1102_v44, %v9052_v17  ;;  %v9442_v44 = vpack.c.bf16 %v123_v35, %v122_v5 }
 0x10c   :  { %v564_v54 = vpop.f32.mrf.mxu0  ;;  %v1104_v4 = vpop.f32.mrf.mxu1 }
 0x10d   :  { %v2351_v58 = vsel %vm2302_vm1, %v2190_v53, 0.0 }
 0x10e   :  { %v568_v23 = vpop.f32.mrf.mxu0  ;;  %7505 = vmatmul.mubr.msk.bf16.gmra.mxu0 %vm251_vm0, %v9128_v40  ;;  %2670 = vadd.xlane.f32.xlu1 %v2669_v52  ;;  %v1108_v28 = vpop.f32.mrf.mxu1 }
 0x10f   :  { %v569_v31 = vadd.f32 %v568_v23, %v9052_v17  ;;  %2352 = vadd.xlane.f32.xlu0 %v2351_v58  ;;  %816 = vmatprep.mubr.bf16.mxu0 %v13858_v2  ;;  %v1109_v29 = vadd.f32 %v1108_v28, %v9052_v17  ;;  %v2672_v58 = vsel %vm2302_vm1, %v2297_v26, 0.0  ;;  %v2298_v23 = vmul.f32 %v2161_v60, %v1101_v30 }
 0x110   :  { %v570_v49 = vpop.f32.mrf.mxu0  ;;  %7844 = vmatmul.mubr.msk.bf16.gmra.mxu1 %vm251_vm0, %v9396_v55  ;;  %v1110_v40 = vpop.f32.mrf.mxu1  ;;  %v1733_v28 = vrot.slane %v563_v16, %v9057_v19  ;;  %v2165_v30 = vrot.slane %v1103_v46, %v9057_v19 }
 0x111   :  { %v1737_v37 = vrot.slane %v569_v31, %v9057_v19  ;;  %v571_v38 = vadd.f32 %v570_v49, %v9061_v21  ;;  %v2169_v48 = vrot.slane %v1109_v29, %v9057_v19  ;;  %7847 = vmatprep.mubr.msk.bf16.mxu1 %vm251_vm0, %v9399_v12  ;;  %v1111_v47 = vadd.f32 %v1110_v40, %v9061_v21 }
 0x112   :  { %v572_v43 = vpop.f32.mrf.mxu0  ;;  %2349 = vadd.xlane.f32.xlu1 %v2348_v36  ;;  %v9431_v52 = vpop.f32.mrf.mxu1  ;;  %v9440_v36 = vpack.c.bf16 %v121_v42, %v120_v18  ;;  %v565_v40 = vadd.f32 %v564_v54, %v9061_v21  ;;  %v2675_v54 = vsel %vm2302_vm1, %v2298_v23, 0.0  ;;  %v124_v42 = vld [vmem:[%s13848_s0 + $0x330] sm:$0xff] }
 0x113   :  { %v573_v53 = vadd.f32 %v572_v43, %v9052_v17  ;;  %v2192_v62 = vmul.f32 %v1737_v37, %v571_v38  ;;  %v9436_v29 = vmul.f32 %v2169_v48, %v1111_v47  ;;  %v1105_v38 = vadd.f32 %v1104_v4, %v9061_v21  ;;  %v125_v4 = vld [vmem:[%s13848_s0 + $0x338] sm:$0xff]  ;;  %v126_v47 = vld [vmem:[%s13848_s0 + $0x340] sm:$0xff] }
 0x114   :  { %v574_v31 = vpop.f32.mrf.mxu0  ;;  %v9438_v49 = vpop.f32.mrf.mxu1  ;;  %v2191_v46 = vmul.f32 %v1733_v28, %v565_v40 }
 0x115   :  { %13961 = vst [vmem:[#allocation7_spill] sm:$0xff] %v9436_v29  ;;  %v1741_v61 = vrot.slane %v573_v53, %v9057_v19  ;;  %v575_v43 = vadd.f32 %v574_v31, %v9061_v21  ;;  %v2357_v26 = vsel %vm2302_vm1, %v2192_v62, 0.0  ;;  %v127_v53 = vld [vmem:[%s13848_s0 + $0x348] sm:$0xff]  ;;  %v2299_v31 = vmul.f32 %v2165_v30, %v1105_v38 }
 0x116   :  { %v578_v60 = vpop.f32.mrf.mxu0  ;;  %7506 = vmatmul.mubr.msk.bf16.gmra.mxu0 %vm251_vm0, %v9130_v41  ;;  %2673 = vadd.xlane.f32.xlu1 %v2672_v58  ;;  %v9451_v16 = vpop.f32.mrf.mxu1 }
 0x117   :  { %v579_v18 = vadd.f32 %v578_v60, %v9052_v17  ;;  %2358 = vadd.xlane.f32.xlu0 %v2357_v26  ;;  %v2193_v37 = vmul.f32 %v1741_v61, %v575_v43  ;;  %826 = vmatprep.mubr.bf16.mxu0 %v13858_v2  ;;  %v9483_v26 = vpack.c.bf16 %v125_v4, %v124_v42 }
 0x118   :  { %v580_v48 = vpop.f32.mrf.mxu0  ;;  %7848 = vmatmul.mubr.msk.bf16.gmra.mxu1 %vm251_vm0, %v9440_v36  ;;  %v9459_v41 = vpop.f32.mrf.mxu1  ;;  %v9485_v60 = vpack.c.bf16 %v127_v53, %v126_v47  ;;  %v129_v47 = vld [vmem:[%s13848_s0 + $0x358] sm:$0xff] }
 0x119   :  { %v1745_v5 = vrot.slane %v579_v18, %v9057_v19  ;;  %v581_v35 = vadd.f32 %v580_v48, %v9061_v21  ;;  %v2360_v61 = vsel %vm2302_vm1, %v2193_v37, 0.0  ;;  %7851 = vmatprep.mubr.msk.bf16.mxu1 %vm251_vm0, %v9442_v44 }
 0x11a   :  { %v582_v58 = vpop.f32.mrf.mxu0  ;;  %2676 = vadd.xlane.f32.xlu1 %v2675_v54  ;;  %v9478_v62 = vpop.f32.mrf.mxu1  ;;  %v2354_v54 = vsel %vm2302_vm1, %v2191_v46, 0.0 }
 0x11b   :  { %v583_v23 = vadd.f32 %v582_v58, %v9052_v17  ;;  %2361 = vadd.xlane.f32.xlu0 %v2360_v61  ;;  %v2194_v28 = vmul.f32 %v1745_v5, %v581_v35  ;;  %v2678_v5 = vsel %vm2302_vm1, %v2299_v31, 0.0 }
 0x11c   :  { %v584_v40 = vpop.f32.mrf.mxu0  ;;  %v9481_v43 = vpop.f32.mrf.mxu1 }
 0x11d   :  { %v1749_v18 = vrot.slane %v583_v23, %v9057_v19  ;;  %v585_v37 = vadd.f32 %v584_v40, %v9061_v21  ;;  %v2363_v48 = vsel %vm2302_vm1, %v2194_v28, 0.0 }
 0x11e   :  { %v588_v7 = vpop.f32.mrf.mxu0  ;;  %7507 = vmatmul.mubr.msk.bf16.gmra.mxu0 %vm251_vm0, %v9167_v32  ;;  %2355 = vadd.xlane.f32.xlu1 %v2354_v54  ;;  %v9493_v30 = vpop.f32.mrf.mxu1 }
 0x11f   :  { %v589_v38 = vadd.f32 %v588_v7, %v9052_v17  ;;  %2364 = vadd.xlane.f32.xlu0 %v2363_v48  ;;  %v2195_v42 = vmul.f32 %v1749_v18, %v585_v37  ;;  %836 = vmatprep.mubr.bf16.mxu0 %v13858_v2  ;;  %v128_v7 = vld [vmem:[%s13848_s0 + $0x350] sm:$0xff] }
 0x120   :  { %v590_v35 = vpop.f32.mrf.mxu0  ;;  %7852 = vmatmul.mubr.msk.bf16.gmra.mxu1 %vm251_vm0, %v9483_v26  ;;  %v9500_v61 = vpop.f32.mrf.mxu1  ;;  %v9518_v18 = vpack.c.bf16 %v129_v47, %v128_v7 }
 0x121   :  { %v1753_v46 = vrot.slane %v589_v38, %v9057_v19  ;;  %v591_v32 = vadd.f32 %v590_v35, %v9061_v21  ;;  %v2366_v4 = vsel %vm2302_vm1, %v2195_v42, 0.0  ;;  %7855 = vmatprep.mubr.msk.bf16.mxu1 %vm251_vm0, %v9485_v60 }
 0x122   :  { %v592_v53 = vpop.f32.mrf.mxu0  ;;  %2679 = vadd.xlane.f32.xlu1 %v2678_v5  ;;  %v9513_v58 = vpop.f32.mrf.mxu1 }
 0x123   :  { %v593_v23 = vadd.f32 %v592_v53, %v9052_v17  ;;  %2367 = vadd.xlane.f32.xlu0 %v2366_v4  ;;  %v2196_v28 = vmul.f32 %v1753_v46, %v591_v32 }
 0x124   :  { %v594_v31 = vpop.f32.mrf.mxu0  ;;  %v9516_v40 = vpop.f32.mrf.mxu1 }
 0x125   :  { %v1757_v37 = vrot.slane %v593_v23, %v9057_v19  ;;  %v595_v54 = vadd.f32 %v594_v31, %v9061_v21  ;;  %v2369_v48 = vsel %vm2302_vm1, %v2196_v28, 0.0 }
 0x126   :  { %v598_v38 = vpop.f32.mrf.mxu0  ;;  %7508 = vmatmul.mubr.msk.bf16.gmra.mxu0 %vm251_vm0, %v9169_v34  ;;  %v9525_v42 = vpop.f32.mrf.mxu1 }
 0x127   :  { %v599_v5 = vadd.f32 %v598_v38, %v9052_v17  ;;  %2370 = vadd.xlane.f32.xlu0 %v2369_v48  ;;  %v2197_v35 = vmul.f32 %v1757_v37, %v595_v54  ;;  %846 = vmatprep.mubr.bf16.mxu0 %v13858_v2 }
 0x128   :  { %v600_v46 = vpop.f32.mrf.mxu0  ;;  %7856 = vmatmul.mubr.msk.bf16.gmra.mxu1 %vm251_vm0, %v9518_v18  ;;  %v9531_v32 = vpop.f32.mrf.mxu1 }
 0x129   :  { %v1761_v4 = vrot.slane %v599_v5, %v9057_v19  ;;  %v601_v7 = vadd.f32 %v600_v46, %v9061_v21  ;;  %v2372_v34 = vsel %vm2302_vm1, %v2197_v35, 0.0  ;;  %7859 = vmatprep.mubr.msk.bf16.mxu1 %vm251_vm0, %v8641_v8 }
 0x12a   :  { %v602_v47 = vpop.f32.mrf.mxu0  ;;  %v9538_v53 = vpop.f32.mrf.mxu1 }
 0x12b   :  { %v603_v23 = vadd.f32 %v602_v47, %v9052_v17  ;;  %2373 = vadd.xlane.f32.xlu0 %v2372_v34  ;;  %v2198_v28 = vmul.f32 %v1761_v4, %v601_v7 }
 0x12c   :  { %v604_v31 = vpop.f32.mrf.mxu0  ;;  %v9541_v37 = vpop.f32.mrf.mxu1 }
 0x12d   :  { %v1765_v54 = vrot.slane %v603_v23, %v9057_v19  ;;  %v605_v48 = vadd.f32 %v604_v31, %v9061_v21  ;;  %v2375_v38 = vsel %vm2302_vm1, %v2198_v28, 0.0 }
 0x12e   :  { %v608_v5 = vpop.f32.mrf.mxu0  ;;  %7509 = vmatmul.mubr.msk.bf16.gmra.mxu0 %vm251_vm0, %v9203_v13  ;;  %v9548_v8 = vpop.f32.mrf.mxu1 }
 0x12f   :  { %v609_v35 = vadd.f32 %v608_v5, %v9052_v17  ;;  %2376 = vadd.xlane.f32.xlu0 %v2375_v38  ;;  %v2199_v46 = vmul.f32 %v1765_v54, %v605_v48  ;;  %856 = vmatprep.mubr.bf16.mxu0 %v13858_v2 }
 0x130   :  { %v610_v4 = vpop.f32.mrf.mxu0  ;;  %7860 = vmatmul.mubr.msk.bf16.gmra.mxu1 %vm251_vm0, %v8665_v14  ;;  %v9554_v7 = vpop.f32.mrf.mxu1 }
 0x131   :  { %v1769_v34 = vrot.slane %v609_v35, %v9057_v19  ;;  %v611_v47 = vadd.f32 %v610_v4, %v9061_v21  ;;  %v2378_v13 = vsel %vm2302_vm1, %v2199_v46, 0.0  ;;  %7863 = vmatprep.mubr.msk.bf16.mxu1 %vm251_vm0, %v8687_v20 }
 0x132   :  { %v612_v23 = vpop.f32.mrf.mxu0  ;;  %2379 = vadd.xlane.f32.xlu1 %v2378_v13  ;;  %v9561_v28 = vpop.f32.mrf.mxu1 }
 0x133   :  { %v613_v31 = vadd.f32 %v612_v23, %v9052_v17  ;;  %v2200_v54 = vmul.f32 %v1769_v34, %v611_v47 }
 0x134   :  { %v614_v48 = vpop.f32.mrf.mxu0  ;;  %v9564_v14 = vpop.f32.mrf.mxu1 }
 0x135   :  { %v1773_v38 = vrot.slane %v613_v31, %v9057_v19  ;;  %v615_v5 = vadd.f32 %v614_v48, %v9061_v21  ;;  %v2381_v35 = vsel %vm2302_vm1, %v2200_v54, 0.0 }
 0x136   :  { %v618_v46 = vpop.f32.mrf.mxu0  ;;  %7510 = vmatmul.mubr.msk.bf16.gmra.mxu0 %vm251_vm0, %v9206_v24  ;;  %2382 = vadd.xlane.f32.xlu1 %v2381_v35  ;;  %v9571_v20 = vpop.f32.mrf.mxu1 }
 0x137   :  { %v619_v4 = vadd.f32 %v618_v46, %v9052_v17  ;;  %v2201_v13 = vmul.f32 %v1773_v38, %v615_v5  ;;  %866 = vmatprep.mubr.bf16.mxu0 %v13858_v2 }
 0x138   :  { %v620_v34 = vpop.f32.mrf.mxu0  ;;  %v9575_v47 = vpop.f32.mrf.mxu1  ;;  %7864 = vmatmul.mubr.msk.bf16.gmra.mxu1 %vm251_vm0, %v8712_v27 }
 0x139   :  { %v1777_v23 = vrot.slane %v619_v4, %v9057_v19  ;;  %v621_v31 = vadd.f32 %v620_v34, %v9061_v21  ;;  %v2384_v24 = vsel %vm2302_vm1, %v2201_v13, 0.0  ;;  %7867 = vmatprep.mubr.msk.bf16.mxu1 %vm251_vm0, %v8734_v33 }
 0x13a   :  { %v622_v54 = vpop.f32.mrf.mxu0  ;;  %2385 = vadd.xlane.f32.xlu1 %v2384_v24  ;;  %v9584_v48 = vpop.f32.mrf.mxu1 }
 0x13b   :  { %v623_v38 = vadd.f32 %v622_v54, %v9052_v17  ;;  %v2202_v5 = vmul.f32 %v1777_v23, %v621_v31 }
 0x13c   :  { %v624_v35 = vpop.f32.mrf.mxu0  ;;  %v9587_v46 = vpop.f32.mrf.mxu1 }
 0x13d   :  { %v1781_v27 = vrot.slane %v623_v38, %v9057_v19  ;;  %v625_v4 = vadd.f32 %v624_v35, %v9061_v21  ;;  %v2387_v34 = vsel %vm2302_vm1, %v2202_v5, 0.0 }
 0x13e   :  { %v628_v13 = vpop.f32.mrf.mxu0  ;;  %7511 = vmatmul.mubr.msk.bf16.gmra.mxu0 %vm251_vm0, %v9240_v1  ;;  %2388 = vadd.xlane.f32.xlu1 %v2387_v34  ;;  %v9594_v33 = vpop.f32.mrf.mxu1 }
 0x13f   :  { %v629_v24 = vadd.f32 %v628_v13, %v9052_v17  ;;  %v2203_v54 = vmul.f32 %v1781_v27, %v625_v4  ;;  %876 = vmatprep.mubr.bf16.mxu0 %v13858_v2 }
 0x140   :  { %v630_v23 = vpop.f32.mrf.mxu0  ;;  %v9598_v31 = vpop.f32.mrf.mxu1  ;;  %7868 = vmatmul.mubr.msk.bf16.gmra.mxu1 %vm251_vm0, %v8756_v39 }
 0x141   :  { %v1785_v38 = vrot.slane %v629_v24, %v9057_v19  ;;  %v631_v5 = vadd.f32 %v630_v23, %v9061_v21  ;;  %v2390_v1 = vsel %vm2302_vm1, %v2203_v54, 0.0  ;;  %7871 = vmatprep.mubr.msk.bf16.mxu1 %vm251_vm0, %v8776_v45 }
 0x142   :  { %v632_v35 = vpop.f32.mrf.mxu0  ;;  %2391 = vadd.xlane.f32.xlu1 %v2390_v1  ;;  %v9608_v34 = vpop.f32.mrf.mxu1 }
 0x143   :  { %v633_v27 = vadd.f32 %v632_v35, %v9052_v17  ;;  %v2204_v4 = vmul.f32 %v1785_v38, %v631_v5 }
 0x144   :  { %v634_v13 = vpop.f32.mrf.mxu0  ;;  %v9617_v38 = vpop.f32.mrf.mxu1 }
 0x145   :  { %v1789_v15 = vrot.slane %v633_v27, %v9057_v19  ;;  %v635_v39 = vadd.f32 %v634_v13, %v9061_v21  ;;  %v2393_v24 = vsel %vm2302_vm1, %v2204_v4, 0.0 }
 0x146   :  { %v638_v23 = vpop.f32.mrf.mxu0  ;;  %7512 = vmatmul.mubr.msk.bf16.gmra.mxu0 %vm251_vm0, %v9245_v11  ;;  %2394 = vadd.xlane.f32.xlu1 %v2393_v24  ;;  %v9627_v13 = vpop.f32.mrf.mxu1 }
 0x147   :  { %v639_v45 = vadd.f32 %v638_v23, %v9052_v17  ;;  %v2205_v54 = vmul.f32 %v1789_v15, %v635_v39  ;;  %886 = vmatprep.mubr.bf16.mxu0 %v13858_v2 }
 0x148   :  { %v640_v5 = vpop.f32.mrf.mxu0  ;;  %7872 = vmatmul.mubr.msk.bf16.gmra.mxu1 %vm251_vm0, %v8795_v51 }
 0x149   :  { %v1793_v1 = vrot.slane %v639_v45, %v9057_v19  ;;  %v641_v35 = vadd.f32 %v640_v5, %v9061_v21  ;;  %v2396_v27 = vsel %vm2302_vm1, %v2205_v54, 0.0  ;;  %7875 = vmatprep.mubr.msk.bf16.mxu1 %vm251_vm0, %v8814_v57  ;;  %v13857_v57 = vsub.s32 2, %v9021_v6 }
 0x14a   :  { %v642_v11 = vpop.f32.mrf.mxu0  ;;  %2397 = vadd.xlane.f32.xlu1 %v2396_v27  ;;  %v9643_v27 = vadd.f32 %v9271_v50, %v9052_v17 }
 0x14b   :  { %v643_v15 = vadd.f32 %v642_v11, %v9052_v17  ;;  %v2206_v4 = vmul.f32 %v1793_v1, %v641_v35  ;;  %v9637_v1 = vpop.f32.mrf.mxu1 }
 0x14c   :  { %v644_v39 = vpop.f32.mrf.mxu0  ;;  %13962 = vst [vmem:[#allocation8_spill] sm:$0xff] %v9643_v27 }
 0x14d   :  { %v1797_v24 = vrot.slane %v643_v15, %v9057_v19  ;;  %v645_v51 = vadd.f32 %v644_v39, %v9061_v21  ;;  %v2399_v23 = vsel %vm2302_vm1, %v2206_v4, 0.0  ;;  %v9650_v4 = vadd.f32 %v9431_v52, %v9052_v17 }
 0x14e   :  { %v648_v45 = vpop.f32.mrf.mxu0  ;;  %7513 = vmatmul.mubr.msk.bf16.gmra.mxu0 %vm251_vm0, %v9281_v56  ;;  %2400 = vadd.xlane.f32.xlu0 %v2399_v23  ;;  %v9660_v23 = vpop.f32.mrf.mxu1 }
 0x14f   :  { %v649_v54 = vadd.f32 %v648_v45, %v9052_v17  ;;  %v2207_v5 = vmul.f32 %v1797_v24, %v645_v51  ;;  %896 = vmatprep.mubr.bf16.mxu0 %v13858_v2  ;;  %13963 = vst [vmem:[#allocation9_spill] sm:$0xff] %v9650_v4 }
 0x150   :  { %v650_v35 = vpop.f32.mrf.mxu0  ;;  %7876 = vmatmul.mubr.msk.bf16.gmra.mxu1 %vm251_vm0, %v8833_v63  ;;  %v8563_v63 = vld [vmem:[%s13850_s2] sm:$0x7] }
 0x151   :  { %v1801_v56 = vrot.slane %v649_v54, %v9057_v19  ;;  %v651_v11 = vadd.f32 %v650_v35, %v9061_v21  ;;  %v2402_v15 = vsel %vm2302_vm1, %v2207_v5, 0.0  ;;  %v9657_v50 = vrot.slane %v8563_v63, %v13857_v57 }
 0x152   :  { %v652_v39 = vpop.f32.mrf.mxu0  ;;  %2403 = vadd.xlane.f32.xlu1 %v2402_v15  ;;  %v9669_v15 = vadd.f32 %v9287_v9, %v9061_v21 }
 0x153   :  { %v653_v24 = vadd.f32 %v652_v39, %v9052_v17  ;;  %v2208_v51 = vmul.f32 %v1801_v56, %v651_v11  ;;  %v9675_v56 = vadd.f32 %v9438_v49, %v9061_v21  ;;  %v9681_v63 = vadd.f32 %v9451_v16, %v9657_v50  ;;  %v9691_v49 = vpop.f32.mrf.mxu1 }
 0x154   :  { %v654_v45 = vpop.f32.mrf.mxu0  ;;  %13964 = vst [vmem:[#allocation10_spill] sm:$0xff] %v9669_v15  ;;  %v9685_v9 = vadd.f32 %v9459_v41, %v9657_v50  ;;  %v9699_v16 = vadd.f32 %v9481_v43, %v9657_v50  ;;  %v9703_v41 = vadd.f32 %v9493_v30, %v9657_v50  ;;  %v9717_v39 = vadd.f32 %v9513_v58, %v9657_v50 }
 0x155   :  { %v1805_v54 = vrot.slane %v653_v24, %v9057_v19  ;;  %v655_v5 = vadd.f32 %v654_v45, %v9061_v21  ;;  %v2405_v35 = vsel %vm2302_vm1, %v2208_v51, 0.0  ;;  %13965 = vst [vmem:[#allocation11_spill] sm:$0xff] %v9675_v56  ;;  %13966 = vst [vmem:[#allocation12_spill] sm:$0xff] %v9681_v63  ;;  %v9721_v30 = vadd.f32 %v9516_v40, %v9657_v50  ;;  %v9739_v6 = vpop.f32.mrf.mxu1 }
 0x156   :  { %v658_v11 = vpop.f32.mrf.mxu0  ;;  %7514 = vmatmul.mubr.msk.bf16.gmra.mxu0 %vm251_vm0, %v9292_v25  ;;  %2406 = vadd.xlane.f32.xlu0 %v2405_v35  ;;  %13967 = vst [vmem:[#allocation13_spill] sm:$0xff] %v9685_v9  ;;  %v9695_v25 = vadd.f32 %v9478_v62, %v9657_v50  ;;  %13969 = vst [vmem:[#allocation15_spill] sm:$0xff] %v9699_v16  ;;  %v9725_v52 = vadd.f32 %v9525_v42, %v9657_v50  ;;  %v13981_v15 = vmov 0  }
 0x157   :  { %v659_v24 = vadd.f32 %v658_v11, %v9052_v17  ;;  %v9688_v51 = vpop.xlane.xlu0 %2304  ;;  %v2209_v45 = vmul.f32 %v1805_v54, %v655_v5  ;;  %906 = vmatprep.mubr.bf16.mxu0 %v13858_v2  ;;  %13970 = vst [vmem:[#allocation16_spill] sm:$0xff] %v9703_v41  ;;  %v9710_v5 = vadd.f32 %v9500_v61, %v9657_v50  ;;  %13972 = vst [vmem:[#allocation18_spill] sm:$0xff] %v9717_v39 }
 0x158   :  { %13968 = vst [vmem:[#allocation14_spill] sm:$0xff] %v9695_v25  ;;  %v2687_v35 = vrot.slane %v9688_v51, 4  ;;  %v660_v11 = vpop.f32.mrf.mxu0  ;;  %v9706_v54 = vpop.xlane.xlu1 %2628  ;;  %13973 = vst [vmem:[#allocation19_spill] sm:$0xff] %v9721_v30  ;;  %v9734_v58 = vadd.f32 %v9538_v53, %v9657_v50  ;;  %v9743_v42 = vadd.f32 %v9541_v37, %v9657_v50  ;;  %v9756_v37 = vadd.f32 %v9554_v7, %v9657_v50 }
 0x159   :  { %13971 = vst [vmem:[#allocation17_spill] sm:$0xff] %v9710_v5  ;;  %v1809_v62 = vrot.slane %v659_v24, %v9057_v19  ;;  %v661_v57 = vadd.f32 %v660_v11, %v9061_v21  ;;  %v2408_v43 = vsel %vm2302_vm1, %v2209_v45, 0.0  ;;  %13974 = vst [vmem:[#allocation20_spill] sm:$0xff] %v9725_v52  ;;  %v9730_v24 = vadd.f32 %v9531_v32, %v9657_v50 }
 0x15a   :  { %v2688_v61 = vmax.f32 %v9688_v51, %v2687_v35  ;;  %v662_v2 = vpop.f32.mrf.mxu0  ;;  %2409 = vadd.xlane.f32.xlu0 %v2408_v43  ;;  %13976 = vst [vmem:[#allocation22_spill] sm:$0xff] %v9734_v58  ;;  %13977 = vst [vmem:[#allocation23_spill] sm:$0xff] %v9743_v42  ;;  %v9747_v35 = vadd.f32 %v9548_v8, %v9657_v50  ;;  %v9790_v58 = vadd.f32 %v9575_v47, %v9657_v50 }
 0x15b   :  { %13975 = vst [vmem:[#allocation21_spill] sm:$0xff] %v9730_v24  ;;  %v663_v45 = vadd.f32 %v662_v2, %v9052_v17  ;;  %v9737_v40 = vpop.xlane.xlu0 %2307  ;;  %v2210_v11 = vmul.f32 %v1809_v62, %v661_v57  ;;  %v3335_v62 = vrot.slane %v9706_v54, 4  ;;  %13979 = vst [vmem:[#allocation25_spill] sm:$0xff] %v9756_v37 }
 0x15c   :  { %13978 = vst [vmem:[#allocation24_spill] sm:$0xff] %v9747_v35  ;;  %v2689_v32 = vrot.slane %v2688_v61, 2  ;;  %v2693_v43 = vrot.slane %v9737_v40, 4  ;;  %v664_v53 = vpop.f32.mrf.mxu0  ;;  %v9761_v27 = vpop.xlane.xlu1 %2631  ;;  %v9785_v35 = vadd.f32 %v9571_v20, %v9657_v50 }
 0x15d   :  { %v1813_v4 = vrot.slane %v663_v45, %v9057_v19  ;;  %v665_v2 = vadd.f32 %v664_v53, %v9061_v21  ;;  %v2411_v57 = vsel %vm2302_vm1, %v2210_v11, 0.0  ;;  %v9765_v45 = vadd.f32 %v9561_v28, %v9657_v50 }
 0x15e   :  { %v2690_v56 = vmax.f32 %v2688_v61, %v2689_v32  ;;  %v2694_v8 = vmax.f32 %v9737_v40, %v2693_v43  ;;  %v668_v29 = vpop.f32.mrf.mxu0  ;;  %7515 = vmatmul.mubr.msk.bf16.gmra.mxu0 %vm251_vm0, %v9324_v10  ;;  %2412 = vadd.xlane.f32.xlu0 %v2411_v57  ;;  %v3341_v61 = vrot.slane %v9761_v27, 4  ;;  %v9772_v32 = vpop.f32.mrf.mxu1  ;;  %v9776_v10 = vadd.f32 %v9564_v14, %v9657_v50 }
 0x15f   :  { %13980 = vst [vmem:[#allocation26_spill] sm:$0xff] %v9765_v45  ;;  %v669_v11 = vadd.f32 %v668_v29, %v9052_v17  ;;  %v9768_v53 = vpop.xlane.xlu0 %2310  ;;  %v2211_v7 = vmul.f32 %v1813_v4, %v665_v2  ;;  %916 = vmatprep.mubr.bf16.mxu0 %v13981_v15  ;;  %v3336_v2 = vmax.f32 %v9706_v54, %v3335_v62 }
 0x160   :  { %13982 = vst [vmem:[#allocation27_spill] sm:$0xff] %v9776_v10  ;;  %v2691_v43 = vrot.slane %v2690_v56, 1  ;;  %v2695_v57 = vrot.slane %v2694_v8, 2  ;;  %v2699_v28 = vrot.slane %v9768_v53, 4  ;;  %v670_v3 = vpop.f32.mrf.mxu0  ;;  %v3342_v62 = vmax.f32 %v9761_v27, %v3341_v61  ;;  %v9796_v52 = vpop.f32.mrf.mxu1 }
 0x161   :  { %v1817_v29 = vrot.slane %v669_v11, %v9057_v19  ;;  %v671_v45 = vadd.f32 %v670_v3, %v9061_v21  ;;  %v2414_v4 = vsel %vm2302_vm1, %v2211_v7, 0.0  ;;  %v3337_v47 = vrot.slane %v3336_v2, 2 }
 0x162   :  { %v2692_v37 = vmax.f32 %v2690_v56, %v2691_v43  ;;  %v2696_v14 = vmax.f32 %v2694_v8, %v2695_v57  ;;  %v2700_v10 = vmax.f32 %v9768_v53, %v2699_v28  ;;  %v672_v39 = vpop.f32.mrf.mxu0  ;;  %2415 = vadd.xlane.f32.xlu0 %v2414_v4 }
 0x163   :  { %v673_v3 = vadd.f32 %v672_v39, %v9052_v17  ;;  %v9793_v11 = vpop.xlane.xlu0 %2313  ;;  %v2212_v7 = vmul.f32 %v1817_v29, %v671_v45 }
 0x164   :  { %v3455_v20 = vsub.f32 %v9688_v51, %v2692_v37  ;;  %v2697_v56 = vrot.slane %v2696_v14, 1  ;;  %v2701_v8 = vrot.slane %v2700_v10, 2  ;;  %v2705_v43 = vrot.slane %v9793_v11, 4  ;;  %v674_v57 = vpop.f32.mrf.mxu0  ;;  %v9806_v51 = vpop.xlane.xlu1 %2634 }
 0x165   :  { %v1821_v28 = vrot.slane %v673_v3, %v9057_v19  ;;  %v675_v4 = vadd.f32 %v674_v57, %v9061_v21  ;;  %v2417_v39 = vsel %vm2302_vm1, %v2212_v7, 0.0  ;;  %v3343_v3 = vrot.slane %v3342_v62, 2 }
 0x166   :  { %v3583_v42 = vmul.f32 1.442695, %v3455_v20  ;;  %v2698_v45 = vmax.f32 %v2696_v14, %v2697_v56  ;;  %v2702_v29 = vmax.f32 %v2700_v10, %v2701_v8  ;;  %v2706_v61 = vmax.f32 %v9793_v11, %v2705_v43  ;;  %v678_v41 = vpop.f32.mrf.mxu0  ;;  %7516 = vmatmul.mubr.msk.bf16.gmra.mxu0 %vm251_vm0, %v9326_v59  ;;  %2418 = vadd.xlane.f32.xlu0 %v2417_v39  ;;  %v9813_v10 = vpop.f32.mrf.mxu1 }
 0x167   :  { %v679_v37 = vadd.f32 %v678_v41, %v9052_v17  ;;  %v9809_v30 = vpop.xlane.xlu0 %2316  ;;  %v2213_v57 = vmul.f32 %v1821_v28, %v675_v4  ;;  %v3347_v7 = vrot.slane %v9806_v51, 4  ;;  %926 = vmatprep.mubr.bf16.mxu0 %v13981_v15  ;;  %v9818_v8 = vadd.f32 %v9584_v48, %v9657_v50 }
 0x168   :  { %7955 = vpow2.f32 %v3583_v42  ;;  %v3456_v14 = vsub.f32 %v9737_v40, %v2698_v45  ;;  %v2703_v20 = vrot.slane %v2702_v29, 1  ;;  %v2707_v59 = vrot.slane %v2706_v61, 2  ;;  %v680_v56 = vpop.f32.mrf.mxu0  ;;  %v9834_v63 = vpop.f32.mrf.mxu1 }
 0x169   :  { %v9822_v41 = vadd.f32 %v9587_v46, %v9657_v50  ;;  %v9826_v43 = vadd.f32 %v9594_v33, %v9657_v50  ;;  %v2711_v28 = vrot.slane %v9809_v30, 4  ;;  %v3338_v40 = vmax.f32 %v3336_v2, %v3337_v47 }
 0x16a   :  { %v3585_v42 = vmul.f32 1.442695, %v3456_v14  ;;  %v2704_v4 = vmax.f32 %v2702_v29, %v2703_v20  ;;  %v2708_v39 = vmax.f32 %v2706_v61, %v2707_v59  ;;  %v682_v45 = vpop.f32.mrf.mxu0  ;;  %v1825_v24 = vrot.slane %v679_v37, %v9057_v19 }
 0x16b   :  { %13983 = vst [vmem:[#allocation28_spill] sm:$0xff] %v9826_v43  ;;  %v3344_v5 = vmax.f32 %v3342_v62, %v3343_v3  ;;  %v2712_v48 = vmax.f32 %v9809_v30, %v2711_v28  ;;  %v2420_v25 = vsel %vm2302_vm1, %v2213_v57, 0.0  ;;  %v9832_v46 = vpop.xlane.xlu0 %2640  ;;  %v681_v14 = vadd.f32 %v680_v56, %v9061_v21 }
 0x16c   :  { %v3457_v33 = vsub.f32 %v9768_v53, %v2704_v4  ;;  %v2709_v43 = vrot.slane %v2708_v39, 1  ;;  %2421 = vadd.xlane.f32.xlu0 %v2420_v25  ;;  %v3348_v2 = vmax.f32 %v9806_v51, %v3347_v7  ;;  %v684_v47 = vpop.f32.mrf.mxu0  ;;  %7957 = vpow2.f32 %v3585_v42 }
 0x16d   :  { %v2713_v29 = vrot.slane %v2712_v48, 2  ;;  %v683_v62 = vadd.f32 %v682_v45, %v9052_v17  ;;  %v3359_v61 = vrot.slane %v9832_v46, 4  ;;  %v9843_v37 = vadd.f32 %v9598_v31, %v9657_v50  ;;  %v9855_v31 = vpop.f32.mrf.mxu1 }
 0x16e   :  { %v3587_v3 = vmul.f32 1.442695, %v3457_v33  ;;  %v2710_v57 = vmax.f32 %v2708_v39, %v2709_v43  ;;  %v3349_v53 = vrot.slane %v3348_v2, 2  ;;  %v9845_v20 = vpop.f32.mrf.mxu0  ;;  %7517 = vmatmul.mubr.msk.bf16.gmra.mxu0 %vm251_vm0, %v9362_v0  ;;  %v9851_v25 = vadd.f32 %v9608_v34, %v9657_v50  ;;  %v9864_v33 = vpop.xlane.xlu1 %2637 }
 0x16f   :  { %v3339_v7 = vrot.slane %v3338_v40, 1  ;;  %v2714_v59 = vmax.f32 %v2712_v48, %v2713_v29  ;;  %v3360_v56 = vmax.f32 %v9832_v46, %v3359_v61  ;;  %936 = vmatprep.mubr.bf16.mxu0 %v13981_v15  ;;  %v3345_v28 = vrot.slane %v3344_v5, 1  ;;  %v9858_v4 = vpop.xlane.xlu0 %2319 }
 0x170   :  { %13984 = vst [vmem:[#allocation29_spill] sm:$0xff] %v9851_v25  ;;  %7959 = vpow2.f32 %v3587_v3  ;;  %v3458_v43 = vsub.f32 %v9793_v11, %v2710_v57  ;;  %v2214_v42 = vmul.f32 %v1825_v24, %v681_v14  ;;  %v9860_v0 = vpop.f32.mrf.mxu0  ;;  %v1829_v34 = vrot.slane %v683_v62, %v9057_v19 }
 0x171   :  { %v2715_v39 = vrot.slane %v2714_v59, 1  ;;  %v3361_v45 = vrot.slane %v3360_v56, 2  ;;  %v685_v48 = vadd.f32 %v684_v47, %v9061_v21  ;;  %v3350_v61 = vmax.f32 %v3348_v2, %v3349_v53 }
 0x172   :  { %v3589_v29 = vmul.f32 1.442695, %v3458_v43  ;;  %v2423_v3 = vsel %vm2302_vm1, %v2214_v42, 0.0  ;;  %v3353_v11 = vrot.slane %v9864_v33, 4  ;;  %v9868_v57 = vpop.f32.mrf.mxu0  ;;  %v9872_v24 = vadd.f32 %v9617_v38, %v9657_v50  ;;  %v9879_v43 = vpop.f32.mrf.mxu1 }
 0x173   :  { %v9876_v14 = vadd.f32 %v9627_v13, %v9657_v50  ;;  %v2716_v62 = vmax.f32 %v2714_v59, %v2715_v39  ;;  %2424 = vadd.xlane.f32.xlu0 %v2423_v3  ;;  %v2717_v47 = vrot.slane %v9858_v4, 4  ;;  %v3340_v2 = vmax.f32 %v3338_v40, %v3339_v7 }
 0x174   :  { %13985 = vst [vmem:[#allocation30_spill] sm:$0xff] %v9872_v24  ;;  %7961 = vpow2.f32 %v3589_v29  ;;  %v3362_v53 = vmax.f32 %v3360_v56, %v3361_v45  ;;  %v3354_v42 = vmax.f32 %v9864_v33, %v3353_v11  ;;  %v9882_v25 = vpop.f32.mrf.mxu0  ;;  %v3346_v38 = vmax.f32 %v3344_v5, %v3345_v28  ;;  %v9893_v56 = vpop.xlane.xlu0 %2322 }
 0x175   :  { %13986 = vst [vmem:[#allocation31_spill] sm:$0xff] %v9876_v14  ;;  %v9884_v16 = vpop.eup %7955  ;;  %v3459_v9 = vsub.f32 %v9809_v30, %v2716_v62  ;;  %v2718_v13 = vmax.f32 %v9858_v4, %v2717_v47  ;;  %v2215_v59 = vmul.f32 %v1829_v34, %v685_v48  ;;  %v9891_v3 = vadd.f32 %v9637_v1, %v9657_v50  ;;  %v9904_v48 = vpop.xlane.xlu1 %2643 }
 0x176   :  { %13987 = vst [vmem:[#allocation32_spill] sm:$0xff] %v9884_v16  ;;  %v3839_v39 = vrot.slane %v9884_v16, 4  ;;  %v3351_v40 = vrot.slane %v3350_v61, 1  ;;  %v3355_v7 = vrot.slane %v3354_v42, 2  ;;  %v9895_v45 = vpop.f32.mrf.mxu0  ;;  %7518 = vmatmul.mubr.msk.bf16.gmra.mxu0 %vm251_vm0, %v9364_v22  ;;  %v9901_v5 = vadd.f32 %v9660_v23, %v9657_v50  ;;  %v9906_v1 = vpop.f32.mrf.mxu1 }
 0x177   :  { %v3591_v30 = vmul.f32 1.442695, %v3459_v9  ;;  %v2719_v28 = vrot.slane %v2718_v13, 2  ;;  %v2426_v34 = vsel %vm2302_vm1, %v2215_v59, 0.0  ;;  %946 = vmatprep.mubr.bf16.mxu0 %v13981_v15  ;;  %v9912_v11 = vadd.f32 %v9691_v49, %v9657_v50 }
 0x178   :  { %13988 = vst [vmem:[#allocation33_spill] sm:$0xff] %v9901_v5  ;;  %v3840_v29 = vadd.f32 %v9884_v16, %v3839_v39  ;;  %v3363_v22 = vrot.slane %v3362_v53, 1  ;;  %2427 = vadd.xlane.f32.xlu1 %v2426_v34  ;;  %v3365_v23 = vrot.slane %v9904_v48, 4  ;;  %v9915_v9 = vpop.f32.mrf.mxu0  ;;  %v3563_v62 = vsub.f32 %v9706_v54, %v3340_v2  ;;  %v9932_v2 = vpop.f32.mrf.mxu1 }
 0x179   :  { %13989 = vst [vmem:[#allocation34_spill] sm:$0xff] %v9912_v11  ;;  %v3564_v47 = vsub.f32 %v9761_v27, %v3346_v38  ;;  %v3356_v59 = vmax.f32 %v3354_v42, %v3355_v7  ;;  %v2723_v5 = vrot.slane %v9893_v56, 4  ;;  %v9920_v14 = vpop.eup %7957  ;;  %7963 = vpow2.f32 %v3591_v30 }
 0x17a   :  { %13990 = vst [vmem:[#allocation35_spill] sm:$0xff] %v9920_v14  ;;  %v3352_v39 = vmax.f32 %v3350_v61, %v3351_v40  ;;  %v689_v49 = vadd.f32 %v9845_v20, %v9052_v17  ;;  %v2720_v16 = vmax.f32 %v2718_v13, %v2719_v28  ;;  %v9924_v34 = vpop.f32.mrf.mxu0  ;;  %v3841_v24 = vrot.slane %v3840_v29, 2 }
 0x17b   :  { %v9928_v11 = vadd.f32 %v9739_v6, %v9657_v50  ;;  %v3366_v27 = vmax.f32 %v9904_v48, %v3365_v23  ;;  %v2724_v54 = vmax.f32 %v9893_v56, %v2723_v5  ;;  %v3364_v42 = vmax.f32 %v3362_v53, %v3363_v22 }
 0x17c   :  { %v9936_v61 = vadd.f32 %v9772_v32, %v9657_v50  ;;  %v9940_v20 = vadd.f32 %v9796_v52, %v9657_v50  ;;  %v9944_v38 = vadd.f32 %v9813_v10, %v9657_v50  ;;  %v9946_v6 = vpop.f32.mrf.mxu0  ;;  %v3845_v40 = vrot.slane %v9920_v14, 4 }
 0x17d   :  { %13991 = vst [vmem:[#allocation36_spill] sm:$0xff] %v9928_v11  ;;  %v9948_v13 = vpop.eup %7959  ;;  %v3799_v7 = vmul.f32 1.442695, %v3563_v62  ;;  %v3357_v53 = vrot.slane %v3356_v59, 1  ;;  %v2725_v5 = vrot.slane %v2724_v54, 2  ;;  %v3565_v32 = vsub.f32 %v9806_v51, %v3352_v39  ;;  %v9960_v11 = vpop.f32.mrf.mxu1 }
 0x17e   :  { %13992 = vst [vmem:[#allocation37_spill] sm:$0xff] %v9936_v61  ;;  %13993 = vst [vmem:[#allocation38_spill] sm:$0xff] %v9940_v20  ;;  %v3801_v30 = vmul.f32 1.442695, %v3564_v47  ;;  %v1833_v28 = vrot.slane %v689_v49, %v9057_v19  ;;  %v2721_v52 = vrot.slane %v2720_v16, 1  ;;  %v9953_v22 = vpop.f32.mrf.mxu0  ;;  %7519 = vmatmul.mubr.msk.bf16.gmra.mxu0 %vm251_vm0, %v9396_v55  ;;  %v3842_v10 = vadd.f32 %v3841_v24, %v3840_v29 }
 0x17f   :  { %13994 = vst [vmem:[#allocation39_spill] sm:$0xff] %v9944_v38  ;;  %13995 = vst [vmem:[#allocation40_spill] sm:$0xff] %v9948_v13  ;;  %v3851_v23 = vrot.slane %v9948_v13, 4  ;;  %v691_v20 = vadd.f32 %v9860_v0, %v9061_v21  ;;  %v3367_v62 = vrot.slane %v3366_v27, 2  ;;  %956 = vmatprep.mubr.bf16.mxu0 %v13981_v15  ;;  %v3567_v51 = vsub.f32 %v9832_v46, %v3364_v42  ;;  %v9979_v46 = vpop.xlane.xlu1 %2328 }
 0x180   :  { %v693_v47 = vadd.f32 %v9868_v57, %v9052_v17  ;;  %v9968_v39 = vadd.f32 %v9834_v63, %v9657_v50  ;;  %v2726_v55 = vmax.f32 %v2724_v54, %v2725_v5  ;;  %v9970_v24 = vpop.f32.mrf.mxu0  ;;  %v3846_v0 = vadd.f32 %v9920_v14, %v3845_v40 }
 0x181   :  { %v9972_v29 = vpop.eup %7961  ;;  %7965 = vpow2.f32 %v3799_v7  ;;  %v3358_v49 = vmax.f32 %v3356_v59, %v3357_v53  ;;  %v9977_v38 = vadd.f32 %v9855_v31, %v9657_v50  ;;  %v3803_v57 = vmul.f32 1.442695, %v3565_v32  ;;  %v9988_v53 = vpop.f32.mrf.mxu1 }
 0x182   :  { %13996 = vst [vmem:[#allocation41_spill] sm:$0xff] %v9968_v39  ;;  %13997 = vst [vmem:[#allocation42_spill] sm:$0xff] %v9972_v29  ;;  %7967 = vpow2.f32 %v3801_v30  ;;  %v2722_v42 = vmax.f32 %v2720_v16, %v2721_v52  ;;  %v9983_v63 = vadd.f32 %v9879_v43, %v9657_v50  ;;  %v9985_v54 = vpop.f32.mrf.mxu0  ;;  %v3843_v5 = vrot.slane %v3842_v10, 1  ;;  %v9992_v16 = vpop.xlane.xlu0 %2646 }
 0x183   :  { %13998 = vst [vmem:[#allocation43_spill] sm:$0xff] %v9977_v38  ;;  %v3852_v40 = vadd.f32 %v9948_v13, %v3851_v23  ;;  %v3368_v7 = vmax.f32 %v3366_v27, %v3367_v62  ;;  %v2216_v59 = vmul.f32 %v1833_v28, %v691_v20  ;;  %v3857_v31 = vrot.slane %v9972_v29, 4 }
 0x184   :  { %13999 = vst [vmem:[#allocation44_spill] sm:$0xff] %v9983_v63  ;;  %v3807_v39 = vmul.f32 1.442695, %v3567_v51  ;;  %v1837_v30 = vrot.slane %v693_v47, %v9057_v19  ;;  %v2727_v32 = vrot.slane %v2726_v55, 1  ;;  %v9994_v52 = vpop.f32.mrf.mxu0  ;;  %v3847_v43 = vrot.slane %v3846_v0, 2 }
 0x185   :  { %v3566_v63 = vsub.f32 %v9864_v33, %v3358_v49  ;;  %v2429_v38 = vsel %vm2302_vm1, %v2216_v59, 0.0  ;;  %v2735_v27 = vrot.slane %v9979_v46, 4  ;;  %7969 = vpow2.f32 %v3803_v57  ;;  %v10009_v57 = vpop.xlane.xlu1 %2331 }
 0x186   :  { %v3460_v20 = vsub.f32 %v9858_v4, %v2722_v42  ;;  %v695_v28 = vadd.f32 %v9882_v25, %v9061_v21  ;;  %v699_v23 = vadd.f32 %v9895_v45, %v9052_v17  ;;  %2430 = vadd.xlane.f32.xlu1 %v2429_v38  ;;  %7520 = vmatmul.mubr.msk.bf16.gmra.mxu0 %vm251_vm0, %v9399_v12  ;;  %v10006_v62 = vpop.eup %7963  ;;  %v3853_v51 = vrot.slane %v3852_v40, 2  ;;  %v10011_v4 = vpop.f32.mrf.mxu0 }
 0x187   :  { %14000 = vst [vmem:[#allocation45_spill] sm:$0xff] %v10006_v62  ;;  %v3844_v33 = vadd.f32 %v3843_v5, %v3842_v10  ;;  %v3369_v47 = vrot.slane %v3368_v7, 1  ;;  %v2736_v49 = vmax.f32 %v9979_v46, %v2735_v27  ;;  %966 = vmatprep.mubr.bf16.mxu0 %v13981_v15  ;;  %v3858_v25 = vadd.f32 %v9972_v29, %v3857_v31  ;;  %v10019_v38 = vpop.f32.mrf.mxu1  ;;  %v10024_v31 = vpop.xlane.xlu0 %2325 }
 0x188   :  { %7971 = vpow2.f32 %v3807_v39  ;;  %v2728_v45 = vmax.f32 %v2726_v55, %v2727_v32  ;;  %v10017_v12 = vadd.f32 %v9906_v1, %v9657_v50  ;;  %v3848_v10 = vadd.f32 %v3847_v43, %v3846_v0  ;;  %v10026_v32 = vpop.f32.mrf.mxu0 }
 0x189   :  { %v3805_v42 = vmul.f32 1.442695, %v3566_v63  ;;  %v2737_v5 = vrot.slane %v2736_v49, 2  ;;  %v3371_v59 = vrot.slane %v9992_v16, 4  ;;  %v3863_v27 = vrot.slane %v10006_v62, 4 }
 0x18a   :  { %14001 = vst [vmem:[#allocation46_spill] sm:$0xff] %v10017_v12  ;;  %v3593_v61 = vmul.f32 1.442695, %v3460_v20  ;;  %v1841_v13 = vrot.slane %v699_v23, %v9057_v19  ;;  %v2217_v14 = vmul.f32 %v1837_v30, %v695_v28  ;;  %7973 = vrcp.f32 %v3844_v33  ;;  %v10032_v20 = vpop.f32.mrf.mxu1  ;;  %v10037_v28 = vpop.xlane.xlu1 %2334 }
 0x18b   :  { %v3854_v39 = vadd.f32 %v3853_v51, %v3852_v40  ;;  %v3370_v55 = vmax.f32 %v3368_v7, %v3369_v47  ;;  %v2738_v1 = vmax.f32 %v2736_v49, %v2737_v5  ;;  %v3859_v12 = vrot.slane %v3858_v25, 2 }
 0x18c   :  { %v3461_v0 = vsub.f32 %v9893_v56, %v2728_v45  ;;  %v701_v63 = vadd.f32 %v9915_v9, %v9061_v21  ;;  %v2432_v43 = vsel %vm2302_vm1, %v2217_v14, 0.0  ;;  %v3372_v30 = vmax.f32 %v9992_v16, %v3371_v59  ;;  %v10051_v59 = vpop.f32.mrf.mxu0 }
 0x18d   :  { %v2739_v23 = vrot.slane %v2738_v1, 1  ;;  %2433 = vadd.xlane.f32.xlu1 %v2432_v43  ;;  %v2741_v40 = vrot.slane %v10009_v57, 4  ;;  %v2729_v7 = vrot.slane %v10024_v31, 4  ;;  %v3849_v56 = vrot.slane %v3848_v10, 1 }
 0x18e   :  { %v10039_v33 = vpop.eup %7965  ;;  %v3864_v51 = vadd.f32 %v10006_v62, %v3863_v27  ;;  %7975 = vpow2.f32 %v3593_v61  ;;  %v703_v14 = vadd.f32 %v9924_v34, %v9052_v17  ;;  %7521 = vmatmul.mubr.msk.bf16.gmra.mxu0 %vm251_vm0, %v9440_v36  ;;  %v3568_v47 = vsub.f32 %v9904_v48, %v3370_v55 }
 0x18f   :  { %14002 = vst [vmem:[#allocation47_spill] sm:$0xff] %v10039_v33  ;;  %v10046_v9 = vpop.eup %7967  ;;  %v2740_v49 = vmax.f32 %v2738_v1, %v2739_v23  ;;  %v2742_v45 = vmax.f32 %v10009_v57, %v2741_v40  ;;  %v2730_v5 = vmax.f32 %v10024_v31, %v2729_v7  ;;  %976 = vmatprep.mubr.bf16.mxu0 %v13981_v15  ;;  %v3855_v61 = vrot.slane %v3854_v39, 1  ;;  %v10054_v33 = vpop.f32.mrf.mxu1 }
 0x190   :  { %14003 = vst [vmem:[#allocation48_spill] sm:$0xff] %v10046_v9  ;;  %v3860_v27 = vadd.f32 %v3859_v12, %v3858_v25  ;;  %v3595_v43 = vmul.f32 1.442695, %v3461_v0  ;;  %v2218_v34 = vmul.f32 %v1841_v13, %v701_v63  ;;  %v3373_v9 = vrot.slane %v3372_v30, 2  ;;  %v10067_v63 = vpop.f32.mrf.mxu0 }
 0x191   :  { %v3463_v36 = vsub.f32 %v9979_v46, %v2740_v49  ;;  %v2743_v62 = vrot.slane %v2742_v45, 2  ;;  %v2731_v48 = vrot.slane %v2730_v5, 2  ;;  %v3865_v55 = vrot.slane %v3864_v51, 2  ;;  %v10065_v46 = vpop.xlane.xlu1 %2337  ;;  %v10070_v29 = vpop.f32.mrf.mxu1 }
 0x192   :  { %v1845_v1 = vrot.slane %v703_v14, %v9057_v19  ;;  %v705_v23 = vadd.f32 %v9946_v6, %v9061_v21  ;;  %v2435_v40 = vsel %vm2302_vm1, %v2218_v34, 0.0  ;;  %v10061_v7 = vpop.eup %7969  ;;  %v709_v0 = vadd.f32 %v9953_v22, %v9052_v17 }
 0x193   :  { %14004 = vst [vmem:[#allocation49_spill] sm:$0xff] %v10061_v7  ;;  %v3599_v25 = vmul.f32 1.442695, %v3463_v36  ;;  %v2744_v12 = vmax.f32 %v2742_v45, %v2743_v62  ;;  %v2732_v13 = vmax.f32 %v2730_v5, %v2731_v48  ;;  %2436 = vadd.xlane.f32.xlu1 %v2435_v40  ;;  %v3850_v49 = vadd.f32 %v3849_v56, %v3848_v10  ;;  %v10078_v40 = vpop.f32.mrf.mxu0 }
 0x194   :  { %7977 = vpow2.f32 %v3805_v42  ;;  %v3809_v14 = vmul.f32 1.442695, %v3568_v47  ;;  %v2747_v6 = vrot.slane %v10037_v28, 4  ;;  %v3856_v36 = vadd.f32 %v3855_v61, %v3854_v39 }
 0x195   :  { %v10072_v34 = vpop.eup %7971  ;;  %7979 = vpow2.f32 %v3599_v25  ;;  %v2745_v62 = vrot.slane %v2744_v12, 1  ;;  %v2733_v45 = vrot.slane %v2732_v13, 1  ;;  %v3861_v5 = vrot.slane %v3860_v27, 1 }
 0x196   :  { %14005 = vst [vmem:[#allocation50_spill] sm:$0xff] %v10072_v34  ;;  %7981 = vpow2.f32 %v3595_v43  ;;  %v3374_v22 = vmax.f32 %v3372_v30, %v3373_v9  ;;  %v2748_v48 = vmax.f32 %v10037_v28, %v2747_v6  ;;  %7522 = vmatmul.mubr.msk.bf16.gmra.mxu0 %vm251_vm0, %v9442_v44  ;;  %v3866_v10 = vadd.f32 %v3865_v55, %v3864_v51  ;;  %v10088_v51 = vpop.f32.mrf.mxu1 }
 0x197   :  { %v2746_v42 = vmax.f32 %v2744_v12, %v2745_v62  ;;  %v1849_v56 = vrot.slane %v709_v0, %v9057_v19  ;;  %v2219_v47 = vmul.f32 %v1845_v1, %v705_v23  ;;  %986 = vmatprep.mubr.bf16.mxu0 %v13981_v15  ;;  %v10081_v39 = vpop.eup %7973  ;;  %v711_v30 = vadd.f32 %v9970_v24, %v9061_v21  ;;  %v10092_v23 = vpop.xlane.xlu1 %2340 }
 0x198   :  { %v2749_v61 = vrot.slane %v2748_v48, 2  ;;  %v713_v9 = vadd.f32 %v9985_v54, %v9052_v17  ;;  %v2753_v44 = vrot.slane %v10065_v46, 4  ;;  %7983 = vrcp.f32 %v3850_v49  ;;  %v10097_v49 = vpop.f32.mrf.mxu0 }
 0x199   :  { %v3464_v43 = vsub.f32 %v10009_v57, %v2746_v42  ;;  %v2734_v55 = vmax.f32 %v2732_v13, %v2733_v45  ;;  %v2438_v1 = vsel %vm2302_vm1, %v2219_v47, 0.0  ;;  %v3862_v25 = vadd.f32 %v3861_v5, %v3860_v27  ;;  %v10100_v47 = vpop.f32.mrf.mxu1 }
 0x19a   :  { %7985 = vpow2.f32 %v3809_v14  ;;  %v2750_v12 = vmax.f32 %v2748_v48, %v2749_v61  ;;  %2439 = vadd.xlane.f32.xlu1 %v2438_v1  ;;  %v2754_v24 = vmax.f32 %v10065_v46, %v2753_v44  ;;  %v3867_v54 = vrot.slane %v3866_v10, 1 }
 0x19b   :  { %v10095_v0 = vpop.eup %7975  ;;  %7987 = vrcp.f32 %v3856_v36  ;;  %v3375_v6 = vrot.slane %v3374_v22, 1  ;;  %v3601_v62 = vmul.f32 1.442695, %v3464_v43  ;;  %v1853_v13 = vrot.slane %v713_v9, %v9057_v19  ;;  %v10110_v9 = vpop.xlane.xlu0 %2649 }
 0x19c   :  { %14006 = vst [vmem:[#allocation51_spill] sm:$0xff] %v10095_v0  ;;  %v2751_v57 = vrot.slane %v2750_v12, 1  ;;  %v2755_v45 = vrot.slane %v2754_v24, 2  ;;  %v2220_v42 = vmul.f32 %v1849_v56, %v711_v30  ;;  %v3462_v27 = vsub.f32 %v10024_v31, %v2734_v55  ;;  %v10119_v44 = vpop.xlane.xlu1 %2343 }
 0x19d   :  { %7989 = vpow2.f32 %v3601_v62  ;;  %v715_v14 = vadd.f32 %v9994_v52, %v9061_v21  ;;  %v2759_v36 = vrot.slane %v10092_v23, 4  ;;  %v10108_v5 = vadd.f32 %v9932_v2, %v9657_v50  ;;  %v10121_v2 = vpop.f32.mrf.mxu0 }
 0x19e   :  { %7991 = vrcp.f32 %v3862_v25  ;;  %v2752_v48 = vmax.f32 %v2750_v12, %v2751_v57  ;;  %v2756_v61 = vmax.f32 %v2754_v24, %v2755_v45  ;;  %7523 = vmatmul.mubr.msk.bf16.gmra.mxu0 %vm251_vm0, %v9483_v26  ;;  %v719_v31 = vadd.f32 %v10011_v4, %v9052_v17  ;;  %v10125_v25 = vpop.f32.mrf.mxu1 }
 0x19f   :  { %14007 = vst [vmem:[#allocation52_spill] sm:$0xff] %v10108_v5  ;;  %v2441_v56 = vsel %vm2302_vm1, %v2220_v42, 0.0  ;;  %v2760_v52 = vmax.f32 %v10092_v23, %v2759_v36  ;;  %v3377_v30 = vrot.slane %v10110_v9, 4  ;;  %996 = vmatprep.mubr.bf16.mxu0 %v13981_v15  ;;  %v3868_v43 = vadd.f32 %v3867_v54, %v3866_v10 }
 0x1a0   :  { %v3376_v55 = vmax.f32 %v3374_v22, %v3375_v6  ;;  %v3465_v1 = vsub.f32 %v10037_v28, %v2752_v48  ;;  %v2757_v26 = vrot.slane %v2756_v61, 1  ;;  %2442 = vadd.xlane.f32.xlu1 %v2441_v56  ;;  %v3597_v12 = vmul.f32 1.442695, %v3462_v27  ;;  %v10140_v56 = vpop.f32.mrf.mxu0 }
 0x1a1   :  { %v10127_v4 = vpop.eup %7977  ;;  %v2761_v24 = vrot.slane %v2760_v52, 2  ;;  %v3378_v62 = vmax.f32 %v10110_v9, %v3377_v30  ;;  %v2221_v57 = vmul.f32 %v1853_v13, %v715_v14  ;;  %v3869_v42 = vrot.slane %v10095_v0, 4  ;;  %v10145_v30 = vpop.xlane.xlu0 %2652 }
 0x1a2   :  { %14008 = vst [vmem:[#allocation53_spill] sm:$0xff] %v10127_v4  ;;  %v10130_v45 = vpop.eup %7979  ;;  %v3603_v36 = vmul.f32 1.442695, %v3465_v1  ;;  %v2758_v10 = vmax.f32 %v2756_v61, %v2757_v26  ;;  %v2765_v22 = vrot.slane %v10119_v44, 4  ;;  %v1857_v6 = vrot.slane %v719_v31, %v9057_v19  ;;  %v10147_v1 = vpop.f32.mrf.mxu1 }
 0x1a3   :  { %14009 = vst [vmem:[#allocation54_spill] sm:$0xff] %v10130_v45  ;;  %v10134_v28 = vpop.eup %7981  ;;  %v3887_v54 = vrot.slane %v10130_v45, 4  ;;  %v2762_v48 = vmax.f32 %v2760_v52, %v2761_v24  ;;  %v721_v27 = vadd.f32 %v10026_v32, %v9061_v21  ;;  %v2444_v14 = vsel %vm2302_vm1, %v2221_v57, 0.0  ;;  %v10164_v34 = vpop.f32.mrf.mxu0 }
 0x1a4   :  { %14010 = vst [vmem:[#allocation55_spill] sm:$0xff] %v10134_v28  ;;  %7993 = vpow2.f32 %v3603_v36  ;;  %v3466_v13 = vsub.f32 %v10065_v46, %v2758_v10  ;;  %v2766_v61 = vmax.f32 %v10119_v44, %v2765_v22  ;;  %v3379_v31 = vrot.slane %v3378_v62, 2  ;;  %2445 = vadd.xlane.f32.xlu1 %v2444_v14 }
 0x1a5   :  { %7995 = vpow2.f32 %v3597_v12  ;;  %v2763_v26 = vrot.slane %v2762_v48, 1  ;;  %v3383_v52 = vrot.slane %v10145_v30, 4  ;;  %v10150_v32 = vpop.eup %7983  ;;  %v3870_v24 = vadd.f32 %v10095_v0, %v3869_v42 }
 0x1a6   :  { %v3569_v46 = vsub.f32 %v9992_v16, %v3376_v55  ;;  %v3605_v36 = vmul.f32 1.442695, %v3466_v13  ;;  %v2767_v57 = vrot.slane %v2766_v61, 2  ;;  %7524 = vmatmul.mubr.msk.bf16.gmra.mxu0 %vm251_vm0, %v9485_v60  ;;  %v3875_v12 = vrot.slane %v10134_v28, 4  ;;  %v10170_v13 = vpop.f32.mrf.mxu1 }
 0x1a7   :  { %v10156_v10 = vpop.eup %7985  ;;  %v10161_v22 = vadd.f32 %v9960_v11, %v9657_v50  ;;  %v2764_v14 = vmax.f32 %v2762_v48, %v2763_v26  ;;  %v3384_v5 = vmax.f32 %v10145_v30, %v3383_v52  ;;  %1006 = vmatprep.mubr.bf16.mxu0 %v13981_v15  ;;  %7997 = vrcp.f32 %v3868_v43 }
 0x1a8   :  { %14011 = vst [vmem:[#allocation56_spill] sm:$0xff] %v10156_v10  ;;  %v10167_v16 = vpop.eup %7987  ;;  %v3888_v60 = vadd.f32 %v10130_v45, %v3887_v54  ;;  %v2768_v55 = vmax.f32 %v2766_v61, %v2767_v57  ;;  %v2222_v42 = vmul.f32 %v1857_v6, %v721_v27  ;;  %7999 = vpow2.f32 %v3605_v36  ;;  %v10187_v57 = vpop.f32.mrf.mxu1 }
 0x1a9   :  { %14012 = vst [vmem:[#allocation57_spill] sm:$0xff] %v10161_v22  ;;  %14013 = vst [vmem:[#allocation58_spill] sm:$0xff] %v10167_v16  ;;  %v3467_v11 = vsub.f32 %v10092_v23, %v2764_v14  ;;  %v3380_v22 = vmax.f32 %v3378_v62, %v3379_v31  ;;  %v3385_v48 = vrot.slane %v3384_v5, 2  ;;  %v3871_v52 = vrot.slane %v3870_v24, 2  ;;  %v10182_v23 = vpop.xlane.xlu1 %2667  ;;  %v10184_v62 = vpop.f32.mrf.mxu0 }
 0x1aa   :  { %v10173_v26 = vpop.eup %7989  ;;  %v3811_v10 = vmul.f32 1.442695, %v3569_v46  ;;  %v2769_v4 = vrot.slane %v2768_v55, 1  ;;  %v2447_v15 = vsel %vm2302_vm1, %v2222_v42, 0.0  ;;  %v3876_v43 = vadd.f32 %v10134_v28, %v3875_v12 }
 0x1ab   :  { %14014 = vst [vmem:[#allocation59_spill] sm:$0xff] %v10173_v26  ;;  %v10176_v7 = vpop.eup %7991  ;;  %v3893_v54 = vrot.slane %v10173_v26, 4  ;;  %v3607_v6 = vmul.f32 1.442695, %v3467_v11  ;;  %v723_v27 = vadd.f32 %v10051_v59, %v9052_v17  ;;  %2448 = vadd.xlane.f32.xlu0 %v2447_v15  ;;  %v3889_v61 = vrot.slane %v3888_v60, 2 }
 0x1ac   :  { %14015 = vst [vmem:[#allocation60_spill] sm:$0xff] %v10176_v7  ;;  %v2770_v31 = vmax.f32 %v2768_v55, %v2769_v4  ;;  %v3386_v46 = vmax.f32 %v3384_v5, %v3385_v48  ;;  %v3413_v36 = vrot.slane %v10182_v23, 4  ;;  %v10191_v12 = vadd.f32 %v9988_v53, %v9657_v50  ;;  %v10202_v55 = vpop.xlane.xlu0 %2655 }
 0x1ad   :  { %v10195_v14 = vadd.f32 %v10019_v38, %v9657_v50  ;;  %8001 = vpow2.f32 %v3607_v6  ;;  %v3381_v59 = vrot.slane %v3380_v22, 1  ;;  %v10197_v42 = vadd.f32 %v3871_v52, %v3870_v24  ;;  %v10210_v52 = vpop.f32.mrf.mxu0  ;;  %v10216_v6 = vpop.f32.mrf.mxu1 }
 0x1ae   :  { %14016 = vst [vmem:[#allocation61_spill] sm:$0xff] %v10191_v12  ;;  %v3894_v11 = vadd.f32 %v10173_v26, %v3893_v54  ;;  %v3468_v5 = vsub.f32 %v10119_v44, %v2770_v31  ;;  %v3414_v4 = vmax.f32 %v10182_v23, %v3413_v36  ;;  %7525 = vmatmul.mubr.msk.bf16.gmra.mxu0 %vm251_vm0, %v9518_v18  ;;  %v3387_v48 = vrot.slane %v3386_v46, 1 }
 0x1af   :  { %14017 = vst [vmem:[#allocation62_spill] sm:$0xff] %v10195_v14  ;;  %v1861_v53 = vrot.slane %v723_v27, %v9057_v19  ;;  %v725_v38 = vadd.f32 %v10067_v63, %v9061_v21  ;;  %v3389_v24 = vrot.slane %v10202_v55, 4  ;;  %v3877_v15 = vrot.slane %v3876_v43, 2  ;;  %v10240_v45 = vpop.f32.mrf.mxu1 }
 0x1b0   :  { %v3890_v54 = vadd.f32 %v3889_v61, %v3888_v60  ;;  %8003 = vpow2.f32 %v3811_v10  ;;  %v10214_v44 = vadd.f32 %v10032_v20, %v9657_v50  ;;  %v3382_v27 = vmax.f32 %v3380_v22, %v3381_v59  ;;  %v10229_v22 = vpop.xlane.xlu1 %2346  ;;  %v10231_v59 = vpop.f32.mrf.mxu0 }
 0x1b1   :  { %v10218_v18 = vpop.eup %7993  ;;  %v3609_v31 = vmul.f32 1.442695, %v3468_v5  ;;  %v3415_v36 = vrot.slane %v3414_v4, 2  ;;  %v3390_v63 = vmax.f32 %v10202_v55, %v3389_v24  ;;  %v3895_v28 = vrot.slane %v3894_v11, 2 }
 0x1b2   :  { %14018 = vst [vmem:[#allocation63_spill] sm:$0xff] %v10214_v44  ;;  %14019 = vst [vmem:[#allocation64_spill] sm:$0xff] %v10218_v18  ;;  %v10221_v12 = vpop.eup %7995  ;;  %v3899_v10 = vrot.slane %v10218_v18, 4  ;;  %v10227_v20 = vadd.f32 %v10054_v33, %v9657_v50  ;;  %v3388_v60 = vmax.f32 %v3386_v46, %v3387_v48  ;;  %v2223_v0 = vmul.f32 %v1861_v53, %v725_v38 }
 0x1b3   :  { %14020 = vst [vmem:[#allocation65_spill] sm:$0xff] %v10221_v12  ;;  %v3416_v61 = vmax.f32 %v3414_v4, %v3415_v36  ;;  %v3391_v44 = vrot.slane %v3390_v63, 2  ;;  %v10233_v5 = vadd.f32 %v3877_v15, %v3876_v43  ;;  %v3891_v24 = vrot.slane %v3890_v54, 1  ;;  %v10252_v36 = vpop.xlane.xlu0 %2664 }
 0x1b4   :  { %14021 = vst [vmem:[#allocation66_spill] sm:$0xff] %v10227_v20  ;;  %v3900_v14 = vadd.f32 %v10218_v18, %v3899_v10  ;;  %v10238_v26 = vadd.f32 %v10070_v29, %v9657_v50  ;;  %v10242_v33 = vpop.eup %7997  ;;  %v3881_v46 = vrot.slane %v10221_v12, 4  ;;  %v3570_v4 = vsub.f32 %v10110_v9, %v3382_v27 }
 0x1b5   :  { %14023 = vst [vmem:[#allocation68_spill] sm:$0xff] %v10242_v33  ;;  %8005 = vpow2.f32 %v3609_v31  ;;  %v2450_v53 = vsel %vm2302_vm1, %v2223_v0, 0.0  ;;  %v10247_v43 = vpop.eup %7999  ;;  %v3896_v48 = vadd.f32 %v3895_v28, %v3894_v11  ;;  %v729_v38 = vadd.f32 %v10078_v40, %v9052_v17  ;;  %v10260_v31 = vpop.f32.mrf.mxu0 }
 0x1b6   :  { %14022 = vst [vmem:[#allocation67_spill] sm:$0xff] %v10238_v26  ;;  %14024 = vst [vmem:[#allocation69_spill] sm:$0xff] %v10247_v43  ;;  %v3417_v15 = vrot.slane %v3416_v61, 1  ;;  %2451 = vadd.xlane.f32.xlu1 %v2450_v53  ;;  %v2771_v29 = vrot.slane %v10229_v22, 4  ;;  %v10256_v10 = vadd.f32 %v10088_v51, %v9657_v50  ;;  %v3571_v9 = vsub.f32 %v10145_v30, %v3388_v60  ;;  %v10267_v26 = vpop.f32.mrf.mxu1 }
 0x1b7   :  { %v3392_v27 = vmax.f32 %v3390_v63, %v3391_v44  ;;  %v3407_v0 = vrot.slane %v10252_v36, 4  ;;  %v3892_v28 = vadd.f32 %v3891_v24, %v3890_v54  ;;  %v3901_v11 = vrot.slane %v3900_v14, 2  ;;  %v10285_v20 = vpop.f32.mrf.mxu0 }
 0x1b8   :  { %14025 = vst [vmem:[#allocation70_spill] sm:$0xff] %v10256_v10  ;;  %v10264_v40 = vadd.f32 %v10100_v47, %v9657_v50  ;;  %v2772_v53 = vmax.f32 %v10229_v22, %v2771_v29  ;;  %v10270_v51 = vadd.f32 %v10221_v12, %v3881_v46  ;;  %v3905_v30 = vrot.slane %v10247_v43, 4  ;;  %v10288_v18 = vpop.f32.mrf.mxu1 }
 0x1b9   :  { %v3813_v44 = vmul.f32 1.442695, %v3570_v4  ;;  %v10275_v63 = vadd.f32 %v10125_v25, %v9657_v50  ;;  %v3897_v60 = vrot.slane %v3896_v48, 1  ;;  %v1865_v47 = vrot.slane %v729_v38, %v9057_v19 }
 0x1ba   :  { %14026 = vst [vmem:[#allocation71_spill] sm:$0xff] %v10264_v40  ;;  %v10277_v54 = vpop.eup %8001  ;;  %v3418_v24 = vmax.f32 %v3416_v61, %v3417_v15  ;;  %v731_v29 = vadd.f32 %v10097_v49, %v9061_v21  ;;  %v3815_v40 = vmul.f32 1.442695, %v3571_v9  ;;  %v3393_v10 = vrot.slane %v3392_v27, 1 }
 0x1bb   :  { %14027 = vst [vmem:[#allocation72_spill] sm:$0xff] %v10275_v63  ;;  %14028 = vst [vmem:[#allocation73_spill] sm:$0xff] %v10277_v54  ;;  %v733_v46 = vadd.f32 %v10121_v2, %v9052_v17  ;;  %v3408_v4 = vmax.f32 %v10252_v36, %v3407_v0  ;;  %8007 = vrcp.f32 %v3892_v28  ;;  %v3902_v25 = vadd.f32 %v3901_v11, %v3900_v14  ;;  %v10303_v28 = vpop.xlane.xlu1 %2670  ;;  %v10305_v11 = vpop.xlane.xlu0 %2352 }
 0x1bc   :  { %v3911_v63 = vrot.slane %v10277_v54, 4  ;;  %v2773_v12 = vrot.slane %v2772_v53, 2  ;;  %v3906_v38 = vadd.f32 %v10247_v43, %v3905_v30  ;;  %8009 = vpow2.f32 %v3813_v44 }
 0x1bd   :  { %v10290_v61 = vpop.eup %8003  ;;  %v10296_v2 = vadd.f32 %v10147_v1, %v9657_v50  ;;  %v3898_v15 = vadd.f32 %v3897_v60, %v3896_v48  ;;  %v3576_v9 = vsub.f32 %v10182_v23, %v3418_v24  ;;  %v10301_v14 = vadd.f32 %v10170_v13, %v9657_v50  ;;  %v10312_v13 = vpop.f32.mrf.mxu1 }
 0x1be   :  { %14029 = vst [vmem:[#allocation74_spill] sm:$0xff] %v10290_v61  ;;  %v2224_v0 = vmul.f32 %v1865_v47, %v731_v29  ;;  %8011 = vpow2.f32 %v3815_v40  ;;  %v3394_v49 = vmax.f32 %v3392_v27, %v3393_v10  ;;  %v1869_v30 = vrot.slane %v733_v46, %v9057_v19  ;;  %v10308_v61 = vpop.f32.mrf.mxu0 }
 0x1bf   :  { %14030 = vst [vmem:[#allocation75_spill] sm:$0xff] %v10296_v2  ;;  %14031 = vst [vmem:[#allocation76_spill] sm:$0xff] %v10301_v14  ;;  %v3409_v44 = vrot.slane %v3408_v4, 2  ;;  %v3903_v1 = vrot.slane %v3902_v25, 1  ;;  %v3912_v48 = vadd.f32 %v10277_v54, %v3911_v63  ;;  %v2774_v23 = vmax.f32 %v2772_v53, %v2773_v12 }
 0x1c0   :  { %v2453_v60 = vsel %vm2302_vm1, %v2224_v0, 0.0  ;;  %v3907_v47 = vrot.slane %v3906_v38, 2  ;;  %v739_v24 = vadd.f32 %v10164_v34, %v9052_v17  ;;  %v3419_v10 = vrot.slane %v10303_v28, 4 }
 0x1c1   :  { %2454 = vadd.xlane.f32.xlu0 %v2453_v60  ;;  %v2783_v27 = vrot.slane %v10305_v11, 4  ;;  %8013 = vrcp.f32 %v3898_v15  ;;  %v3825_v29 = vmul.f32 1.442695, %v3576_v9  ;;  %v10322_v12 = vadd.f32 %v10187_v57, %v9657_v50  ;;  %v10329_v60 = vpop.f32.mrf.mxu0  ;;  %v10335_v57 = vpop.xlane.xlu1 %2349 }
 0x1c2   :  { %v10318_v40 = vpop.eup %8005  ;;  %v735_v53 = vadd.f32 %v10140_v56, %v9061_v21  ;;  %v3572_v63 = vsub.f32 %v10202_v55, %v3394_v49  ;;  %v3410_v46 = vmax.f32 %v3408_v4, %v3409_v44  ;;  %v3420_v34 = vmax.f32 %v10303_v28, %v3419_v10 }
 0x1c3   :  { %14032 = vst [vmem:[#allocation77_spill] sm:$0xff] %v10318_v40  ;;  %14033 = vst [vmem:[#allocation78_spill] sm:$0xff] %v10322_v12  ;;  %v2784_v0 = vmax.f32 %v10305_v11, %v2783_v27  ;;  %v3904_v2 = vadd.f32 %v3903_v1, %v3902_v25  ;;  %v3913_v14 = vrot.slane %v3912_v48, 2  ;;  %v2775_v15 = vrot.slane %v2774_v23, 1  ;;  %v10337_v12 = vpop.f32.mrf.mxu1  ;;  %v10345_v54 = vpop.f32.mrf.mxu0 }
 0x1c4   :  { %v10333_v9 = vadd.f32 %v10216_v6, %v9657_v50  ;;  %v3908_v56 = vadd.f32 %v3907_v47, %v3906_v38  ;;  %v3917_v55 = vrot.slane %v10318_v40, 4  ;;  %v1873_v4 = vrot.slane %v739_v24, %v9057_v19 }
 0x1c5   :  { %v2785_v49 = vrot.slane %v2784_v0, 2  ;;  %8015 = vpow2.f32 %v3825_v29  ;;  %v741_v25 = vadd.f32 %v10184_v62, %v9061_v21  ;;  %v743_v44 = vadd.f32 %v10210_v52, %v9052_v17  ;;  %v10349_v29 = vpop.xlane.xlu0 %2358  ;;  %v10351_v33 = vpop.f32.mrf.mxu1 }
 0x1c6   :  { %14034 = vst [vmem:[#allocation79_spill] sm:$0xff] %v10333_v9  ;;  %v2225_v1 = vmul.f32 %v1869_v30, %v735_v53  ;;  %v3817_v6 = vmul.f32 1.442695, %v3572_v63  ;;  %v3411_v10 = vrot.slane %v3410_v46, 1  ;;  %v3421_v27 = vrot.slane %v3420_v34, 2 }
 0x1c7   :  { %v2786_v9 = vmax.f32 %v2784_v0, %v2785_v49  ;;  %v3914_v38 = vadd.f32 %v3913_v14, %v3912_v48  ;;  %v2776_v47 = vmax.f32 %v2774_v23, %v2775_v15  ;;  %v2777_v24 = vrot.slane %v10335_v57, 4  ;;  %v10362_v15 = vpop.xlane.xlu1 %2673 }
 0x1c8   :  { %v2456_v43 = vsel %vm2302_vm1, %v2225_v1, 0.0  ;;  %v10353_v62 = vpop.eup %8007  ;;  %8017 = vrcp.f32 %v3904_v2  ;;  %v3909_v52 = vrot.slane %v3908_v56, 1  ;;  %v3918_v30 = vadd.f32 %v10318_v40, %v3917_v55  ;;  %v10365_v55 = vpop.f32.mrf.mxu0 }
 0x1c9   :  { %14035 = vst [vmem:[#allocation80_spill] sm:$0xff] %v10353_v62  ;;  %v2787_v53 = vrot.slane %v2786_v9, 1  ;;  %2457 = vadd.xlane.f32.xlu0 %v2456_v43  ;;  %v10356_v63 = vpop.eup %8009  ;;  %v1877_v14 = vrot.slane %v743_v44, %v9057_v19  ;;  %v2778_v48 = vmax.f32 %v10335_v57, %v2777_v24  ;;  %v745_v23 = vadd.f32 %v10231_v59, %v9061_v21  ;;  %v10371_v40 = vpop.f32.mrf.mxu1 }
 0x1ca   :  { %14036 = vst [vmem:[#allocation81_spill] sm:$0xff] %v10356_v63  ;;  %v2226_v0 = vmul.f32 %v1873_v4, %v741_v25  ;;  %v3412_v49 = vmax.f32 %v3410_v46, %v3411_v10  ;;  %v3422_v1 = vmax.f32 %v3420_v34, %v3421_v27  ;;  %v2795_v62 = vrot.slane %v10349_v29, 4 }
 0x1cb   :  { %v2788_v2 = vmax.f32 %v2786_v9, %v2787_v53  ;;  %v10367_v43 = vpop.eup %8011  ;;  %v3915_v63 = vrot.slane %v3914_v38, 1  ;;  %8019 = vpow2.f32 %v3817_v6  ;;  %v3469_v44 = vsub.f32 %v10229_v22, %v2776_v47 }
 0x1cc   :  { %14037 = vst [vmem:[#allocation82_spill] sm:$0xff] %v10367_v43  ;;  %v2459_v24 = vsel %vm2302_vm1, %v2226_v0, 0.0  ;;  %v2779_v4 = vrot.slane %v2778_v48, 2  ;;  %v749_v46 = vadd.f32 %v10260_v31, %v9052_v17  ;;  %v2796_v34 = vmax.f32 %v10349_v29, %v2795_v62 }
 0x1cd   :  { %v3471_v59 = vsub.f32 %v10305_v11, %v2788_v2  ;;  %2460 = vadd.xlane.f32.xlu0 %v2459_v24  ;;  %v3910_v9 = vadd.f32 %v3909_v52, %v3908_v56  ;;  %v3919_v25 = vrot.slane %v3918_v30, 2  ;;  %v3425_v10 = vrot.slane %v10362_v15, 4  ;;  %v10381_v11 = vpop.xlane.xlu0 %2361  ;;  %v10383_v2 = vpop.f32.mrf.mxu0 }
 0x1ce   :  { %v2227_v6 = vmul.f32 %v1877_v14, %v745_v23  ;;  %v10378_v27 = vpop.eup %8013  ;;  %v3575_v22 = vsub.f32 %v10252_v36, %v3412_v49  ;;  %v3423_v47 = vrot.slane %v3422_v1, 1  ;;  %v2797_v0 = vrot.slane %v2796_v34, 2  ;;  %v10390_v52 = vpop.xlane.xlu1 %2676 }
 0x1cf   :  { %14038 = vst [vmem:[#allocation83_spill] sm:$0xff] %v10378_v27  ;;  %v3615_v53 = vmul.f32 1.442695, %v3471_v59  ;;  %v3916_v31 = vadd.f32 %v3915_v63, %v3914_v38  ;;  %v3611_v24 = vmul.f32 1.442695, %v3469_v44  ;;  %v10387_v56 = vadd.f32 %v10240_v45, %v9657_v50  ;;  %v10392_v14 = vpop.f32.mrf.mxu1 }
 0x1d0   :  { %v2462_v62 = vsel %vm2302_vm1, %v2227_v6, 0.0  ;;  %v2780_v36 = vmax.f32 %v2778_v48, %v2779_v4  ;;  %v1881_v23 = vrot.slane %v749_v46, %v9057_v19  ;;  %v2798_v49 = vmax.f32 %v2796_v34, %v2797_v0  ;;  %v10403_v4 = vpop.f32.mrf.mxu0 }
 0x1d1   :  { %14039 = vst [vmem:[#allocation84_spill] sm:$0xff] %v10387_v56  ;;  %v751_v59 = vadd.f32 %v10285_v20, %v9061_v21  ;;  %2463 = vadd.xlane.f32.xlu0 %v2462_v62  ;;  %v10397_v38 = vadd.f32 %v3919_v25, %v3918_v30  ;;  %8021 = vpow2.f32 %v3615_v53  ;;  %v3426_v45 = vmax.f32 %v10362_v15, %v3425_v10  ;;  %v10412_v34 = vpop.f32.mrf.mxu1 }
 0x1d2   :  { %v2801_v63 = vrot.slane %v10381_v11, 4  ;;  %v10401_v44 = vpop.eup %8015  ;;  %8023 = vrcp.f32 %v3910_v9  ;;  %v3823_v6 = vmul.f32 1.442695, %v3575_v22  ;;  %v3424_v56 = vmax.f32 %v3422_v1, %v3423_v47  ;;  %v10414_v1 = vpop.xlane.xlu0 %2364 }
 0x1d3   :  { %14040 = vst [vmem:[#allocation85_spill] sm:$0xff] %v10401_v44  ;;  %v2799_v48 = vrot.slane %v2798_v49, 1  ;;  %8025 = vpow2.f32 %v3611_v24  ;;  %v10407_v20 = vadd.f32 %v10267_v26, %v9657_v50  ;;  %v753_v30 = vadd.f32 %v10308_v61, %v9052_v17  ;;  %v10423_v0 = vpop.xlane.xlu1 %2355 }
 0x1d4   :  { %v2802_v46 = vmax.f32 %v10381_v11, %v2801_v63  ;;  %8027 = vrcp.f32 %v3916_v31  ;;  %v2781_v25 = vrot.slane %v2780_v36, 1  ;;  %v2228_v10 = vmul.f32 %v1881_v23, %v751_v59  ;;  %v768_v23 = vpop.f32.mrf.mxu0 }
 0x1d5   :  { %14041 = vst [vmem:[#allocation86_spill] sm:$0xff] %v10407_v20  ;;  %v2800_v9 = vmax.f32 %v2798_v49, %v2799_v48  ;;  %v10416_v22 = vpop.eup %8017  ;;  %v10421_v26 = vadd.f32 %v10288_v18, %v9657_v50  ;;  %v3427_v53 = vrot.slane %v3426_v45, 2  ;;  %8029 = vpow2.f32 %v3823_v6  ;;  %v10434_v48 = vpop.f32.mrf.mxu1 }
 0x1d6   :  { %14042 = vst [vmem:[#allocation87_spill] sm:$0xff] %v10416_v22  ;;  %v2803_v61 = vrot.slane %v2802_v46, 2  ;;  %v3577_v31 = vsub.f32 %v10303_v28, %v3424_v56  ;;  %v2465_v62 = vsel %vm2302_vm1, %v2228_v10, 0.0  ;;  %v10430_v49 = vadd.f32 %v10312_v13, %v9657_v50 }
 0x1d7   :  { %14043 = vst [vmem:[#allocation88_spill] sm:$0xff] %v10421_v26  ;;  %v3473_v24 = vsub.f32 %v10349_v29, %v2800_v9  ;;  %v1885_v59 = vrot.slane %v753_v30, %v9057_v19  ;;  %v3431_v18 = vrot.slane %v10390_v52, 4  ;;  %2466 = vadd.xlane.f32.xlu0 %v2465_v62  ;;  %v2782_v28 = vmax.f32 %v2780_v36, %v2781_v25  ;;  %v10455_v25 = vpop.xlane.xlu0 %2367 }
 0x1d8   :  { %14044 = vst [vmem:[#allocation89_spill] sm:$0xff] %v10430_v49  ;;  %v2804_v63 = vmax.f32 %v2802_v46, %v2803_v61  ;;  %v10436_v6 = vpop.eup %8019  ;;  %v755_v29 = vadd.f32 %v10329_v60, %v9061_v21  ;;  %v2789_v9 = vrot.slane %v10423_v0, 4  ;;  %v10443_v13 = vadd.f32 %v10337_v12, %v9657_v50 }
 0x1d9   :  { %14045 = vst [vmem:[#allocation90_spill] sm:$0xff] %v10436_v6  ;;  %v3619_v56 = vmul.f32 1.442695, %v3473_v24  ;;  %v3428_v30 = vmax.f32 %v3426_v45, %v3427_v53  ;;  %v2807_v46 = vrot.slane %v10414_v1, 4  ;;  %v10446_v61 = vmul.f32 1.442695, %v3577_v31  ;;  %v10457_v24 = vpop.f32.mrf.mxu0  ;;  %v10461_v31 = vpop.f32.mrf.mxu1 }
 0x1da   :  { %14046 = vst [vmem:[#allocation91_spill] sm:$0xff] %v10443_v13  ;;  %v2805_v10 = vrot.slane %v2804_v63, 1  ;;  %v10450_v62 = vadd.f32 %v10351_v33, %v9657_v50  ;;  %v759_v36 = vadd.f32 %v10345_v54, %v9052_v17  ;;  %v2790_v60 = vmax.f32 %v10423_v0, %v2789_v9 }
 0x1db   :  { %8031 = vpow2.f32 %v3619_v56  ;;  %v3432_v12 = vmax.f32 %v10390_v52, %v3431_v18  ;;  %v2808_v53 = vmax.f32 %v10414_v1, %v2807_v46  ;;  %v3470_v33 = vsub.f32 %v10335_v57, %v2782_v28  ;;  %v772_v28 = vpop.f32.mrf.mxu0 }
 0x1dc   :  { %14047 = vst [vmem:[#allocation92_spill] sm:$0xff] %v10450_v62  ;;  %v2806_v45 = vmax.f32 %v2804_v63, %v2805_v10  ;;  %v2791_v47 = vrot.slane %v2790_v60, 2  ;;  %v763_v54 = vadd.f32 %v10383_v2, %v9052_v17  ;;  %v2229_v13 = vmul.f32 %v1885_v59, %v755_v29 }
 0x1dd   :  { %v3429_v9 = vrot.slane %v3428_v30, 1  ;;  %v2809_v62 = vrot.slane %v2808_v53, 2  ;;  %v2813_v56 = vrot.slane %v10455_v25, 4  ;;  %v1889_v18 = vrot.slane %v759_v36, %v9057_v19  ;;  %v774_v43 = vpop.f32.mrf.mxu0 }
 0x1de   :  { %v3474_v26 = vsub.f32 %v10381_v11, %v2806_v45  ;;  %v10468_v49 = vpop.eup %8021  ;;  %v2792_v63 = vmax.f32 %v2790_v60, %v2791_v47  ;;  %v761_v10 = vadd.f32 %v10365_v55, %v9061_v21  ;;  %v2468_v57 = vsel %vm2302_vm1, %v2229_v13, 0.0  ;;  %v10478_v45 = vpop.f32.mrf.mxu1 }
 0x1df   :  { %v10474_v46 = vpop.eup %8023  ;;  %v3935_v2 = vrot.slane %v10468_v49, 4  ;;  %v2810_v11 = vmax.f32 %v2808_v53, %v2809_v62  ;;  %2469 = vadd.xlane.f32.xlu0 %v2468_v57  ;;  %v2814_v29 = vmax.f32 %v10455_v25, %v2813_v56  ;;  %v3613_v47 = vmul.f32 1.442695, %v3470_v33  ;;  %v10483_v13 = vpop.xlane.xlu0 %2370 }
 0x1e0   :  { %14048 = vst [vmem:[#allocation93_spill] sm:$0xff] %v10474_v46  ;;  %v3621_v59 = vmul.f32 1.442695, %v3474_v26  ;;  %v10480_v20 = vpop.eup %8025  ;;  %v3433_v36 = vrot.slane %v3432_v12, 2  ;;  %v2793_v60 = vrot.slane %v2792_v63, 1  ;;  %v1893_v55 = vrot.slane %v763_v54, %v9057_v19  ;;  %v10493_v7 = vpop.f32.mrf.mxu1 }
 0x1e1   :  { %14049 = vst [vmem:[#allocation94_spill] sm:$0xff] %v10480_v20  ;;  %v10485_v44 = vpop.eup %8027  ;;  %v3936_v6 = vadd.f32 %v10468_v49, %v3935_v2  ;;  %v2811_v26 = vrot.slane %v2810_v11, 1  ;;  %v2815_v62 = vrot.slane %v2814_v29, 2  ;;  %v765_v56 = vadd.f32 %v10403_v4, %v9061_v21 }
 0x1e2   :  { %14050 = vst [vmem:[#allocation95_spill] sm:$0xff] %v10485_v44  ;;  %8033 = vpow2.f32 %v3621_v59  ;;  %v2794_v53 = vmax.f32 %v2792_v63, %v2793_v60  ;;  %v769_v57 = vadd.f32 %v768_v23, %v9052_v17  ;;  %v2230_v33 = vmul.f32 %v1889_v18, %v761_v10  ;;  %v10491_v46 = vpop.eup %8029 }
 0x1e3   :  { %14051 = vst [vmem:[#allocation96_spill] sm:$0xff] %v10491_v46  ;;  %v3937_v54 = vrot.slane %v3936_v6, 2  ;;  %v2812_v22 = vmax.f32 %v2810_v11, %v2811_v26  ;;  %v2816_v27 = vmax.f32 %v2814_v29, %v2815_v62  ;;  %v2819_v2 = vrot.slane %v10483_v13, 4  ;;  %v10503_v62 = vpop.f32.mrf.mxu0 }
 0x1e4   :  { %v3923_v59 = vrot.slane %v10480_v20, 4  ;;  %v10497_v44 = vmax.f32 %v3428_v30, %v3429_v9  ;;  %v3472_v63 = vsub.f32 %v10423_v0, %v2794_v53  ;;  %v2471_v4 = vsel %vm2302_vm1, %v2230_v33, 0.0  ;;  %v10506_v53 = vpop.f32.mrf.mxu1 }
 0x1e5   :  { %v3938_v23 = vadd.f32 %v3937_v54, %v3936_v6  ;;  %v3434_v18 = vmax.f32 %v3432_v12, %v3433_v36  ;;  %v3475_v10 = vsub.f32 %v10414_v1, %v2812_v22  ;;  %v2817_v60 = vrot.slane %v2816_v27, 1  ;;  %2472 = vadd.xlane.f32.xlu0 %v2471_v4  ;;  %v10508_v6 = vpop.xlane.xlu0 %2373 }
 0x1e6   :  { %8035 = vpow2.f32 %v3613_v47  ;;  %v3617_v11 = vmul.f32 1.442695, %v3472_v63  ;;  %v2820_v29 = vmax.f32 %v10483_v13, %v2819_v2  ;;  %v2231_v26 = vmul.f32 %v1893_v55, %v765_v56  ;;  %v10523_v2 = vpop.f32.mrf.mxu0  ;;  %v10529_v63 = vpop.f32.mrf.mxu1 }
 0x1e7   :  { %v3939_v46 = vrot.slane %v3938_v23, 1  ;;  %v3623_v30 = vmul.f32 1.442695, %v3475_v10  ;;  %v2818_v9 = vmax.f32 %v2816_v27, %v2817_v60  ;;  %v1897_v0 = vrot.slane %v769_v57, %v9057_v19  ;;  %v10532_v10 = vpop.xlane.xlu1 %2679 }
 0x1e8   :  { %v10510_v12 = vpop.eup %8031  ;;  %8037 = vpow2.f32 %v3617_v11  ;;  %v2821_v1 = vrot.slane %v2820_v29, 2  ;;  %v771_v22 = vadd.f32 %v10457_v24, %v9061_v21  ;;  %v2474_v47 = vsel %vm2302_vm1, %v2231_v26, 0.0 }
 0x1e9   :  { %v3940_v36 = vadd.f32 %v3939_v46, %v3938_v23  ;;  %v3947_v55 = vrot.slane %v10510_v12, 4  ;;  %8039 = vpow2.f32 %v3623_v30  ;;  %v773_v27 = vadd.f32 %v772_v28, %v9052_v17  ;;  %2475 = vadd.xlane.f32.xlu1 %v2474_v47  ;;  %v10536_v26 = vpop.xlane.xlu0 %2376 }
 0x1ea   :  { %v10519_v56 = vadd.f32 %v10371_v40, %v9657_v50  ;;  %v3476_v57 = vsub.f32 %v10455_v25, %v2818_v9  ;;  %v2822_v33 = vmax.f32 %v2820_v29, %v2821_v1  ;;  %v2825_v54 = vrot.slane %v10508_v6, 4  ;;  %v10541_v1 = vpop.f32.mrf.mxu0 }
 0x1eb   :  { %v3924_v24 = vadd.f32 %v10480_v20, %v3923_v59  ;;  %8041 = vrcp.f32 %v3940_v36  ;;  %v3578_v46 = vsub.f32 %v10362_v15, %v10497_v44  ;;  %v3948_v28 = vadd.f32 %v10510_v12, %v3947_v55  ;;  %v10544_v55 = vpop.f32.mrf.mxu1 }
 0x1ec   :  { %14052 = vst [vmem:[#allocation97_spill] sm:$0xff] %v10519_v56  ;;  %v3435_v4 = vrot.slane %v3434_v18, 1  ;;  %v3625_v40 = vmul.f32 1.442695, %v3476_v57  ;;  %v2823_v23 = vrot.slane %v2822_v33, 1  ;;  %v2826_v25 = vmax.f32 %v10508_v6, %v2825_v54  ;;  %v10568_v56 = vpop.xlane.xlu1 %2379 }
 0x1ed   :  { %v3949_v60 = vrot.slane %v3948_v28, 2  ;;  %v1901_v11 = vrot.slane %v773_v27, %v9057_v19  ;;  %v2232_v29 = vmul.f32 %v1897_v0, %v771_v22  ;;  %v3437_v59 = vrot.slane %v10532_v10, 4 }
 0x1ee   :  { %8043 = vpow2.f32 %v3625_v40  ;;  %v2824_v44 = vmax.f32 %v2822_v33, %v2823_v23  ;;  %v2827_v30 = vrot.slane %v2826_v25, 2  ;;  %v775_v9 = vadd.f32 %v774_v43, %v9061_v21 }
 0x1ef   :  { %v10538_v15 = vpop.eup %8033  ;;  %v3950_v47 = vadd.f32 %v3949_v60, %v3948_v28  ;;  %v2477_v0 = vsel %vm2302_vm1, %v2232_v29, 0.0  ;;  %v3438_v22 = vmax.f32 %v10532_v10, %v3437_v59  ;;  %v3436_v27 = vmax.f32 %v3434_v18, %v3435_v4  ;;  %v10557_v4 = vpop.f32.mrf.mxu0 }
 0x1f0   :  { %v3953_v36 = vrot.slane %v10538_v15, 4  ;;  %v3477_v57 = vsub.f32 %v10483_v13, %v2824_v44  ;;  %v2828_v54 = vmax.f32 %v2826_v25, %v2827_v30  ;;  %2478 = vadd.xlane.f32.xlu1 %v2477_v0  ;;  %v2831_v33 = vrot.slane %v10536_v26, 4 }
 0x1f1   :  { %v3925_v40 = vrot.slane %v3924_v24, 2  ;;  %8045 = vpow2.f32 %v10446_v61  ;;  %v3951_v43 = vrot.slane %v3950_v47, 1  ;;  %v10554_v23 = vadd.f32 %v10392_v14, %v9657_v50  ;;  %v10565_v61 = vpop.f32.mrf.mxu1 }
 0x1f2   :  { %v3954_v28 = vadd.f32 %v10538_v15, %v3953_v36  ;;  %v3627_v60 = vmul.f32 1.442695, %v3477_v57  ;;  %v2829_v29 = vrot.slane %v2828_v54, 1  ;;  %v2832_v18 = vmax.f32 %v10536_v26, %v2831_v33 }
 0x1f3   :  { %14053 = vst [vmem:[#allocation98_spill] sm:$0xff] %v10554_v23  ;;  %v10559_v13 = vpop.eup %8035  ;;  %v3952_v25 = vadd.f32 %v3951_v43, %v3950_v47  ;;  %v10563_v59 = vadd.f32 %v10412_v34, %v9657_v50  ;;  %v3439_v44 = vrot.slane %v3438_v22, 2  ;;  %v2233_v30 = vmul.f32 %v1901_v11, %v775_v9  ;;  %v10581_v9 = vpop.f32.mrf.mxu0 }
 0x1f4   :  { %14054 = vst [vmem:[#allocation99_spill] sm:$0xff] %v10559_v13  ;;  %v3829_v36 = vmul.f32 1.442695, %v3578_v46  ;;  %v3579_v14 = vsub.f32 %v10390_v52, %v3436_v27  ;;  %v2830_v0 = vmax.f32 %v2828_v54, %v2829_v29  ;;  %v2833_v57 = vrot.slane %v2832_v18, 2  ;;  %v10584_v54 = vpop.f32.mrf.mxu1 }
 0x1f5   :  { %14055 = vst [vmem:[#allocation100_spill] sm:$0xff] %v10563_v59  ;;  %v10570_v33 = vpop.eup %8037  ;;  %v10572_v23 = vadd.f32 %v3925_v40, %v3924_v24  ;;  %v3955_v47 = vrot.slane %v3954_v28, 2  ;;  %v779_v34 = vadd.f32 %v10503_v62, %v9052_v17  ;;  %v2480_v43 = vsel %vm2302_vm1, %v2233_v30, 0.0  ;;  %v10592_v20 = vpop.f32.mrf.mxu0 }
 0x1f6   :  { %v10577_v59 = vpop.eup %8039  ;;  %v3941_v46 = vrot.slane %v10570_v33, 4  ;;  %8047 = vpow2.f32 %v3627_v60  ;;  %v3478_v52 = vsub.f32 %v10508_v6, %v2830_v0  ;;  %v2834_v11 = vmax.f32 %v2832_v18, %v2833_v57  ;;  %2481 = vadd.xlane.f32.xlu1 %v2480_v43 }
 0x1f7   :  { %8049 = vrcp.f32 %v3952_v25  ;;  %v3959_v24 = vrot.slane %v10577_v59, 4  ;;  %v3440_v27 = vmax.f32 %v3438_v22, %v3439_v44  ;;  %v2837_v62 = vrot.slane %v10568_v56, 4 }
 0x1f8   :  { %v8042_v40 = vpop.eup %8041  ;;  %8051 = vpow2.f32 %v3829_v36  ;;  %v3831_v29 = vmul.f32 1.442695, %v3579_v14  ;;  %v3942_v30 = vadd.f32 %v10570_v33, %v3941_v46  ;;  %v2835_v60 = vrot.slane %v2834_v11, 1 }
 0x1f9   :  { %v4751_v6 = vmul.f32 %v8042_v40, %v10468_v49  ;;  %v3929_v18 = vrot.slane %v10559_v13, 4  ;;  %v3956_v0 = vadd.f32 %v3955_v47, %v3954_v28  ;;  %v3960_v25 = vadd.f32 %v10577_v59, %v3959_v24  ;;  %v10600_v28 = vpop.f32.mrf.mxu1 }
 0x1fa   :  { %v3943_v57 = vrot.slane %v3942_v30, 2  ;;  %v3629_v43 = vmul.f32 1.442695, %v3478_v52  ;;  %v2836_v22 = vmax.f32 %v2834_v11, %v2835_v60  ;;  %v2838_v44 = vmax.f32 %v10568_v56, %v2837_v62 }
 0x1fb   :  { %v10594_v16 = vpop.eup %8043  ;;  %v4879_v36 = vmul.f32 %v4751_v6, %v9790_v58  ;;  %v1905_v14 = vrot.slane %v779_v34, %v9057_v19  ;;  %v3441_v46 = vrot.slane %v3440_v27, 1  ;;  %v781_v49 = vadd.f32 %v10523_v2, %v9061_v21 }
 0x1fc   :  { %v3944_v47 = vadd.f32 %v3943_v57, %v3942_v30  ;;  %v3965_v52 = vrot.slane %v10594_v16, 4  ;;  %v3479_v11 = vsub.f32 %v10536_v26, %v2836_v22  ;;  %v2839_v24 = vrot.slane %v2838_v44, 2  ;;  %v10617_v26 = vpop.f32.mrf.mxu0  ;;  %v10622_v57 = vpop.f32.mrf.mxu1 }
 0x1fd   :  { %8053 = vpow2.f32 %v3831_v29  ;;  %v3957_v62 = vrot.slane %v3956_v0, 1  ;;  %v3961_v40 = vrot.slane %v3960_v25, 2  ;;  %v10606_v58 = vadd.f32 %v10434_v48, %v9657_v50 }
 0x1fe   :  { %v10608_v34 = vpop.eup %8045  ;;  %v10611_v60 = vadd.f32 %v10559_v13, %v3929_v18  ;;  %v10615_v2 = vadd.f32 %v10461_v31, %v9657_v50  ;;  %8055 = vpow2.f32 %v3629_v43  ;;  %v3631_v30 = vmul.f32 1.442695, %v3479_v11  ;;  %v10626_v13 = vpop.xlane.xlu1 %2382 }
 0x1ff   :  { %14056 = vst [vmem:[#allocation101_spill] sm:$0xff] %v10606_v58  ;;  %14057 = vst [vmem:[#allocation102_spill] sm:$0xff] %v10608_v34  ;;  %v5103_v29 = vsel %vm2302_vm1, %v4879_v36, 0.0  ;;  %v783_v6 = vadd.f32 %v10541_v1, %v9052_v17  ;;  %v2840_v48 = vmax.f32 %v2838_v44, %v2839_v24  ;;  %v2234_v22 = vmul.f32 %v1905_v14, %v781_v49 }
 0x200   :  { %14058 = vst [vmem:[#allocation103_spill] sm:$0xff] %v10615_v2  ;;  %v3945_v58 = vrot.slane %v3944_v47, 1  ;;  %v3966_v18 = vadd.f32 %v10594_v16, %v3965_v52  ;;  %v3442_v34 = vmax.f32 %v3440_v27, %v3441_v46  ;;  %8057 = vpow2.f32 %v3631_v30  ;;  %v7822_v52 = vpop.f32.mrf.mxu1 }
 0x201   :  { %v3958_v31 = vadd.f32 %v3957_v62, %v3956_v0  ;;  %v3962_v2 = vadd.f32 %v3961_v40, %v3960_v25  ;;  %v2841_v43 = vrot.slane %v2840_v48, 1  ;;  %v2483_v11 = vsel %vm2302_vm1, %v2234_v22, 0.0  ;;  %v10640_v0 = vpop.f32.mrf.mxu0 }
 0x202   :  { %v5104_v36 = vrot.slane %v5103_v29, 4  ;;  %v10630_v1 = vadd.f32 %v10478_v45, %v9657_v50  ;;  %v10634_v44 = vadd.f32 %v10493_v7, %v9657_v50  ;;  %v10638_v27 = vadd.f32 %v10506_v53, %v9657_v50  ;;  %2484 = vadd.xlane.f32.xlu1 %v2483_v11 }
 0x203   :  { %v10642_v25 = vpop.eup %8047  ;;  %v1909_v46 = vrot.slane %v783_v6, %v9057_v19  ;;  %v2842_v49 = vmax.f32 %v2840_v48, %v2841_v43  ;;  %v785_v45 = vadd.f32 %v10557_v4, %v9061_v21  ;;  %v3946_v24 = vadd.f32 %v3945_v58, %v3944_v47  ;;  %v10661_v58 = vpop.f32.mrf.mxu0 }
 0x204   :  { %14059 = vst [vmem:[#allocation104_spill] sm:$0xff] %v10630_v1  ;;  %14060 = vst [vmem:[#allocation105_spill] sm:$0xff] %v10634_v44  ;;  %v8050_v7 = vpop.eup %8049  ;;  %v3967_v62 = vrot.slane %v3966_v18, 2  ;;  %v3580_v53 = vsub.f32 %v10532_v10, %v3442_v34  ;;  %v2843_v40 = vrot.slane %v10626_v13, 4  ;;  %8059 = vrcp.f32 %v3958_v31  ;;  %v1426_v43 = vpop.f32.mrf.mxu1 }
 0x205   :  { %14061 = vst [vmem:[#allocation106_spill] sm:$0xff] %v10638_v27  ;;  %v10650_v30 = vpop.eup %8051  ;;  %v3963_v22 = vrot.slane %v3962_v2, 1  ;;  %v10654_v11 = vadd.f32 %v10529_v63, %v9657_v50  ;;  %v3480_v6 = vsub.f32 %v10568_v56, %v2842_v49  ;;  %v5105_v48 = vadd.f32 %v5104_v36, %v5103_v29  ;;  %v10672_v36 = vpop.xlane.xlu1 %2385 }
 0x206   :  { %14062 = vst [vmem:[#allocation107_spill] sm:$0xff] %v10650_v30  ;;  %v3971_v4 = vrot.slane %v10642_v25, 4  ;;  %v789_v47 = vadd.f32 %v10581_v9, %v9052_v17  ;;  %v2844_v10 = vmax.f32 %v10626_v13, %v2843_v40  ;;  %v4753_v34 = vmul.f32 %v8050_v7, %v10510_v12 }
 0x207   :  { %14063 = vst [vmem:[#allocation108_spill] sm:$0xff] %v10654_v11  ;;  %v10666_v31 = vadd.f32 %v10544_v55, %v9657_v50  ;;  %v3633_v63 = vmul.f32 1.442695, %v3480_v6  ;;  %v2235_v14 = vmul.f32 %v1909_v46, %v785_v45  ;;  %8061 = vrcp.f32 %v3946_v24  ;;  %v10683_v45 = vpop.f32.mrf.mxu0 }
 0x208   :  { %v3968_v56 = vadd.f32 %v3967_v62, %v3966_v18  ;;  %v10670_v29 = vadd.f32 %v10565_v61, %v9657_v50  ;;  %v3833_v9 = vmul.f32 1.442695, %v3580_v53  ;;  %v3964_v49 = vadd.f32 %v3963_v22, %v3962_v2  ;;  %v7825_v53 = vpop.f32.mrf.mxu1 }
 0x209   :  { %14064 = vst [vmem:[#allocation109_spill] sm:$0xff] %v10666_v31  ;;  %v10676_v12 = vadd.f32 %v10584_v54, %v9657_v50  ;;  %8063 = vpow2.f32 %v3633_v63  ;;  %v2845_v55 = vrot.slane %v2844_v10, 2  ;;  %v5106_v40 = vrot.slane %v5105_v48, 2 }
 0x20a   :  { %14065 = vst [vmem:[#allocation110_spill] sm:$0xff] %v10670_v29  ;;  %v10678_v7 = vpop.eup %8053  ;;  %v3972_v46 = vadd.f32 %v10642_v25, %v3971_v4  ;;  %v1913_v18 = vrot.slane %v789_v47, %v9057_v19  ;;  %v2486_v61 = vsel %vm2302_vm1, %v2235_v14, 0.0  ;;  %v4881_v2 = vmul.f32 %v4753_v34, %v9785_v35 }
 0x20b   :  { %14066 = vst [vmem:[#allocation111_spill] sm:$0xff] %v10676_v12  ;;  %14067 = vst [vmem:[#allocation112_spill] sm:$0xff] %v10678_v7  ;;  %v10685_v24 = vpop.eup %8055  ;;  %v2846_v62 = vmax.f32 %v2844_v10, %v2845_v55  ;;  %v791_v54 = vadd.f32 %v10592_v20, %v9061_v21  ;;  %2487 = vadd.xlane.f32.xlu1 %v2486_v61  ;;  %v2849_v22 = vrot.slane %v10672_v36, 4  ;;  %v3969_v6 = vrot.slane %v3968_v56, 1  ;;  %v10709_v55 = vpop.xlane.xlu1 %2388 }
 0x20c   :  { %8065 = vpow2.f32 %v3833_v9  ;;  %v10693_v4 = vadd.f32 %v10600_v28, %v9657_v50  ;;  %v10697_v14 = vadd.f32 %v10622_v57, %v9657_v50  ;;  %v10702_v35 = vadd.f32 %v7822_v52, %v9657_v50  ;;  %v802_v57 = vpop.f32.mrf.mxu0 }
 0x20d   :  { %v10699_v47 = vpop.eup %8057  ;;  %8067 = vrcp.f32 %v3964_v49  ;;  %v2847_v20 = vrot.slane %v2846_v62, 1  ;;  %v2850_v10 = vmax.f32 %v10672_v36, %v2849_v22  ;;  %v10705_v34 = vadd.f32 %v5106_v40, %v5105_v48 }
 0x20e   :  { %14068 = vst [vmem:[#allocation113_spill] sm:$0xff] %v10693_v4  ;;  %14069 = vst [vmem:[#allocation114_spill] sm:$0xff] %v10697_v14  ;;  %v3973_v63 = vrot.slane %v3972_v46, 2  ;;  %v3977_v9 = vrot.slane %v10685_v24, 4  ;;  %v3983_v28 = vrot.slane %v10699_v47, 4  ;;  %v5117_v61 = vsel %vm2302_vm1, %v4881_v2, 0.0  ;;  %v10712_v14 = vpop.f32.mrf.mxu1 }
 0x20f   :  { %14070 = vst [vmem:[#allocation115_spill] sm:$0xff] %v10702_v35  ;;  %14071 = vst [vmem:[#allocation116_spill] sm:$0xff] %v10705_v34  ;;  %v2848_v4 = vmax.f32 %v2846_v62, %v2847_v20  ;;  %v2851_v49 = vrot.slane %v2850_v10, 2  ;;  %v2236_v52 = vmul.f32 %v1913_v18, %v791_v54  ;;  %v3970_v35 = vadd.f32 %v3969_v6, %v3968_v56 }
 0x210   :  { %v3984_v22 = vadd.f32 %v10699_v47, %v3983_v28  ;;  %v10716_v48 = vadd.f32 %v1426_v43, %v9657_v50  ;;  %v793_v40 = vadd.f32 %v10617_v26, %v9052_v17  ;;  %v10722_v11 = vadd.f32 %v7825_v53, %v9657_v50  ;;  %v804_v43 = vpop.f32.mrf.mxu0 }
 0x211   :  { %v3481_v29 = vsub.f32 %v10626_v13, %v2848_v4  ;;  %v2852_v2 = vmax.f32 %v2850_v10, %v2851_v49  ;;  %v2489_v62 = vsel %vm2302_vm1, %v2236_v52, 0.0  ;;  %v8060_v20 = vpop.eup %8059  ;;  %v5118_v12 = vrot.slane %v5117_v61, 4  ;;  %v10728_v13 = vpop.f32.mrf.mxu1 }
 0x212   :  { %14072 = vst [vmem:[#allocation117_spill] sm:$0xff] %v10716_v48  ;;  %14073 = vst [vmem:[#allocation118_spill] sm:$0xff] %v10722_v11  ;;  %v3974_v18 = vadd.f32 %v3973_v63, %v3972_v46  ;;  %v3978_v56 = vadd.f32 %v10685_v24, %v3977_v9  ;;  %v3985_v54 = vrot.slane %v3984_v22, 2  ;;  %2490 = vadd.xlane.f32.xlu1 %v2489_v62  ;;  %v2855_v53 = vrot.slane %v10709_v55, 4  ;;  %v10734_v63 = vpop.xlane.xlu1 %2391 }
 0x213   :  { %v3635_v6 = vmul.f32 1.442695, %v3481_v29  ;;  %v2853_v28 = vrot.slane %v2852_v2, 1  ;;  %v799_v26 = vadd.f32 %v10661_v58, %v9052_v17  ;;  %8069 = vrcp.f32 %v3970_v35 }
 0x214   :  { %v3986_v4 = vadd.f32 %v3985_v54, %v3984_v22  ;;  %v1917_v10 = vrot.slane %v793_v40, %v9057_v19  ;;  %v795_v46 = vadd.f32 %v10640_v0, %v9061_v21  ;;  %v8062_v9 = vpop.eup %8061  ;;  %v4754_v29 = vmul.f32 %v8060_v20, %v10538_v15  ;;  %v808_v40 = vpop.f32.mrf.mxu0 }
 0x215   :  { %8071 = vpow2.f32 %v3635_v6  ;;  %v2854_v49 = vmax.f32 %v2852_v2, %v2853_v28  ;;  %v2856_v58 = vmax.f32 %v10709_v55, %v2855_v53  ;;  %v10740_v62 = vadd.f32 %v5118_v12, %v5117_v61  ;;  %v10745_v15 = vpop.f32.mrf.mxu1 }
 0x216   :  { %v10738_v52 = vpop.eup %8063  ;;  %v3975_v35 = vrot.slane %v3974_v18, 1  ;;  %v3979_v22 = vrot.slane %v3978_v56, 2  ;;  %v3987_v54 = vrot.slane %v3986_v4, 1  ;;  %v1921_v11 = vrot.slane %v799_v26, %v9057_v19 }
 0x217   :  { %14074 = vst [vmem:[#allocation119_spill] sm:$0xff] %v10740_v62  ;;  %v3989_v48 = vrot.slane %v10738_v52, 4  ;;  %v3482_v0 = vsub.f32 %v10672_v36, %v2854_v49  ;;  %v2857_v31 = vrot.slane %v2856_v58, 2  ;;  %v4752_v2 = vmul.f32 %v8062_v9, %v10570_v33  ;;  %v10762_v9 = vpop.f32.mrf.mxu1 }
 0x218   :  { %v3988_v20 = vadd.f32 %v3987_v54, %v3986_v4  ;;  %v803_v6 = vadd.f32 %v802_v57, %v9052_v17  ;;  %v2237_v12 = vmul.f32 %v1917_v10, %v795_v46  ;;  %v801_v36 = vadd.f32 %v10683_v45, %v9061_v21  ;;  %v10760_v4 = vpop.xlane.xlu1 %2394  ;;  %v810_v10 = vpop.f32.mrf.mxu0 }
 0x219   :  { %v10749_v61 = vpop.eup %8065  ;;  %v3990_v28 = vadd.f32 %v10738_v52, %v3989_v48  ;;  %v3637_v53 = vmul.f32 1.442695, %v3482_v0  ;;  %v2858_v44 = vmax.f32 %v2856_v58, %v2857_v31  ;;  %v4882_v27 = vmul.f32 %v4754_v29, %v9818_v8 }
 0x21a   :  { %14075 = vst [vmem:[#allocation120_spill] sm:$0xff] %v10749_v61  ;;  %v10754_v49 = vpop.eup %8067  ;;  %v2492_v33 = vsel %vm2302_vm1, %v2237_v12, 0.0  ;;  %v2861_v57 = vrot.slane %v10734_v63, 4  ;;  %v3980_v46 = vadd.f32 %v3979_v22, %v3978_v56  ;;  %v4880_v45 = vmul.f32 %v4752_v2, %v9822_v41 }
 0x21b   :  { %v3991_v48 = vrot.slane %v3990_v28, 2  ;;  %8073 = vpow2.f32 %v3637_v53  ;;  %v2859_v31 = vrot.slane %v2858_v44, 1  ;;  %2493 = vadd.xlane.f32.xlu1 %v2492_v33  ;;  %v1925_v58 = vrot.slane %v803_v6, %v9057_v19  ;;  %v812_v33 = vpop.f32.mrf.mxu0 }
 0x21c   :  { %8075 = vrcp.f32 %v3988_v20  ;;  %v2862_v8 = vmax.f32 %v10734_v63, %v2861_v57  ;;  %v805_v0 = vadd.f32 %v804_v43, %v9061_v21  ;;  %v2238_v12 = vmul.f32 %v1921_v11, %v801_v36  ;;  %v10775_v20 = vpop.f32.mrf.mxu1 }
 0x21d   :  { %v3992_v29 = vadd.f32 %v3991_v48, %v3990_v28  ;;  %v2860_v54 = vmax.f32 %v2858_v44, %v2859_v31  ;;  %v3976_v26 = vadd.f32 %v3975_v35, %v3974_v18  ;;  %v809_v22 = vadd.f32 %v808_v40, %v9052_v17  ;;  %v10782_v40 = vpop.xlane.xlu1 %2397 }
 0x21e   :  { %v2863_v56 = vrot.slane %v2862_v8, 2  ;;  %v2867_v53 = vrot.slane %v10760_v4, 4  ;;  %v10772_v41 = vadd.f32 %v10712_v14, %v9657_v50  ;;  %v2495_v44 = vsel %vm2302_vm1, %v2238_v12, 0.0 }
 0x21f   :  { %v3993_v1 = vrot.slane %v3992_v29, 1  ;;  %v3483_v2 = vsub.f32 %v10709_v55, %v2860_v54  ;;  %v10779_v11 = vsel %vm2302_vm1, %v4882_v27, 0.0  ;;  %v3981_v18 = vrot.slane %v3980_v46, 1  ;;  %2496 = vadd.xlane.f32.xlu0 %v2495_v44  ;;  %v814_v54 = vpop.f32.mrf.mxu0 }
 0x220   :  { %14076 = vst [vmem:[#allocation121_spill] sm:$0xff] %v10772_v41  ;;  %v2864_v43 = vmax.f32 %v2862_v8, %v2863_v56  ;;  %v2868_v35 = vmax.f32 %v10760_v4, %v2867_v53  ;;  %v10784_v6 = vpop.eup %8069  ;;  %v10787_v14 = vsel %vm2302_vm1, %v4880_v45, 0.0  ;;  %v2239_v36 = vmul.f32 %v1925_v58, %v805_v0  ;;  %v10794_v56 = vpop.f32.mrf.mxu1 }
 0x221   :  { %v3994_v55 = vadd.f32 %v3993_v1, %v3992_v29  ;;  %v3639_v28 = vmul.f32 1.442695, %v3483_v2  ;;  %v1929_v27 = vrot.slane %v809_v22, %v9057_v19  ;;  %v811_v8 = vadd.f32 %v810_v10, %v9061_v21  ;;  %v10799_v22 = vpop.xlane.xlu0 %2400  ;;  %v818_v41 = vpop.f32.mrf.mxu0 }
 0x222   :  { %v10789_v57 = vpop.eup %8071  ;;  %v2865_v48 = vrot.slane %v2864_v43, 1  ;;  %v2869_v31 = vrot.slane %v2868_v35, 2  ;;  %v2498_v45 = vsel %vm2302_vm1, %v2239_v36, 0.0  ;;  %v2873_v1 = vrot.slane %v10782_v40, 4 }
 0x223   :  { %8077 = vrcp.f32 %v3994_v55  ;;  %v3995_v12 = vrot.slane %v10789_v57, 4  ;;  %v813_v0 = vadd.f32 %v812_v33, %v9052_v17  ;;  %2499 = vadd.xlane.f32.xlu1 %v2498_v45  ;;  %v5125_v10 = vrot.slane %v10779_v11, 4  ;;  %v10806_v33 = vpop.f32.mrf.mxu1 }
 0x224   :  { %8079 = vpow2.f32 %v3639_v28  ;;  %v2866_v58 = vmax.f32 %v2864_v43, %v2865_v48  ;;  %v2870_v29 = vmax.f32 %v2868_v35, %v2869_v31  ;;  %v2874_v2 = vmax.f32 %v10782_v40, %v2873_v1 }
 0x225   :  { %8081 = vrcp.f32 %v3976_v26  ;;  %v3996_v53 = vadd.f32 %v10789_v57, %v3995_v12  ;;  %v3982_v44 = vadd.f32 %v3981_v18, %v3980_v46  ;;  %v2240_v28 = vmul.f32 %v1929_v27, %v811_v8 }
 0x226   :  { %v3484_v55 = vsub.f32 %v10734_v63, %v2866_v58  ;;  %v2871_v36 = vrot.slane %v2870_v29, 1  ;;  %v5111_v43 = vrot.slane %v10787_v14, 4  ;;  %v2875_v48 = vrot.slane %v2874_v2, 2 }
 0x227   :  { %v3997_v35 = vrot.slane %v3996_v53, 2  ;;  %v2879_v31 = vrot.slane %v10799_v22, 4  ;;  %v1933_v1 = vrot.slane %v813_v0, %v9057_v19  ;;  %v2501_v46 = vsel %vm2302_vm1, %v2240_v28, 0.0  ;;  %v10819_v28 = vpop.f32.mrf.mxu1 }
 0x228   :  { %v10809_v45 = vpop.eup %8073  ;;  %v3641_v26 = vmul.f32 1.442695, %v3484_v55  ;;  %v2872_v12 = vmax.f32 %v2870_v29, %v2871_v36  ;;  %v2876_v8 = vmax.f32 %v2874_v2, %v2875_v48  ;;  %2502 = vadd.xlane.f32.xlu0 %v2501_v46  ;;  %v815_v7 = vadd.f32 %v814_v54, %v9061_v21  ;;  %v820_v29 = vpop.f32.mrf.mxu0 }
 0x229   :  { %v8076_v63 = vpop.eup %8075  ;;  %v3998_v18 = vadd.f32 %v3997_v35, %v3996_v53  ;;  %v4001_v27 = vrot.slane %v10809_v45, 4  ;;  %v2880_v58 = vmax.f32 %v10799_v22, %v2879_v31  ;;  %v819_v55 = vadd.f32 %v818_v41, %v9052_v17 }
 0x22a   :  { %8083 = vpow2.f32 %v3641_v26  ;;  %v3485_v61 = vsub.f32 %v10760_v4, %v2872_v12  ;;  %v2877_v53 = vrot.slane %v2876_v8, 1  ;;  %v10822_v2 = vadd.f32 %v5125_v10, %v10779_v11  ;;  %v10827_v12 = vpop.xlane.xlu1 %2403  ;;  %v822_v30 = vpop.f32.mrf.mxu0 }
 0x22b   :  { %v3999_v36 = vrot.slane %v3998_v18, 1  ;;  %v4002_v0 = vadd.f32 %v10809_v45, %v4001_v27  ;;  %v2881_v35 = vrot.slane %v2880_v58, 2  ;;  %v4755_v48 = vmul.f32 %v10754_v49, %v10577_v59  ;;  %v10831_v59 = vpop.f32.mrf.mxu1 }
 0x22c   :  { %14077 = vst [vmem:[#allocation122_spill] sm:$0xff] %v10822_v2  ;;  %v4759_v4 = vmul.f32 %v8076_v63, %v10699_v47  ;;  %v3643_v31 = vmul.f32 1.442695, %v3485_v61  ;;  %8085 = vrcp.f32 %v3982_v44  ;;  %v2878_v26 = vmax.f32 %v2876_v8, %v2877_v53 }
 0x22d   :  { %v4000_v54 = vadd.f32 %v3999_v36, %v3998_v18  ;;  %v4003_v41 = vrot.slane %v4002_v0, 2  ;;  %v5112_v46 = vadd.f32 %v5111_v43, %v10787_v14  ;;  %v2882_v27 = vmax.f32 %v2880_v58, %v2881_v35  ;;  %v10853_v53 = vpop.f32.mrf.mxu1  ;;  %v824_v35 = vpop.f32.mrf.mxu0 }
 0x22e   :  { %8087 = vpow2.f32 %v3643_v31  ;;  %v2241_v34 = vmul.f32 %v1933_v1, %v815_v7  ;;  %v3486_v10 = vsub.f32 %v10782_v40, %v2878_v26  ;;  %v1937_v47 = vrot.slane %v819_v55, %v9057_v19 }
 0x22f   :  { %8089 = vrcp.f32 %v4000_v54  ;;  %v4004_v11 = vadd.f32 %v4003_v41, %v4002_v0  ;;  %v4887_v49 = vmul.f32 %v4759_v4, %v9891_v3  ;;  %v2883_v44 = vrot.slane %v2882_v27, 1  ;;  %v10860_v54 = vpop.xlane.xlu0 %2406 }
 0x230   :  { %v8078_v61 = vpop.eup %8077  ;;  %v2504_v63 = vsel %vm2302_vm1, %v2241_v34, 0.0  ;;  %v2885_v14 = vrot.slane %v10827_v12, 4  ;;  %v3645_v7 = vmul.f32 1.442695, %v3486_v10  ;;  %v821_v1 = vadd.f32 %v820_v29, %v9061_v21 }
 0x231   :  { %v10837_v43 = vpop.eup %8079  ;;  %v4005_v18 = vrot.slane %v4004_v11, 1  ;;  %v823_v40 = vadd.f32 %v822_v30, %v9052_v17  ;;  %2505 = vadd.xlane.f32.xlu0 %v2504_v63  ;;  %v10843_v58 = vadd.f32 %v10728_v13, %v9657_v50  ;;  %v2884_v55 = vmax.f32 %v2882_v27, %v2883_v44  ;;  %v14081_v44 = vld [vmem:[#allocation30_spill] sm:$0xff] }
 0x232   :  { %v8082_v8 = vpop.eup %8081  ;;  %v4007_v3 = vrot.slane %v10837_v43, 4  ;;  %v2886_v34 = vmax.f32 %v10827_v12, %v2885_v14  ;;  %v10848_v36 = vmul.f32 %v4755_v48, %v9843_v37  ;;  %v4756_v0 = vmul.f32 %v10784_v6, %v10594_v16 }
 0x233   :  { %14078 = vst [vmem:[#allocation123_spill] sm:$0xff] %v10843_v58  ;;  %v4760_v29 = vmul.f32 %v8078_v61, %v10738_v52  ;;  %v4006_v30 = vadd.f32 %v4005_v18, %v4004_v11  ;;  %v10857_v13 = vadd.f32 %v10745_v15, %v9657_v50  ;;  %8091 = vpow2.f32 %v3645_v7  ;;  %v14080_v11 = vld [vmem:[#allocation34_spill] sm:$0xff] }
 0x234   :  { %v3487_v4 = vsub.f32 %v10799_v22, %v2884_v55  ;;  %v2887_v31 = vrot.slane %v2886_v34, 2  ;;  %v5113_v37 = vrot.slane %v5112_v46, 2  ;;  %v5159_v48 = vsel %vm2302_vm1, %v4887_v49, 0.0  ;;  %v10869_v22 = vpop.f32.mrf.mxu1 }
 0x235   :  { %14079 = vst [vmem:[#allocation124_spill] sm:$0xff] %v10857_v13  ;;  %v1941_v16 = vrot.slane %v823_v40, %v9057_v19  ;;  %v2242_v52 = vmul.f32 %v1937_v47, %v821_v1  ;;  %v4008_v6 = vadd.f32 %v10837_v43, %v4007_v3  ;;  %v825_v27 = vadd.f32 %v824_v35, %v9061_v21  ;;  %v828_v40 = vpop.f32.mrf.mxu0 }
 0x236   :  { %v3647_v41 = vmul.f32 1.442695, %v3487_v4  ;;  %v2888_v26 = vmax.f32 %v2886_v34, %v2887_v31  ;;  %v4888_v10 = vmul.f32 %v4760_v29, %v14080_v11  ;;  %8093 = vrcp.f32 %v4006_v30  ;;  %v7837_v35 = vpop.f32.mrf.mxu1  ;;  %v10904_v11 = vpop.xlane.xlu0 %2409 }
 0x237   :  { %v10866_v15 = vpop.eup %8083  ;;  %v2507_v61 = vsel %vm2302_vm1, %v2242_v52, 0.0  ;;  %v2891_v49 = vrot.slane %v10860_v54, 4  ;;  %v10874_v63 = vmul.f32 %v4756_v0, %v14081_v44  ;;  %v5160_v47 = vrot.slane %v5159_v48, 4 }
 0x238   :  { %v10878_v14 = vadd.f32 %v10762_v9, %v9657_v50  ;;  %v4013_v18 = vrot.slane %v10866_v15, 4  ;;  %2508 = vadd.xlane.f32.xlu0 %v2507_v61  ;;  %v10881_v7 = vadd.f32 %v5113_v37, %v5112_v46  ;;  %8095 = vpow2.f32 %v3647_v41 }
 0x239   :  { %v2889_v1 = vrot.slane %v2888_v26, 1  ;;  %v2892_v3 = vmax.f32 %v10860_v54, %v2891_v49  ;;  %v8086_v55 = vpop.eup %8085  ;;  %v10885_v34 = vmul.f32 %v8082_v8, %v10642_v25  ;;  %v4009_v0 = vrot.slane %v4008_v6, 2 }
 0x23a   :  { %14082 = vst [vmem:[#allocation34_spill] sm:$0xff] %v10878_v14  ;;  %14083 = vst [vmem:[#allocation30_spill] sm:$0xff] %v10881_v7  ;;  %v4014_v29 = vadd.f32 %v10866_v15, %v4013_v18  ;;  %v10890_v9 = vadd.f32 %v10775_v20, %v9657_v50  ;;  %v5166_v46 = vsel %vm2302_vm1, %v4888_v10, 0.0  ;;  %v2243_v37 = vmul.f32 %v1941_v16, %v825_v27  ;;  %v830_v27 = vpop.f32.mrf.mxu0 }
 0x23b   :  { %v10892_v30 = vpop.eup %8087  ;;  %v2890_v4 = vmax.f32 %v2888_v26, %v2889_v1  ;;  %v2893_v31 = vrot.slane %v2892_v3, 2  ;;  %v5161_v41 = vadd.f32 %v5160_v47, %v5159_v48  ;;  %v10897_v25 = vadd.f32 %v10794_v56, %v9657_v50 }
 0x23c   :  { %14084 = vst [vmem:[#allocation125_spill] sm:$0xff] %v10890_v9  ;;  %v8090_v52 = vpop.eup %8089  ;;  %v4019_v8 = vrot.slane %v10892_v30, 4  ;;  %v10902_v20 = vadd.f32 %v10806_v33, %v9657_v50  ;;  %v4015_v61 = vrot.slane %v4014_v29, 2  ;;  %v829_v26 = vadd.f32 %v828_v40, %v9052_v17  ;;  %v1487_v33 = vpop.f32.mrf.mxu1 }
 0x23d   :  { %14085 = vst [vmem:[#allocation126_spill] sm:$0xff] %v10897_v25  ;;  %v3488_v10 = vsub.f32 %v10827_v12, %v2890_v4  ;;  %v2894_v16 = vmax.f32 %v2892_v3, %v2893_v31  ;;  %v5167_v48 = vrot.slane %v5166_v46, 4  ;;  %v4761_v49 = vmul.f32 %v8090_v52, %v10789_v57 }
 0x23e   :  { %14086 = vst [vmem:[#allocation127_spill] sm:$0xff] %v10902_v20  ;;  %v4010_v56 = vadd.f32 %v4009_v0, %v4008_v6  ;;  %v2510_v44 = vsel %vm2302_vm1, %v2243_v37, 0.0  ;;  %v4020_v47 = vadd.f32 %v10892_v30, %v4019_v8  ;;  %v2897_v25 = vrot.slane %v10904_v11, 4  ;;  %v14091_v37 = vld [vmem:[#allocation31_spill] sm:$0xff] }
 0x23f   :  { %v3649_v18 = vmul.f32 1.442695, %v3488_v10  ;;  %v2895_v1 = vrot.slane %v2894_v16, 1  ;;  %2511 = vadd.xlane.f32.xlu0 %v2510_v44  ;;  %v10913_v12 = vmul.f32 %v8086_v55, %v10685_v24  ;;  %v10917_v40 = vadd.f32 %v10819_v28, %v9657_v50  ;;  %v832_v24 = vpop.f32.mrf.mxu0  ;;  %v7838_v44 = vpop.f32.mrf.mxu1 }
 0x240   :  { %v10921_v57 = vadd.f32 %v10831_v59, %v9657_v50  ;;  %v10925_v6 = vadd.f32 %v10853_v53, %v9657_v50  ;;  %v10927_v3 = vpop.eup %8091  ;;  %v5162_v0 = vrot.slane %v5161_v41, 2  ;;  %v4016_v4 = vadd.f32 %v4015_v61, %v4014_v29 }
 0x241   :  { %14087 = vst [vmem:[#allocation128_spill] sm:$0xff] %v10913_v12  ;;  %14088 = vst [vmem:[#allocation129_spill] sm:$0xff] %v10917_v40  ;;  %8097 = vpow2.f32 %v3649_v18  ;;  %v2896_v31 = vmax.f32 %v2894_v16, %v2895_v1  ;;  %v5168_v55 = vadd.f32 %v5167_v48, %v5166_v46  ;;  %v4889_v52 = vmul.f32 %v4761_v49, %v14091_v37 }
 0x242   :  { %14089 = vst [vmem:[#allocation130_spill] sm:$0xff] %v10921_v57  ;;  %14090 = vst [vmem:[#allocation131_spill] sm:$0xff] %v10925_v6  ;;  %v4011_v28 = vrot.slane %v4010_v56, 1  ;;  %v2898_v8 = vmax.f32 %v10904_v11, %v2897_v25  ;;  %v4021_v10 = vrot.slane %v4020_v47, 2  ;;  %v1945_v59 = vrot.slane %v829_v26, %v9057_v19 }
 0x243   :  { %v3489_v53 = vsub.f32 %v10860_v54, %v2896_v31  ;;  %v831_v6 = vadd.f32 %v830_v27, %v9061_v21  ;;  %v8094_v40 = vpop.eup %8093  ;;  %v4025_v29 = vrot.slane %v10927_v3, 4  ;;  %v10937_v61 = vadd.f32 %v10869_v22, %v9657_v50  ;;  %v834_v54 = vpop.f32.mrf.mxu0 }
 0x244   :  { %v833_v46 = vadd.f32 %v832_v24, %v9052_v17  ;;  %v2899_v16 = vrot.slane %v2898_v8, 2  ;;  %v10940_v48 = vadd.f32 %v5162_v0, %v5161_v41  ;;  %v4017_v25 = vrot.slane %v4016_v4, 1  ;;  %v10948_v22 = vpop.xlane.xlu0 %2412  ;;  %v1490_v41 = vpop.f32.mrf.mxu1 }
 0x245   :  { %14092 = vst [vmem:[#allocation31_spill] sm:$0xff] %v10937_v61  ;;  %v10943_v26 = vadd.f32 %v7837_v35, %v9657_v50  ;;  %v3651_v49 = vmul.f32 1.442695, %v3489_v53  ;;  %v10945_v18 = vpop.eup %8095  ;;  %v5169_v27 = vrot.slane %v5168_v55, 2  ;;  %v5173_v1 = vsel %vm2302_vm1, %v4889_v52, 0.0  ;;  %v14147_v61 = vld [vmem:[#allocation19_spill] sm:$0xff] }
 0x246   :  { %14093 = vst [vmem:[#allocation132_spill] sm:$0xff] %v10940_v48  ;;  %14095 = vst [vmem:[#allocation134_spill] sm:$0xff] %v10945_v18  ;;  %v4012_v31 = vadd.f32 %v4011_v28, %v4010_v56  ;;  %v2900_v37 = vmax.f32 %v2898_v8, %v2899_v16  ;;  %v4762_v24 = vmul.f32 %v8094_v40, %v10809_v45  ;;  %v4031_v52 = vrot.slane %v10945_v18, 4 }
 0x247   :  { %14094 = vst [vmem:[#allocation133_spill] sm:$0xff] %v10943_v26  ;;  %v4022_v57 = vadd.f32 %v4021_v10, %v4020_v47  ;;  %8099 = vpow2.f32 %v3651_v49  ;;  %v2244_v0 = vmul.f32 %v1945_v59, %v831_v6  ;;  %v4026_v35 = vadd.f32 %v10927_v3, %v4025_v29  ;;  %v14098_v6 = vld [vmem:[#allocation33_spill] sm:$0xff]  ;;  %v7841_v29 = vpop.f32.mrf.mxu1 }
 0x248   :  { %v1949_v53 = vrot.slane %v833_v46, %v9057_v19  ;;  %v2901_v26 = vrot.slane %v2900_v37, 1  ;;  %v835_v14 = vadd.f32 %v834_v54, %v9061_v21  ;;  %v4018_v20 = vadd.f32 %v4017_v25, %v4016_v4  ;;  %v838_v46 = vpop.f32.mrf.mxu0 }
 0x249   :  { %v2513_v56 = vsel %vm2302_vm1, %v2244_v0, 0.0  ;;  %v2903_v28 = vrot.slane %v10948_v22, 4  ;;  %v5174_v8 = vrot.slane %v5173_v1, 4  ;;  %v10958_v45 = vadd.f32 %v1487_v33, %v9657_v50 }
 0x24a   :  { %v10961_v47 = vadd.f32 %v7838_v44, %v9657_v50  ;;  %v2902_v40 = vmax.f32 %v2900_v37, %v2901_v26  ;;  %2514 = vadd.xlane.f32.xlu0 %v2513_v56  ;;  %v4890_v10 = vmul.f32 %v4762_v24, %v14098_v6  ;;  %v4023_v59 = vrot.slane %v4022_v57, 1  ;;  %v10971_v44 = vpop.xlane.xlu0 %2415 }
 0x24b   :  { %14096 = vst [vmem:[#allocation135_spill] sm:$0xff] %v10958_v45  ;;  %v10965_v4 = vadd.f32 %v1490_v41, %v9657_v50  ;;  %v2904_v16 = vmax.f32 %v10948_v22, %v2903_v28  ;;  %8101 = vrcp.f32 %v4012_v31  ;;  %v4027_v25 = vrot.slane %v4026_v35, 2 }
 0x24c   :  { %14097 = vst [vmem:[#allocation136_spill] sm:$0xff] %v10961_v47  ;;  %v10969_v33 = vadd.f32 %v7841_v29, %v9657_v50  ;;  %v2245_v49 = vmul.f32 %v1949_v53, %v835_v14  ;;  %v10973_v26 = vadd.f32 %v5169_v27, %v5168_v55  ;;  %8103 = vrcp.f32 %v4018_v20  ;;  %v1503_v20 = vpop.f32.mrf.mxu1 }
 0x24d   :  { %14099 = vst [vmem:[#allocation33_spill] sm:$0xff] %v10965_v4  ;;  %v4032_v54 = vadd.f32 %v10945_v18, %v4031_v52  ;;  %v2905_v37 = vrot.slane %v2904_v16, 2  ;;  %v10978_v41 = vadd.f32 %v5174_v8, %v5173_v1  ;;  %v3490_v0 = vsub.f32 %v10904_v11, %v2902_v40  ;;  %v14151_v18 = vld [vmem:[#allocation20_spill] sm:$0xff] }
 0x24e   :  { %14100 = vst [vmem:[#allocation137_spill] sm:$0xff] %v10969_v33  ;;  %14101 = vst [vmem:[#allocation138_spill] sm:$0xff] %v10973_v26  ;;  %v10976_v24 = vpop.eup %8097  ;;  %v10982_v31 = vadd.f32 %v838_v46, %v9052_v17  ;;  %v2516_v56 = vsel %vm2302_vm1, %v2245_v49, 0.0  ;;  %v5180_v14 = vsel %vm2302_vm1, %v4890_v10, 0.0  ;;  %v4024_v53 = vadd.f32 %v4023_v59, %v4022_v57 }
 0x24f   :  { %14102 = vst [vmem:[#allocation139_spill] sm:$0xff] %v10976_v24  ;;  %14103 = vst [vmem:[#allocation140_spill] sm:$0xff] %v10978_v41  ;;  %v4037_v55 = vrot.slane %v10976_v24, 4  ;;  %2517 = vadd.xlane.f32.xlu0 %v2516_v56  ;;  %v2909_v27 = vrot.slane %v10971_v44, 4  ;;  %v4028_v52 = vadd.f32 %v4027_v25, %v4026_v35  ;;  %v10989_v1 = vadd.f32 %v1503_v20, %v9657_v50 }
 0x250   :  { %v2906_v28 = vmax.f32 %v2904_v16, %v2905_v37  ;;  %v3879_v11 = vrot.slane %v10233_v5, 1  ;;  %v4033_v8 = vrot.slane %v4032_v54, 2  ;;  %v14105_v57 = vrot.slane %v10270_v51, 2 }
 0x251   :  { %14104 = vst [vmem:[#allocation141_spill] sm:$0xff] %v10989_v1  ;;  %v4038_v40 = vadd.f32 %v10976_v24, %v4037_v55  ;;  %v2910_v6 = vmax.f32 %v10971_v44, %v2909_v27  ;;  %v5181_v29 = vrot.slane %v5180_v14, 4  ;;  %v3653_v46 = vmul.f32 1.442695, %v3490_v0  ;;  %v840_v27 = vpop.f32.mrf.mxu0 }
 0x252   :  { %v3884_v10 = vadd.f32 %v14105_v57, %v10270_v51  ;;  %8105 = vrcp.f32 %v4024_v53  ;;  %v14106_v25 = vrot.slane %v10197_v42, 1  ;;  %v4029_v55 = vrot.slane %v4028_v52, 1 }
 0x253   :  { %v2911_v16 = vrot.slane %v2910_v6, 2  ;;  %v2907_v20 = vrot.slane %v2906_v28, 1  ;;  %v3880_v51 = vadd.f32 %v3879_v11, %v10233_v5  ;;  %v14108_v0 = vrot.slane %v10611_v60, 2  ;;  %v842_v11 = vpop.f32.mrf.mxu0 }
 0x254   :  { %v3874_v49 = vadd.f32 %v14106_v25, %v10197_v42  ;;  %v3885_v37 = vrot.slane %v3884_v10, 1  ;;  %v11003_v56 = vpop.eup %8099  ;;  %v4034_v59 = vadd.f32 %v4033_v8, %v4032_v54  ;;  %v4039_v35 = vrot.slane %v4038_v40, 2  ;;  %v7842_v42 = vpop.f32.mrf.mxu1 }
 0x255   :  { %14107 = vst [vmem:[#allocation142_spill] sm:$0xff] %v11003_v56  ;;  %v3932_v57 = vadd.f32 %v14108_v0, %v10611_v60  ;;  %v4043_v53 = vrot.slane %v11003_v56, 4  ;;  %v3927_v33 = vrot.slane %v10572_v23, 1  ;;  %8107 = vpow2.f32 %v3653_v46 }
 0x256   :  { %v2912_v25 = vmax.f32 %v2910_v6, %v2911_v16  ;;  %v3886_v47 = vadd.f32 %v3885_v37, %v3884_v10  ;;  %v11011_v45 = vadd.f32 %v5181_v29, %v5180_v14  ;;  %v11014_v9 = vadd.f32 %v7842_v42, %v9657_v50  ;;  %v1506_v0 = vpop.f32.mrf.mxu1 }
 0x257   :  { %v3933_v4 = vrot.slane %v3932_v57, 1  ;;  %v11017_v5 = vadd.f32 %v840_v27, %v9061_v21  ;;  %8109 = vrcp.f32 %v3874_v49  ;;  %v4030_v60 = vadd.f32 %v4029_v55, %v4028_v52  ;;  %v14112_v52 = vld [vmem:[#allocation32_spill] sm:$0xff]  ;;  %v14114_v55 = vld [vmem:[#allocation35_spill] sm:$0xff] }
 0x258   :  { %14109 = vst [vmem:[#allocation143_spill] sm:$0xff] %v11011_v45  ;;  %14110 = vst [vmem:[#allocation144_spill] sm:$0xff] %v11014_v9  ;;  %v2908_v54 = vmax.f32 %v2906_v28, %v2907_v20  ;;  %v14111_v8 = vrot.slane %v10397_v38, 1  ;;  %8111 = vrcp.f32 %v3880_v51  ;;  %v8102_v6 = vpop.eup %8101  ;;  %v4035_v10 = vrot.slane %v4034_v59, 1  ;;  %v14116_v20 = vld [vmem:[#allocation58_spill] sm:$0xff]  ;;  %v14118_v51 = vld [vmem:[#allocation60_spill] sm:$0xff]  ;;  %v11179_v45 = vpop.xlane.xlu0 %2418 }
 0x259   :  { %v4040_v16 = vadd.f32 %v4039_v35, %v4038_v40  ;;  %v4044_v14 = vadd.f32 %v11003_v56, %v4043_v53  ;;  %v3928_v29 = vadd.f32 %v3927_v33, %v10572_v23  ;;  %v8104_v37 = vpop.eup %8103  ;;  %v2913_v27 = vrot.slane %v2912_v25, 1  ;;  %v14115_v35 = vld [vmem:[#allocation40_spill] sm:$0xff]  ;;  %v14138_v9 = vld [vmem:[#allocation87_spill] sm:$0xff] }
 0x25a   :  { %v3922_v46 = vadd.f32 %v14111_v8, %v10397_v38  ;;  %v3934_v42 = vadd.f32 %v3933_v4, %v3932_v57  ;;  %8113 = vrcp.f32 %v3886_v47  ;;  %v4735_v28 = vmul.f32 %v10081_v39, %v14112_v52  ;;  %v14117_v47 = vld [vmem:[#allocation42_spill] sm:$0xff]  ;;  %v844_v52 = vpop.f32.mrf.mxu0 }
 0x25b   :  { %v11027_v49 = vadd.f32 %v1506_v0, %v9657_v50  ;;  %v11030_v38 = vadd.f32 %v842_v11, %v9052_v17  ;;  %v4736_v40 = vmul.f32 %v10150_v32, %v14114_v55  ;;  %v4737_v23 = vmul.f32 %v14116_v20, %v14115_v35  ;;  %v14119_v32 = vld [vmem:[#allocation13_spill] sm:$0xff] }
 0x25c   :  { %v4763_v33 = vmul.f32 %v8102_v6, %v10837_v43  ;;  %v3491_v4 = vsub.f32 %v10948_v22, %v2908_v54  ;;  %8115 = vrcp.f32 %v3922_v46  ;;  %v4738_v39 = vmul.f32 %v14118_v51, %v14117_v47  ;;  %v7845_v22 = vpop.f32.mrf.mxu1  ;;  %v14120_v54 = vld [vmem:[#allocation15_spill] sm:$0xff]  ;;  %v14121_v6 = vld [vmem:[#allocation12_spill] sm:$0xff] }
 0x25d   :  { %14113 = vst [vmem:[#allocation32_spill] sm:$0xff] %v11027_v49  ;;  %v4764_v57 = vmul.f32 %v8104_v37, %v10866_v15  ;;  %v4036_v53 = vadd.f32 %v4035_v10, %v4034_v59  ;;  %v4041_v8 = vrot.slane %v4040_v16, 1  ;;  %8117 = vrcp.f32 %v3928_v29  ;;  %v14124_v10 = vld [vmem:[#allocation68_spill] sm:$0xff]  ;;  %v14125_v37 = vld [vmem:[#allocation14_spill] sm:$0xff] }
 0x25e   :  { %v4045_v11 = vrot.slane %v4044_v14, 2  ;;  %v2914_v0 = vmax.f32 %v2912_v25, %v2913_v27  ;;  %8119 = vrcp.f32 %v3934_v42  ;;  %v4863_v55 = vmul.f32 %v4735_v28, %v14119_v32  ;;  %v14123_v25 = vld [vmem:[#allocation45_spill] sm:$0xff]  ;;  %v14128_v28 = vld [vmem:[#allocation39_spill] sm:$0xff] }
 0x25f   :  { %8121 = vrcp.f32 %v4030_v60  ;;  %v4864_v46 = vmul.f32 %v4736_v40, %v14120_v54  ;;  %v4865_v35 = vmul.f32 %v4737_v23, %v14121_v6  ;;  %v11046_v20 = vpop.eup %8105  ;;  %v3655_v15 = vmul.f32 1.442695, %v3491_v4  ;;  %v14126_v60 = vld [vmem:[#allocation37_spill] sm:$0xff]  ;;  %v14132_v6 = vld [vmem:[#allocation54_spill] sm:$0xff] }
 0x260   :  { %v11049_v59 = vadd.f32 %v7845_v22, %v9657_v50  ;;  %v4739_v29 = vmul.f32 %v14124_v10, %v14123_v25  ;;  %v4866_v27 = vmul.f32 %v4738_v39, %v14125_v37  ;;  %v11055_v42 = vmul.f32 %v4763_v33, %v14126_v60  ;;  %v14135_v25 = vld [vmem:[#allocation83_spill] sm:$0xff] }
 0x261   :  { %v11058_v47 = vmul.f32 %v4764_v57, %v14128_v28  ;;  %8123 = vrcp.f32 %v4036_v53  ;;  %v11061_v40 = vadd.f32 %v844_v52, %v9061_v21  ;;  %v11063_v23 = vadd.f32 %v4041_v8, %v4040_v16  ;;  %v14131_v52 = vld [vmem:[#allocation17_spill] sm:$0xff] }
 0x262   :  { %14122 = vst [vmem:[#allocation35_spill] sm:$0xff] %v11049_v59  ;;  %14127 = vst [vmem:[#allocation40_spill] sm:$0xff] %v11055_v42  ;;  %v11065_v4 = vadd.f32 %v4045_v11, %v4044_v14  ;;  %v3492_v51 = vsub.f32 %v10971_v44, %v2914_v0  ;;  %v4991_v32 = vsel %vm2302_vm1, %v4863_v55, 0.0  ;;  %v11069_v22 = vpop.eup %8107  ;;  %v4998_v33 = vsel %vm2302_vm1, %v4864_v46, 0.0  ;;  %v14133_v44 = vld [vmem:[#allocation80_spill] sm:$0xff]  ;;  %v14134_v55 = vld [vmem:[#allocation59_spill] sm:$0xff] }
 0x263   :  { %14129 = vst [vmem:[#allocation58_spill] sm:$0xff] %v11058_v47  ;;  %14130 = vst [vmem:[#allocation42_spill] sm:$0xff] %v11069_v22  ;;  %v4992_v39 = vrot.slane %v4991_v32, 4  ;;  %v5005_v57 = vsel %vm2302_vm1, %v4865_v35, 0.0  ;;  %v5012_v53 = vsel %vm2302_vm1, %v4866_v27, 0.0  ;;  %8125 = vpow2.f32 %v3655_v15  ;;  %v14137_v59 = vld [vmem:[#allocation64_spill] sm:$0xff] }
 0x264   :  { %v8110_v54 = vpop.eup %8109  ;;  %v4867_v16 = vmul.f32 %v4739_v29, %v14131_v52  ;;  %v4999_v8 = vrot.slane %v4998_v33, 4  ;;  %v5006_v14 = vrot.slane %v5005_v57, 4  ;;  %v4743_v0 = vmul.f32 %v14133_v44, %v14132_v6  ;;  %v14136_v29 = vld [vmem:[#allocation51_spill] sm:$0xff] }
 0x265   :  { %v8112_v11 = vpop.eup %8111  ;;  %v4744_v10 = vmul.f32 %v14135_v25, %v14134_v55  ;;  %v4993_v37 = vadd.f32 %v4992_v39, %v4991_v32  ;;  %v5013_v60 = vrot.slane %v5012_v53, 4  ;;  %v4049_v46 = vrot.slane %v11069_v22, 4  ;;  %v14139_v6 = vld [vmem:[#allocation55_spill] sm:$0xff]  ;;  %v14140_v25 = vld [vmem:[#allocation69_spill] sm:$0xff] }
 0x266   :  { %v3657_v35 = vmul.f32 1.442695, %v3492_v51  ;;  %v5000_v28 = vadd.f32 %v4999_v8, %v4998_v33  ;;  %v5007_v27 = vadd.f32 %v5006_v14, %v5005_v57  ;;  %v4740_v52 = vmul.f32 %v8110_v54, %v14136_v29  ;;  %v14141_v51 = vld [vmem:[#allocation93_spill] sm:$0xff]  ;;  %v14143_v8 = vld [vmem:[#allocation95_spill] sm:$0xff] }
 0x267   :  { %v8114_v43 = vpop.eup %8113  ;;  %v4745_v58 = vmul.f32 %v14138_v9, %v14137_v59  ;;  %v4994_v13 = vrot.slane %v4993_v37, 2  ;;  %v4741_v44 = vmul.f32 %v8112_v11, %v14139_v6  ;;  %v5014_v55 = vadd.f32 %v5013_v60, %v5012_v53  ;;  %v14142_v57 = vld [vmem:[#allocation73_spill] sm:$0xff] }
 0x268   :  { %v5001_v49 = vrot.slane %v5000_v28, 2  ;;  %v5019_v32 = vsel %vm2302_vm1, %v4867_v16, 0.0  ;;  %v4746_v33 = vmul.f32 %v14141_v51, %v14140_v25  ;;  %v4747_v14 = vmul.f32 %v14143_v8, %v14142_v57  ;;  %v14144_v9 = vld [vmem:[#allocation65_spill] sm:$0xff]  ;;  %v14149_v57 = vld [vmem:[#allocation16_spill] sm:$0xff] }
 0x269   :  { %v8116_v39 = vpop.eup %8115  ;;  %v4995_v15 = vadd.f32 %v4994_v13, %v4993_v37  ;;  %v5008_v1 = vrot.slane %v5007_v27, 2  ;;  %v11091_v29 = vadd.f32 %v11069_v22, %v4049_v46  ;;  %8127 = vpow2.f32 %v3657_v35  ;;  %v14145_v11 = vld [vmem:[#allocation21_spill] sm:$0xff]  ;;  %v14148_v13 = vld [vmem:[#allocation94_spill] sm:$0xff]  ;;  %v14150_v46 = vld [vmem:[#allocation23_spill] sm:$0xff] }
 0x26a   :  { %v8118_v54 = vpop.eup %8117  ;;  %v4742_v59 = vmul.f32 %v8114_v43, %v14144_v9  ;;  %v4871_v53 = vmul.f32 %v4743_v0, %v14145_v11  ;;  %v14146_v16 = vld [vmem:[#allocation77_spill] sm:$0xff]  ;;  %v4868_v56 = vmul.f32 %v4740_v52, %v14147_v61  ;;  %v5002_v25 = vadd.f32 %v5001_v49, %v5000_v28  ;;  %v14152_v9 = vld [vmem:[#allocation22_spill] sm:$0xff]  ;;  %v14154_v61 = vld [vmem:[#allocation99_spill] sm:$0xff] }
 0x26b   :  { %v8120_v60 = vpop.eup %8119  ;;  %v4748_v6 = vmul.f32 %v8116_v39, %v14146_v16  ;;  %v5020_v51 = vrot.slane %v5019_v32, 4  ;;  %v4749_v37 = vmul.f32 %v8118_v54, %v14148_v13  ;;  %v4869_v8 = vmul.f32 %v4741_v44, %v14149_v57  ;;  %v14155_v28 = vld [vmem:[#allocation18_spill] sm:$0xff]  ;;  %v14156_v16 = vld [vmem:[#allocation25_spill] sm:$0xff]  ;;  %v14157_v44 = vld [vmem:[#allocation27_spill] sm:$0xff] }
 0x26c   :  { %v11097_v24 = vpop.eup %8121  ;;  %v4872_v22 = vmul.f32 %v4744_v10, %v14150_v46  ;;  %v5015_v35 = vrot.slane %v5014_v55, 2  ;;  %v4873_v43 = vmul.f32 %v4745_v58, %v14151_v18  ;;  %v4874_v0 = vmul.f32 %v4746_v33, %v14152_v9  ;;  %v14158_v18 = vld [vmem:[#allocation24_spill] sm:$0xff] }
 0x26d   :  { %v4996_v11 = vrot.slane %v4995_v15, 1  ;;  %v5009_v47 = vadd.f32 %v5008_v1, %v5007_v27  ;;  %v4750_v49 = vmul.f32 %v8120_v60, %v14154_v61  ;;  %v4870_v52 = vmul.f32 %v4742_v59, %v14155_v28 }
 0x26e   :  { %v11104_v39 = vpop.eup %8123  ;;  %v4875_v42 = vmul.f32 %v4747_v14, %v14156_v16  ;;  %v5047_v54 = vsel %vm2302_vm1, %v4871_v53, 0.0  ;;  %v4876_v13 = vmul.f32 %v4748_v6, %v14157_v44  ;;  %v5003_v10 = vrot.slane %v5002_v25, 1 }
 0x26f   :  { %14153 = vst [vmem:[#allocation60_spill] sm:$0xff] %v11104_v39  ;;  %v5021_v57 = vadd.f32 %v5020_v51, %v5019_v32  ;;  %v5026_v58 = vsel %vm2302_vm1, %v4868_v56, 0.0  ;;  %v4877_v33 = vmul.f32 %v4749_v37, %v14158_v18  ;;  %v5016_v46 = vadd.f32 %v5015_v35, %v5014_v55  ;;  %v14160_v56 = vld [vmem:[#allocation26_spill] sm:$0xff] }
 0x270   :  { %v5027_v1 = vrot.slane %v5026_v58, 4  ;;  %v5033_v27 = vsel %vm2302_vm1, %v4869_v8, 0.0  ;;  %v11114_v9 = vpop.eup %8125  ;;  %v11116_v60 = vadd.f32 %v4996_v11, %v4995_v15  ;;  %v5010_v59 = vrot.slane %v5009_v47, 1 }
 0x271   :  { %14159 = vst [vmem:[#allocation13_spill] sm:$0xff] %v11114_v9  ;;  %v5022_v14 = vrot.slane %v5021_v57, 2  ;;  %v5034_v61 = vrot.slane %v5033_v27, 4  ;;  %v5040_v6 = vsel %vm2302_vm1, %v4870_v52, 0.0  ;;  %v5048_v28 = vrot.slane %v5047_v54, 4 }
 0x272   :  { %v5028_v53 = vadd.f32 %v5027_v1, %v5026_v58  ;;  %v5054_v32 = vsel %vm2302_vm1, %v4872_v22, 0.0  ;;  %v4878_v51 = vmul.f32 %v4750_v49, %v14160_v56  ;;  %v11121_v37 = vadd.f32 %v5003_v10, %v5002_v25 }
 0x273   :  { %v5023_v55 = vadd.f32 %v5022_v14, %v5021_v57  ;;  %v5035_v35 = vadd.f32 %v5034_v61, %v5033_v27  ;;  %v5041_v16 = vrot.slane %v5040_v6, 4  ;;  %v5049_v44 = vadd.f32 %v5048_v28, %v5047_v54  ;;  %v11129_v27 = vpop.f32.mrf.mxu0 }
 0x274   :  { %v5029_v8 = vrot.slane %v5028_v53, 2  ;;  %v5055_v15 = vrot.slane %v5054_v32, 4  ;;  %v11123_v11 = vadd.f32 %v5010_v59, %v5009_v47  ;;  %v5017_v18 = vrot.slane %v5016_v46, 1 }
 0x275   :  { %v5036_v39 = vrot.slane %v5035_v35, 2  ;;  %v5061_v58 = vsel %vm2302_vm1, %v4873_v43, 0.0  ;;  %v5042_v1 = vadd.f32 %v5041_v16, %v5040_v6  ;;  %v5050_v26 = vrot.slane %v5049_v44, 2 }
 0x276   :  { %v5030_v52 = vadd.f32 %v5029_v8, %v5028_v53  ;;  %v5056_v22 = vadd.f32 %v5055_v15, %v5054_v32  ;;  %v11126_v48 = vpop.eup %8127  ;;  %v5024_v25 = vrot.slane %v5023_v55, 1  ;;  %v5062_v10 = vrot.slane %v5061_v58, 4  ;;  %v11136_v15 = vpop.f32.mrf.mxu0 }
 0x277   :  { %14161 = vst [vmem:[#allocation15_spill] sm:$0xff] %v11126_v48  ;;  %v5037_v49 = vadd.f32 %v5036_v39, %v5035_v35  ;;  %v5068_v57 = vsel %vm2302_vm1, %v4874_v0, 0.0  ;;  %v5043_v47 = vrot.slane %v5042_v1, 2  ;;  %v5051_v59 = vadd.f32 %v5050_v26, %v5049_v44 }
 0x278   :  { %v5031_v54 = vrot.slane %v5030_v52, 1  ;;  %v5057_v14 = vrot.slane %v5056_v22, 2  ;;  %v11131_v61 = vadd.f32 %v5017_v18, %v5016_v46  ;;  %v5063_v43 = vadd.f32 %v5062_v10, %v5061_v58 }
 0x279   :  { %v5069_v53 = vrot.slane %v5068_v57, 4  ;;  %v5075_v6 = vsel %vm2302_vm1, %v4875_v42, 0.0  ;;  %v5038_v28 = vrot.slane %v5037_v49, 1  ;;  %v5044_v32 = vadd.f32 %v5043_v47, %v5042_v1 }
 0x27a   :  { %v5052_v56 = vrot.slane %v5051_v59, 1  ;;  %v5058_v8 = vadd.f32 %v5057_v14, %v5056_v22  ;;  %v11134_v39 = vadd.f32 %v5024_v25, %v5023_v55  ;;  %v5064_v35 = vrot.slane %v5063_v43, 2  ;;  %v11147_v14 = vpop.f32.mrf.mxu0 }
 0x27b   :  { %v5070_v0 = vadd.f32 %v5069_v53, %v5068_v57  ;;  %v5076_v16 = vrot.slane %v5075_v6, 4  ;;  %v11138_v41 = vadd.f32 %v5031_v54, %v5030_v52  ;;  %v5045_v26 = vrot.slane %v5044_v32, 1 }
 0x27c   :  { %v5059_v46 = vrot.slane %v5058_v8, 1  ;;  %v5082_v44 = vsel %vm2302_vm1, %v4876_v13, 0.0  ;;  %v5065_v18 = vadd.f32 %v5064_v35, %v5063_v43  ;;  %v11141_v1 = vadd.f32 %v5038_v28, %v5037_v49  ;;  %v7949_v13 = vld [vmem:[%s13851_s3 + $0x8] sm:$0xff]  }
 0x27d   :  { %v5071_v58 = vrot.slane %v5070_v0, 2  ;;  %v5077_v42 = vadd.f32 %v5076_v16, %v5075_v6  ;;  %v5083_v10 = vrot.slane %v5082_v44, 4  ;;  %v11143_v22 = vadd.f32 %v5052_v56, %v5051_v59  ;;  %7879 = vmatprep.subr.bf16.mxu1 %v7949_v13 }
 0x27e   :  { %v5089_v55 = vsel %vm2302_vm1, %v4877_v33, 0.0  ;;  %v5096_v25 = vsel %vm2302_vm1, %v4878_v51, 0.0  ;;  %v5066_v57 = vrot.slane %v5065_v18, 1  ;;  %v5046_v43 = vadd.f32 %v5045_v26, %v5044_v32  ;;  %7880 = vmatpush3.bf16.msra.mxu1 %v7949_v13  ;;  %v11158_v26 = vpop.f32.mrf.mxu1 }
 0x27f   :  { %v5072_v47 = vadd.f32 %v5071_v58, %v5070_v0  ;;  %v5078_v52 = vrot.slane %v5077_v42, 2  ;;  %v5084_v54 = vadd.f32 %v5083_v10, %v5082_v44  ;;  %v5060_v53 = vadd.f32 %v5059_v46, %v5058_v8  ;;  %v11160_v46 = vpop.f32.mrf.mxu0 }
 0x280   :  { %v5090_v49 = vrot.slane %v5089_v55, 4  ;;  %v5097_v6 = vrot.slane %v5096_v25, 4  ;;  %v5888_v33 = vpack.c.bf16 %v11116_v60, %v11116_v60  ;;  %v5067_v51 = vadd.f32 %v5066_v57, %v5065_v18  ;;  %v7950_v60 = vld [vmem:[%s13851_s3] sm:$0xff]  }
 0x281   :  { %v5073_v59 = vrot.slane %v5072_v47, 1  ;;  %v5079_v28 = vadd.f32 %v5078_v52, %v5077_v42  ;;  %v5085_v56 = vrot.slane %v5084_v54, 2  ;;  %v5889_v16 = vpack.c.bf16 %v11121_v37, %v11121_v37  ;;  %7881 = vmatprep.subr.bf16.mxu1 %v7950_v60 }
 0x282   :  { %v5091_v35 = vadd.f32 %v5090_v49, %v5089_v55  ;;  %v5098_v0 = vadd.f32 %v5097_v6, %v5096_v25  ;;  %v5890_v8 = vpack.c.bf16 %v11123_v11, %v11123_v11  ;;  %v5891_v37 = vpack.c.bf16 %v11131_v61, %v11131_v61  ;;  %7882 = vmatpush3.bf16.msra.mxu1 %v7950_v60 }
 0x283   :  { %v5074_v44 = vadd.f32 %v5073_v59, %v5072_v47  ;;  %v5080_v58 = vrot.slane %v5079_v28, 1  ;;  %v5086_v32 = vadd.f32 %v5085_v56, %v5084_v54  ;;  %v5892_v10 = vpack.c.bf16 %v11134_v39, %v11134_v39  ;;  %v11175_v59 = vpop.f32.mrf.mxu1 }
 0x284   :  { %v5092_v18 = vrot.slane %v5091_v35, 2  ;;  %v5099_v42 = vrot.slane %v5098_v0, 2  ;;  %v5893_v11 = vpack.c.bf16 %v11138_v41, %v11138_v41  ;;  %v5894_v57 = vpack.c.bf16 %v11141_v1, %v11141_v1 }
 0x285   :  { %v5081_v55 = vadd.f32 %v5080_v58, %v5079_v28  ;;  %v5087_v25 = vrot.slane %v5086_v32, 1  ;;  %v5895_v54 = vpack.c.bf16 %v5046_v43, %v5046_v43  ;;  %v5896_v13 = vpack.c.bf16 %v11143_v22, %v11143_v22  ;;  %v11177_v28 = vpop.f32.mrf.mxu0  ;;  %v11181_v7 = vpop.f32.mrf.mxu1 }
 0x286   :  { %v5093_v47 = vadd.f32 %v5092_v18, %v5091_v35  ;;  %v5100_v52 = vadd.f32 %v5099_v42, %v5098_v0  ;;  %v5897_v49 = vpack.c.bf16 %v5060_v53, %v5060_v53  ;;  %v5898_v6 = vpack.c.bf16 %v5067_v51, %v5067_v51 }
 0x287   :  { %v5088_v61 = vadd.f32 %v5087_v25, %v5086_v32  ;;  %v5899_v39 = vpack.c.bf16 %v5074_v44, %v5074_v44  ;;  %v5900_v58 = vpack.c.bf16 %v5081_v55, %v5081_v55  ;;  %v6152_v1 = vunpack.c.l.b16 %v5888_v33  ;;  %v11183_v62 = vpop.f32.mrf.mxu0 }
 0x288   :  { %v5094_v41 = vrot.slane %v5093_v47, 1  ;;  %v5101_v56 = vrot.slane %v5100_v52, 1  ;;  %v6153_v43 = vunpack.c.l.b16 %v5889_v16  ;;  %v6154_v0 = vunpack.c.l.b16 %v5890_v8 }
 0x289   :  { %v5901_v35 = vpack.c.bf16 %v5088_v61, %v5088_v61  ;;  %v6155_v18 = vunpack.c.l.b16 %v5891_v37  ;;  %v6156_v32 = vunpack.c.l.b16 %v5892_v10  ;;  %v6157_v53 = vunpack.c.l.b16 %v5893_v11  ;;  %v11186_v10 = vpop.xlane.xlu0 %2421 }
 0x28a   :  { %v5095_v22 = vadd.f32 %v5094_v41, %v5093_v47  ;;  %v5102_v60 = vadd.f32 %v5101_v56, %v5100_v52  ;;  %v6158_v51 = vunpack.c.l.b16 %v5894_v57  ;;  %v6159_v44 = vunpack.c.l.b16 %v5895_v54  ;;  %v11190_v52 = vpop.f32.mrf.mxu1  ;;  %v862_v54 = vpop.f32.mrf.mxu0 }
 0x28b   :  { %v6160_v42 = vunpack.c.l.b16 %v5896_v13  ;;  %v6161_v25 = vunpack.c.l.b16 %v5897_v49  ;;  %v6162_v2 = vunpack.c.l.b16 %v5898_v6  ;;  %v6163_v12 = vunpack.c.l.b16 %v5899_v39 }
 0x28c   :  { %v5902_v55 = vpack.c.bf16 %v5095_v22, %v5095_v22  ;;  %v5903_v33 = vpack.c.bf16 %v5102_v60, %v5102_v60  ;;  %v6164_v61 = vunpack.c.l.b16 %v5900_v58  ;;  %v6165_v16 = vunpack.c.l.b16 %v5901_v35 }
 0x28d   :  { %v6281_v37 = vsel %vm6280_vm2, %v6153_v43, %v6152_v1  ;;  %v6294_v47 = vsel %vm6280_vm2, %v6161_v25, %v6160_v42  ;;  %v849_v6 = vadd.f32 %v11129_v27, %v9052_v17  ;;  %v14162_v56 = vrot.slane %v10982_v31, %v9057_v19  ;;  %v11212_v31 = vpop.f32.mrf.mxu1 }
 0x28e   :  { %v6166_v8 = vunpack.c.l.b16 %v5902_v55  ;;  %v6167_v11 = vunpack.c.l.b16 %v5903_v33  ;;  %v6283_v57 = vsel %vm6282_vm3, %v6154_v0, %v6281_v37  ;;  %v6295_v49 = vsel %vm6282_vm3, %v6162_v2, %v6294_v47  ;;  %v11206_v0 = vpop.xlane.xlu1 %2427 }
 0x28f   :  { %v6285_v13 = vsel %vm6284_vm4, %v6155_v18, %v6283_v57  ;;  %v6296_v41 = vsel %vm6284_vm4, %v6163_v12, %v6295_v49  ;;  %v2246_v58 = vmul.f32 %v14162_v56, %v11017_v5  ;;  %v4051_v1 = vrot.slane %v11091_v29, 2  ;;  %v864_v5 = vpop.f32.mrf.mxu0 }
 0x290   :  { %v6287_v39 = vsel %vm6286_vm5, %v6156_v32, %v6285_v13  ;;  %v6297_v43 = vsel %vm6286_vm5, %v6164_v61, %v6296_v41  ;;  %v2915_v2 = vrot.slane %v11179_v45, 4  ;;  %v1961_v12 = vrot.slane %v849_v6, %v9057_v19  ;;  %v11227_v61 = vpop.xlane.xlu0 %2424 }
 0x291   :  { %v6289_v35 = vsel %vm6288_vm6, %v6157_v53, %v6287_v39  ;;  %v6298_v18 = vsel %vm6288_vm6, %v6165_v16, %v6297_v43  ;;  %v2519_v22 = vsel %vm2302_vm1, %v2246_v58, 0.0  ;;  %v851_v42 = vadd.f32 %v11136_v15, %v9061_v21  ;;  %v868_v47 = vpop.f32.mrf.mxu0 }
 0x292   :  { %v6291_v27 = vsel %vm6290_vm7, %v6158_v51, %v6289_v35  ;;  %v6299_v32 = vsel %vm6290_vm7, %v6166_v8, %v6298_v18  ;;  %2520 = vadd.xlane.f32.xlu0 %v2519_v22  ;;  %v2916_v53 = vmax.f32 %v11179_v45, %v2915_v2  ;;  %v4055_v51 = vrot.slane %v11114_v9, 4  ;;  %v11245_v39 = vpop.xlane.xlu1 %2430 }
 0x293   :  { %v6293_v60 = vsel %vm6292_vm8, %v6159_v44, %v6291_v27  ;;  %v6300_v25 = vsel %vm6292_vm8, %v6167_v11, %v6299_v32  ;;  %v853_v55 = vadd.f32 %v11147_v14, %v9052_v17  ;;  %v14163_v33 = vrot.slane %v11030_v38, %v9057_v19  ;;  %v870_v27 = vpop.f32.mrf.mxu0 }
 0x294   :  { %v4052_v16 = vadd.f32 %v4051_v1, %v11091_v29  ;;  %v11230_v8 = vpack.c.b16 %v6300_v25, %v6293_v60  ;;  %v2917_v37 = vrot.slane %v2916_v53, 2  ;;  %v2921_v15 = vrot.slane %v11186_v10, 4 }
 0x295   :  { %v2247_v44 = vmul.f32 %v14163_v33, %v11061_v40  ;;  %v1965_v57 = vrot.slane %v853_v55, %v9057_v19  ;;  %v855_v14 = vadd.f32 %v11160_v46, %v9061_v21  ;;  %v859_v38 = vadd.f32 %v11177_v28, %v9052_v17  ;;  %v11239_v40 = vpop.f32.mrf.mxu1 }
 0x296   :  { %14164 = vst [vmem:[#allocation12_spill] sm:$0xff] %v11230_v8  ;;  %7883 = vmatprep.mubr.msk.bf16.mxu1 %vm2302_vm1, %v11230_v8  ;;  %v2918_v29 = vmax.f32 %v2916_v53, %v2917_v37  ;;  %v2922_v13 = vmax.f32 %v11186_v10, %v2921_v15  ;;  %v2248_v49 = vmul.f32 %v1961_v12, %v851_v42  ;;  %v2927_v6 = vrot.slane %v11227_v61, 4 }
 0x297   :  { %v2522_v11 = vsel %vm2302_vm1, %v2247_v44, 0.0  ;;  %v11249_v46 = vmul.f32 %v11046_v20, %v10892_v30  ;;  %8129 = vrcp.f32 %v11063_v23  ;;  %v4056_v28 = vadd.f32 %v11114_v9, %v4055_v51  ;;  %v11258_v2 = vpop.f32.mrf.mxu1  ;;  %v11270_v44 = vpop.xlane.xlu1 %2433 }
 0x298   :  { %2523 = vadd.xlane.f32.xlu1 %v2522_v11  ;;  %v1969_v41 = vrot.slane %v859_v38, %v9057_v19  ;;  %v2919_v56 = vrot.slane %v2918_v29, 1  ;;  %v2923_v58 = vrot.slane %v2922_v13, 2  ;;  %v2525_v1 = vsel %vm2302_vm1, %v2248_v49, 0.0 }
 0x299   :  { %v2928_v35 = vmax.f32 %v11227_v61, %v2927_v6  ;;  %v861_v43 = vadd.f32 %v11183_v62, %v9061_v21  ;;  %v863_v30 = vadd.f32 %v862_v54, %v9052_v17  ;;  %v2249_v20 = vmul.f32 %v1965_v57, %v855_v14  ;;  %v11273_v37 = vpop.f32.mrf.mxu1  ;;  %v872_v14 = vpop.f32.mrf.mxu0 }
 0x29a   :  { %v2933_v23 = vrot.slane %v11206_v0, 4  ;;  %v14165_v18 = vrot.slane %v11065_v4, 1  ;;  %v4053_v22 = vrot.slane %v4052_v16, 1  ;;  %v2920_v60 = vmax.f32 %v2918_v29, %v2919_v56 }
 0x29b   :  { %v2929_v32 = vrot.slane %v2928_v35, 2  ;;  %v4057_v53 = vrot.slane %v4056_v28, 2  ;;  %v4061_v42 = vrot.slane %v11126_v48, 4  ;;  %v2528_v62 = vsel %vm2302_vm1, %v2249_v20, 0.0 }
 0x29c   :  { %v4048_v12 = vadd.f32 %v14165_v18, %v11065_v4  ;;  %2526 = vadd.xlane.f32.xlu1 %v2525_v1  ;;  %v2934_v51 = vmax.f32 %v11206_v0, %v2933_v23  ;;  %v3493_v54 = vsub.f32 %v11179_v45, %v2920_v60  ;;  %v2924_v25 = vmax.f32 %v2922_v13, %v2923_v58  ;;  %v874_v23 = vpop.f32.mrf.mxu0 }
 0x29d   :  { %v2930_v55 = vmax.f32 %v2928_v35, %v2929_v32  ;;  %v865_v33 = vadd.f32 %v864_v5, %v9061_v21  ;;  %v1973_v4 = vrot.slane %v863_v30, %v9057_v19  ;;  %v2250_v57 = vmul.f32 %v1969_v41, %v861_v43  ;;  %v11280_v43 = vpop.f32.mrf.mxu1 }
 0x29e   :  { %v2935_v15 = vrot.slane %v2934_v51, 2  ;;  %v2939_v11 = vrot.slane %v11245_v39, 4  ;;  %8131 = vrcp.f32 %v4048_v12  ;;  %v4054_v38 = vadd.f32 %v4053_v22, %v4052_v16  ;;  %v11287_v22 = vpop.xlane.xlu1 %2436 }
 0x29f   :  { %v2931_v29 = vrot.slane %v2930_v55, 1  ;;  %v869_v45 = vadd.f32 %v868_v47, %v9052_v17  ;;  %v4058_v13 = vadd.f32 %v4057_v53, %v4056_v28  ;;  %v2531_v5 = vsel %vm2302_vm1, %v2250_v57, 0.0  ;;  %v878_v57 = vpop.f32.mrf.mxu0 }
 0x2a0   :  { %2529 = vadd.xlane.f32.xlu1 %v2528_v62  ;;  %v2936_v49 = vmax.f32 %v2934_v51, %v2935_v15  ;;  %v2940_v6 = vmax.f32 %v11245_v39, %v2939_v11  ;;  %v4062_v56 = vadd.f32 %v11126_v48, %v4061_v42  ;;  %v3659_v58 = vmul.f32 1.442695, %v3493_v54  ;;  %v14198_v48 = vld [vmem:[#allocation50_spill] sm:$0xff] }
 0x2a1   :  { %v2925_v1 = vrot.slane %v2924_v25, 1  ;;  %v2932_v41 = vmax.f32 %v2930_v55, %v2931_v29  ;;  %v873_v16 = vadd.f32 %v872_v14, %v9052_v17  ;;  %v2251_v20 = vmul.f32 %v1973_v4, %v865_v33  ;;  %v11296_v4 = vpop.f32.mrf.mxu1 }
 0x2a2   :  { %v2937_v35 = vrot.slane %v2936_v49, 1  ;;  %v2941_v30 = vrot.slane %v2940_v6, 2  ;;  %v1977_v28 = vrot.slane %v869_v45, %v9057_v19  ;;  %v871_v18 = vadd.f32 %v870_v27, %v9061_v21 }
 0x2a3   :  { %v3495_v47 = vsub.f32 %v11227_v61, %v2932_v41  ;;  %v2945_v12 = vrot.slane %v11270_v44, 4  ;;  %v1981_v53 = vrot.slane %v873_v16, %v9057_v19  ;;  %v2534_v42 = vsel %vm2302_vm1, %v2251_v20, 0.0  ;;  %v880_v16 = vpop.f32.mrf.mxu0 }
 0x2a4   :  { %2532 = vadd.xlane.f32.xlu1 %v2531_v5  ;;  %v2938_v60 = vmax.f32 %v2936_v49, %v2937_v35  ;;  %v2942_v32 = vmax.f32 %v2940_v6, %v2941_v30  ;;  %v11291_v62 = vpop.eup %8129  ;;  %8133 = vrcp.f32 %v4054_v38  ;;  %v875_v54 = vadd.f32 %v874_v23, %v9061_v21  ;;  %v11301_v35 = vpop.xlane.xlu1 %2439 }
 0x2a5   :  { %14166 = vst [vmem:[#allocation45_spill] sm:$0xff] %v11291_v62  ;;  %v3663_v51 = vmul.f32 1.442695, %v3495_v47  ;;  %v2946_v61 = vmax.f32 %v11270_v44, %v2945_v12  ;;  %v4059_v55 = vrot.slane %v4058_v13, 1  ;;  %v4063_v27 = vrot.slane %v4062_v56, 2  ;;  %v11308_v30 = vpop.f32.mrf.mxu1 }
 0x2a6   :  { %v3496_v33 = vsub.f32 %v11206_v0, %v2938_v60  ;;  %v2943_v15 = vrot.slane %v2942_v32, 1  ;;  %v2926_v11 = vmax.f32 %v2924_v25, %v2925_v1  ;;  %v2252_v29 = vmul.f32 %v1977_v28, %v871_v18 }
 0x2a7   :  { %8135 = vpow2.f32 %v3663_v51  ;;  %v2947_v14 = vrot.slane %v2946_v61, 2  ;;  %v2253_v49 = vmul.f32 %v1981_v53, %v875_v54  ;;  %v879_v6 = vadd.f32 %v878_v57, %v9052_v17  ;;  %v14169_v54 = vld [vmem:[#allocation47_spill] sm:$0xff] }
 0x2a8   :  { %2535 = vadd.xlane.f32.xlu1 %v2534_v42  ;;  %8137 = vpow2.f32 %v3659_v58  ;;  %v3665_v38 = vmul.f32 1.442695, %v3496_v33  ;;  %v2944_v45 = vmax.f32 %v2942_v32, %v2943_v15  ;;  %v2537_v41 = vsel %vm2302_vm1, %v2252_v29, 0.0  ;;  %v882_v42 = vpop.f32.mrf.mxu0 }
 0x2a9   :  { %v2948_v5 = vmax.f32 %v2946_v61, %v2947_v14  ;;  %v2951_v0 = vrot.slane %v11287_v22, 4  ;;  %v11305_v25 = vmul.f32 %v11097_v24, %v10927_v3  ;;  %v4060_v1 = vadd.f32 %v4059_v55, %v4058_v13  ;;  %v14168_v24 = vld [vmem:[#allocation49_spill] sm:$0xff] }
 0x2aa   :  { %8139 = vpow2.f32 %v3665_v38  ;;  %v3497_v58 = vsub.f32 %v11245_v39, %v2944_v45  ;;  %v11310_v20 = vadd.f32 %v4063_v27, %v4062_v56  ;;  %v3494_v23 = vsub.f32 %v11186_v10, %v2926_v11  ;;  %v11321_v10 = vpop.f32.mrf.mxu1 }
 0x2ab   :  { %v2949_v47 = vrot.slane %v2948_v5, 1  ;;  %v2952_v28 = vmax.f32 %v11287_v22, %v2951_v0  ;;  %v11314_v18 = vpop.eup %8131  ;;  %v2540_v3 = vsel %vm2302_vm1, %v2253_v49, 0.0  ;;  %v4499_v13 = vrot.slane %v14168_v24, 4 }
 0x2ac   :  { %2538 = vadd.xlane.f32.xlu1 %v2537_v41  ;;  %14167 = vst [vmem:[#allocation68_spill] sm:$0xff] %v11314_v18  ;;  %v3667_v12 = vmul.f32 1.442695, %v3497_v58  ;;  %v2957_v39 = vrot.slane %v11301_v35, 4  ;;  %v1985_v32 = vrot.slane %v879_v6, %v9057_v19  ;;  %v881_v53 = vadd.f32 %v880_v16, %v9061_v21 }
 0x2ad   :  { %v2950_v60 = vmax.f32 %v2948_v5, %v2949_v47  ;;  %v2953_v56 = vrot.slane %v2952_v28, 2  ;;  %v4500_v51 = vadd.f32 %v14168_v24, %v4499_v13  ;;  %v4487_v55 = vrot.slane %v14169_v54, 4 }
 0x2ae   :  { %8141 = vpow2.f32 %v3667_v12  ;;  %v2958_v61 = vmax.f32 %v11301_v35, %v2957_v39  ;;  %v3661_v27 = vmul.f32 1.442695, %v3494_v23  ;;  %v883_v49 = vadd.f32 %v882_v42, %v9052_v17 }
 0x2af   :  { %8143 = vrcp.f32 %v4060_v1  ;;  %v3498_v33 = vsub.f32 %v11270_v44, %v2950_v60  ;;  %v2954_v15 = vmax.f32 %v2952_v28, %v2953_v56  ;;  %v4501_v11 = vrot.slane %v4500_v51, 2  ;;  %v11336_v44 = vpop.f32.mrf.mxu1  ;;  %v884_v28 = vpop.f32.mrf.mxu0 }
 0x2b0   :  { %2541 = vadd.xlane.f32.xlu1 %v2540_v3  ;;  %v2959_v14 = vrot.slane %v2958_v61, 2  ;;  %v4488_v29 = vadd.f32 %v14169_v54, %v4487_v55  ;;  %v2254_v5 = vmul.f32 %v1985_v32, %v881_v53  ;;  %v11334_v41 = vadd.f32 %v11158_v26, %v9657_v50  ;;  %v11360_v55 = vpop.xlane.xlu1 %2442 }
 0x2b1   :  { %v3669_v38 = vmul.f32 1.442695, %v3498_v33  ;;  %v2955_v45 = vrot.slane %v2954_v15, 1  ;;  %v11330_v6 = vpop.eup %8133  ;;  %v4502_v0 = vadd.f32 %v4501_v11, %v4500_v51  ;;  %v11340_v16 = vadd.f32 %v11175_v59, %v9657_v50  ;;  %v11357_v56 = vpop.f32.mrf.mxu1 }
 0x2b2   :  { %14170 = vst [vmem:[#allocation14_spill] sm:$0xff] %v11330_v6  ;;  %14171 = vst [vmem:[#allocation37_spill] sm:$0xff] %v11334_v41  ;;  %v2960_v1 = vmax.f32 %v2958_v61, %v2959_v14  ;;  %v4489_v58 = vrot.slane %v4488_v29, 2  ;;  %v11344_v23 = vadd.f32 %v11181_v7, %v9657_v50  ;;  %8145 = vpow2.f32 %v3661_v27 }
 0x2b3   :  { %14172 = vst [vmem:[#allocation39_spill] sm:$0xff] %v11340_v16  ;;  %v2956_v47 = vmax.f32 %v2954_v15, %v2955_v45  ;;  %v4503_v26 = vrot.slane %v4502_v0, 1  ;;  %v2543_v39 = vsel %vm2302_vm1, %v2254_v5, 0.0  ;;  %v11353_v59 = vadd.f32 %v11190_v52, %v9657_v50  ;;  %v14179_v15 = vld [vmem:[#allocation53_spill] sm:$0xff] }
 0x2b4   :  { %14173 = vst [vmem:[#allocation17_spill] sm:$0xff] %v11344_v23  ;;  %v11346_v12 = vpop.eup %8135  ;;  %v2961_v3 = vrot.slane %v2960_v1, 1  ;;  %v4490_v13 = vadd.f32 %v4489_v58, %v4488_v29  ;;  %8147 = vpow2.f32 %v3669_v38  ;;  %v1989_v32 = vrot.slane %v883_v49, %v9057_v19  ;;  %2544 = vadd.xlane.f32.xlu0 %v2543_v39  ;;  %v888_v49 = vpop.f32.mrf.mxu0 }
 0x2b5   :  { %14174 = vst [vmem:[#allocation54_spill] sm:$0xff] %v11346_v12  ;;  %v11349_v60 = vpop.eup %8137  ;;  %14176 = vst [vmem:[#allocation59_spill] sm:$0xff] %v11353_v59  ;;  %v3499_v7 = vsub.f32 %v11287_v22, %v2956_v47  ;;  %v4504_v53 = vadd.f32 %v4503_v26, %v4502_v0  ;;  %v885_v51 = vadd.f32 %v884_v28, %v9061_v21  ;;  %v4079_v22 = vrot.slane %v11346_v12, 4 }
 0x2b6   :  { %14175 = vst [vmem:[#allocation80_spill] sm:$0xff] %v11349_v60  ;;  %v2962_v42 = vmax.f32 %v2960_v1, %v2961_v3  ;;  %v4491_v61 = vrot.slane %v4490_v13, 1  ;;  %v11366_v52 = vadd.f32 %v11212_v31, %v9657_v50  ;;  %v4505_v11 = vrot.slane %v14179_v15, 4 }
 0x2b7   :  { %v11362_v27 = vpop.eup %8139  ;;  %v3671_v33 = vmul.f32 1.442695, %v3499_v7  ;;  %v11372_v14 = vadd.f32 %v11239_v40, %v9657_v50  ;;  %8149 = vrcp.f32 %v4504_v53  ;;  %v2963_v5 = vrot.slane %v11360_v55, 4  ;;  %v1570_v40 = vpop.f32.mrf.mxu1 }
 0x2b8   :  { %14177 = vst [vmem:[#allocation83_spill] sm:$0xff] %v11362_v27  ;;  %14178 = vst [vmem:[#allocation51_spill] sm:$0xff] %v11366_v52  ;;  %v4085_v29 = vrot.slane %v11362_v27, 4  ;;  %v4492_v38 = vadd.f32 %v4491_v61, %v4490_v13  ;;  %v3500_v45 = vsub.f32 %v11301_v35, %v2962_v42  ;;  %v4506_v31 = vadd.f32 %v14179_v15, %v4505_v11  ;;  %v14196_v52 = vld [vmem:[#allocation74_spill] sm:$0xff] }
 0x2b9   :  { %14180 = vst [vmem:[#allocation64_spill] sm:$0xff] %v11372_v14  ;;  %8151 = vpow2.f32 %v3671_v33  ;;  %v4067_v0 = vrot.slane %v11349_v60, 4  ;;  %v11381_v1 = vadd.f32 %v11258_v2, %v9657_v50  ;;  %v2255_v58 = vmul.f32 %v1989_v32, %v885_v51  ;;  %v14186_v32 = vld [vmem:[#allocation48_spill] sm:$0xff]  ;;  %v7861_v11 = vpop.f32.mrf.mxu1 }
 0x2ba   :  { %8153 = vrcp.f32 %v4492_v38  ;;  %v4080_v28 = vadd.f32 %v11346_v12, %v4079_v22  ;;  %v11388_v35 = vadd.f32 %v11273_v37, %v9657_v50  ;;  %v4507_v26 = vrot.slane %v4506_v31, 2  ;;  %v11405_v22 = vpop.xlane.xlu1 %2445  ;;  %v890_v38 = vpop.f32.mrf.mxu0 }
 0x2bb   :  { %14181 = vst [vmem:[#allocation87_spill] sm:$0xff] %v11381_v1  ;;  %v11383_v47 = vpop.eup %8141  ;;  %v2964_v3 = vmax.f32 %v11360_v55, %v2963_v5  ;;  %v11395_v2 = vadd.f32 %v11280_v43, %v9657_v50  ;;  %v889_v7 = vadd.f32 %v888_v49, %v9052_v17  ;;  %v4493_v53 = vrot.slane %v14186_v32, 4 }
 0x2bc   :  { %14182 = vst [vmem:[#allocation55_spill] sm:$0xff] %v11383_v47  ;;  %14183 = vst [vmem:[#allocation69_spill] sm:$0xff] %v11388_v35  ;;  %v11391_v13 = vpop.eup %8143  ;;  %v4091_v39 = vrot.slane %v11383_v47, 4  ;;  %v4086_v42 = vadd.f32 %v11362_v27, %v4085_v29  ;;  %v11403_v37 = vadd.f32 %v11296_v4, %v9657_v50  ;;  %v3673_v51 = vmul.f32 1.442695, %v3500_v45 }
 0x2bd   :  { %14184 = vst [vmem:[#allocation93_spill] sm:$0xff] %v11391_v13  ;;  %14185 = vst [vmem:[#allocation73_spill] sm:$0xff] %v11395_v2  ;;  %v4508_v61 = vadd.f32 %v4507_v26, %v4506_v31  ;;  %v4068_v33 = vadd.f32 %v11349_v60, %v4067_v0  ;;  %v11410_v43 = vadd.f32 %v11308_v30, %v9657_v50  ;;  %v2546_v29 = vsel %vm2302_vm1, %v2255_v58, 0.0 }
 0x2be   :  { %14187 = vst [vmem:[#allocation95_spill] sm:$0xff] %v11403_v37  ;;  %v4494_v49 = vadd.f32 %v14186_v32, %v4493_v53  ;;  %v4081_v5 = vrot.slane %v4080_v28, 2  ;;  %v11416_v4 = vadd.f32 %v11321_v10, %v9657_v50  ;;  %v2965_v31 = vrot.slane %v2964_v3, 2  ;;  %2547 = vadd.xlane.f32.xlu1 %v2546_v29 }
 0x2bf   :  { %14188 = vst [vmem:[#allocation65_spill] sm:$0xff] %v11410_v43  ;;  %v4509_v45 = vrot.slane %v4508_v61, 1  ;;  %v11418_v26 = vpop.eup %8145  ;;  %v4092_v0 = vadd.f32 %v11383_v47, %v4091_v39  ;;  %v1993_v30 = vrot.slane %v889_v7, %v9057_v19  ;;  %v2969_v8 = vrot.slane %v11405_v22, 4 }
 0x2c0   :  { %14189 = vst [vmem:[#allocation21_spill] sm:$0xff] %v11416_v4  ;;  %14190 = vst [vmem:[#allocation77_spill] sm:$0xff] %v11418_v26  ;;  %v4495_v57 = vrot.slane %v4494_v49, 2  ;;  %v4087_v53 = vrot.slane %v4086_v42, 2  ;;  %8155 = vpow2.f32 %v3673_v51  ;;  %v891_v37 = vadd.f32 %v890_v38, %v9061_v21  ;;  %v1583_v4 = vpop.f32.mrf.mxu1 }
 0x2c1   :  { %v4510_v58 = vadd.f32 %v4509_v45, %v4508_v61  ;;  %v11424_v35 = vpop.eup %8147  ;;  %v4069_v10 = vrot.slane %v4068_v33, 2  ;;  %v11428_v29 = vadd.f32 %v11336_v44, %v9657_v50  ;;  %v2970_v39 = vmax.f32 %v11405_v22, %v2969_v8  ;;  %v892_v8 = vpop.f32.mrf.mxu0 }
 0x2c2   :  { %14191 = vst [vmem:[#allocation19_spill] sm:$0xff] %v11424_v35  ;;  %v4496_v43 = vadd.f32 %v4495_v57, %v4494_v49  ;;  %v4073_v7 = vrot.slane %v11418_v26, 4  ;;  %v4082_v2 = vadd.f32 %v4081_v5, %v4080_v28  ;;  %v2966_v14 = vmax.f32 %v2964_v3, %v2965_v31 }
 0x2c3   :  { %14192 = vst [vmem:[#allocation94_spill] sm:$0xff] %v11428_v29  ;;  %8157 = vrcp.f32 %v4510_v58  ;;  %v4093_v51 = vrot.slane %v4092_v0, 2  ;;  %v11434_v61 = vadd.f32 %v11357_v56, %v9657_v50  ;;  %v1592_v38 = vadd.f32 %v7861_v11, %v9657_v50  ;;  %v7862_v56 = vpop.f32.mrf.mxu1 }
 0x2c4   :  { %v4497_v45 = vrot.slane %v4496_v43, 1  ;;  %v8150_v59 = vpop.eup %8149  ;;  %v4088_v44 = vadd.f32 %v4087_v53, %v4086_v42  ;;  %v4097_v29 = vrot.slane %v11424_v35, 4  ;;  %v11439_v57 = vadd.f32 %v1570_v40, %v9657_v50 }
 0x2c5   :  { %14193 = vst [vmem:[#allocation16_spill] sm:$0xff] %v11434_v61  ;;  %v2256_v49 = vmul.f32 %v1993_v30, %v891_v37  ;;  %v4845_v3 = vmul.f32 %v8150_v59, %v14168_v24  ;;  %v1584_v5 = vadd.f32 %v1583_v4, %v9657_v50  ;;  %v2971_v58 = vrot.slane %v2970_v39, 2 }
 0x2c6   :  { %14194 = vst [vmem:[#allocation23_spill] sm:$0xff] %v11439_v57  ;;  %v11441_v28 = vpop.eup %8151  ;;  %v4498_v31 = vadd.f32 %v4497_v45, %v4496_v43  ;;  %v11445_v61 = vadd.f32 %v4069_v10, %v4068_v33  ;;  %v11448_v42 = vadd.f32 %v11418_v26, %v4073_v7  ;;  %v4083_v53 = vrot.slane %v4082_v2, 1  ;;  %v1586_v7 = vpop.f32.mrf.mxu1 }
 0x2c7   :  { %14195 = vst [vmem:[#allocation20_spill] sm:$0xff] %v11441_v28  ;;  %v8154_v11 = vpop.eup %8153  ;;  %v2967_v40 = vrot.slane %v2966_v14, 1  ;;  %v4094_v57 = vadd.f32 %v4093_v51, %v4092_v0  ;;  %v4973_v1 = vmul.f32 %v4845_v3, %v1592_v38  ;;  %v11452_v30 = vadd.f32 %v892_v8, %v9052_v17  ;;  %v11460_v8 = vpop.xlane.xlu0 %2448 }
 0x2c8   :  { %v4843_v37 = vmul.f32 %v8154_v11, %v14169_v54  ;;  %v4089_v24 = vrot.slane %v4088_v44, 1  ;;  %v4098_v59 = vadd.f32 %v11424_v35, %v4097_v29  ;;  %v4103_v43 = vrot.slane %v11441_v28, 4 }
 0x2c9   :  { %v2549_v33 = vsel %vm2302_vm1, %v2256_v49, 0.0  ;;  %v5761_v4 = vsel %vm2302_vm1, %v4973_v1, 0.0  ;;  %8159 = vrcp.f32 %v4498_v31  ;;  %v2972_v45 = vmax.f32 %v2970_v39, %v2971_v58  ;;  %v894_v49 = vpop.f32.mrf.mxu0 }
 0x2ca   :  { %v4971_v10 = vmul.f32 %v4843_v37, %v1584_v5  ;;  %2550 = vadd.xlane.f32.xlu0 %v2549_v33  ;;  %v4084_v54 = vadd.f32 %v4083_v53, %v4082_v2  ;;  %v1595_v51 = vadd.f32 %v7862_v56, %v9657_v50  ;;  %v2968_v38 = vmax.f32 %v2966_v14, %v2967_v40 }
 0x2cb   :  { %v4095_v29 = vrot.slane %v4094_v57, 1  ;;  %v5762_v3 = vrot.slane %v5761_v4, 4  ;;  %v4523_v1 = vrot.slane %v14196_v52, 4  ;;  %v4099_v5 = vrot.slane %v4098_v59, 2  ;;  %v898_v16 = vpop.f32.mrf.mxu0 }
 0x2cc   :  { %v5747_v11 = vsel %vm2302_vm1, %v4971_v10, 0.0  ;;  %v4104_v31 = vadd.f32 %v11441_v28, %v4103_v43  ;;  %v1587_v39 = vadd.f32 %v1586_v7, %v9657_v50  ;;  %v1997_v2 = vrot.slane %v11452_v30, %v9057_v19 }
 0x2cd   :  { %v11468_v58 = vpop.eup %8155  ;;  %v4090_v14 = vadd.f32 %v4089_v24, %v4088_v44  ;;  %v2973_v56 = vrot.slane %v2972_v45, 1  ;;  %v4524_v53 = vadd.f32 %v14196_v52, %v4523_v1  ;;  %v2975_v40 = vrot.slane %v11460_v8, 4 }
 0x2ce   :  { %14197 = vst [vmem:[#allocation22_spill] sm:$0xff] %v11468_v58  ;;  %8161 = vrcp.f32 %v4084_v54  ;;  %v5748_v37 = vrot.slane %v5747_v11, 4  ;;  %v3501_v33 = vsub.f32 %v11360_v55, %v2968_v38  ;;  %v895_v10 = vadd.f32 %v894_v49, %v9061_v21 }
 0x2cf   :  { %v4096_v0 = vadd.f32 %v4095_v29, %v4094_v57  ;;  %v5763_v7 = vadd.f32 %v5762_v3, %v5761_v4  ;;  %v4525_v23 = vrot.slane %v4524_v53, 2  ;;  %v2976_v30 = vmax.f32 %v11460_v8, %v2975_v40 }
 0x2d0   :  { %v8158_v43 = vpop.eup %8157  ;;  %v4100_v41 = vadd.f32 %v4099_v5, %v4098_v59  ;;  %v4105_v44 = vrot.slane %v4104_v31, 2  ;;  %v4109_v24 = vrot.slane %v11468_v58, 4  ;;  %8163 = vrcp.f32 %v4090_v14 }
 0x2d1   :  { %v4846_v1 = vmul.f32 %v8158_v43, %v14179_v15  ;;  %v2974_v54 = vmax.f32 %v2972_v45, %v2973_v56  ;;  %v4526_v26 = vadd.f32 %v4525_v23, %v4524_v53  ;;  %v2977_v60 = vrot.slane %v2976_v30, 2  ;;  %v900_v53 = vpop.f32.mrf.mxu0 }
 0x2d2   :  { %v5749_v55 = vadd.f32 %v5748_v37, %v5747_v11  ;;  %v3675_v49 = vmul.f32 1.442695, %v3501_v33  ;;  %v899_v57 = vadd.f32 %v898_v16, %v9052_v17  ;;  %8165 = vrcp.f32 %v4096_v0 }
 0x2d3   :  { %v4974_v38 = vmul.f32 %v4846_v1, %v1595_v51  ;;  %v5764_v4 = vrot.slane %v5763_v7, 2  ;;  %v4527_v29 = vrot.slane %v4526_v26, 1  ;;  %v2978_v3 = vmax.f32 %v2976_v30, %v2977_v60 }
 0x2d4   :  { %v4101_v40 = vrot.slane %v4100_v41, 1  ;;  %v4106_v59 = vadd.f32 %v4105_v44, %v4104_v31  ;;  %v4110_v5 = vadd.f32 %v11468_v58, %v4109_v24  ;;  %v4511_v28 = vrot.slane %v14198_v48, 4 }
 0x2d5   :  { %v5768_v15 = vsel %vm2302_vm1, %v4974_v38, 0.0  ;;  %v3502_v23 = vsub.f32 %v11405_v22, %v2974_v54  ;;  %v4528_v45 = vadd.f32 %v4527_v29, %v4526_v26  ;;  %v2979_v11 = vrot.slane %v2978_v3, 1  ;;  %v7865_v54 = vpop.f32.mrf.mxu1 }
 0x2d6   :  { %v8160_v51 = vpop.eup %8159  ;;  %v5750_v14 = vrot.slane %v5749_v55, 2  ;;  %8167 = vpow2.f32 %v3675_v49  ;;  %v2001_v16 = vrot.slane %v899_v57, %v9057_v19  ;;  %v4512_v0 = vadd.f32 %v14198_v48, %v4511_v28  ;;  %v11487_v49 = vpop.xlane.xlu1 %2451 }
 0x2d7   :  { %v5765_v60 = vadd.f32 %v5764_v4, %v5763_v7  ;;  %v4844_v31 = vmul.f32 %v8160_v51, %v14186_v32  ;;  %8169 = vrcp.f32 %v4528_v45  ;;  %v2980_v56 = vmax.f32 %v2978_v3, %v2979_v11 }
 0x2d8   :  { %v4102_v37 = vadd.f32 %v4101_v40, %v4100_v41  ;;  %v4111_v33 = vrot.slane %v4110_v5, 2  ;;  %v5769_v43 = vrot.slane %v5768_v15, 4  ;;  %v4513_v30 = vrot.slane %v4512_v0, 2 }
 0x2d9   :  { %v4107_v22 = vrot.slane %v4106_v59, 1  ;;  %v4972_v26 = vmul.f32 %v4844_v31, %v1587_v39  ;;  %v3677_v44 = vmul.f32 1.442695, %v3502_v23  ;;  %v3503_v24 = vsub.f32 %v11460_v8, %v2980_v56  ;;  %v902_v23 = vpop.f32.mrf.mxu0 }
 0x2da   :  { %v5751_v1 = vadd.f32 %v5750_v14, %v5749_v55  ;;  %v901_v38 = vadd.f32 %v900_v53, %v9061_v21  ;;  %v4514_v28 = vadd.f32 %v4513_v30, %v4512_v0  ;;  %v2257_v7 = vmul.f32 %v1997_v2, %v895_v10  ;;  %v14201_v2 = vld [vmem:[#allocation81_spill] sm:$0xff] }
 0x2db   :  { %v11489_v32 = vpop.eup %8161  ;;  %v5766_v57 = vrot.slane %v5765_v60, 1  ;;  %v5754_v41 = vsel %vm2302_vm1, %v4972_v26, 0.0  ;;  %v1608_v4 = vadd.f32 %v7865_v54, %v9657_v50  ;;  %v3679_v29 = vmul.f32 1.442695, %v3503_v24 }
 0x2dc   :  { %14199 = vst [vmem:[#allocation99_spill] sm:$0xff] %v11489_v32  ;;  %v11493_v39 = vadd.f32 %v4111_v33, %v4110_v5  ;;  %v5770_v3 = vadd.f32 %v5769_v43, %v5768_v15  ;;  %v4515_v8 = vrot.slane %v4514_v28, 1  ;;  %v2552_v55 = vsel %vm2302_vm1, %v2257_v7, 0.0  ;;  %v14204_v43 = vld [vmem:[#allocation56_spill] sm:$0xff] }
 0x2dd   :  { %v4108_v40 = vadd.f32 %v4107_v22, %v4106_v59  ;;  %8171 = vpow2.f32 %v3677_v44  ;;  %2553 = vadd.xlane.f32.xlu0 %v2552_v55  ;;  %v4529_v10 = vrot.slane %v14201_v2, 4  ;;  %v2981_v45 = vrot.slane %v11487_v49, 4  ;;  %v11498_v11 = vpop.eup %8163  ;;  %v904_v44 = vpop.f32.mrf.mxu0 }
 0x2de   :  { %14200 = vst [vmem:[#allocation18_spill] sm:$0xff] %v11493_v39  ;;  %14202 = vst [vmem:[#allocation25_spill] sm:$0xff] %v11498_v11  ;;  %v5752_v51 = vrot.slane %v5751_v1, 1  ;;  %v5755_v14 = vrot.slane %v5754_v41, 4  ;;  %v2258_v0 = vmul.f32 %v2001_v16, %v901_v38  ;;  %v4516_v31 = vadd.f32 %v4515_v8, %v4514_v28  ;;  %v11509_v28 = vpop.xlane.xlu0 %2454 }
 0x2df   :  { %v5767_v5 = vadd.f32 %v5766_v57, %v5765_v60  ;;  %8173 = vpow2.f32 %v3679_v29  ;;  %v4530_v15 = vadd.f32 %v14201_v2, %v4529_v10  ;;  %v2982_v56 = vmax.f32 %v11487_v49, %v2981_v45  ;;  %v11502_v59 = vpop.eup %8165 }
 0x2e0   :  { %14203 = vst [vmem:[#allocation27_spill] sm:$0xff] %v11502_v59  ;;  %v5771_v53 = vrot.slane %v5770_v3, 2  ;;  %8175 = vrcp.f32 %v4516_v31  ;;  %v903_v33 = vadd.f32 %v902_v23, %v9052_v17  ;;  %v4517_v30 = vrot.slane %v14204_v43, 4  ;;  %v14227_v59 = vld [vmem:[#allocation30_spill] sm:$0xff] }
 0x2e1   :  { %8177 = vrcp.f32 %v4102_v37  ;;  %v4531_v26 = vrot.slane %v4530_v15, 2  ;;  %v2983_v16 = vrot.slane %v2982_v56, 2  ;;  %v5753_v60 = vadd.f32 %v5752_v51, %v5751_v1 }
 0x2e2   :  { %v5756_v24 = vadd.f32 %v5755_v14, %v5754_v41  ;;  %v4518_v54 = vadd.f32 %v14204_v43, %v4517_v30  ;;  %v2555_v38 = vsel %vm2302_vm1, %v2258_v0, 0.0  ;;  %8179 = vrcp.f32 %v4108_v40 }
 0x2e3   :  { %v11511_v7 = vpop.eup %8167  ;;  %v5998_v57 = vpack.c.bf16 %v5767_v5, %v5767_v5  ;;  %v4532_v29 = vadd.f32 %v4531_v26, %v4530_v15  ;;  %v2984_v8 = vmax.f32 %v2982_v56, %v2983_v16  ;;  %2556 = vadd.xlane.f32.xlu0 %v2555_v38  ;;  %v5772_v55 = vadd.f32 %v5771_v53, %v5770_v3  ;;  %v1599_v56 = vpop.f32.mrf.mxu1 }
 0x2e4   :  { %14205 = vst [vmem:[#allocation24_spill] sm:$0xff] %v11511_v7  ;;  %v8170_v37 = vpop.eup %8169  ;;  %v2005_v23 = vrot.slane %v903_v33, %v9057_v19  ;;  %v905_v1 = vadd.f32 %v904_v44, %v9061_v21  ;;  %v4519_v41 = vrot.slane %v4518_v54, 2  ;;  %v2987_v14 = vrot.slane %v11509_v28, 4  ;;  %v14206_v44 = vld [vmem:[#allocation82_spill] sm:$0xff] }
 0x2e5   :  { %v4849_v10 = vmul.f32 %v8170_v37, %v14196_v52  ;;  %v4533_v45 = vrot.slane %v4532_v29, 1  ;;  %v2985_v51 = vrot.slane %v2984_v8, 1  ;;  %v5996_v0 = vpack.c.bf16 %v5753_v60, %v5753_v60 }
 0x2e6   :  { %v4115_v40 = vrot.slane %v11511_v7, 4  ;;  %v5757_v31 = vrot.slane %v5756_v24, 2  ;;  %v4520_v5 = vadd.f32 %v4519_v41, %v4518_v54  ;;  %v2988_v53 = vmax.f32 %v11509_v28, %v2987_v14 }
 0x2e7   :  { %v4977_v15 = vmul.f32 %v4849_v10, %v1608_v4  ;;  %v4534_v30 = vadd.f32 %v4533_v45, %v4532_v29  ;;  %v2986_v3 = vmax.f32 %v2984_v8, %v2985_v51  ;;  %v5773_v33 = vrot.slane %v5772_v55, 1  ;;  %v908_v8 = vpop.f32.mrf.mxu0 }
 0x2e8   :  { %v2259_v26 = vmul.f32 %v2005_v23, %v905_v1  ;;  %v4521_v16 = vrot.slane %v4520_v5, 1  ;;  %v4535_v52 = vrot.slane %v14206_v44, 4  ;;  %v2989_v37 = vrot.slane %v2988_v53, 2  ;;  %v7866_v1 = vpop.f32.mrf.mxu1 }
 0x2e9   :  { %v5789_v38 = vsel %vm2302_vm1, %v4977_v15, 0.0  ;;  %8181 = vrcp.f32 %v4534_v30  ;;  %v3504_v60 = vsub.f32 %v11487_v49, %v2986_v3  ;;  %v5758_v54 = vadd.f32 %v5757_v31, %v5756_v24  ;;  %v11532_v31 = vpop.xlane.xlu0 %2457 }
 0x2ea   :  { %v11522_v22 = vpop.eup %8171  ;;  %v1600_v4 = vadd.f32 %v1599_v56, %v9657_v50  ;;  %v4522_v29 = vadd.f32 %v4521_v16, %v4520_v5  ;;  %v4536_v41 = vadd.f32 %v14206_v44, %v4535_v52  ;;  %v11526_v10 = vunpack.c.l.b16 %v5998_v57  ;;  %v910_v52 = vpop.f32.mrf.mxu0 }
 0x2eb   :  { %14207 = vst [vmem:[#allocation26_spill] sm:$0xff] %v11522_v22  ;;  %v4116_v23 = vadd.f32 %v11511_v7, %v4115_v40  ;;  %v3681_v45 = vmul.f32 1.442695, %v3504_v60  ;;  %v2990_v51 = vmax.f32 %v2988_v53, %v2989_v37  ;;  %v5790_v49 = vrot.slane %v5789_v38, 4 }
 0x2ec   :  { %14208 = vst [vmem:[#allocation49_spill] sm:$0xff] %v11526_v10  ;;  %v11529_v14 = vpop.eup %8173  ;;  %8183 = vrcp.f32 %v4522_v29  ;;  %v4537_v15 = vrot.slane %v4536_v41, 2  ;;  %v2558_v24 = vsel %vm2302_vm1, %v2259_v26, 0.0  ;;  %v11534_v56 = vunpack.c.l.b16 %v5996_v0  ;;  %v1602_v29 = vpop.f32.mrf.mxu1 }
 0x2ed   :  { %v8176_v5 = vpop.eup %8175  ;;  %v5774_v30 = vadd.f32 %v5773_v33, %v5772_v55  ;;  %8185 = vpow2.f32 %v3681_v45  ;;  %v2991_v57 = vrot.slane %v2990_v51, 1  ;;  %2559 = vadd.xlane.f32.xlu0 %v2558_v24  ;;  %v5759_v3 = vrot.slane %v5758_v54, 1 }
 0x2ee   :  { %14209 = vst [vmem:[#allocation47_spill] sm:$0xff] %v11534_v56  ;;  %v11536_v40 = vpop.eup %8177  ;;  %v4121_v53 = vrot.slane %v11522_v22, 4  ;;  %v4847_v16 = vmul.f32 %v8176_v5, %v14198_v48  ;;  %v4538_v60 = vadd.f32 %v4537_v15, %v4536_v41  ;;  %v4117_v37 = vrot.slane %v4116_v23, 2 }
 0x2ef   :  { %14210 = vst [vmem:[#allocation53_spill] sm:$0xff] %v11536_v40  ;;  %v4127_v26 = vrot.slane %v11529_v14, 4  ;;  %v2992_v10 = vmax.f32 %v2990_v51, %v2991_v57  ;;  %v2993_v0 = vrot.slane %v11532_v31, 4  ;;  %v11542_v55 = vpop.eup %8179  ;;  %v5791_v33 = vadd.f32 %v5790_v49, %v5789_v38 }
 0x2f0   :  { %14211 = vst [vmem:[#allocation48_spill] sm:$0xff] %v11542_v55  ;;  %v4975_v45 = vmul.f32 %v4847_v16, %v1600_v4  ;;  %v909_v24 = vadd.f32 %v908_v8, %v9052_v17  ;;  %v4539_v56 = vrot.slane %v4538_v60, 1  ;;  %v5999_v7 = vpack.c.bf16 %v5774_v30, %v5774_v30  ;;  %v912_v55 = vpop.f32.mrf.mxu0  ;;  %v7869_v8 = vpop.f32.mrf.mxu1 }
 0x2f1   :  { %v1611_v58 = vadd.f32 %v7866_v1, %v9657_v50  ;;  %v3505_v48 = vsub.f32 %v11509_v28, %v2992_v10  ;;  %v2994_v41 = vmax.f32 %v11532_v31, %v2993_v0  ;;  %v5760_v15 = vadd.f32 %v5759_v3, %v5758_v54 }
 0x2f2   :  { %v11549_v5 = vadd.f32 %v11522_v22, %v4121_v53  ;;  %v5775_v51 = vsel %vm2302_vm1, %v4975_v45, 0.0  ;;  %v4540_v57 = vadd.f32 %v4539_v56, %v4538_v60  ;;  %v4128_v38 = vadd.f32 %v11529_v14, %v4127_v26  ;;  %v914_v45 = vpop.f32.mrf.mxu0 }
 0x2f3   :  { %v5776_v4 = vrot.slane %v5775_v51, 4  ;;  %v3683_v49 = vmul.f32 1.442695, %v3505_v48  ;;  %v2995_v30 = vrot.slane %v2994_v41, 2  ;;  %v5792_v16 = vrot.slane %v5791_v33, 2 }
 0x2f4   :  { %14212 = vst [vmem:[#allocation74_spill] sm:$0xff] %v11549_v5  ;;  %v2009_v1 = vrot.slane %v909_v24, %v9057_v19  ;;  %v911_v28 = vadd.f32 %v910_v52, %v9061_v21  ;;  %8187 = vrcp.f32 %v4540_v57  ;;  %v913_v10 = vadd.f32 %v912_v55, %v9052_v17  ;;  %v1615_v57 = vpop.f32.mrf.mxu1 }
 0x2f5   :  { %v5777_v54 = vadd.f32 %v5776_v4, %v5775_v51  ;;  %8189 = vpow2.f32 %v3683_v49  ;;  %v2996_v3 = vmax.f32 %v2994_v41, %v2995_v30  ;;  %v11556_v56 = vunpack.c.l.b16 %v5999_v7 }
 0x2f6   :  { %v8182_v53 = vpop.eup %8181  ;;  %v11558_v60 = vadd.f32 %v4117_v37, %v4116_v23  ;;  %v1603_v0 = vadd.f32 %v1602_v29, %v9657_v50  ;;  %v5997_v48 = vpack.c.bf16 %v5760_v15, %v5760_v15  ;;  %v4129_v24 = vrot.slane %v4128_v38, 2 }
 0x2f7   :  { %14213 = vst [vmem:[#allocation50_spill] sm:$0xff] %v11556_v56  ;;  %v4850_v52 = vmul.f32 %v8182_v53, %v14201_v2  ;;  %v2997_v51 = vrot.slane %v2996_v3, 1  ;;  %v5793_v4 = vadd.f32 %v5792_v16, %v5791_v33  ;;  %v11564_v55 = vadd.f32 %v7869_v8, %v9657_v50  ;;  %v14220_v56 = vld [vmem:[#allocation128_spill] sm:$0xff] }
 0x2f8   :  { %14214 = vst [vmem:[#allocation81_spill] sm:$0xff] %v11558_v60  ;;  %v11566_v41 = vmul.f32 %v2009_v1, %v911_v28  ;;  %v1616_v7 = vadd.f32 %v1615_v57, %v9657_v50  ;;  %v5778_v37 = vrot.slane %v5777_v54, 2  ;;  %v2013_v29 = vrot.slane %v913_v10, %v9057_v19  ;;  %v7870_v57 = vpop.f32.mrf.mxu1 }
 0x2f9   :  { %14215 = vst [vmem:[#allocation56_spill] sm:$0xff] %v11564_v55  ;;  %v8184_v23 = vpop.eup %8183  ;;  %v4978_v49 = vmul.f32 %v4850_v52, %v1611_v58  ;;  %v915_v15 = vadd.f32 %v914_v45, %v9061_v21  ;;  %v2998_v53 = vmax.f32 %v2996_v3, %v2997_v51  ;;  %v5131_v33 = vsel %vm2302_vm1, %v10848_v36, 0.0  ;;  %v14218_v36 = vld [vmem:[#allocation28_spill] sm:$0xff] }
 0x2fa   :  { %v11571_v30 = vpop.eup %8185  ;;  %v4848_v2 = vmul.f32 %v8184_v23, %v14204_v43  ;;  %v5138_v8 = vsel %vm2302_vm1, %v10874_v63, 0.0  ;;  %v11578_v16 = vunpack.c.l.b16 %v5997_v48  ;;  %v4130_v1 = vadd.f32 %v4129_v24, %v4128_v38 }
 0x2fb   :  { %v5796_v58 = vsel %vm2302_vm1, %v4978_v49, 0.0  ;;  %v4133_v28 = vrot.slane %v11571_v30, 4  ;;  %v5794_v10 = vrot.slane %v5793_v4, 1  ;;  %v5132_v26 = vrot.slane %v5131_v33, 4 }
 0x2fc   :  { %14216 = vst [vmem:[#allocation82_spill] sm:$0xff] %v11578_v16  ;;  %v5797_v45 = vrot.slane %v5796_v58, 4  ;;  %v4976_v52 = vmul.f32 %v4848_v2, %v1603_v0  ;;  %v11584_v3 = vadd.f32 %v7870_v57, %v9657_v50  ;;  %v4885_v63 = vmul.f32 %v10885_v34, %v14218_v36  ;;  %v14219_v2 = vld [vmem:[#allocation29_spill] sm:$0xff] }
 0x2fd   :  { %v4134_v43 = vadd.f32 %v11571_v30, %v4133_v28  ;;  %v5139_v48 = vrot.slane %v5138_v8, 4  ;;  %v5779_v51 = vadd.f32 %v5778_v37, %v5777_v54  ;;  %v3506_v24 = vsub.f32 %v11532_v31, %v2998_v53  ;;  %v14221_v54 = vld [vmem:[#allocation36_spill] sm:$0xff]  ;;  %v14222_v31 = vld [vmem:[#allocation122_spill] sm:$0xff] }
 0x2fe   :  { %14217 = vst [vmem:[#allocation145_spill] sm:$0xff] %v11584_v3  ;;  %v5782_v38 = vsel %vm2302_vm1, %v4976_v52, 0.0  ;;  %v11590_v23 = vmul.f32 %v2013_v29, %v915_v15  ;;  %v5798_v49 = vadd.f32 %v5797_v45, %v5796_v58  ;;  %v4886_v16 = vmul.f32 %v14220_v56, %v14219_v2 }
 0x2ff   :  { %v5783_v0 = vrot.slane %v5782_v38, 4  ;;  %v5133_v28 = vadd.f32 %v5132_v26, %v5131_v33  ;;  %v11594_v55 = vadd.f32 %v5794_v10, %v5793_v4  ;;  %v4131_v57 = vrot.slane %v4130_v1, 1  ;;  %v14223_v4 = vld [vmem:[#allocation119_spill] sm:$0xff] }
 0x300   :  { %v4135_v3 = vrot.slane %v4134_v43, 2  ;;  %v5140_v22 = vadd.f32 %v5139_v48, %v5138_v8  ;;  %v11598_v37 = vmul.f32 %v11249_v46, %v14221_v54  ;;  %v5127_v29 = vrot.slane %v14222_v31, 2 }
 0x301   :  { %v8188_v34 = vpop.eup %8187  ;;  %v5784_v36 = vadd.f32 %v5783_v0, %v5782_v38  ;;  %v5145_v15 = vsel %vm2302_vm1, %v4885_v63, 0.0  ;;  %v5780_v58 = vrot.slane %v5779_v51, 1  ;;  %v3685_v26 = vmul.f32 1.442695, %v3506_v24  ;;  %v14225_v38 = vld [vmem:[#allocation38_spill] sm:$0xff] }
 0x302   :  { %v11602_v53 = vpop.eup %8189  ;;  %v4851_v56 = vmul.f32 %v8188_v34, %v14206_v44  ;;  %v14224_v33 = vrot.slane %v14223_v4, 2  ;;  %v5799_v10 = vrot.slane %v5798_v49, 2  ;;  %v5134_v46 = vrot.slane %v5133_v28, 2 }
 0x303   :  { %v5785_v45 = vrot.slane %v5784_v36, 2  ;;  %v4139_v52 = vrot.slane %v11602_v53, 4  ;;  %v4136_v48 = vadd.f32 %v4135_v3, %v4134_v43  ;;  %v11611_v0 = vmul.f32 %v11305_v25, %v14225_v38 }
 0x304   :  { %v5121_v8 = vadd.f32 %v14224_v33, %v14223_v4  ;;  %v5141_v63 = vrot.slane %v5140_v22, 2  ;;  %v5146_v2 = vrot.slane %v5145_v15, 4  ;;  %v4132_v54 = vadd.f32 %v4131_v57, %v4130_v1  ;;  %v14226_v33 = vld [vmem:[#allocation116_spill] sm:$0xff] }
 0x305   :  { %v4140_v44 = vadd.f32 %v11602_v53, %v4139_v52  ;;  %v4979_v24 = vmul.f32 %v4851_v56, %v1616_v7  ;;  %v5128_v34 = vadd.f32 %v5127_v29, %v14222_v31  ;;  %v5781_v40 = vadd.f32 %v5780_v58, %v5779_v51 }
 0x306   :  { %v5786_v4 = vadd.f32 %v5785_v45, %v5784_v36  ;;  %v5108_v35 = vrot.slane %v14226_v33, 1  ;;  %v5115_v47 = vrot.slane %v14227_v59, 1  ;;  %v5800_v11 = vadd.f32 %v5799_v10, %v5798_v49 }
 0x307   :  { %8191 = vpow2.f32 %v3685_v26  ;;  %v5122_v43 = vrot.slane %v5121_v8, 1  ;;  %v5135_v3 = vadd.f32 %v5134_v46, %v5133_v28  ;;  %v4137_v25 = vrot.slane %v4136_v48, 1 }
 0x308   :  { %v5142_v38 = vadd.f32 %v5141_v63, %v5140_v22  ;;  %v5147_v27 = vadd.f32 %v5146_v2, %v5145_v15  ;;  %v5152_v1 = vsel %vm2302_vm1, %v4886_v16, 0.0  ;;  %v4141_v57 = vrot.slane %v4140_v44, 2 }
 0x309   :  { %v5803_v7 = vsel %vm2302_vm1, %v4979_v24, 0.0  ;;  %v5129_v56 = vrot.slane %v5128_v34, 1  ;;  %v5153_v31 = vrot.slane %v5152_v1, 4  ;;  %8193 = vrcp.f32 %v4132_v54  ;;  %v14228_v24 = vld [vmem:[#allocation143_spill] sm:$0xff] }
 0x30a   :  { %v6000_v36 = vpack.c.bf16 %v5781_v40, %v5781_v40  ;;  %v5787_v29 = vrot.slane %v5786_v4, 1  ;;  %v5801_v49 = vrot.slane %v5800_v11, 1  ;;  %v5136_v58 = vrot.slane %v5135_v3, 1 }
 0x30b   :  { %v5148_v26 = vrot.slane %v5147_v27, 2  ;;  %v5154_v28 = vadd.f32 %v5153_v31, %v5152_v1  ;;  %v4138_v10 = vadd.f32 %v4137_v25, %v4136_v48  ;;  %v5804_v22 = vrot.slane %v5803_v7, 4  ;;  %v14231_v1 = vld [vmem:[#allocation132_spill] sm:$0xff] }
 0x30c   :  { %v11622_v15 = vadd.f32 %v5108_v35, %v14226_v33  ;;  %v5143_v16 = vrot.slane %v5142_v38, 1  ;;  %v4142_v45 = vadd.f32 %v4141_v57, %v4140_v44  ;;  %v11625_v52 = vadd.f32 %v5115_v47, %v14227_v59  ;;  %v14229_v44 = vld [vmem:[#allocation140_spill] sm:$0xff] }
 0x30d   :  { %v11627_v46 = vadd.f32 %v5122_v43, %v5121_v8  ;;  %v11629_v63 = vadd.f32 %v5129_v56, %v5128_v34  ;;  %v11631_v40 = vunpack.c.l.b16 %v6000_v36  ;;  %v11633_v2 = vadd.f32 %v5787_v29, %v5786_v4  ;;  %v14232_v56 = vld [vmem:[#allocation138_spill] sm:$0xff]  ;;  %v14233_v36 = vld [vmem:[#allocation40_spill] sm:$0xff] }
 0x30e   :  { %v5155_v54 = vrot.slane %v5154_v28, 2  ;;  %v5183_v48 = vrot.slane %v14228_v24, 2  ;;  %v11636_v25 = vadd.f32 %v5801_v49, %v5800_v11  ;;  %v11638_v35 = vadd.f32 %v5136_v58, %v5135_v3  ;;  %v11650_v3 = vpop.f32.mrf.mxu0 }
 0x30f   :  { %v5149_v33 = vadd.f32 %v5148_v26, %v5147_v27  ;;  %v14230_v47 = vrot.slane %v14229_v44, 2  ;;  %8195 = vrcp.f32 %v4138_v10  ;;  %v11643_v8 = vadd.f32 %v5804_v22, %v5803_v7  ;;  %v14234_v7 = vld [vmem:[#allocation58_spill] sm:$0xff] }
 0x310   :  { %v11645_v34 = vadd.f32 %v5143_v16, %v5142_v38  ;;  %v5156_v43 = vadd.f32 %v5155_v54, %v5154_v28  ;;  %v4143_v4 = vrot.slane %v4142_v45, 1  ;;  %v5164_v57 = vrot.slane %v14231_v1, 1 }
 0x311   :  { %v5177_v59 = vadd.f32 %v14230_v47, %v14229_v44  ;;  %v5171_v31 = vrot.slane %v14232_v56, 1  ;;  %v5184_v11 = vadd.f32 %v5183_v48, %v14228_v24  ;;  %v5187_v29 = vsel %vm2302_vm1, %v14233_v36, 0.0 }
 0x312   :  { %v5194_v38 = vsel %vm2302_vm1, %v14234_v7, 0.0  ;;  %v5201_v49 = vsel %vm2302_vm1, %v11598_v37, 0.0  ;;  %v5150_v58 = vrot.slane %v5149_v33, 1  ;;  %v5157_v26 = vrot.slane %v5156_v43, 1  ;;  %v11669_v7 = vpop.f32.mrf.mxu0 }
 0x313   :  { %v5178_v28 = vrot.slane %v5177_v59, 1  ;;  %v5188_v10 = vrot.slane %v5187_v29, 4  ;;  %v5195_v54 = vrot.slane %v5194_v38, 4  ;;  %v5202_v24 = vrot.slane %v5201_v49, 4 }
 0x314   :  { %v11660_v22 = vpop.eup %8191  ;;  %v5208_v48 = vsel %vm2302_vm1, %v11611_v0, 0.0  ;;  %v11665_v44 = vadd.f32 %v4143_v4, %v4142_v45  ;;  %v5165_v47 = vadd.f32 %v5164_v57, %v14231_v1  ;;  %v5172_v36 = vadd.f32 %v5171_v31, %v14232_v56 }
 0x315   :  { %v5185_v37 = vrot.slane %v5184_v11, 1  ;;  %v5189_v51 = vadd.f32 %v5188_v10, %v5187_v29  ;;  %v5196_v27 = vadd.f32 %v5195_v54, %v5194_v38  ;;  %v5203_v32 = vadd.f32 %v5202_v24, %v5201_v49  ;;  %v11680_v38 = vpop.f32.mrf.mxu0 }
 0x316   :  { %v5209_v12 = vrot.slane %v5208_v48, 4  ;;  %v11671_v13 = vpop.eup %8193  ;;  %v5151_v9 = vadd.f32 %v5150_v58, %v5149_v33  ;;  %v5158_v6 = vadd.f32 %v5157_v26, %v5156_v43  ;;  %v5179_v0 = vadd.f32 %v5178_v28, %v5177_v59  ;;  %v11682_v58 = vpop.xlane.xlu0 %2460 }
 0x317   :  { %v5190_v45 = vrot.slane %v5189_v51, 2  ;;  %v5197_v4 = vrot.slane %v5196_v27, 2  ;;  %v5204_v18 = vrot.slane %v5203_v32, 2  ;;  %v5186_v57 = vadd.f32 %v5185_v37, %v5184_v11  ;;  %v11692_v24 = vpop.f32.mrf.mxu0 }
 0x318   :  { %v5210_v1 = vadd.f32 %v5209_v12, %v5208_v48  ;;  %v5904_v56 = vpack.c.bf16 %v11622_v15, %v11622_v15  ;;  %v5905_v31 = vpack.c.bf16 %v11625_v52, %v11625_v52  ;;  %v5906_v29 = vpack.c.bf16 %v11627_v46, %v11627_v46 }
 0x319   :  { %v5191_v49 = vadd.f32 %v5190_v45, %v5189_v51  ;;  %v5198_v33 = vadd.f32 %v5197_v4, %v5196_v27  ;;  %v5205_v43 = vadd.f32 %v5204_v18, %v5203_v32  ;;  %v5907_v12 = vpack.c.bf16 %v11629_v63, %v11629_v63  ;;  %v928_v60 = vpop.f32.mrf.mxu0 }
 0x31a   :  { %v5211_v59 = vrot.slane %v5210_v1, 2  ;;  %v5908_v15 = vpack.c.bf16 %v11638_v35, %v11638_v35  ;;  %v5909_v52 = vpack.c.bf16 %v11645_v34, %v11645_v34  ;;  %v5910_v11 = vpack.c.bf16 %v5151_v9, %v5151_v9 }
 0x31b   :  { %v5192_v26 = vrot.slane %v5191_v49, 1  ;;  %v5199_v46 = vrot.slane %v5198_v33, 1  ;;  %v5206_v28 = vrot.slane %v5205_v43, 1  ;;  %v5911_v18 = vpack.c.bf16 %v5158_v6, %v5158_v6 }
 0x31c   :  { %v5212_v10 = vadd.f32 %v5211_v59, %v5210_v1  ;;  %v11690_v51 = vpop.eup %8195  ;;  %v5912_v32 = vpack.c.bf16 %v5165_v47, %v5165_v47  ;;  %v5913_v27 = vpack.c.bf16 %v5172_v36, %v5172_v36  ;;  %v5914_v54 = vpack.c.bf16 %v5179_v0, %v5179_v0  ;;  %v11694_v59 = vpop.xlane.xlu0 %2463 }
 0x31d   :  { %v5193_v63 = vadd.f32 %v5192_v26, %v5191_v49  ;;  %v5200_v48 = vadd.f32 %v5199_v46, %v5198_v33  ;;  %v5207_v37 = vadd.f32 %v5206_v28, %v5205_v43  ;;  %v5915_v45 = vpack.c.bf16 %v5186_v57, %v5186_v57 }
 0x31e   :  { %v5213_v35 = vrot.slane %v5212_v10, 1  ;;  %v6168_v4 = vunpack.c.l.b16 %v5904_v56  ;;  %v6169_v34 = vunpack.c.l.b16 %v5905_v31  ;;  %v6170_v9 = vunpack.c.l.b16 %v5906_v29 }
 0x31f   :  { %v5916_v62 = vpack.c.bf16 %v5193_v63, %v5193_v63  ;;  %v5917_v39 = vpack.c.bf16 %v5200_v48, %v5200_v48  ;;  %v5918_v1 = vpack.c.bf16 %v5207_v37, %v5207_v37  ;;  %v6171_v6 = vunpack.c.l.b16 %v5907_v12 }
 0x320   :  { %v5214_v16 = vadd.f32 %v5213_v35, %v5212_v10  ;;  %v6172_v47 = vunpack.c.l.b16 %v5908_v15  ;;  %v6173_v36 = vunpack.c.l.b16 %v5909_v52  ;;  %v6174_v0 = vunpack.c.l.b16 %v5910_v11  ;;  %v14235_v52 = vld [vmem:[#allocation90_spill] sm:$0xff] }
 0x321   :  { %v6176_v49 = vunpack.c.l.b16 %v5912_v32  ;;  %v6177_v33 = vunpack.c.l.b16 %v5913_v27  ;;  %v6178_v43 = vunpack.c.l.b16 %v5914_v54  ;;  %v6175_v26 = vunpack.c.l.b16 %v5911_v18  ;;  %v930_v32 = vpop.f32.mrf.mxu0  ;;  %v11708_v27 = vpop.xlane.xlu0 %2466 }
 0x322   :  { %v5919_v5 = vpack.c.bf16 %v5214_v16, %v5214_v16  ;;  %v6179_v57 = vunpack.c.l.b16 %v5915_v45  ;;  %v6180_v56 = vunpack.c.l.b16 %v5916_v62  ;;  %v6181_v31 = vunpack.c.l.b16 %v5917_v39 }
 0x323   :  { %v6182_v29 = vunpack.c.l.b16 %v5918_v1  ;;  %v6301_v28 = vsel %vm6280_vm2, %v6169_v34, %v6168_v4  ;;  %v6308_v10 = vsel %vm6280_vm2, %v6177_v33, %v6176_v49  ;;  %v4541_v11 = vrot.slane %v14235_v52, 4 }
 0x324   :  { %v6183_v46 = vunpack.c.l.b16 %v5919_v5  ;;  %v6302_v12 = vsel %vm6282_vm3, %v6170_v9, %v6301_v28  ;;  %v6309_v15 = vsel %vm6282_vm3, %v6178_v43, %v6308_v10  ;;  %v919_v16 = vadd.f32 %v11650_v3, %v9052_v17 }
 0x325   :  { %v6303_v18 = vsel %vm6284_vm4, %v6171_v6, %v6302_v12  ;;  %v6310_v62 = vsel %vm6284_vm4, %v6179_v57, %v6309_v15  ;;  %v2561_v39 = vsel %vm2302_vm1, %v11566_v41, 0.0  ;;  %v2999_v5 = vrot.slane %v11682_v58, 4  ;;  %v932_v6 = vpop.f32.mrf.mxu0 }
 0x326   :  { %v6304_v54 = vsel %vm6286_vm5, %v6172_v47, %v6303_v18  ;;  %v6311_v63 = vsel %vm6286_vm5, %v6180_v56, %v6310_v62  ;;  %v4542_v48 = vadd.f32 %v14235_v52, %v4541_v11  ;;  %v2017_v3 = vrot.slane %v919_v16, %v9057_v19  ;;  %2562 = vadd.xlane.f32.xlu0 %v2561_v39 }
 0x327   :  { %v6305_v37 = vsel %vm6288_vm6, %v6173_v36, %v6304_v54  ;;  %v6312_v35 = vsel %vm6288_vm6, %v6181_v31, %v6311_v63  ;;  %v3000_v45 = vmax.f32 %v11682_v58, %v2999_v5  ;;  %v921_v41 = vadd.f32 %v11669_v7, %v9061_v21  ;;  %v934_v12 = vpop.f32.mrf.mxu0 }
 0x328   :  { %v6306_v4 = vsel %vm6290_vm7, %v6174_v0, %v6305_v37  ;;  %v6313_v34 = vsel %vm6290_vm7, %v6182_v29, %v6312_v35  ;;  %v4543_v9 = vrot.slane %v4542_v48, 2  ;;  %v923_v1 = vadd.f32 %v11680_v38, %v9052_v17  ;;  %v11734_v29 = vpop.xlane.xlu0 %2469 }
 0x329   :  { %v6307_v47 = vsel %vm6292_vm8, %v6175_v26, %v6306_v4  ;;  %v6314_v36 = vsel %vm6292_vm8, %v6183_v46, %v6313_v34  ;;  %v3001_v49 = vrot.slane %v3000_v45, 2  ;;  %v2262_v33 = vmul.f32 %v2017_v3, %v921_v41 }
 0x32a   :  { %v11725_v43 = vpack.c.b16 %v6314_v36, %v6307_v47  ;;  %v4544_v57 = vadd.f32 %v4543_v9, %v4542_v48  ;;  %v2021_v7 = vrot.slane %v923_v1, %v9057_v19  ;;  %v2564_v0 = vsel %vm2302_vm1, %v11590_v23, 0.0 }
 0x32b   :  { %v3002_v56 = vmax.f32 %v3000_v45, %v3001_v49  ;;  %2565 = vadd.xlane.f32.xlu0 %v2564_v0  ;;  %v3005_v31 = vrot.slane %v11694_v59, 4  ;;  %v925_v38 = vadd.f32 %v11692_v24, %v9061_v21  ;;  %v929_v26 = vadd.f32 %v928_v60, %v9052_v17  ;;  %v938_v45 = vpop.f32.mrf.mxu0 }
 0x32c   :  { %14236 = vst [vmem:[#allocation28_spill] sm:$0xff] %v11725_v43  ;;  %7884 = vmatmul.mubr.msk.bf16.vlgmr.msra.gmra.mxu1 %vm2302_vm1, %v11725_v43  ;;  %v4545_v46 = vrot.slane %v4544_v57, 1  ;;  %v2567_v28 = vsel %vm2302_vm1, %v2262_v33, 0.0  ;;  %v3011_v10 = vrot.slane %v11708_v27, 4  ;;  %v931_v23 = vadd.f32 %v930_v32, %v9061_v21  ;;  %v11756_v1 = vpop.xlane.xlu0 %2472 }
 0x32d   :  { %v3003_v15 = vrot.slane %v3002_v56, 1  ;;  %v3006_v11 = vmax.f32 %v11694_v59, %v3005_v31  ;;  %v2263_v16 = vmul.f32 %v2021_v7, %v925_v38  ;;  %v2025_v24 = vrot.slane %v929_v26, %v9057_v19 }
 0x32e   :  { %v4546_v60 = vadd.f32 %v4545_v46, %v4544_v57  ;;  %v3012_v18 = vmax.f32 %v11708_v27, %v3011_v10  ;;  %v933_v62 = vadd.f32 %v932_v6, %v9052_v17  ;;  %v3017_v39 = vrot.slane %v11734_v29, 4 }
 0x32f   :  { %v3004_v5 = vmax.f32 %v3002_v56, %v3003_v15  ;;  %v3007_v54 = vrot.slane %v3006_v11, 2  ;;  %2568 = vadd.xlane.f32.xlu0 %v2567_v28  ;;  %v2264_v63 = vmul.f32 %v2025_v24, %v931_v23  ;;  %v2570_v32 = vsel %vm2302_vm1, %v2263_v16, 0.0  ;;  %v14239_v56 = vld [vmem:[#allocation102_spill] sm:$0xff]  ;;  %v940_v28 = vpop.f32.mrf.mxu0 }
 0x330   :  { %v14237_v48 = vrot.slane %v11643_v8, 2  ;;  %8197 = vrcp.f32 %v4546_v60  ;;  %v3013_v37 = vrot.slane %v3012_v18, 2  ;;  %2571 = vadd.xlane.f32.xlu1 %v2570_v32  ;;  %v3018_v35 = vmax.f32 %v11734_v29, %v3017_v39  ;;  %v14240_v60 = vld [vmem:[#allocation96_spill] sm:$0xff] }
 0x331   :  { %v3507_v41 = vsub.f32 %v11682_v58, %v3004_v5  ;;  %v3008_v4 = vmax.f32 %v3006_v11, %v3007_v54  ;;  %v2029_v34 = vrot.slane %v933_v62, %v9057_v19  ;;  %v935_v9 = vadd.f32 %v934_v12, %v9061_v21 }
 0x332   :  { %v11750_v3 = vadd.f32 %v14237_v48, %v11643_v8  ;;  %8199 = vrcp.f32 %v11665_v44  ;;  %v3014_v6 = vmax.f32 %v3012_v18, %v3013_v37  ;;  %v3019_v8 = vrot.slane %v3018_v35, 2  ;;  %v11775_v37 = vpop.f32.mrf.mxu0 }
 0x333   :  { %v2573_v47 = vsel %vm2302_vm1, %v2264_v63, 0.0  ;;  %v14238_v36 = vrot.slane %v11660_v22, 4  ;;  %v3687_v33 = vmul.f32 1.442695, %v3507_v41  ;;  %v3009_v57 = vrot.slane %v3008_v4, 1 }
 0x334   :  { %v939_v58 = vadd.f32 %v938_v45, %v9052_v17  ;;  %v3015_v7 = vrot.slane %v3014_v6, 1  ;;  %v3020_v0 = vmax.f32 %v3018_v35, %v3019_v8  ;;  %2574 = vadd.xlane.f32.xlu1 %v2573_v47  ;;  %v4571_v31 = vrot.slane %v14239_v56, 4  ;;  %v1618_v45 = vpop.f32.mrf.mxu1  ;;  %v14241_v8 = vld [vmem:[#allocation107_spill] sm:$0xff] }
 0x335   :  { %v4146_v49 = vadd.f32 %v11660_v22, %v14238_v36  ;;  %v3023_v38 = vrot.slane %v11756_v1, 4  ;;  %v5808_v44 = vrot.slane %v11750_v3, 1  ;;  %8201 = vpow2.f32 %v3687_v33 }
 0x336   :  { %v3010_v26 = vmax.f32 %v3008_v4, %v3009_v57  ;;  %v2265_v46 = vmul.f32 %v2029_v34, %v935_v9  ;;  %v3016_v10 = vmax.f32 %v3014_v6, %v3015_v7  ;;  %v3021_v23 = vrot.slane %v3020_v0, 1 }
 0x337   :  { %v4572_v12 = vadd.f32 %v14239_v56, %v4571_v31  ;;  %v3024_v15 = vmax.f32 %v11756_v1, %v3023_v38  ;;  %v4147_v11 = vrot.slane %v4146_v49, 2  ;;  %v2033_v24 = vrot.slane %v939_v58, %v9057_v19  ;;  %v11785_v38 = vpop.f32.mrf.mxu0 }
 0x338   :  { %v3508_v16 = vsub.f32 %v11694_v59, %v3010_v26  ;;  %v4559_v18 = vrot.slane %v14240_v60, 4  ;;  %v3509_v62 = vsub.f32 %v11708_v27, %v3016_v10  ;;  %v3022_v39 = vmax.f32 %v3020_v0, %v3021_v23  ;;  %v11779_v27 = vpop.xlane.xlu1 %2475 }
 0x339   :  { %v4573_v5 = vrot.slane %v4572_v12, 2  ;;  %v3025_v54 = vrot.slane %v3024_v15, 2  ;;  %v941_v32 = vadd.f32 %v940_v28, %v9061_v21  ;;  %v2576_v35 = vsel %vm2302_vm1, %v2265_v46, 0.0 }
 0x33a   :  { %v3689_v63 = vmul.f32 1.442695, %v3508_v16  ;;  %v4560_v48 = vadd.f32 %v14240_v60, %v4559_v18  ;;  %v3691_v59 = vmul.f32 1.442695, %v3509_v62  ;;  %v3510_v41 = vsub.f32 %v11734_v29, %v3022_v39  ;;  %2577 = vadd.xlane.f32.xlu1 %v2576_v35 }
 0x33b   :  { %v4574_v4 = vadd.f32 %v4573_v5, %v4572_v12  ;;  %v3026_v34 = vmax.f32 %v3024_v15, %v3025_v54  ;;  %v4148_v9 = vadd.f32 %v4147_v11, %v4146_v49  ;;  %v4577_v47 = vrot.slane %v14241_v8, 4 }
 0x33c   :  { %8203 = vpow2.f32 %v3689_v63  ;;  %v4561_v6 = vrot.slane %v4560_v48, 2  ;;  %v3693_v36 = vmul.f32 1.442695, %v3510_v41  ;;  %v1619_v7 = vadd.f32 %v1618_v45, %v9657_v50  ;;  %v11796_v63 = vpop.f32.mrf.mxu0 }
 0x33d   :  { %8205 = vpow2.f32 %v3691_v59  ;;  %v4575_v33 = vrot.slane %v4574_v4, 1  ;;  %v3027_v57 = vrot.slane %v3026_v34, 1  ;;  %v8198_v58 = vpop.eup %8197  ;;  %v4578_v29 = vadd.f32 %v14241_v8, %v4577_v47 }
 0x33e   :  { %v4562_v0 = vadd.f32 %v4561_v6, %v4560_v48  ;;  %v3029_v31 = vrot.slane %v11779_v27, 4  ;;  %v4852_v49 = vmul.f32 %v8198_v58, %v14235_v52  ;;  %v2266_v28 = vmul.f32 %v2033_v24, %v941_v32  ;;  %v14243_v24 = vld [vmem:[#allocation85_spill] sm:$0xff] }
 0x33f   :  { %v4576_v26 = vadd.f32 %v4575_v33, %v4574_v4  ;;  %v3028_v46 = vmax.f32 %v3026_v34, %v3027_v57  ;;  %v8200_v10 = vpop.eup %8199  ;;  %8207 = vpow2.f32 %v3693_v36  ;;  %v4579_v12 = vrot.slane %v4578_v29, 2  ;;  %v11809_v4 = vpop.xlane.xlu1 %2478 }
 0x340   :  { %v4563_v23 = vrot.slane %v4562_v0, 1  ;;  %v3030_v15 = vmax.f32 %v11779_v27, %v3029_v31  ;;  %v6003_v11 = vpack.c.bf16 %v11636_v25, %v11636_v25  ;;  %v14242_v16 = vpack.c.bf16 %v11633_v2, %v11633_v2  ;;  %v11821_v57 = vpop.f32.mrf.mxu0 }
 0x341   :  { %8209 = vrcp.f32 %v4576_v26  ;;  %v3511_v62 = vsub.f32 %v11756_v1, %v3028_v46  ;;  %v4580_v39 = vadd.f32 %v4579_v12, %v4578_v29  ;;  %v4565_v54 = vrot.slane %v14243_v24, 4 }
 0x342   :  { %v6265_v18 = vunpack.c.l.b16 %v14242_v16  ;;  %v4564_v52 = vadd.f32 %v4563_v23, %v4562_v0  ;;  %v3031_v5 = vrot.slane %v3030_v15, 2  ;;  %v11798_v32 = vpop.eup %8201  ;;  %v14244_v48 = vpack.c.bf16 %v11594_v55, %v11594_v55 }
 0x343   :  { %v4980_v35 = vmul.f32 %v4852_v49, %v1619_v7  ;;  %v3695_v45 = vmul.f32 1.442695, %v3511_v62  ;;  %v2579_v2 = vsel %vm2302_vm1, %v2266_v28, 0.0  ;;  %v11807_v1 = vadd.f32 %v5808_v44, %v11750_v3  ;;  %v7873_v44 = vpop.f32.mrf.mxu1 }
 0x344   :  { %v6266_v25 = vunpack.c.l.b16 %v14244_v48  ;;  %v4149_v59 = vrot.slane %v4148_v9, 1  ;;  %8211 = vrcp.f32 %v4564_v52  ;;  %v4581_v41 = vrot.slane %v4580_v39, 1  ;;  %2580 = vadd.xlane.f32.xlu1 %v2579_v2 }
 0x345   :  { %14245 = vst [vmem:[#allocation29_spill] sm:$0xff] %v11807_v1  ;;  %v6385_v34 = vsel %vm6280_vm2, %v6265_v18, %v11631_v40  ;;  %8213 = vpow2.f32 %v3695_v45  ;;  %v3032_v55 = vmax.f32 %v3030_v15, %v3031_v5  ;;  %v4566_v6 = vadd.f32 %v14243_v24, %v4565_v54  ;;  %v1631_v16 = vpop.f32.mrf.mxu1  ;;  %v11843_v18 = vpop.f32.mrf.mxu0 }
 0x346   :  { %v11816_v47 = vmul.f32 %v11671_v13, %v11529_v14  ;;  %v11818_v36 = vunpack.c.l.b16 %v6003_v11  ;;  %v4151_v3 = vrot.slane %v11798_v32, 4  ;;  %v4582_v33 = vadd.f32 %v4581_v41, %v4580_v39 }
 0x347   :  { %v5810_v58 = vsel %vm2302_vm1, %v4980_v35, 0.0  ;;  %v3033_v7 = vrot.slane %v3032_v55, 1  ;;  %v4567_v40 = vrot.slane %v4566_v6, 2  ;;  %v3035_v0 = vrot.slane %v11809_v4, 4 }
 0x348   :  { %14246 = vst [vmem:[#allocation128_spill] sm:$0xff] %v11816_v47  ;;  %14247 = vst [vmem:[#allocation36_spill] sm:$0xff] %v11818_v36  ;;  %v11826_v29 = vsel %vm6282_vm3, %v6266_v25, %v6385_v34  ;;  %v4150_v14 = vadd.f32 %v4149_v59, %v4148_v9  ;;  %8215 = vrcp.f32 %v4582_v33  ;;  %v943_v49 = vadd.f32 %v11775_v37, %v9052_v17  ;;  %v11859_v34 = vpop.f32.mrf.mxu0 }
 0x349   :  { %14248 = vst [vmem:[#allocation122_spill] sm:$0xff] %v11826_v29  ;;  %v11830_v31 = vpop.eup %8203  ;;  %v3034_v26 = vmax.f32 %v3032_v55, %v3033_v7  ;;  %v4568_v46 = vadd.f32 %v4567_v40, %v4566_v6  ;;  %v3036_v28 = vmax.f32 %v11809_v4, %v3035_v0  ;;  %v11839_v12 = vmul.f32 %v11690_v51, %v11571_v30  ;;  %v14251_v7 = vld [vmem:[#allocation112_spill] sm:$0xff] }
 0x34a   :  { %v11835_v23 = vpop.eup %8205  ;;  %v5811_v15 = vrot.slane %v5810_v58, 4  ;;  %v4152_v11 = vadd.f32 %v11798_v32, %v4151_v3  ;;  %v4157_v9 = vrot.slane %v11830_v31, 4  ;;  %v11848_v5 = vmul.f32 %v8200_v10, %v11602_v53  ;;  %v7874_v10 = vpop.f32.mrf.mxu1 }
 0x34b   :  { %14249 = vst [vmem:[#allocation119_spill] sm:$0xff] %v11839_v12  ;;  %v4163_v37 = vrot.slane %v11835_v23, 4  ;;  %v3512_v62 = vsub.f32 %v11779_v27, %v3034_v26  ;;  %v4569_v52 = vrot.slane %v4568_v46, 1  ;;  %v3037_v39 = vrot.slane %v3036_v28, 2 }
 0x34c   :  { %14250 = vst [vmem:[#allocation38_spill] sm:$0xff] %v11848_v5  ;;  %8217 = vrcp.f32 %v4150_v14  ;;  %v4158_v30 = vadd.f32 %v11830_v31, %v4157_v9  ;;  %v1640_v51 = vadd.f32 %v7873_v44, %v9657_v50  ;;  %v11852_v54 = vpop.eup %8207  ;;  %v2037_v48 = vrot.slane %v943_v49, %v9057_v19  ;;  %v11870_v9 = vpop.f32.mrf.mxu0 }
 0x34d   :  { %v3697_v25 = vmul.f32 1.442695, %v3512_v62  ;;  %v945_v35 = vadd.f32 %v11785_v38, %v9061_v21  ;;  %v4570_v45 = vadd.f32 %v4569_v52, %v4568_v46  ;;  %v4153_v2 = vrot.slane %v4152_v11, 2 }
 0x34e   :  { %v8210_v27 = vpop.eup %8209  ;;  %v4164_v59 = vadd.f32 %v11835_v23, %v4163_v37  ;;  %v1632_v53 = vadd.f32 %v1631_v16, %v9657_v50  ;;  %v3038_v41 = vmax.f32 %v3036_v28, %v3037_v39  ;;  %v5812_v55 = vadd.f32 %v5811_v15, %v5810_v58  ;;  %v1634_v39 = vpop.f32.mrf.mxu1 }
 0x34f   :  { %v4159_v6 = vrot.slane %v4158_v30, 2  ;;  %v4857_v3 = vmul.f32 %v8210_v27, %v14239_v56  ;;  %v1643_v44 = vadd.f32 %v7874_v10, %v9657_v50  ;;  %v4169_v33 = vrot.slane %v11852_v54, 4 }
 0x350   :  { %8219 = vpow2.f32 %v3697_v25  ;;  %v3039_v38 = vrot.slane %v3038_v41, 1  ;;  %v4583_v40 = vrot.slane %v14251_v7, 4  ;;  %v2267_v49 = vmul.f32 %v2037_v48, %v945_v35 }
 0x351   :  { %v8212_v0 = vpop.eup %8211  ;;  %v4985_v14 = vmul.f32 %v4857_v3, %v1640_v51  ;;  %8221 = vrcp.f32 %v4570_v45  ;;  %v949_v26 = vadd.f32 %v11796_v63, %v9052_v17  ;;  %v4154_v58 = vadd.f32 %v4153_v2, %v4152_v11 }
 0x352   :  { %v11867_v46 = vpop.eup %8213  ;;  %v4165_v28 = vrot.slane %v4164_v59, 2  ;;  %v4855_v56 = vmul.f32 %v8212_v0, %v14240_v60  ;;  %v3040_v15 = vmax.f32 %v3038_v41, %v3039_v38  ;;  %v5813_v16 = vrot.slane %v5812_v55, 2  ;;  %v7877_v38 = vpop.f32.mrf.mxu1 }
 0x353   :  { %v4160_v37 = vadd.f32 %v4159_v6, %v4158_v30  ;;  %v5845_v62 = vsel %vm2302_vm1, %v4985_v14, 0.0  ;;  %v4175_v52 = vrot.slane %v11867_v46, 4  ;;  %v4170_v51 = vadd.f32 %v11852_v54, %v4169_v33  ;;  %v11882_v6 = vpop.f32.mrf.mxu0 }
 0x354   :  { %v5846_v48 = vrot.slane %v5845_v62, 4  ;;  %v4983_v63 = vmul.f32 %v4855_v56, %v1632_v53  ;;  %v4584_v25 = vadd.f32 %v14251_v7, %v4583_v40  ;;  %v1635_v60 = vadd.f32 %v1634_v39, %v9657_v50 }
 0x355   :  { %v8216_v11 = vpop.eup %8215  ;;  %v4176_v35 = vadd.f32 %v11867_v46, %v4175_v52  ;;  %v2041_v45 = vrot.slane %v949_v26, %v9057_v19  ;;  %v3513_v30 = vsub.f32 %v11809_v4, %v3040_v15  ;;  %v4155_v27 = vrot.slane %v4154_v58, 1  ;;  %v11895_v39 = vpop.f32.mrf.mxu0 }
 0x356   :  { %v4166_v2 = vadd.f32 %v4165_v28, %v4164_v59  ;;  %v5831_v10 = vsel %vm2302_vm1, %v4983_v63, 0.0  ;;  %v4858_v41 = vmul.f32 %v8216_v11, %v14241_v8  ;;  %v5814_v53 = vadd.f32 %v5813_v16, %v5812_v55  ;;  %v11892_v55 = vpop.xlane.xlu1 %2481 }
 0x357   :  { %v4161_v3 = vrot.slane %v4160_v37, 1  ;;  %v5847_v33 = vadd.f32 %v5846_v48, %v5845_v62  ;;  %v3699_v40 = vmul.f32 1.442695, %v3513_v30  ;;  %v4171_v0 = vrot.slane %v4170_v51, 2  ;;  %v1647_v30 = vpop.f32.mrf.mxu1 }
 0x358   :  { %v4986_v14 = vmul.f32 %v4858_v41, %v1643_v44  ;;  %v11885_v56 = vadd.f32 %v7877_v38, %v9657_v50  ;;  %v4585_v26 = vrot.slane %v4584_v25, 2  ;;  %v4177_v59 = vrot.slane %v4176_v35, 2 }
 0x359   :  { %v11887_v4 = vpop.eup %8217  ;;  %v5832_v28 = vrot.slane %v5831_v10, 4  ;;  %v951_v8 = vadd.f32 %v11821_v57, %v9061_v21  ;;  %v2582_v15 = vsel %vm2302_vm1, %v2267_v49, 0.0  ;;  %v4156_v16 = vadd.f32 %v4155_v27, %v4154_v58 }
 0x35a   :  { %14252 = vst [vmem:[#allocation116_spill] sm:$0xff] %v11885_v56  ;;  %v4167_v62 = vrot.slane %v4166_v2, 1  ;;  %v5852_v52 = vsel %vm2302_vm1, %v4986_v14, 0.0  ;;  %v4586_v44 = vadd.f32 %v4585_v26, %v4584_v25  ;;  %2583 = vadd.xlane.f32.xlu1 %v2582_v15  ;;  %v5815_v48 = vrot.slane %v5814_v53, 1 }
 0x35b   :  { %v4162_v63 = vadd.f32 %v4161_v3, %v4160_v37  ;;  %v5848_v11 = vrot.slane %v5847_v33, 2  ;;  %8223 = vpow2.f32 %v3699_v40  ;;  %v11897_v41 = vadd.f32 %v4171_v0, %v4170_v51  ;;  %v11906_v51 = vpop.f32.mrf.mxu0 }
 0x35c   :  { %v11900_v57 = vadd.f32 %v1647_v30, %v9657_v50  ;;  %v4587_v49 = vrot.slane %v4586_v44, 1  ;;  %v3041_v58 = vrot.slane %v11892_v55, 4  ;;  %v4178_v38 = vadd.f32 %v4177_v59, %v4176_v35 }
 0x35d   :  { %v11903_v27 = vpop.eup %8219  ;;  %v5833_v25 = vadd.f32 %v5832_v28, %v5831_v10  ;;  %v5853_v14 = vrot.slane %v5852_v52, 4  ;;  %v2268_v26 = vmul.f32 %v2041_v45, %v951_v8  ;;  %8225 = vrcp.f32 %v4156_v16 }
 0x35e   :  { %v8222_v15 = vpop.eup %8221  ;;  %v4168_v37 = vadd.f32 %v4167_v62, %v4166_v2  ;;  %v4588_v3 = vadd.f32 %v4587_v49, %v4586_v44  ;;  %v3042_v40 = vmax.f32 %v11892_v55, %v3041_v58  ;;  %v11908_v0 = vadd.f32 %v5815_v48, %v5814_v53  ;;  %v14254_v62 = vld [vmem:[#allocation120_spill] sm:$0xff] }
 0x35f   :  { %8227 = vrcp.f32 %v4162_v63  ;;  %v5849_v30 = vadd.f32 %v5848_v11, %v5847_v33  ;;  %v953_v13 = vadd.f32 %v11843_v18, %v9052_v17  ;;  %v4856_v10 = vmul.f32 %v8222_v15, %v14243_v24  ;;  %v11916_v33 = vpop.f32.mrf.mxu0  ;;  %v11923_v11 = vpop.xlane.xlu1 %2484 }
 0x360   :  { %14253 = vst [vmem:[#allocation30_spill] sm:$0xff] %v11908_v0  ;;  %8229 = vrcp.f32 %v4588_v3  ;;  %v3043_v45 = vrot.slane %v3042_v40, 2  ;;  %v4179_v59 = vrot.slane %v4178_v38, 1  ;;  %v5834_v2 = vrot.slane %v5833_v25, 2 }
 0x361   :  { %v5854_v28 = vadd.f32 %v5853_v14, %v5852_v52  ;;  %v4181_v8 = vrot.slane %v11903_v27, 4  ;;  %8231 = vrcp.f32 %v4168_v37  ;;  %v4984_v16 = vmul.f32 %v4856_v10, %v1635_v60 }
 0x362   :  { %v3044_v53 = vmax.f32 %v3042_v40, %v3043_v45  ;;  %v4589_v44 = vrot.slane %v14254_v62, 4  ;;  %v5850_v48 = vrot.slane %v5849_v30, 1  ;;  %v2045_v18 = vrot.slane %v953_v13, %v9057_v19  ;;  %v11930_v45 = vpop.f32.mrf.mxu0 }
 0x363   :  { %v955_v24 = vadd.f32 %v11859_v34, %v9061_v21  ;;  %v959_v63 = vadd.f32 %v11870_v9, %v9052_v17  ;;  %v5838_v52 = vsel %vm2302_vm1, %v4984_v16, 0.0  ;;  %v2585_v58 = vsel %vm2302_vm1, %v2268_v26, 0.0  ;;  %v7878_v34 = vpop.f32.mrf.mxu1 }
 0x364   :  { %v3045_v49 = vrot.slane %v3044_v53, 1  ;;  %v4590_v60 = vadd.f32 %v14254_v62, %v4589_v44  ;;  %v4180_v14 = vadd.f32 %v4179_v59, %v4178_v38  ;;  %v5835_v15 = vadd.f32 %v5834_v2, %v5833_v25  ;;  %2586 = vadd.xlane.f32.xlu1 %v2585_v58  ;;  %v11944_v58 = vpop.xlane.xlu1 %2487  ;;  %v972_v35 = vpop.f32.mrf.mxu0 }
 0x365   :  { %v5855_v37 = vrot.slane %v5854_v28, 2  ;;  %v4182_v13 = vadd.f32 %v11903_v27, %v4181_v8  ;;  %v5839_v3 = vrot.slane %v5838_v52, 4  ;;  %v3047_v9 = vrot.slane %v11923_v11, 4 }
 0x366   :  { %v3046_v40 = vmax.f32 %v3044_v53, %v3045_v49  ;;  %v4591_v10 = vrot.slane %v4590_v60, 2  ;;  %v11932_v16 = vadd.f32 %v5850_v48, %v5849_v30  ;;  %v11935_v44 = vadd.f32 %v7878_v34, %v9657_v50 }
 0x367   :  { %v2269_v26 = vmul.f32 %v2045_v18, %v955_v24  ;;  %v2049_v38 = vrot.slane %v959_v63, %v9057_v19  ;;  %v3048_v8 = vmax.f32 %v11923_v11, %v3047_v9  ;;  %v961_v53 = vadd.f32 %v11882_v6, %v9061_v21 }
 0x368   :  { %14255 = vst [vmem:[#allocation143_spill] sm:$0xff] %v11935_v44  ;;  %v11938_v25 = vpop.eup %8223  ;;  %v3514_v59 = vsub.f32 %v11892_v55, %v3046_v40  ;;  %v4592_v2 = vadd.f32 %v4591_v10, %v4590_v60  ;;  %8233 = vrcp.f32 %v4180_v14  ;;  %v5836_v49 = vrot.slane %v5835_v15, 1 }
 0x369   :  { %v5856_v30 = vadd.f32 %v5855_v37, %v5854_v28  ;;  %v4183_v48 = vrot.slane %v4182_v13, 2  ;;  %v5840_v34 = vadd.f32 %v5839_v3, %v5838_v52  ;;  %v3049_v63 = vrot.slane %v3048_v8, 2 }
 0x36a   :  { %v3701_v18 = vmul.f32 1.442695, %v3514_v59  ;;  %v4593_v24 = vrot.slane %v4592_v2, 1  ;;  %v11946_v43 = vpop.eup %8225  ;;  %v4187_v55 = vrot.slane %v11938_v25, 4  ;;  %v2270_v60 = vmul.f32 %v2049_v38, %v961_v53 }
 0x36b   :  { %v963_v40 = vadd.f32 %v11895_v39, %v9052_v17  ;;  %v2588_v6 = vsel %vm2302_vm1, %v2269_v26, 0.0  ;;  %v3050_v37 = vmax.f32 %v3048_v8, %v3049_v63  ;;  %v3053_v52 = vrot.slane %v11944_v58, 4  ;;  %v1650_v39 = vpop.f32.mrf.mxu1 }
 0x36c   :  { %v11952_v14 = vpop.eup %8227  ;;  %8235 = vpow2.f32 %v3701_v18  ;;  %v4594_v28 = vadd.f32 %v4593_v24, %v4592_v2  ;;  %2589 = vadd.xlane.f32.xlu1 %v2588_v6  ;;  %v6010_v10 = vpack.c.bf16 %v11932_v16, %v11932_v16  ;;  %v5837_v9 = vadd.f32 %v5836_v49, %v5835_v15  ;;  %v974_v18 = vpop.f32.mrf.mxu0 }
 0x36d   :  { %v8230_v3 = vpop.eup %8229  ;;  %v5857_v59 = vrot.slane %v5856_v30, 1  ;;  %v2053_v38 = vrot.slane %v963_v40, %v9057_v19  ;;  %v4184_v53 = vadd.f32 %v4183_v48, %v4182_v13  ;;  %v3051_v26 = vrot.slane %v3050_v37, 1  ;;  %v11966_v16 = vpop.xlane.xlu1 %2490 }
 0x36e   :  { %8237 = vrcp.f32 %v4594_v28  ;;  %v3054_v0 = vmax.f32 %v11944_v58, %v3053_v52  ;;  %v11959_v2 = vpop.eup %8231  ;;  %v5841_v8 = vrot.slane %v5840_v34, 2  ;;  %v4188_v24 = vadd.f32 %v11938_v25, %v4187_v55 }
 0x36f   :  { %v965_v63 = vadd.f32 %v11906_v51, %v9061_v21  ;;  %v969_v15 = vadd.f32 %v11916_v33, %v9052_v17  ;;  %v4859_v13 = vmul.f32 %v8230_v3, %v14251_v7  ;;  %v3052_v49 = vmax.f32 %v3050_v37, %v3051_v26  ;;  %v978_v7 = vpop.f32.mrf.mxu0 }
 0x370   :  { %v3055_v48 = vrot.slane %v3054_v0, 2  ;;  %v2591_v40 = vsel %vm2302_vm1, %v2270_v60, 0.0  ;;  %v6008_v6 = vpack.c.bf16 %v5837_v9, %v5837_v9  ;;  %v11971_v28 = vadd.f32 %v1650_v39, %v9657_v50 }
 0x371   :  { %v2271_v52 = vmul.f32 %v2053_v38, %v965_v63  ;;  %v2057_v55 = vrot.slane %v969_v15, %v9057_v19  ;;  %2592 = vadd.xlane.f32.xlu0 %v2591_v40  ;;  %v11974_v51 = vadd.f32 %v5857_v59, %v5856_v30  ;;  %v3515_v33 = vsub.f32 %v11923_v11, %v3052_v49  ;;  %v11986_v63 = vpop.xlane.xlu1 %2493 }
 0x372   :  { %v3056_v1 = vmax.f32 %v3054_v0, %v3055_v48  ;;  %v3059_v36 = vrot.slane %v11966_v16, 4  ;;  %v4185_v37 = vrot.slane %v4184_v53, 1  ;;  %v5842_v3 = vadd.f32 %v5841_v8, %v5840_v34 }
 0x373   :  { %14256 = vst [vmem:[#allocation140_spill] sm:$0xff] %v11974_v51  ;;  %v4189_v26 = vrot.slane %v4188_v24, 2  ;;  %v971_v60 = vadd.f32 %v11930_v45, %v9061_v21  ;;  %v4987_v50 = vmul.f32 %v4859_v13, %v11900_v57  ;;  %v3703_v9 = vmul.f32 1.442695, %v3515_v33  ;;  %v11990_v57 = vpop.xlane.xlu0 %2496  ;;  %v980_v13 = vpop.f32.mrf.mxu0 }
 0x374   :  { %v3057_v38 = vrot.slane %v3056_v1, 1  ;;  %v3060_v39 = vmax.f32 %v11966_v16, %v3059_v36  ;;  %v11982_v30 = vunpack.c.l.b16 %v6010_v10  ;;  %v973_v0 = vadd.f32 %v972_v35, %v9052_v17 }
 0x375   :  { %v2272_v59 = vmul.f32 %v2057_v55, %v971_v60  ;;  %v2594_v11 = vsel %vm2302_vm1, %v2271_v52, 0.0  ;;  %v8234_v34 = vpop.eup %8233  ;;  %v11988_v8 = vunpack.c.l.b16 %v6008_v6  ;;  %8239 = vpow2.f32 %v3703_v9 }
 0x376   :  { %14257 = vst [vmem:[#allocation132_spill] sm:$0xff] %v11982_v30  ;;  %v3058_v45 = vmax.f32 %v3056_v1, %v3057_v38  ;;  %v3061_v15 = vrot.slane %v3060_v39, 2  ;;  %2595 = vadd.xlane.f32.xlu1 %v2594_v11  ;;  %v4186_v10 = vadd.f32 %v4185_v37, %v4184_v53  ;;  %v5843_v49 = vrot.slane %v5842_v3, 1  ;;  %v12018_v30 = vpop.xlane.xlu1 %2499 }
 0x377   :  { %v4190_v35 = vadd.f32 %v4189_v26, %v4188_v24  ;;  %v5859_v48 = vsel %vm2302_vm1, %v4987_v50, 0.0  ;;  %v3065_v6 = vrot.slane %v11986_v63, 4  ;;  %v2061_v1 = vrot.slane %v973_v0, %v9057_v19 }
 0x378   :  { %v3516_v40 = vsub.f32 %v11944_v58, %v3058_v45  ;;  %v3062_v52 = vmax.f32 %v3060_v39, %v3061_v15  ;;  %v975_v33 = vadd.f32 %v974_v18, %v9061_v21  ;;  %v2597_v60 = vsel %vm2302_vm1, %v2272_v59, 0.0  ;;  %v982_v58 = vpop.f32.mrf.mxu0 }
 0x379   :  { %v11997_v55 = vpop.eup %8235  ;;  %v3071_v9 = vrot.slane %v11990_v57, 4  ;;  %v3066_v26 = vmax.f32 %v11986_v63, %v3065_v6  ;;  %2598 = vadd.xlane.f32.xlu0 %v2597_v60  ;;  %8241 = vrcp.f32 %v4186_v10  ;;  %v5844_v38 = vadd.f32 %v5843_v49, %v5842_v3 }
 0x37a   :  { %14258 = vst [vmem:[#allocation138_spill] sm:$0xff] %v11997_v55  ;;  %v4193_v53 = vrot.slane %v11997_v55, 4  ;;  %v3705_v24 = vmul.f32 1.442695, %v3516_v40  ;;  %v3063_v37 = vrot.slane %v3062_v52, 1  ;;  %v979_v39 = vadd.f32 %v978_v7, %v9052_v17  ;;  %v984_v49 = vpop.f32.mrf.mxu0 }
 0x37b   :  { %v8238_v50 = vpop.eup %8237  ;;  %v3072_v0 = vmax.f32 %v11990_v57, %v3071_v9  ;;  %v4191_v45 = vrot.slane %v4190_v35, 1  ;;  %v5860_v15 = vrot.slane %v5859_v48, 4  ;;  %v3067_v40 = vrot.slane %v3066_v26, 2 }
 0x37c   :  { %v4194_v18 = vadd.f32 %v11997_v55, %v4193_v53  ;;  %v4860_v59 = vmul.f32 %v8238_v50, %v14254_v62  ;;  %8243 = vpow2.f32 %v3705_v24  ;;  %v3064_v11 = vmax.f32 %v3062_v52, %v3063_v37 }
 0x37d   :  { %v3073_v36 = vrot.slane %v3072_v0, 2  ;;  %v2273_v3 = vmul.f32 %v2061_v1, %v975_v33  ;;  %v12012_v7 = vmul.f32 %v8234_v34, %v11867_v46  ;;  %v3068_v9 = vmax.f32 %v3066_v26, %v3067_v40 }
 0x37e   :  { %v4195_v6 = vrot.slane %v4194_v18, 2  ;;  %v4988_v60 = vmul.f32 %v4860_v59, %v11971_v28  ;;  %v3517_v10 = vsub.f32 %v11966_v16, %v3064_v11  ;;  %v983_v62 = vadd.f32 %v982_v58, %v9052_v17  ;;  %v12027_v11 = vpop.xlane.xlu0 %2502 }
 0x37f   :  { %14259 = vst [vmem:[#allocation40_spill] sm:$0xff] %v12012_v7  ;;  %v3074_v53 = vmax.f32 %v3072_v0, %v3073_v36  ;;  %v2065_v37 = vrot.slane %v979_v39, %v9057_v19  ;;  %v981_v50 = vadd.f32 %v980_v13, %v9061_v21  ;;  %v6009_v28 = vpack.c.bf16 %v5844_v38, %v5844_v38  ;;  %v988_v36 = vpop.f32.mrf.mxu0 }
 0x380   :  { %v5866_v52 = vsel %vm2302_vm1, %v4988_v60, 0.0  ;;  %v3707_v24 = vmul.f32 1.442695, %v3517_v10  ;;  %v5861_v16 = vadd.f32 %v5860_v15, %v5859_v48  ;;  %v4196_v1 = vadd.f32 %v4195_v6, %v4194_v18 }
 0x381   :  { %v3069_v33 = vrot.slane %v3068_v9, 1  ;;  %v4192_v59 = vadd.f32 %v4191_v45, %v4190_v35  ;;  %v3075_v46 = vrot.slane %v3074_v53, 1  ;;  %v2600_v34 = vsel %vm2302_vm1, %v2273_v3, 0.0 }
 0x382   :  { %8245 = vpow2.f32 %v3707_v24  ;;  %v12021_v26 = vpop.eup %8239  ;;  %v5867_v58 = vrot.slane %v5866_v52, 4  ;;  %v2069_v39 = vrot.slane %v983_v62, %v9057_v19  ;;  %2601 = vadd.xlane.f32.xlu0 %v2600_v34  ;;  %v3077_v13 = vrot.slane %v12018_v30, 4 }
 0x383   :  { %14260 = vst [vmem:[#allocation58_spill] sm:$0xff] %v12021_v26  ;;  %v3070_v0 = vmax.f32 %v3068_v9, %v3069_v33  ;;  %v4199_v38 = vrot.slane %v12021_v26, 4  ;;  %v3076_v48 = vmax.f32 %v3074_v53, %v3075_v46  ;;  %v2274_v18 = vmul.f32 %v2065_v37, %v981_v50  ;;  %v990_v9 = vpop.f32.mrf.mxu0 }
 0x384   :  { %v985_v35 = vadd.f32 %v984_v49, %v9061_v21  ;;  %v5862_v45 = vrot.slane %v5861_v16, 2  ;;  %v4197_v15 = vrot.slane %v4196_v1, 1  ;;  %v3078_v6 = vmax.f32 %v12018_v30, %v3077_v13  ;;  %v12041_v13 = vpop.xlane.xlu0 %2505 }
 0x385   :  { %v3518_v40 = vsub.f32 %v11986_v63, %v3070_v0  ;;  %v6273_v60 = vunpack.c.l.b16 %v6009_v28  ;;  %8247 = vrcp.f32 %v4192_v59  ;;  %v4200_v10 = vadd.f32 %v12021_v26, %v4199_v38 }
 0x386   :  { %v3519_v3 = vsub.f32 %v11990_v57, %v3076_v48  ;;  %v5868_v62 = vadd.f32 %v5867_v58, %v5866_v52  ;;  %v3079_v24 = vrot.slane %v3078_v6, 2  ;;  %v2275_v37 = vmul.f32 %v2069_v39, %v985_v35  ;;  %v8242_v49 = vpop.eup %8241  ;;  %v992_v39 = vpop.f32.mrf.mxu0 }
 0x387   :  { %v3709_v53 = vmul.f32 1.442695, %v3518_v40  ;;  %v4201_v50 = vrot.slane %v4200_v10, 2  ;;  %v2603_v46 = vsel %vm2302_vm1, %v2274_v18, 0.0  ;;  %v3083_v63 = vrot.slane %v12027_v11, 4 }
 0x388   :  { %v3711_v33 = vmul.f32 1.442695, %v3519_v3  ;;  %v12037_v28 = vadd.f32 %v5862_v45, %v5861_v16  ;;  %v4198_v59 = vadd.f32 %v4197_v15, %v4196_v1  ;;  %v3080_v0 = vmax.f32 %v3078_v6, %v3079_v24  ;;  %2604 = vadd.xlane.f32.xlu0 %v2603_v46 }
 0x389   :  { %v12035_v34 = vpop.eup %8243  ;;  %8249 = vpow2.f32 %v3709_v53  ;;  %v4202_v57 = vadd.f32 %v4201_v50, %v4200_v10  ;;  %v3084_v58 = vmax.f32 %v12027_v11, %v3083_v63  ;;  %v12045_v38 = vsel %vm6280_vm2, %v6273_v60, %v11988_v8 }
 0x38a   :  { %14261 = vst [vmem:[#allocation90_spill] sm:$0xff] %v12035_v34  ;;  %v4205_v52 = vrot.slane %v12035_v34, 4  ;;  %8251 = vpow2.f32 %v3711_v33  ;;  %14262 = vst [vmem:[#allocation102_spill] sm:$0xff] %v12045_v38  ;;  %v5869_v48 = vrot.slane %v5868_v62, 2  ;;  %v3081_v16 = vrot.slane %v3080_v0, 1  ;;  %v14307_v38 = vld [vmem:[#allocation20_spill] sm:$0xff] }
 0x38b   :  { %v12048_v1 = vadd.f32 %v988_v36, %v9052_v17  ;;  %v12051_v18 = vmul.f32 %v8242_v49, %v11903_v27  ;;  %v3085_v45 = vrot.slane %v3084_v58, 2  ;;  %v2606_v15 = vsel %vm2302_vm1, %v2275_v37, 0.0 }
 0x38c   :  { %v4206_v35 = vadd.f32 %v12035_v34, %v4205_v52  ;;  %v4203_v40 = vrot.slane %v4202_v57, 1  ;;  %v3082_v6 = vmax.f32 %v3080_v0, %v3081_v16  ;;  %v12056_v10 = vadd.f32 %v992_v39, %v9052_v17  ;;  %2607 = vadd.xlane.f32.xlu0 %v2606_v15 }
 0x38d   :  { %14263 = vst [vmem:[#allocation96_spill] sm:$0xff] %v12051_v18  ;;  %v3089_v8 = vrot.slane %v12041_v13, 4  ;;  %8253 = vrcp.f32 %v4198_v59  ;;  %v3086_v3 = vmax.f32 %v3084_v58, %v3085_v45  ;;  %v12062_v53 = vadd.f32 %v5869_v48, %v5868_v62  ;;  %v994_v59 = vpop.f32.mrf.mxu0 }
 0x38e   :  { %v4207_v36 = vrot.slane %v4206_v35, 2  ;;  %v3520_v24 = vsub.f32 %v12018_v30, %v3082_v6  ;;  %v991_v63 = vadd.f32 %v990_v9, %v9061_v21  ;;  %v4204_v0 = vadd.f32 %v4203_v40, %v4202_v57 }
 0x38f   :  { %v12060_v27 = vpop.eup %8245  ;;  %14265 = vst [vmem:[#allocation85_spill] sm:$0xff] %v12062_v53  ;;  %v3090_v49 = vmax.f32 %v12041_v13, %v3089_v8  ;;  %v3087_v46 = vrot.slane %v3086_v3, 1  ;;  %v4071_v16 = vrot.slane %v11445_v61, 1  ;;  %v995_v15 = vadd.f32 %v994_v59, %v9061_v21 }
 0x390   :  { %14264 = vst [vmem:[#allocation107_spill] sm:$0xff] %v12060_v27  ;;  %v4208_v50 = vadd.f32 %v4207_v36, %v4206_v35  ;;  %v4211_v33 = vrot.slane %v12060_v27, 4  ;;  %v3713_v52 = vmul.f32 1.442695, %v3520_v24  ;;  %v14266_v9 = vrot.slane %v11448_v42, 2 }
 0x391   :  { %v3091_v58 = vrot.slane %v3090_v49, 2  ;;  %v3088_v48 = vmax.f32 %v3086_v3, %v3087_v46  ;;  %v14267_v36 = vrot.slane %v11310_v20, 1  ;;  %v14268_v46 = vld [vmem:[#allocation74_spill] sm:$0xff]  ;;  %vm7402_vm0 = vcmask 589312  }
 0x392   :  { %v4209_v39 = vrot.slane %v4208_v50, 1  ;;  %v4212_v30 = vadd.f32 %v12060_v27, %v4211_v33  ;;  %v8248_v45 = vpop.eup %8247  ;;  %8255 = vpow2.f32 %v3713_v52  ;;  %v4076_v57 = vadd.f32 %v14266_v9, %v11448_v42  ;;  %v14320_v27 = vld [vmem:[#allocation24_spill] sm:$0xff] }
 0x393   :  { %v3092_v35 = vmax.f32 %v3090_v49, %v3091_v58  ;;  %v3521_v8 = vsub.f32 %v12027_v11, %v3088_v48  ;;  %v4066_v24 = vadd.f32 %v14267_v36, %v11310_v20  ;;  %8257 = vrcp.f32 %v4204_v0 }
 0x394   :  { %v4210_v40 = vadd.f32 %v4209_v39, %v4208_v50  ;;  %v4213_v6 = vrot.slane %v4212_v30, 2  ;;  %v4077_v33 = vrot.slane %v4076_v57, 1  ;;  %v14269_v49 = vrot.slane %v14268_v46, 2  ;;  %v14271_v50 = vld [vmem:[#allocation81_spill] sm:$0xff] }
 0x395   :  { %v3093_v3 = vrot.slane %v3092_v35, 1  ;;  %v3715_v62 = vmul.f32 1.442695, %v3521_v8  ;;  %v4072_v42 = vadd.f32 %v4071_v16, %v11445_v61  ;;  %v4119_v39 = vrot.slane %v14271_v50, 1 }
 0x396   :  { %v4124_v52 = vadd.f32 %v14269_v49, %v14268_v46  ;;  %v12085_v59 = vpop.eup %8249  ;;  %v4214_v58 = vadd.f32 %v4213_v6, %v4212_v30  ;;  %8259 = vrcp.f32 %v4210_v40  ;;  %v4078_v48 = vadd.f32 %v4077_v33, %v4076_v57  ;;  %v14273_v6 = vld [vmem:[#allocation18_spill] sm:$0xff]  ;;  %v14276_v57 = vld [vmem:[#allocation60_spill] sm:$0xff] }
 0x397   :  { %14270 = vst [vmem:[#allocation112_spill] sm:$0xff] %v12085_v59  ;;  %v12089_v11 = vpop.eup %8251  ;;  %v4217_v20 = vrot.slane %v12085_v59, 4  ;;  %v3094_v0 = vmax.f32 %v3092_v35, %v3093_v3  ;;  %8261 = vpow2.f32 %v3715_v62  ;;  %v14274_v61 = vrot.slane %v14273_v6, 1  ;;  %v14275_v35 = vld [vmem:[#allocation134_spill] sm:$0xff] }
 0x398   :  { %14272 = vst [vmem:[#allocation120_spill] sm:$0xff] %v12089_v11  ;;  %v4215_v9 = vrot.slane %v4214_v58, 1  ;;  %v4223_v36 = vrot.slane %v12089_v11, 4  ;;  %v4125_v46 = vrot.slane %v4124_v52, 1  ;;  %8263 = vrcp.f32 %v4066_v24  ;;  %v14280_v24 = vld [vmem:[#allocation142_spill] sm:$0xff] }
 0x399   :  { %v4218_v49 = vadd.f32 %v12085_v59, %v4217_v20  ;;  %v3522_v30 = vsub.f32 %v12041_v13, %v3094_v0  ;;  %v4114_v16 = vadd.f32 %v14274_v61, %v14273_v6  ;;  %8265 = vrcp.f32 %v4072_v42  ;;  %v14278_v20 = vld [vmem:[#allocation139_spill] sm:$0xff]  ;;  %v14279_v13 = vld [vmem:[#allocation45_spill] sm:$0xff] }
 0x39a   :  { %v4216_v8 = vadd.f32 %v4215_v9, %v4214_v58  ;;  %v4224_v40 = vadd.f32 %v12089_v11, %v4223_v36  ;;  %v4767_v3 = vmul.f32 %v14276_v57, %v14275_v35  ;;  %v12101_v33 = vpop.eup %8253  ;;  %v4120_v37 = vadd.f32 %v4119_v39, %v14271_v50  ;;  %v14281_v58 = vld [vmem:[#allocation68_spill] sm:$0xff] }
 0x39b   :  { %14277 = vst [vmem:[#allocation74_spill] sm:$0xff] %v12101_v33  ;;  %v3717_v62 = vmul.f32 1.442695, %v3522_v30  ;;  %8267 = vrcp.f32 %v4078_v48  ;;  %v4768_v0 = vmul.f32 %v14279_v13, %v14278_v20  ;;  %v4126_v6 = vadd.f32 %v4125_v46, %v4124_v52  ;;  %v14285_v48 = vld [vmem:[#allocation42_spill] sm:$0xff] }
 0x39c   :  { %8269 = vrcp.f32 %v4216_v8  ;;  %v4225_v60 = vrot.slane %v4224_v40, 2  ;;  %v4769_v9 = vmul.f32 %v14281_v58, %v14280_v24  ;;  %v12109_v42 = vmul.f32 %v8248_v45, %v11938_v25  ;;  %v14286_v8 = vld [vmem:[#allocation14_spill] sm:$0xff]  ;;  %v14288_v25 = vld [vmem:[#allocation13_spill] sm:$0xff] }
 0x39d   :  { %v14283_v36 = vrot.slane %v12037_v28, 1  ;;  %v4219_v30 = vrot.slane %v4218_v49, 2  ;;  %8271 = vpow2.f32 %v3717_v62  ;;  %v4770_v52 = vmul.f32 %v14286_v8, %v14285_v48  ;;  %v14289_v45 = vld [vmem:[#allocation93_spill] sm:$0xff]  ;;  %v14296_v48 = vld [vmem:[#allocation99_spill] sm:$0xff] }
 0x39e   :  { %14282 = vst [vmem:[#allocation81_spill] sm:$0xff] %v12109_v42  ;;  %v4226_v39 = vadd.f32 %v4225_v60, %v4224_v40  ;;  %8273 = vrcp.f32 %v4114_v16  ;;  %v14287_v46 = vrot.slane %v12048_v1, %v9057_v19  ;;  %v4771_v57 = vmul.f32 %v14289_v45, %v14288_v25  ;;  %v14293_v40 = vld [vmem:[#allocation46_spill] sm:$0xff]  ;;  %v14294_v24 = vld [vmem:[#allocation41_spill] sm:$0xff]  ;;  %v14301_v45 = vld [vmem:[#allocation27_spill] sm:$0xff] }
 0x39f   :  { %v12114_v61 = vadd.f32 %v14283_v36, %v12037_v28  ;;  %8275 = vrcp.f32 %v4120_v37  ;;  %v14290_v28 = vld [vmem:[#allocation43_spill] sm:$0xff]  ;;  %v12127_v13 = vpop.eup %8255  ;;  %v14292_v60 = vrot.slane %v12056_v10, %v9057_v19  ;;  %v4896_v62 = vmul.f32 %v4768_v0, %v14293_v40  ;;  %v14295_v36 = vld [vmem:[#allocation54_spill] sm:$0xff]  ;;  %v14299_v25 = vld [vmem:[#allocation25_spill] sm:$0xff] }
 0x3a0   :  { %v12122_v35 = vmul.f32 %v14287_v46, %v991_v63  ;;  %v4895_v20 = vmul.f32 %v4767_v3, %v14290_v28  ;;  %14291 = vst [vmem:[#allocation134_spill] sm:$0xff] %v12127_v13  ;;  %8277 = vrcp.f32 %v4126_v6  ;;  %v4897_v1 = vmul.f32 %v4769_v9, %v14294_v24  ;;  %v12141_v8 = vpop.eup %8257  ;;  %v14298_v46 = vld [vmem:[#allocation83_spill] sm:$0xff]  ;;  %v14303_v0 = vld [vmem:[#allocation53_spill] sm:$0xff]  ;;  %v14304_v9 = vld [vmem:[#allocation44_spill] sm:$0xff] }
 0x3a1   :  { %14284 = vst [vmem:[#allocation18_spill] sm:$0xff] %v12114_v61  ;;  %v12132_v16 = vmul.f32 %v14292_v60, %v995_v15  ;;  %v12136_v63 = vadd.f32 %v4219_v30, %v4218_v49  ;;  %v4227_v37 = vrot.slane %v4226_v39, 1  ;;  %v4229_v58 = vrot.slane %v12127_v13, 4  ;;  %14297 = vst [vmem:[#allocation60_spill] sm:$0xff] %v12141_v8  ;;  %v14300_v15 = vld [vmem:[#allocation55_spill] sm:$0xff]  ;;  %v14305_v40 = vld [vmem:[#allocation57_spill] sm:$0xff] }
 0x3a2   :  { %v4775_v3 = vmul.f32 %v14296_v48, %v14295_v36  ;;  %v4776_v10 = vmul.f32 %v14299_v25, %v14298_v46  ;;  %v4777_v6 = vmul.f32 %v14301_v45, %v14300_v15  ;;  %v14302_v28 = vld [vmem:[#allocation19_spill] sm:$0xff]  ;;  %v4898_v49 = vmul.f32 %v4770_v52, %v14304_v9  ;;  %v14308_v46 = vld [vmem:[#allocation48_spill] sm:$0xff] }
 0x3a3   :  { %v4778_v60 = vmul.f32 %v14303_v0, %v14302_v28  ;;  %v4230_v30 = vadd.f32 %v12127_v13, %v4229_v58  ;;  %v4899_v24 = vmul.f32 %v4771_v57, %v14305_v40  ;;  %v5215_v50 = vsel %vm2302_vm1, %v4895_v20, 0.0  ;;  %v12154_v48 = vpop.eup %8259  ;;  %v14310_v0 = vld [vmem:[#allocation66_spill] sm:$0xff] }
 0x3a4   :  { %v5222_v36 = vsel %vm2302_vm1, %v4896_v62, 0.0  ;;  %14306 = vst [vmem:[#allocation139_spill] sm:$0xff] %v12154_v48  ;;  %v4779_v25 = vmul.f32 %v14308_v46, %v14307_v38  ;;  %v5216_v51 = vrot.slane %v5215_v50, 4  ;;  %v5229_v45 = vsel %vm2302_vm1, %v4897_v1, 0.0  ;;  %v12159_v28 = vpop.eup %8261  ;;  %v14311_v40 = vld [vmem:[#allocation70_spill] sm:$0xff] }
 0x3a5   :  { %v5223_v15 = vrot.slane %v5222_v36, 4  ;;  %14309 = vst [vmem:[#allocation45_spill] sm:$0xff] %v12159_v28  ;;  %v12161_v52 = vadd.f32 %v4227_v37, %v4226_v39  ;;  %v4231_v58 = vrot.slane %v4230_v30, 2  ;;  %v12164_v57 = vmul.f32 %v4775_v3, %v14310_v0  ;;  %v8264_v9 = vpop.eup %8263  ;;  %v14312_v0 = vld [vmem:[#allocation15_spill] sm:$0xff] }
 0x3a6   :  { %v5230_v20 = vrot.slane %v5229_v45, 4  ;;  %v4235_v62 = vrot.slane %v12159_v28, 4  ;;  %v12168_v29 = vmul.f32 %v4776_v10, %v14311_v40  ;;  %v5217_v38 = vadd.f32 %v5216_v51, %v5215_v50  ;;  %v8266_v53 = vpop.eup %8265  ;;  %v14314_v10 = vld [vmem:[#allocation80_spill] sm:$0xff]  ;;  %v14315_v51 = vld [vmem:[#allocation77_spill] sm:$0xff] }
 0x3a7   :  { %v5224_v46 = vadd.f32 %v5223_v15, %v5222_v36  ;;  %v4232_v61 = vadd.f32 %v4231_v58, %v4230_v30  ;;  %v5236_v44 = vsel %vm2302_vm1, %v4898_v49, 0.0  ;;  %v5243_v39 = vsel %vm2302_vm1, %v4899_v24, 0.0  ;;  %v14316_v36 = vld [vmem:[#allocation63_spill] sm:$0xff] }
 0x3a8   :  { %v5231_v1 = vadd.f32 %v5230_v20, %v5229_v45  ;;  %v8268_v37 = vpop.eup %8267  ;;  %v4236_v3 = vadd.f32 %v12159_v28, %v4235_v62  ;;  %v4772_v56 = vmul.f32 %v8264_v9, %v14312_v0  ;;  %v5218_v13 = vrot.slane %v5217_v38, 2 }
 0x3a9   :  { %v5225_v11 = vrot.slane %v5224_v46, 2  ;;  %v12174_v42 = vpop.eup %8269  ;;  %v4773_v40 = vmul.f32 %v8266_v53, %v14314_v10  ;;  %v4774_v50 = vmul.f32 %v8268_v37, %v14315_v51  ;;  %v12179_v30 = vmul.f32 %v4777_v6, %v14316_v36  ;;  %v14318_v37 = vld [vmem:[#allocation22_spill] sm:$0xff] }
 0x3aa   :  { %14313 = vst [vmem:[#allocation142_spill] sm:$0xff] %v12174_v42  ;;  %v5232_v15 = vrot.slane %v5231_v1, 2  ;;  %v12181_v49 = vpop.eup %8271  ;;  %v4233_v24 = vrot.slane %v4232_v61, 1  ;;  %v4237_v45 = vrot.slane %v4236_v3, 2  ;;  %v5219_v58 = vadd.f32 %v5218_v13, %v5217_v38  ;;  %v14319_v6 = vld [vmem:[#allocation62_spill] sm:$0xff] }
 0x3ab   :  { %14317 = vst [vmem:[#allocation68_spill] sm:$0xff] %v12181_v49  ;;  %v5226_v20 = vadd.f32 %v5225_v11, %v5224_v46  ;;  %v8274_v62 = vpop.eup %8273  ;;  %v4241_v9 = vrot.slane %v12181_v49, 4  ;;  %v5237_v28 = vrot.slane %v5236_v44, 4  ;;  %v5244_v18 = vrot.slane %v5243_v39, 4  ;;  %v14321_v11 = vld [vmem:[#allocation52_spill] sm:$0xff]  ;;  %v14322_v46 = vld [vmem:[#allocation61_spill] sm:$0xff] }
 0x3ac   :  { %v5233_v0 = vadd.f32 %v5232_v15, %v5231_v1  ;;  %v8276_v7 = vpop.eup %8275  ;;  %v12184_v53 = vadd.f32 %v4237_v45, %v4236_v3  ;;  %v4780_v10 = vmul.f32 %v8274_v62, %v14318_v37  ;;  %v4900_v51 = vmul.f32 %v4772_v56, %v14319_v6  ;;  %v14323_v15 = vld [vmem:[#allocation67_spill] sm:$0xff]  ;;  %v14324_v3 = vld [vmem:[#allocation72_spill] sm:$0xff]  ;;  %v14325_v56 = vld [vmem:[#allocation26_spill] sm:$0xff] }
 0x3ad   :  { %v5220_v36 = vrot.slane %v5219_v58, 1  ;;  %v8278_v59 = vpop.eup %8277  ;;  %v4242_v42 = vadd.f32 %v12181_v49, %v4241_v9  ;;  %v4781_v13 = vmul.f32 %v8276_v7, %v14320_v27  ;;  %v4901_v38 = vmul.f32 %v4773_v40, %v14321_v11  ;;  %v14326_v6 = vld [vmem:[#allocation76_spill] sm:$0xff] }
 0x3ae   :  { %v4902_v48 = vmul.f32 %v4774_v50, %v14322_v46  ;;  %v12192_v1 = vadd.f32 %v4233_v24, %v4232_v61  ;;  %v4906_v34 = vmul.f32 %v4778_v60, %v14323_v15  ;;  %v4907_v45 = vmul.f32 %v4779_v25, %v14324_v3  ;;  %v14327_v50 = vld [vmem:[#allocation71_spill] sm:$0xff] }
 0x3af   :  { %v5227_v5 = vrot.slane %v5226_v20, 1  ;;  %v4782_v37 = vmul.f32 %v8278_v59, %v14325_v56  ;;  %v4908_v12 = vmul.f32 %v4780_v10, %v14326_v6  ;;  %v5234_v9 = vrot.slane %v5233_v0, 1 }
 0x3b0   :  { %v4243_v49 = vrot.slane %v4242_v42, 2  ;;  %v12199_v7 = vadd.f32 %v5220_v36, %v5219_v58  ;;  %v5238_v27 = vadd.f32 %v5237_v28, %v5236_v44  ;;  %v5245_v40 = vadd.f32 %v5244_v18, %v5243_v39  ;;  %v14328_v36 = vld [vmem:[#allocation75_spill] sm:$0xff] }
 0x3b1   :  { %v4909_v61 = vmul.f32 %v4781_v13, %v14327_v50  ;;  %v5250_v24 = vsel %vm2302_vm1, %v4900_v51, 0.0  ;;  %v5257_v60 = vsel %vm2302_vm1, %v4901_v38, 0.0  ;;  %v5264_v25 = vsel %vm2302_vm1, %v4902_v48, 0.0 }
 0x3b2   :  { %v12205_v11 = vadd.f32 %v5227_v5, %v5226_v20  ;;  %v5239_v46 = vrot.slane %v5238_v27, 2  ;;  %v5246_v59 = vrot.slane %v5245_v40, 2  ;;  %v5251_v15 = vrot.slane %v5250_v24, 4 }
 0x3b3   :  { %v12207_v10 = vadd.f32 %v5234_v9, %v5233_v0  ;;  %v5258_v3 = vrot.slane %v5257_v60, 4  ;;  %v5265_v58 = vrot.slane %v5264_v25, 4  ;;  %v5271_v44 = vsel %vm2302_vm1, %v12164_v57, 0.0 }
 0x3b4   :  { %v5240_v18 = vadd.f32 %v5239_v46, %v5238_v27  ;;  %v5247_v28 = vadd.f32 %v5246_v59, %v5245_v40  ;;  %v5252_v39 = vadd.f32 %v5251_v15, %v5250_v24  ;;  %v5272_v51 = vrot.slane %v5271_v44, 4 }
 0x3b5   :  { %v4910_v13 = vmul.f32 %v4782_v37, %v14328_v36  ;;  %v5259_v38 = vadd.f32 %v5258_v3, %v5257_v60  ;;  %v5266_v48 = vadd.f32 %v5265_v58, %v5264_v25  ;;  %v5278_v5 = vsel %vm2302_vm1, %v12168_v29, 0.0 }
 0x3b6   :  { %v5241_v20 = vrot.slane %v5240_v18, 1  ;;  %v5248_v56 = vrot.slane %v5247_v28, 1  ;;  %v5253_v0 = vrot.slane %v5252_v39, 2  ;;  %v5273_v6 = vadd.f32 %v5272_v51, %v5271_v44  ;;  %v12223_v51 = vpop.f32.mrf.mxu0 }
 0x3b7   :  { %v12214_v9 = vadd.f32 %v4243_v49, %v4242_v42  ;;  %v5260_v50 = vrot.slane %v5259_v38, 2  ;;  %v5267_v62 = vrot.slane %v5266_v48, 2  ;;  %v5279_v57 = vrot.slane %v5278_v5, 4 }
 0x3b8   :  { %v12216_v27 = vadd.f32 %v5241_v20, %v5240_v18  ;;  %v12218_v40 = vadd.f32 %v5248_v56, %v5247_v28  ;;  %v5254_v24 = vadd.f32 %v5253_v0, %v5252_v39  ;;  %v5274_v37 = vrot.slane %v5273_v6, 2 }
 0x3b9   :  { %v5261_v60 = vadd.f32 %v5260_v50, %v5259_v38  ;;  %v5268_v25 = vadd.f32 %v5267_v62, %v5266_v48  ;;  %v5280_v46 = vadd.f32 %v5279_v57, %v5278_v5  ;;  %v5285_v29 = vsel %vm2302_vm1, %v12179_v30, 0.0 }
 0x3ba   :  { %v5255_v59 = vrot.slane %v5254_v24, 1  ;;  %v5275_v15 = vadd.f32 %v5274_v37, %v5273_v6  ;;  %v5286_v3 = vrot.slane %v5285_v29, 4  ;;  %v5292_v42 = vsel %vm2302_vm1, %v4906_v34, 0.0  ;;  %v12236_v37 = vpop.f32.mrf.mxu0 }
 0x3bb   :  { %v5262_v49 = vrot.slane %v5261_v60, 1  ;;  %v5269_v58 = vrot.slane %v5268_v25, 1  ;;  %v5281_v44 = vrot.slane %v5280_v46, 2  ;;  %v5293_v18 = vrot.slane %v5292_v42, 4 }
 0x3bc   :  { %v12225_v28 = vadd.f32 %v5255_v59, %v5254_v24  ;;  %v5276_v39 = vrot.slane %v5275_v15, 1  ;;  %v5287_v36 = vadd.f32 %v5286_v3, %v5285_v29  ;;  %v5299_v62 = vsel %vm2302_vm1, %v4907_v45, 0.0 }
 0x3bd   :  { %v12228_v38 = vadd.f32 %v5262_v49, %v5261_v60  ;;  %v12230_v30 = vadd.f32 %v5269_v58, %v5268_v25  ;;  %v5282_v48 = vadd.f32 %v5281_v44, %v5280_v46  ;;  %v5294_v5 = vadd.f32 %v5293_v18, %v5292_v42  ;;  %v12239_v42 = vpop.xlane.xlu0 %2508 }
 0x3be   :  { %v12232_v20 = vadd.f32 %v5276_v39, %v5275_v15  ;;  %v5288_v34 = vrot.slane %v5287_v36, 2  ;;  %v5300_v56 = vrot.slane %v5299_v62, 4  ;;  %v5306_v0 = vsel %vm2302_vm1, %v4908_v12, 0.0 }
 0x3bf   :  { %v5283_v6 = vrot.slane %v5282_v48, 1  ;;  %v5295_v50 = vrot.slane %v5294_v5, 2  ;;  %v5307_v57 = vrot.slane %v5306_v0, 4  ;;  %v5313_v24 = vsel %vm2302_vm1, %v4909_v61, 0.0 }
 0x3c0   :  { %v5289_v45 = vadd.f32 %v5288_v34, %v5287_v36  ;;  %v5301_v60 = vadd.f32 %v5300_v56, %v5299_v62  ;;  %v5314_v29 = vrot.slane %v5313_v24, 4  ;;  %v5320_v25 = vsel %vm2302_vm1, %v4910_v13, 0.0  ;;  %v12245_v62 = vpop.f32.mrf.mxu0  ;;  %v12249_v56 = vpop.xlane.xlu1 %2523 }
 0x3c1   :  { %v5284_v46 = vadd.f32 %v5283_v6, %v5282_v48  ;;  %v5296_v59 = vadd.f32 %v5295_v50, %v5294_v5  ;;  %v5308_v15 = vadd.f32 %v5307_v57, %v5306_v0  ;;  %v5321_v3 = vrot.slane %v5320_v25, 4 }
 0x3c2   :  { %v5290_v49 = vrot.slane %v5289_v45, 1  ;;  %v5302_v12 = vrot.slane %v5301_v60, 2  ;;  %v5315_v58 = vadd.f32 %v5314_v29, %v5313_v24  ;;  %v5920_v44 = vpack.c.bf16 %v12199_v7, %v12199_v7 }
 0x3c3   :  { %v5297_v61 = vrot.slane %v5296_v59, 1  ;;  %v5309_v18 = vrot.slane %v5308_v15, 2  ;;  %v5322_v39 = vadd.f32 %v5321_v3, %v5320_v25  ;;  %v5921_v36 = vpack.c.bf16 %v12205_v11, %v12205_v11 }
 0x3c4   :  { %v5291_v13 = vadd.f32 %v5290_v49, %v5289_v45  ;;  %v5303_v48 = vadd.f32 %v5302_v12, %v5301_v60  ;;  %v5316_v5 = vrot.slane %v5315_v58, 2  ;;  %v5922_v34 = vpack.c.bf16 %v12207_v10, %v12207_v10 }
 0x3c5   :  { %v5298_v0 = vadd.f32 %v5297_v61, %v5296_v59  ;;  %v5310_v6 = vadd.f32 %v5309_v18, %v5308_v15  ;;  %v5323_v50 = vrot.slane %v5322_v39, 2  ;;  %v5923_v7 = vpack.c.bf16 %v12216_v27, %v12216_v27  ;;  %v12261_v59 = vpop.xlane.xlu0 %2511  ;;  %v12263_v15 = vpop.f32.mrf.mxu0 }
 0x3c6   :  { %v5304_v57 = vrot.slane %v5303_v48, 1  ;;  %v5317_v24 = vadd.f32 %v5316_v5, %v5315_v58  ;;  %v5924_v11 = vpack.c.bf16 %v12218_v40, %v12218_v40  ;;  %v5925_v45 = vpack.c.bf16 %v12225_v28, %v12225_v28 }
 0x3c7   :  { %v5311_v60 = vrot.slane %v5310_v6, 1  ;;  %v5324_v29 = vadd.f32 %v5323_v50, %v5322_v39  ;;  %v5926_v10 = vpack.c.bf16 %v12228_v38, %v12228_v38  ;;  %v5927_v25 = vpack.c.bf16 %v12230_v30, %v12230_v30  ;;  %v12267_v50 = vpop.xlane.xlu1 %2526 }
 0x3c8   :  { %v5305_v27 = vadd.f32 %v5304_v57, %v5303_v48  ;;  %v5318_v3 = vrot.slane %v5317_v24, 1  ;;  %v5928_v40 = vpack.c.bf16 %v12232_v20, %v12232_v20  ;;  %v5929_v49 = vpack.c.bf16 %v5284_v46, %v5284_v46  ;;  %v1008_v48 = vpop.f32.mrf.mxu0 }
 0x3c9   :  { %v5312_v12 = vadd.f32 %v5311_v60, %v5310_v6  ;;  %v5325_v28 = vrot.slane %v5324_v29, 1  ;;  %v5930_v58 = vpack.c.bf16 %v5291_v13, %v5291_v13  ;;  %v5931_v61 = vpack.c.bf16 %v5298_v0, %v5298_v0  ;;  %v12269_v0 = vpop.xlane.xlu0 %2514 }
 0x3ca   :  { %v5319_v18 = vadd.f32 %v5318_v3, %v5317_v24  ;;  %v5932_v39 = vpack.c.bf16 %v5305_v27, %v5305_v27  ;;  %v6184_v38 = vunpack.c.l.b16 %v5920_v44  ;;  %v6185_v5 = vunpack.c.l.b16 %v5921_v36 }
 0x3cb   :  { %v5326_v30 = vadd.f32 %v5325_v28, %v5324_v29  ;;  %v5933_v47 = vpack.c.bf16 %v5312_v12, %v5312_v12  ;;  %v6186_v8 = vunpack.c.l.b16 %v5922_v34  ;;  %v6187_v26 = vunpack.c.l.b16 %v5923_v7  ;;  %v1010_v12 = vpop.f32.mrf.mxu0 }
 0x3cc   :  { %v5934_v57 = vpack.c.bf16 %v5319_v18, %v5319_v18  ;;  %v6188_v33 = vunpack.c.l.b16 %v5924_v11  ;;  %v6189_v55 = vunpack.c.l.b16 %v5925_v45  ;;  %v6190_v20 = vunpack.c.l.b16 %v5926_v10 }
 0x3cd   :  { %v5935_v46 = vpack.c.bf16 %v5326_v30, %v5326_v30  ;;  %v6191_v6 = vunpack.c.l.b16 %v5927_v25  ;;  %v6192_v60 = vunpack.c.l.b16 %v5928_v40  ;;  %v6193_v13 = vunpack.c.l.b16 %v5929_v49  ;;  %v12279_v40 = vpop.xlane.xlu1 %2529 }
 0x3ce   :  { %v6194_v24 = vunpack.c.l.b16 %v5930_v58  ;;  %v6195_v44 = vunpack.c.l.b16 %v5931_v61  ;;  %v6196_v36 = vunpack.c.l.b16 %v5932_v39  ;;  %v6197_v27 = vunpack.c.l.b16 %v5933_v47 }
 0x3cf   :  { %v6198_v3 = vunpack.c.l.b16 %v5934_v57  ;;  %v6199_v29 = vunpack.c.l.b16 %v5935_v46  ;;  %v6315_v34 = vsel %vm6280_vm2, %v6185_v5, %v6184_v38  ;;  %v6322_v7 = vsel %vm6280_vm2, %v6193_v13, %v6192_v60  ;;  %v1012_v5 = vpop.f32.mrf.mxu0 }
 0x3d0   :  { %v6316_v11 = vsel %vm6282_vm3, %v6186_v8, %v6315_v34  ;;  %v6323_v45 = vsel %vm6282_vm3, %v6194_v24, %v6322_v7  ;;  %v999_v10 = vadd.f32 %v12223_v51, %v9052_v17  ;;  %v2609_v25 = vsel %vm2302_vm1, %v12122_v35, 0.0 }
 0x3d1   :  { %v6317_v47 = vsel %vm6284_vm4, %v6187_v26, %v6316_v11  ;;  %v6324_v49 = vsel %vm6284_vm4, %v6195_v44, %v6323_v45  ;;  %2610 = vadd.xlane.f32.xlu0 %v2609_v25  ;;  %v3095_v28 = vrot.slane %v12239_v42, 4  ;;  %v1001_v8 = vadd.f32 %v12236_v37, %v9061_v21  ;;  %v12296_v37 = vpop.xlane.xlu0 %2517  ;;  %v1014_v34 = vpop.f32.mrf.mxu0  ;;  %v14330_v11 = vld [vmem:[#allocation6_spill] sm:$0xff] }
 0x3d2   :  { %v6318_v58 = vsel %vm6286_vm5, %v6188_v33, %v6317_v47  ;;  %v6325_v61 = vsel %vm6286_vm5, %v6196_v36, %v6324_v49  ;;  %v2081_v51 = vrot.slane %v999_v10, %v9057_v19  ;;  %v1003_v35 = vadd.f32 %v12245_v62, %v9052_v17  ;;  %v12310_v36 = vpop.xlane.xlu1 %2532 }
 0x3d3   :  { %v6319_v18 = vsel %vm6288_vm6, %v6189_v55, %v6318_v58  ;;  %v6326_v26 = vsel %vm6288_vm6, %v6197_v27, %v6325_v61  ;;  %v3096_v39 = vmax.f32 %v12239_v42, %v3095_v28  ;;  %v2612_v38 = vsel %vm2302_vm1, %v12132_v16, 0.0 }
 0x3d4   :  { %v6320_v33 = vsel %vm6290_vm7, %v6190_v20, %v6319_v18  ;;  %v6327_v30 = vsel %vm6290_vm7, %v6198_v3, %v6326_v26  ;;  %v2278_v57 = vmul.f32 %v2081_v51, %v1001_v8  ;;  %v2085_v46 = vrot.slane %v1003_v35, %v9057_v19 }
 0x3d5   :  { %v6321_v62 = vsel %vm6292_vm8, %v6191_v6, %v6320_v33  ;;  %v6328_v55 = vsel %vm6292_vm8, %v6199_v29, %v6327_v30  ;;  %v3097_v60 = vrot.slane %v3096_v39, 2  ;;  %2613 = vadd.xlane.f32.xlu0 %v2612_v38  ;;  %v3101_v13 = vrot.slane %v12261_v59, 4  ;;  %v14331_v38 = vld [vmem:[#allocation10_spill] sm:$0xff] }
 0x3d6   :  { %v12304_v24 = vpack.c.b16 %v6328_v55, %v6321_v62  ;;  %v1005_v16 = vadd.f32 %v12263_v15, %v9061_v21  ;;  %v1009_v20 = vadd.f32 %v1008_v48, %v9052_v17  ;;  %v2615_v44 = vsel %vm2302_vm1, %v2278_v57, 0.0 }
 0x3d7   :  { %v3098_v27 = vmax.f32 %v3096_v39, %v3097_v60  ;;  %v3102_v6 = vmax.f32 %v12261_v59, %v3101_v13  ;;  %v3107_v3 = vrot.slane %v12269_v0, 4  ;;  %v1011_v29 = vadd.f32 %v1010_v12, %v9061_v21  ;;  %v12323_v12 = vpop.xlane.xlu0 %2520 }
 0x3d8   :  { %14329 = vst [vmem:[#allocation42_spill] sm:$0xff] %v12304_v24  ;;  %7887 = vmatprep.mubr.msk.bf16.mxu1 %vm2302_vm1, %v12304_v24  ;;  %v2279_v7 = vmul.f32 %v2085_v46, %v1005_v16  ;;  %v2089_v15 = vrot.slane %v1009_v20, %v9057_v19  ;;  %v1013_v48 = vadd.f32 %v1012_v5, %v9052_v17  ;;  %v2657_v45 = vsel %vm2302_vm1, %v14330_v11, 0.0  ;;  %v14332_v5 = vld [vmem:[#allocation8_spill] sm:$0xff]  ;;  %v12335_v46 = vpop.xlane.xlu1 %2535 }
 0x3d9   :  { %v3099_v10 = vrot.slane %v3098_v27, 1  ;;  %v3103_v25 = vrot.slane %v3102_v6, 2  ;;  %2616 = vadd.xlane.f32.xlu0 %v2615_v44  ;;  %v3108_v47 = vmax.f32 %v12269_v0, %v3107_v3  ;;  %v3113_v49 = vrot.slane %v12296_v37, 4 }
 0x3da   :  { %v2280_v28 = vmul.f32 %v2089_v15, %v1011_v29  ;;  %v2093_v8 = vrot.slane %v1013_v48, %v9057_v19  ;;  %v2618_v58 = vsel %vm2302_vm1, %v2279_v7, 0.0  ;;  %v1015_v61 = vadd.f32 %v1014_v34, %v9061_v21  ;;  %v14334_v7 = vld [vmem:[#allocation7_spill] sm:$0xff] }
 0x3db   :  { %v3100_v17 = vmax.f32 %v3098_v27, %v3099_v10  ;;  %v3104_v51 = vmax.f32 %v3102_v6, %v3103_v25  ;;  %v3109_v35 = vrot.slane %v3108_v47, 2  ;;  %2619 = vadd.xlane.f32.xlu1 %v2618_v58  ;;  %v3114_v18 = vmax.f32 %v12296_v37, %v3113_v49 }
 0x3dc   :  { %v2281_v26 = vmul.f32 %v2093_v8, %v1015_v61  ;;  %v2621_v39 = vsel %vm2302_vm1, %v2280_v28, 0.0  ;;  %v14333_v33 = vrot.slane %v14332_v5, %v9057_v19  ;;  %v3119_v57 = vrot.slane %v12323_v12, 4  ;;  %v14335_v28 = vld [vmem:[#allocation11_spill] sm:$0xff]  ;;  %v14336_v8 = vld [vmem:[#allocation9_spill] sm:$0xff] }
 0x3dd   :  { %v3523_v21 = vsub.f32 %v12239_v42, %v3100_v17  ;;  %v3105_v62 = vrot.slane %v3104_v51, 1  ;;  %v3110_v55 = vmax.f32 %v3108_v47, %v3109_v35  ;;  %2658 = vadd.xlane.f32.xlu0 %v2657_v45  ;;  %v3115_v60 = vrot.slane %v3114_v18, 2  ;;  %v12352_v17 = vpop.xlane.xlu1 %2538 }
 0x3de   :  { %v2293_v30 = vmul.f32 %v14333_v33, %v14331_v38  ;;  %v3120_v16 = vmax.f32 %v12323_v12, %v3119_v57  ;;  %v2624_v20 = vsel %vm2302_vm1, %v2281_v26, 0.0  ;;  %v3125_v44 = vrot.slane %v12249_v56, 4 }
 0x3df   :  { %v3719_v27 = vmul.f32 1.442695, %v3523_v21  ;;  %v3106_v6 = vmax.f32 %v3104_v51, %v3105_v62  ;;  %v3111_v3 = vrot.slane %v3110_v55, 1  ;;  %v3116_v29 = vmax.f32 %v3114_v18, %v3115_v60  ;;  %2622 = vadd.xlane.f32.xlu1 %v2621_v39 }
 0x3e0   :  { %v2660_v13 = vsel %vm2302_vm1, %v2293_v30, 0.0  ;;  %v3121_v34 = vrot.slane %v3120_v16, 2  ;;  %v3126_v42 = vmax.f32 %v12249_v56, %v3125_v44  ;;  %v2681_v15 = vsel %vm2302_vm1, %v14334_v7, 0.0 }
 0x3e1   :  { %v3131_v48 = vrot.slane %v12267_v50, 4  ;;  %8279 = vpow2.f32 %v3719_v27  ;;  %v3524_v11 = vsub.f32 %v12261_v59, %v3106_v6  ;;  %v3112_v45 = vmax.f32 %v3110_v55, %v3111_v3  ;;  %2661 = vadd.xlane.f32.xlu0 %v2660_v13 }
 0x3e2   :  { %v3117_v10 = vrot.slane %v3116_v29, 1  ;;  %v3122_v25 = vmax.f32 %v3120_v16, %v3121_v34  ;;  %v3127_v47 = vrot.slane %v3126_v42, 2  ;;  %v14337_v58 = vrot.slane %v14336_v8, %v9057_v19 }
 0x3e3   :  { %v3132_v49 = vmax.f32 %v12267_v50, %v3131_v48  ;;  %v3721_v51 = vmul.f32 1.442695, %v3524_v11  ;;  %v3525_v35 = vsub.f32 %v12269_v0, %v3112_v45  ;;  %2625 = vadd.xlane.f32.xlu1 %v2624_v20  ;;  %v3137_v59 = vrot.slane %v12279_v40, 4 }
 0x3e4   :  { %v2301_v61 = vmul.f32 %v14337_v58, %v14335_v28  ;;  %v3118_v18 = vmax.f32 %v3116_v29, %v3117_v10  ;;  %v3123_v26 = vrot.slane %v3122_v25, 1  ;;  %v3128_v39 = vmax.f32 %v3126_v42, %v3127_v47  ;;  %v12370_v10 = vpop.xlane.xlu0 %2544 }
 0x3e5   :  { %v3133_v38 = vrot.slane %v3132_v49, 2  ;;  %8281 = vpow2.f32 %v3721_v51  ;;  %v3723_v33 = vmul.f32 1.442695, %v3525_v35  ;;  %v3138_v19 = vmax.f32 %v12279_v40, %v3137_v59 }
 0x3e6   :  { %v2684_v5 = vsel %vm2302_vm1, %v2301_v61, 0.0  ;;  %v3526_v30 = vsub.f32 %v12296_v37, %v3118_v18  ;;  %v3124_v57 = vmax.f32 %v3122_v25, %v3123_v26  ;;  %v3129_v21 = vrot.slane %v3128_v39, 1  ;;  %v12363_v37 = vpop.xlane.xlu1 %2541 }
 0x3e7   :  { %v3134_v62 = vmax.f32 %v3132_v49, %v3133_v38  ;;  %v3143_v0 = vrot.slane %v12310_v36, 4  ;;  %8283 = vpow2.f32 %v3723_v33  ;;  %2682 = vadd.xlane.f32.xlu1 %v2681_v15  ;;  %v3139_v60 = vrot.slane %v3138_v19, 2 }
 0x3e8   :  { %v3725_v55 = vmul.f32 1.442695, %v3526_v30  ;;  %v3149_v13 = vrot.slane %v12335_v46, 4  ;;  %v3527_v16 = vsub.f32 %v12323_v12, %v3124_v57  ;;  %v3130_v20 = vmax.f32 %v3128_v39, %v3129_v21 }
 0x3e9   :  { %v3135_v44 = vrot.slane %v3134_v62, 1  ;;  %v3144_v27 = vmax.f32 %v12310_v36, %v3143_v0  ;;  %v3140_v6 = vmax.f32 %v3138_v19, %v3139_v60  ;;  %v3155_v29 = vrot.slane %v12352_v17, 4 }
 0x3ea   :  { %8285 = vpow2.f32 %v3725_v55  ;;  %v3150_v3 = vmax.f32 %v12335_v46, %v3149_v13  ;;  %v3727_v34 = vmul.f32 1.442695, %v3527_v16  ;;  %v3528_v42 = vsub.f32 %v12249_v56, %v3130_v20 }
 0x3eb   :  { %v3136_v7 = vmax.f32 %v3134_v62, %v3135_v44  ;;  %v3145_v15 = vrot.slane %v3144_v27, 2  ;;  %2685 = vadd.xlane.f32.xlu1 %v2684_v5  ;;  %v3141_v48 = vrot.slane %v3140_v6, 1  ;;  %v3156_v11 = vmax.f32 %v12352_v17, %v3155_v29 }
 0x3ec   :  { %v3151_v12 = vrot.slane %v3150_v3, 2  ;;  %v3161_v45 = vrot.slane %v12363_v37, 4  ;;  %8287 = vpow2.f32 %v3727_v34  ;;  %v3729_v25 = vmul.f32 1.442695, %v3528_v42  ;;  %v12389_v34 = vpop.xlane.xlu0 %2550 }
 0x3ed   :  { %v3529_v47 = vsub.f32 %v12267_v50, %v3136_v7  ;;  %v3146_v49 = vmax.f32 %v3144_v27, %v3145_v15  ;;  %v3142_v28 = vmax.f32 %v3140_v6, %v3141_v48  ;;  %v3157_v58 = vrot.slane %v3156_v11, 2 }
 0x3ee   :  { %v3152_v8 = vmax.f32 %v3150_v3, %v3151_v12  ;;  %v3162_v56 = vmax.f32 %v12363_v37, %v3161_v45  ;;  %v12374_v61 = vpop.eup %8279  ;;  %8289 = vpow2.f32 %v3729_v25  ;;  %v3167_v18 = vrot.slane %v12370_v10, 4  ;;  %v12398_v45 = vpop.xlane.xlu1 %2547 }
 0x3ef   :  { %v3731_v51 = vmul.f32 1.442695, %v3529_v47  ;;  %v3147_v35 = vrot.slane %v3146_v49, 1  ;;  %v4247_v59 = vrot.slane %v12374_v61, 4  ;;  %v3530_v26 = vsub.f32 %v12279_v40, %v3142_v28 }
 0x3f0   :  { %v3153_v39 = vrot.slane %v3152_v8, 1  ;;  %v3158_v38 = vmax.f32 %v3156_v11, %v3157_v58  ;;  %v3163_v5 = vrot.slane %v3162_v56, 2  ;;  %v3168_v33 = vmax.f32 %v12370_v10, %v3167_v18 }
 0x3f1   :  { %8291 = vpow2.f32 %v3731_v51  ;;  %v3148_v50 = vmax.f32 %v3146_v49, %v3147_v35  ;;  %v4248_v30 = vadd.f32 %v12374_v61, %v4247_v59  ;;  %v3733_v19 = vmul.f32 1.442695, %v3530_v26  ;;  %v12411_v35 = vpop.xlane.xlu0 %2553 }
 0x3f2   :  { %v3154_v57 = vmax.f32 %v3152_v8, %v3153_v39  ;;  %v3159_v21 = vrot.slane %v3158_v38, 1  ;;  %v12381_v62 = vpop.eup %8281  ;;  %v4245_v0 = vrot.slane %v12214_v9, 1  ;;  %v3164_v60 = vmax.f32 %v3162_v56, %v3163_v5 }
 0x3f3   :  { %14338 = vst [vmem:[#allocation14_spill] sm:$0xff] %v12381_v62  ;;  %v3531_v55 = vsub.f32 %v12310_v36, %v3148_v50  ;;  %v3169_v40 = vrot.slane %v3168_v33, 2  ;;  %v4249_v13 = vrot.slane %v4248_v30, 2  ;;  %v4253_v16 = vrot.slane %v12381_v62, 4 }
 0x3f4   :  { %8293 = vpow2.f32 %v3733_v19  ;;  %v3532_v20 = vsub.f32 %v12335_v46, %v3154_v57  ;;  %v12387_v44 = vpop.eup %8283  ;;  %v3160_v6 = vmax.f32 %v3158_v38, %v3159_v21  ;;  %v3165_v3 = vrot.slane %v3164_v60, 1 }
 0x3f5   :  { %14339 = vst [vmem:[#allocation13_spill] sm:$0xff] %v12387_v44  ;;  %v3735_v27 = vmul.f32 1.442695, %v3531_v55  ;;  %v3170_v29 = vmax.f32 %v3168_v33, %v3169_v40  ;;  %8295 = vrcp.f32 %v12161_v52  ;;  %v14340_v36 = vrot.slane %v12184_v53, 1 }
 0x3f6   :  { %v4250_v7 = vadd.f32 %v4249_v13, %v4248_v30  ;;  %v3737_v15 = vmul.f32 1.442695, %v3532_v20  ;;  %v3533_v46 = vsub.f32 %v12352_v17, %v3160_v6  ;;  %v3166_v12 = vmax.f32 %v3164_v60, %v3165_v3 }
 0x3f7   :  { %v4240_v42 = vadd.f32 %v14340_v36, %v12184_v53  ;;  %v12395_v48 = vpop.eup %8285  ;;  %8297 = vpow2.f32 %v3735_v27  ;;  %v3171_v11 = vrot.slane %v3170_v29, 1  ;;  %v4246_v25 = vadd.f32 %v4245_v0, %v12214_v9 }
 0x3f8   :  { %14341 = vst [vmem:[#allocation93_spill] sm:$0xff] %v12395_v48  ;;  %8299 = vrcp.f32 %v12192_v1  ;;  %v4254_v52 = vadd.f32 %v12381_v62, %v4253_v16  ;;  %v4259_v47 = vrot.slane %v12387_v44, 4  ;;  %v3739_v53 = vmul.f32 1.442695, %v3533_v46 }
 0x3f9   :  { %8301 = vpow2.f32 %v3737_v15  ;;  %v3534_v49 = vsub.f32 %v12363_v37, %v3166_v12  ;;  %v3172_v28 = vmax.f32 %v3170_v29, %v3171_v11  ;;  %v12405_v8 = vpop.eup %8287  ;;  %v4221_v17 = vrot.slane %v12136_v63, 1 }
 0x3fa   :  { %8303 = vrcp.f32 %v4240_v42  ;;  %v4251_v58 = vrot.slane %v4250_v7, 1  ;;  %v3173_v56 = vrot.slane %v12398_v45, 4  ;;  %v4271_v1 = vrot.slane %v12405_v8, 4 }
 0x3fb   :  { %8305 = vpow2.f32 %v3739_v53  ;;  %v3741_v9 = vmul.f32 1.442695, %v3534_v49  ;;  %v3535_v51 = vsub.f32 %v12370_v10, %v3172_v28  ;;  %v12413_v18 = vpop.eup %8289  ;;  %v4255_v37 = vrot.slane %v4254_v52, 2 }
 0x3fc   :  { %8307 = vrcp.f32 %v4246_v25  ;;  %v12416_v59 = vadd.f32 %v12387_v44, %v4259_v47  ;;  %v4265_v26 = vrot.slane %v12395_v48, 4  ;;  %v4272_v39 = vadd.f32 %v12405_v8, %v4271_v1 }
 0x3fd   :  { %v4277_v38 = vrot.slane %v12413_v18, 4  ;;  %8309 = vpow2.f32 %v3741_v9  ;;  %v3743_v50 = vmul.f32 1.442695, %v3535_v51  ;;  %v4252_v10 = vadd.f32 %v4251_v58, %v4250_v7 }
 0x3fe   :  { %v12421_v5 = vpop.eup %8291  ;;  %v3174_v33 = vmax.f32 %v12398_v45, %v3173_v56  ;;  %v3179_v30 = vrot.slane %v12389_v34, 4  ;;  %v3185_v19 = vrot.slane %v12411_v35, 4  ;;  %v4273_v57 = vrot.slane %v4272_v39, 2 }
 0x3ff   :  { %14342 = vst [vmem:[#allocation43_spill] sm:$0xff] %v12421_v5  ;;  %v4278_v21 = vadd.f32 %v12413_v18, %v4277_v38  ;;  %v4283_v0 = vrot.slane %v12421_v5, 4  ;;  %8311 = vpow2.f32 %v3743_v50  ;;  %v12428_v55 = vadd.f32 %v4255_v37, %v4254_v52 }
 0x400   :  { %v3175_v60 = vrot.slane %v3174_v33, 2  ;;  %v3180_v40 = vmax.f32 %v12389_v34, %v3179_v30  ;;  %v3186_v13 = vmax.f32 %v12411_v35, %v3185_v19  ;;  %v4274_v20 = vadd.f32 %v4273_v57, %v4272_v39 }
 0x401   :  { %v12432_v16 = vpop.eup %8293  ;;  %v4279_v27 = vrot.slane %v4278_v21, 2  ;;  %v4284_v6 = vadd.f32 %v12421_v5, %v4283_v0  ;;  %v14344_v3 = vrot.slane %v11897_v41, 1  ;;  %v4222_v52 = vadd.f32 %v4221_v17, %v12136_v63 }
 0x402   :  { %14343 = vst [vmem:[#allocation46_spill] sm:$0xff] %v12432_v16  ;;  %v4289_v36 = vrot.slane %v12432_v16, 4  ;;  %v3176_v42 = vmax.f32 %v3174_v33, %v3175_v60  ;;  %v3181_v7 = vrot.slane %v3180_v40, 2  ;;  %v3187_v15 = vrot.slane %v3186_v13, 2  ;;  %v12439_v46 = vpop.eup %8295 }
 0x403   :  { %v4174_v29 = vadd.f32 %v14344_v3, %v11897_v41  ;;  %v4275_v12 = vrot.slane %v4274_v20, 1  ;;  %v4280_v11 = vadd.f32 %v4279_v27, %v4278_v21  ;;  %v4285_v25 = vrot.slane %v4284_v6, 2 }
 0x404   :  { %v12442_v47 = vpop.eup %8297  ;;  %v4261_v53 = vrot.slane %v12416_v59, 2  ;;  %v4290_v49 = vadd.f32 %v12432_v16, %v4289_v36  ;;  %v3177_v28 = vrot.slane %v3176_v42, 1  ;;  %v3182_v41 = vmax.f32 %v3180_v40, %v3181_v7 }
 0x405   :  { %14345 = vst [vmem:[#allocation41_spill] sm:$0xff] %v12442_v47  ;;  %v12446_v58 = vpop.eup %8299  ;;  %v4286_v56 = vadd.f32 %v4285_v25, %v4284_v6  ;;  %v4295_v1 = vrot.slane %v12442_v47, 4  ;;  %v3188_v9 = vmax.f32 %v3186_v13, %v3187_v15  ;;  %8313 = vrcp.f32 %v4174_v29 }
 0x406   :  { %v12449_v51 = vpop.eup %8301  ;;  %8315 = vrcp.f32 %v4252_v10  ;;  %v4291_v37 = vrot.slane %v4290_v49, 2  ;;  %v3178_v63 = vmax.f32 %v3176_v42, %v3177_v28  ;;  %v3183_v17 = vrot.slane %v3182_v41, 1 }
 0x407   :  { %14346 = vst [vmem:[#allocation54_spill] sm:$0xff] %v12449_v51  ;;  %v12451_v39 = vpop.eup %8303  ;;  %v4276_v38 = vadd.f32 %v4275_v12, %v4274_v20  ;;  %v4281_v50 = vrot.slane %v4280_v11, 1  ;;  %v4296_v33 = vadd.f32 %v12442_v47, %v4295_v1  ;;  %8317 = vrcp.f32 %v4222_v52 }
 0x408   :  { %v12454_v30 = vpop.eup %8305  ;;  %v4292_v19 = vadd.f32 %v4291_v37, %v4290_v49  ;;  %v4301_v57 = vrot.slane %v12449_v51, 4  ;;  %v3536_v21 = vsub.f32 %v12398_v45, %v3178_v63  ;;  %v3184_v0 = vmax.f32 %v3182_v41, %v3183_v17 }
 0x409   :  { %14347 = vst [vmem:[#allocation99_spill] sm:$0xff] %v12454_v30  ;;  %v12458_v60 = vpop.eup %8307  ;;  %v4287_v10 = vrot.slane %v4286_v56, 1  ;;  %v4297_v40 = vrot.slane %v4296_v33, 2  ;;  %v4307_v13 = vrot.slane %v12454_v30, 4  ;;  %v3189_v27 = vrot.slane %v3188_v9, 1 }
 0x40a   :  { %v12461_v20 = vpop.eup %8309  ;;  %v4293_v6 = vrot.slane %v4292_v19, 1  ;;  %v4302_v3 = vadd.f32 %v12449_v51, %v4301_v57  ;;  %v3745_v29 = vmul.f32 1.442695, %v3536_v21  ;;  %v3537_v36 = vsub.f32 %v12389_v34, %v3184_v0 }
 0x40b   :  { %14348 = vst [vmem:[#allocation83_spill] sm:$0xff] %v12461_v20  ;;  %v4282_v42 = vadd.f32 %v4281_v50, %v4280_v11  ;;  %v4298_v7 = vadd.f32 %v4297_v40, %v4296_v33  ;;  %v4308_v45 = vadd.f32 %v12454_v30, %v4307_v13  ;;  %v4313_v15 = vrot.slane %v12461_v20, 4 }
 0x40c   :  { %v12467_v12 = vpop.eup %8311  ;;  %v12472_v25 = vadd.f32 %v12395_v48, %v4265_v26  ;;  %v4303_v52 = vrot.slane %v4302_v3, 2  ;;  %8319 = vpow2.f32 %v3745_v29  ;;  %v3747_v49 = vmul.f32 1.442695, %v3537_v36 }
 0x40d   :  { %v4288_v28 = vadd.f32 %v4287_v10, %v4286_v56  ;;  %v4299_v41 = vrot.slane %v4298_v7, 1  ;;  %v4309_v1 = vrot.slane %v4308_v45, 2  ;;  %v4319_v34 = vrot.slane %v12467_v12, 4 }
 0x40e   :  { %8321 = vrcp.f32 %v4276_v38  ;;  %v4294_v11 = vadd.f32 %v4293_v6, %v4292_v19  ;;  %v4304_v37 = vadd.f32 %v4303_v52, %v4302_v3  ;;  %v3190_v63 = vmax.f32 %v3188_v9, %v3189_v27  ;;  %v14352_v52 = vld [vmem:[#allocation60_spill] sm:$0xff] }
 0x40f   :  { %8323 = vrcp.f32 %v4282_v42  ;;  %v4300_v17 = vadd.f32 %v4299_v41, %v4298_v7  ;;  %v12476_v50 = vadd.f32 %v12461_v20, %v4313_v15  ;;  %v4320_v26 = vadd.f32 %v12467_v12, %v4319_v34  ;;  %v14349_v42 = vld [vmem:[#allocation138_spill] sm:$0xff] }
 0x410   :  { %v4305_v33 = vrot.slane %v4304_v37, 1  ;;  %v12479_v57 = vadd.f32 %v4309_v1, %v4308_v45  ;;  %8325 = vpow2.f32 %v3747_v49  ;;  %v3538_v56 = vsub.f32 %v12411_v35, %v3190_v63  ;;  %v14350_v7 = vld [vmem:[#allocation74_spill] sm:$0xff]  ;;  %v14354_v49 = vld [vmem:[#allocation128_spill] sm:$0xff]  ;;  %v14356_v1 = vld [vmem:[#allocation119_spill] sm:$0xff] }
 0x411   :  { %v12484_v38 = vadd.f32 %v4261_v53, %v12416_v59  ;;  %8327 = vrcp.f32 %v4288_v28  ;;  %v4321_v9 = vrot.slane %v4320_v26, 2  ;;  %v4786_v40 = vmul.f32 %v11887_v4, %v11660_v22  ;;  %v14351_v15 = vld [vmem:[#allocation58_spill] sm:$0xff] }
 0x412   :  { %v8314_v19 = vpop.eup %8313  ;;  %8329 = vrcp.f32 %v4294_v11  ;;  %v3749_v10 = vmul.f32 1.442695, %v3538_v56  ;;  %v4306_v27 = vadd.f32 %v4305_v33, %v4304_v37  ;;  %v4787_v59 = vmul.f32 %v11946_v43, %v11798_v32  ;;  %v14353_v32 = vld [vmem:[#allocation79_spill] sm:$0xff]  ;;  %v14355_v41 = vld [vmem:[#allocation86_spill] sm:$0xff] }
 0x413   :  { %v12489_v13 = vpop.eup %8315  ;;  %v4322_v6 = vadd.f32 %v4321_v9, %v4320_v26  ;;  %8331 = vrcp.f32 %v4300_v17  ;;  %v4788_v29 = vmul.f32 %v11952_v14, %v11830_v31  ;;  %v4789_v36 = vmul.f32 %v11959_v2, %v11835_v23  ;;  %v14357_v14 = vld [vmem:[#allocation78_spill] sm:$0xff]  ;;  %v14360_v11 = vld [vmem:[#allocation139_spill] sm:$0xff]  ;;  %v14363_v26 = vld [vmem:[#allocation84_spill] sm:$0xff] }
 0x414   :  { %v8318_v53 = vpop.eup %8317  ;;  %8333 = vpow2.f32 %v3749_v10  ;;  %v4790_v4 = vmul.f32 %v8314_v19, %v11852_v54  ;;  %v4794_v45 = vmul.f32 %v14350_v7, %v14349_v42  ;;  %v12504_v43 = vmul.f32 %v14352_v52, %v14351_v15  ;;  %v14358_v34 = vld [vmem:[#allocation38_spill] sm:$0xff]  ;;  %v14361_v37 = vld [vmem:[#allocation107_spill] sm:$0xff]  ;;  %v14364_v9 = vld [vmem:[#allocation112_spill] sm:$0xff] }
 0x415   :  { %v4323_v22 = vrot.slane %v4322_v6, 1  ;;  %v4911_v28 = vmul.f32 %v14354_v49, %v14353_v32  ;;  %v4912_v31 = vmul.f32 %v14356_v1, %v14355_v41  ;;  %v4913_v23 = vmul.f32 %v14358_v34, %v14357_v14  ;;  %v14359_v2 = vld [vmem:[#allocation90_spill] sm:$0xff]  ;;  %v14365_v10 = vld [vmem:[#allocation89_spill] sm:$0xff]  ;;  %v14366_v7 = vld [vmem:[#allocation92_spill] sm:$0xff] }
 0x416   :  { %8335 = vrcp.f32 %v4306_v27  ;;  %v12514_v54 = vmul.f32 %v14360_v11, %v14359_v2  ;;  %v14362_v63 = vld [vmem:[#allocation142_spill] sm:$0xff]  ;;  %v4914_v33 = vmul.f32 %v4786_v40, %v14363_v26  ;;  %v12524_v19 = vmul.f32 %v8318_v53, %v14364_v9  ;;  %v14367_v52 = vld [vmem:[#allocation88_spill] sm:$0xff]  ;;  %v14368_v49 = vld [vmem:[#allocation91_spill] sm:$0xff] }
 0x417   :  { %v12518_v17 = vmul.f32 %v14362_v63, %v14361_v37  ;;  %v12521_v56 = vadd.f32 %v4323_v22, %v4322_v6  ;;  %v4915_v42 = vmul.f32 %v4787_v59, %v14365_v10  ;;  %v4916_v15 = vmul.f32 %v4788_v29, %v14366_v7  ;;  %v14369_v1 = vld [vmem:[#allocation98_spill] sm:$0xff]  ;;  %v14370_v14 = vld [vmem:[#allocation40_spill] sm:$0xff]  ;;  %v14371_v6 = vld [vmem:[#allocation101_spill] sm:$0xff] }
 0x418   :  { %v12531_v32 = vmul.f32 %v4789_v36, %v14367_v52  ;;  %v12534_v41 = vmul.f32 %v4790_v4, %v14368_v49  ;;  %v12538_v40 = vmul.f32 %v14370_v14, %v14369_v1  ;;  %v14372_v22 = vld [vmem:[#allocation96_spill] sm:$0xff]  ;;  %v5327_v29 = vsel %vm2302_vm1, %v4911_v28, 0.0 }
 0x419   :  { %v12528_v27 = vpop.eup %8319  ;;  %v12542_v53 = vmul.f32 %v14372_v22, %v14371_v6  ;;  %v5334_v34 = vsel %vm2302_vm1, %v4912_v31, 0.0  ;;  %v5341_v36 = vsel %vm2302_vm1, %v4913_v23, 0.0  ;;  %v5328_v4 = vrot.slane %v5327_v29, 4 }
 0x41a   :  { %v4325_v59 = vrot.slane %v12528_v27, 4  ;;  %v5335_v11 = vrot.slane %v5334_v34, 4  ;;  %v5342_v37 = vrot.slane %v5341_v36, 4  ;;  %v5348_v63 = vsel %vm2302_vm1, %v4914_v33, 0.0 }
 0x41b   :  { %v12548_v2 = vpop.eup %8321  ;;  %v5349_v10 = vrot.slane %v5348_v63, 4  ;;  %v5355_v7 = vsel %vm2302_vm1, %v4915_v42, 0.0  ;;  %v5362_v28 = vsel %vm2302_vm1, %v4916_v15, 0.0  ;;  %v5329_v31 = vadd.f32 %v5328_v4, %v5327_v29  ;;  %v14376_v29 = vld [vmem:[#allocation97_spill] sm:$0xff] }
 0x41c   :  { %v12551_v26 = vpop.eup %8323  ;;  %v4326_v9 = vadd.f32 %v12528_v27, %v4325_v59  ;;  %v5336_v23 = vadd.f32 %v5335_v11, %v5334_v34  ;;  %v5343_v49 = vadd.f32 %v5342_v37, %v5341_v36  ;;  %v5356_v1 = vrot.slane %v5355_v7, 4  ;;  %v14377_v34 = vld [vmem:[#allocation81_spill] sm:$0xff] }
 0x41d   :  { %14373 = vst [vmem:[#allocation25_spill] sm:$0xff] %v12551_v26  ;;  %v12556_v52 = vpop.eup %8325  ;;  %v5350_v22 = vadd.f32 %v5349_v10, %v5348_v63  ;;  %v5363_v3 = vrot.slane %v5362_v28, 4  ;;  %v5330_v59 = vrot.slane %v5329_v31, 2  ;;  %v4921_v36 = vmul.f32 %v14377_v34, %v14376_v29 }
 0x41e   :  { %v12558_v14 = vpop.eup %8327  ;;  %v4327_v6 = vrot.slane %v4326_v9, 2  ;;  %v4331_v33 = vrot.slane %v12556_v52, 4  ;;  %v5337_v0 = vrot.slane %v5336_v23, 2  ;;  %v5344_v42 = vrot.slane %v5343_v49, 2 }
 0x41f   :  { %14374 = vst [vmem:[#allocation55_spill] sm:$0xff] %v12558_v14  ;;  %v12561_v21 = vpop.eup %8329  ;;  %v5357_v35 = vadd.f32 %v5356_v1, %v5355_v7  ;;  %v5351_v4 = vrot.slane %v5350_v22, 2  ;;  %v5331_v37 = vadd.f32 %v5330_v59, %v5329_v31  ;;  %v5364_v63 = vadd.f32 %v5363_v3, %v5362_v28  ;;  %v14380_v7 = vld [vmem:[#allocation100_spill] sm:$0xff] }
 0x420   :  { %14375 = vst [vmem:[#allocation27_spill] sm:$0xff] %v12561_v21  ;;  %v4328_v15 = vadd.f32 %v4327_v6, %v4326_v9  ;;  %v4332_v24 = vadd.f32 %v12556_v52, %v4331_v33  ;;  %v12566_v11 = vpop.eup %8331  ;;  %v5338_v20 = vadd.f32 %v5337_v0, %v5336_v23  ;;  %v5345_v30 = vadd.f32 %v5344_v42, %v5343_v49  ;;  %v14382_v31 = vld [vmem:[#allocation104_spill] sm:$0xff]  ;;  %v14383_v23 = vld [vmem:[#allocation106_spill] sm:$0xff]  ;;  %v14384_v42 = vld [vmem:[#allocation103_spill] sm:$0xff] }
 0x421   :  { %14378 = vst [vmem:[#allocation19_spill] sm:$0xff] %v12566_v11  ;;  %v12568_v10 = vpop.eup %8333  ;;  %v5352_v62 = vadd.f32 %v5351_v4, %v5350_v22  ;;  %v5358_v51 = vrot.slane %v5357_v35, 2  ;;  %v4922_v1 = vmul.f32 %v4794_v45, %v14380_v7  ;;  %v5332_v6 = vrot.slane %v5331_v37, 1  ;;  %v14385_v4 = vld [vmem:[#allocation105_spill] sm:$0xff] }
 0x422   :  { %14379 = vst [vmem:[#allocation53_spill] sm:$0xff] %v12568_v10  ;;  %v4329_v48 = vrot.slane %v4328_v15, 1  ;;  %v4333_v44 = vrot.slane %v4332_v24, 2  ;;  %v4337_v9 = vrot.slane %v12568_v10, 4  ;;  %v5339_v33 = vrot.slane %v5338_v20, 1 }
 0x423   :  { %v12572_v29 = vpop.eup %8335  ;;  %v4923_v0 = vmul.f32 %v12504_v43, %v14382_v31  ;;  %v5346_v3 = vrot.slane %v5345_v30, 1  ;;  %v4924_v49 = vmul.f32 %v12514_v54, %v14383_v23  ;;  %v5353_v22 = vrot.slane %v5352_v62, 1 }
 0x424   :  { %14381 = vst [vmem:[#allocation44_spill] sm:$0xff] %v12572_v29  ;;  %v4330_v34 = vadd.f32 %v4329_v48, %v4328_v15  ;;  %v4334_v11 = vadd.f32 %v4333_v44, %v4332_v24  ;;  %v4338_v28 = vadd.f32 %v12568_v10, %v4337_v9  ;;  %v5365_v59 = vrot.slane %v5364_v63, 2 }
 0x425   :  { %v12581_v45 = vmul.f32 %v12518_v17, %v14384_v42  ;;  %v12585_v7 = vmul.f32 %v12524_v19, %v14385_v4  ;;  %v12587_v24 = vadd.f32 %v5332_v6, %v5331_v37  ;;  %v5359_v44 = vadd.f32 %v5358_v51, %v5357_v35 }
 0x426   :  { %v4335_v48 = vrot.slane %v4334_v11, 1  ;;  %v4339_v43 = vrot.slane %v4338_v28, 2  ;;  %v12589_v15 = vadd.f32 %v5339_v33, %v5338_v20  ;;  %v5369_v54 = vsel %vm2302_vm1, %v12531_v32, 0.0 }
 0x427   :  { %8337 = vrcp.f32 %v4330_v34  ;;  %v12593_v9 = vadd.f32 %v5346_v3, %v5345_v30  ;;  %v5370_v31 = vrot.slane %v5369_v54, 4  ;;  %v5376_v17 = vsel %vm2302_vm1, %v12534_v41, 0.0 }
 0x428   :  { %v12597_v23 = vadd.f32 %v5353_v22, %v5352_v62  ;;  %v5366_v19 = vadd.f32 %v5365_v59, %v5364_v63  ;;  %v5377_v37 = vrot.slane %v5376_v17, 4  ;;  %v5383_v51 = vsel %vm2302_vm1, %v12538_v40, 0.0 }
 0x429   :  { %v5360_v35 = vrot.slane %v5359_v44, 1  ;;  %v5371_v20 = vadd.f32 %v5370_v31, %v5369_v54  ;;  %v5384_v6 = vrot.slane %v5383_v51, 4  ;;  %v5390_v32 = vsel %vm2302_vm1, %v12542_v53, 0.0 }
 0x42a   :  { %v12603_v33 = vadd.f32 %v4335_v48, %v4334_v11  ;;  %v4340_v30 = vadd.f32 %v4339_v43, %v4338_v28  ;;  %v5378_v34 = vadd.f32 %v5377_v37, %v5376_v17  ;;  %v5391_v3 = vrot.slane %v5390_v32, 4  ;;  %v12608_v17 = vpop.xlane.xlu0 %2556 }
 0x42b   :  { %v5372_v42 = vrot.slane %v5371_v20, 2  ;;  %v5385_v41 = vadd.f32 %v5384_v6, %v5383_v51  ;;  %v5397_v62 = vsel %vm2302_vm1, %v4921_v36, 0.0  ;;  %v5404_v63 = vsel %vm2302_vm1, %v4922_v1, 0.0 }
 0x42c   :  { %v5367_v22 = vrot.slane %v5366_v19, 1  ;;  %v5379_v59 = vrot.slane %v5378_v34, 2  ;;  %v5392_v40 = vadd.f32 %v5391_v3, %v5390_v32  ;;  %v5398_v4 = vrot.slane %v5397_v62, 4 }
 0x42d   :  { %v5373_v54 = vadd.f32 %v5372_v42, %v5371_v20  ;;  %v5386_v31 = vrot.slane %v5385_v41, 2  ;;  %v5405_v10 = vrot.slane %v5404_v63, 4  ;;  %v5411_v53 = vsel %vm2302_vm1, %v4923_v0, 0.0  ;;  %v12611_v20 = vpop.xlane.xlu1 %2571 }
 0x42e   :  { %v4341_v11 = vrot.slane %v4340_v30, 1  ;;  %v5380_v48 = vadd.f32 %v5379_v59, %v5378_v34  ;;  %v5393_v28 = vrot.slane %v5392_v40, 2  ;;  %v5399_v43 = vadd.f32 %v5398_v4, %v5397_v62 }
 0x42f   :  { %v5374_v37 = vrot.slane %v5373_v54, 1  ;;  %v5387_v51 = vadd.f32 %v5386_v31, %v5385_v41  ;;  %v5406_v36 = vadd.f32 %v5405_v10, %v5404_v63  ;;  %v5412_v6 = vrot.slane %v5411_v53, 4 }
 0x430   :  { %v5381_v1 = vrot.slane %v5380_v48, 1  ;;  %v5394_v29 = vadd.f32 %v5393_v28, %v5392_v40  ;;  %v5400_v47 = vrot.slane %v5399_v43, 2  ;;  %v5418_v32 = vsel %vm2302_vm1, %v4924_v49, 0.0 }
 0x431   :  { %v5361_v3 = vadd.f32 %v5360_v35, %v5359_v44  ;;  %v5388_v42 = vrot.slane %v5387_v51, 1  ;;  %v5407_v0 = vrot.slane %v5406_v36, 2  ;;  %v5413_v21 = vadd.f32 %v5412_v6, %v5411_v53  ;;  %v12619_v35 = vpop.xlane.xlu0 %2559 }
 0x432   :  { %v5368_v34 = vadd.f32 %v5367_v22, %v5366_v19  ;;  %v5395_v59 = vrot.slane %v5394_v29, 1  ;;  %v5401_v62 = vadd.f32 %v5400_v47, %v5399_v43  ;;  %v5419_v4 = vrot.slane %v5418_v32, 4 }
 0x433   :  { %v12613_v16 = vadd.f32 %v4341_v11, %v4340_v30  ;;  %v5375_v41 = vadd.f32 %v5374_v37, %v5373_v54  ;;  %v5408_v10 = vadd.f32 %v5407_v0, %v5406_v36  ;;  %v5414_v63 = vrot.slane %v5413_v21, 2  ;;  %v12623_v37 = vpop.xlane.xlu1 %2574 }
 0x434   :  { %v12615_v31 = vpop.eup %8337  ;;  %v5382_v40 = vadd.f32 %v5381_v1, %v5380_v48  ;;  %v5402_v28 = vrot.slane %v5401_v62, 1  ;;  %v5420_v49 = vadd.f32 %v5419_v4, %v5418_v32  ;;  %v5425_v44 = vsel %vm2302_vm1, %v12581_v45, 0.0 }
 0x435   :  { %v5389_v53 = vadd.f32 %v5388_v42, %v5387_v51  ;;  %v5409_v19 = vrot.slane %v5408_v10, 1  ;;  %v5415_v22 = vadd.f32 %v5414_v63, %v5413_v21  ;;  %v5426_v47 = vrot.slane %v5425_v44, 4  ;;  %v12633_v63 = vpop.xlane.xlu0 %2562 }
 0x436   :  { %v5396_v43 = vadd.f32 %v5395_v59, %v5394_v29  ;;  %v5403_v30 = vadd.f32 %v5402_v28, %v5401_v62  ;;  %v5421_v11 = vrot.slane %v5420_v49, 2  ;;  %v5432_v54 = vsel %vm2302_vm1, %v12585_v7, 0.0 }
 0x437   :  { %v5410_v48 = vadd.f32 %v5409_v19, %v5408_v10  ;;  %v5416_v36 = vrot.slane %v5415_v22, 1  ;;  %v5427_v6 = vadd.f32 %v5426_v47, %v5425_v44  ;;  %v5936_v45 = vpack.c.bf16 %v12587_v24, %v12587_v24 }
 0x438   :  { %v5422_v1 = vadd.f32 %v5421_v11, %v5420_v49  ;;  %v5433_v32 = vrot.slane %v5432_v54, 4  ;;  %v5937_v21 = vpack.c.bf16 %v12589_v15, %v12589_v15  ;;  %v5938_v29 = vpack.c.bf16 %v12593_v9, %v12593_v9 }
 0x439   :  { %v5417_v51 = vadd.f32 %v5416_v36, %v5415_v22  ;;  %v5428_v42 = vrot.slane %v5427_v6, 2  ;;  %v5939_v7 = vpack.c.bf16 %v12597_v23, %v12597_v23  ;;  %v5940_v0 = vpack.c.bf16 %v5361_v3, %v5361_v3  ;;  %v12635_v22 = vpop.xlane.xlu1 %2577 }
 0x43a   :  { %v5423_v59 = vrot.slane %v5422_v1, 1  ;;  %v5434_v62 = vadd.f32 %v5433_v32, %v5432_v54  ;;  %v5941_v4 = vpack.c.bf16 %v5368_v34, %v5368_v34  ;;  %v5942_v10 = vpack.c.bf16 %v5375_v41, %v5375_v41 }
 0x43b   :  { %v5429_v24 = vadd.f32 %v5428_v42, %v5427_v6  ;;  %v5943_v28 = vpack.c.bf16 %v5382_v40, %v5382_v40  ;;  %v5944_v49 = vpack.c.bf16 %v5389_v53, %v5389_v53  ;;  %v5945_v44 = vpack.c.bf16 %v5396_v43, %v5396_v43 }
 0x43c   :  { %v5424_v15 = vadd.f32 %v5423_v59, %v5422_v1  ;;  %v5435_v19 = vrot.slane %v5434_v62, 2  ;;  %v5946_v47 = vpack.c.bf16 %v5403_v30, %v5403_v30  ;;  %v5947_v9 = vpack.c.bf16 %v5410_v48, %v5410_v48  ;;  %v12637_v30 = vpop.xlane.xlu0 %2565 }
 0x43d   :  { %v5430_v11 = vrot.slane %v5429_v24, 1  ;;  %v5948_v36 = vpack.c.bf16 %v5417_v51, %v5417_v51  ;;  %v6200_v23 = vunpack.c.l.b16 %v5936_v45  ;;  %v6201_v3 = vunpack.c.l.b16 %v5937_v21 }
 0x43e   :  { %v5436_v14 = vadd.f32 %v5435_v19, %v5434_v62  ;;  %v5949_v54 = vpack.c.bf16 %v5424_v15, %v5424_v15  ;;  %v6202_v34 = vunpack.c.l.b16 %v5938_v29  ;;  %v6203_v41 = vunpack.c.l.b16 %v5939_v7  ;;  %v12641_v7 = vpop.xlane.xlu1 %2580 }
 0x43f   :  { %v5431_v32 = vadd.f32 %v5430_v11, %v5429_v24  ;;  %v6204_v5 = vunpack.c.l.b16 %v5940_v0  ;;  %v6205_v6 = vunpack.c.l.b16 %v5941_v4  ;;  %v6206_v40 = vunpack.c.l.b16 %v5942_v10 }
 0x440   :  { %v5437_v53 = vrot.slane %v5436_v14, 1  ;;  %v6207_v43 = vunpack.c.l.b16 %v5943_v28  ;;  %v6208_v1 = vunpack.c.l.b16 %v5944_v49  ;;  %v6209_v42 = vunpack.c.l.b16 %v5945_v44 }
 0x441   :  { %v5950_v48 = vpack.c.bf16 %v5431_v32, %v5431_v32  ;;  %v6210_v59 = vunpack.c.l.b16 %v5946_v47  ;;  %v6211_v26 = vunpack.c.l.b16 %v5947_v9  ;;  %v6212_v51 = vunpack.c.l.b16 %v5948_v36 }
 0x442   :  { %v5438_v45 = vadd.f32 %v5437_v53, %v5436_v14  ;;  %v6213_v21 = vunpack.c.l.b16 %v5949_v54  ;;  %v6329_v62 = vsel %vm6280_vm2, %v6201_v3, %v6200_v23  ;;  %v6336_v29 = vsel %vm6280_vm2, %v6209_v42, %v6208_v1  ;;  %v12656_v54 = vpop.xlane.xlu0 %2568  ;;  %v12664_v42 = vpop.xlane.xlu1 %2583 }
 0x443   :  { %v6214_v0 = vunpack.c.l.b16 %v5950_v48  ;;  %v6330_v4 = vsel %vm6282_vm3, %v6202_v34, %v6329_v62  ;;  %v6337_v10 = vsel %vm6282_vm3, %v6210_v59, %v6336_v29  ;;  %v3191_v24 = vrot.slane %v12608_v17, 4 }
 0x444   :  { %v5951_v28 = vpack.c.bf16 %v5438_v45, %v5438_v45  ;;  %v6331_v49 = vsel %vm6284_vm4, %v6203_v41, %v6330_v4  ;;  %v6338_v44 = vsel %vm6284_vm4, %v6211_v26, %v6337_v10  ;;  %v3197_v14 = vrot.slane %v12619_v35, 4 }
 0x445   :  { %v6332_v15 = vsel %vm6286_vm5, %v6204_v5, %v6331_v49  ;;  %v6339_v19 = vsel %vm6286_vm5, %v6212_v51, %v6338_v44  ;;  %v3192_v47 = vmax.f32 %v12608_v17, %v3191_v24  ;;  %v3203_v9 = vrot.slane %v12633_v63, 4 }
 0x446   :  { %v6215_v11 = vunpack.c.l.b16 %v5951_v28  ;;  %v6333_v36 = vsel %vm6288_vm6, %v6205_v6, %v6332_v15  ;;  %v6340_v23 = vsel %vm6288_vm6, %v6213_v21, %v6339_v19  ;;  %v3198_v3 = vmax.f32 %v12619_v35, %v3197_v14 }
 0x447   :  { %v6334_v26 = vsel %vm6290_vm7, %v6206_v40, %v6333_v36  ;;  %v6341_v34 = vsel %vm6290_vm7, %v6214_v0, %v6340_v23  ;;  %v3193_v5 = vrot.slane %v3192_v47, 2  ;;  %v3204_v41 = vmax.f32 %v12633_v63, %v3203_v9 }
 0x448   :  { %v6335_v32 = vsel %vm6292_vm8, %v6207_v43, %v6334_v26  ;;  %v6342_v53 = vsel %vm6292_vm8, %v6215_v11, %v6341_v34  ;;  %v3199_v1 = vrot.slane %v3198_v3, 2  ;;  %v3209_v6 = vrot.slane %v12637_v30, 4 }
 0x449   :  { %v12666_v48 = vpack.c.b16 %v6342_v53, %v6335_v32  ;;  %v3194_v59 = vmax.f32 %v3192_v47, %v3193_v5  ;;  %v3205_v51 = vrot.slane %v3204_v41, 2  ;;  %v3215_v40 = vrot.slane %v12656_v54, 4 }
 0x44a   :  { %v3200_v45 = vmax.f32 %v3198_v3, %v3199_v1  ;;  %v3210_v21 = vmax.f32 %v12637_v30, %v3209_v6  ;;  %v3221_v62 = vrot.slane %v12611_v20, 4  ;;  %v3227_v43 = vrot.slane %v12623_v37, 4  ;;  %v12679_v3 = vpop.xlane.xlu1 %2586 }
 0x44b   :  { %14386 = vst [vmem:[#allocation57_spill] sm:$0xff] %v12666_v48  ;;  %7888 = vmatmul.mubr.msk.bf16.gmra.mxu1 %vm2302_vm1, %v12666_v48  ;;  %v3195_v29 = vrot.slane %v3194_v59, 1  ;;  %v3206_v0 = vmax.f32 %v3204_v41, %v3205_v51  ;;  %v3216_v4 = vmax.f32 %v12656_v54, %v3215_v40  ;;  %v3233_v10 = vrot.slane %v12635_v22, 4 }
 0x44c   :  { %v3201_v24 = vrot.slane %v3200_v45, 1  ;;  %v3211_v28 = vrot.slane %v3210_v21, 2  ;;  %v3222_v49 = vmax.f32 %v12611_v20, %v3221_v62  ;;  %v3228_v44 = vmax.f32 %v12623_v37, %v3227_v43 }
 0x44d   :  { %v3196_v14 = vmax.f32 %v3194_v59, %v3195_v29  ;;  %v3207_v15 = vrot.slane %v3206_v0, 1  ;;  %v3217_v19 = vrot.slane %v3216_v4, 2  ;;  %v3234_v47 = vmax.f32 %v12635_v22, %v3233_v10 }
 0x44e   :  { %v3202_v9 = vmax.f32 %v3200_v45, %v3201_v24  ;;  %v3212_v11 = vmax.f32 %v3210_v21, %v3211_v28  ;;  %v3223_v36 = vrot.slane %v3222_v49, 2  ;;  %v3229_v23 = vrot.slane %v3228_v44, 2  ;;  %v12685_v28 = vpop.xlane.xlu1 %2589 }
 0x44f   :  { %v3539_v26 = vsub.f32 %v12608_v17, %v3196_v14  ;;  %v3208_v34 = vmax.f32 %v3206_v0, %v3207_v15  ;;  %v3218_v5 = vmax.f32 %v3216_v4, %v3217_v19  ;;  %v3235_v41 = vrot.slane %v3234_v47, 2  ;;  %v12689_v14 = vpop.xlane.xlu0 %2592 }
 0x450   :  { %v3540_v32 = vsub.f32 %v12619_v35, %v3202_v9  ;;  %v3213_v53 = vrot.slane %v3212_v11, 1  ;;  %v3224_v1 = vmax.f32 %v3222_v49, %v3223_v36  ;;  %v3230_v6 = vmax.f32 %v3228_v44, %v3229_v23 }
 0x451   :  { %v3751_v59 = vmul.f32 1.442695, %v3539_v26  ;;  %v3541_v51 = vsub.f32 %v12633_v63, %v3208_v34  ;;  %v3219_v40 = vrot.slane %v3218_v5, 1  ;;  %v3236_v45 = vmax.f32 %v3234_v47, %v3235_v41 }
 0x452   :  { %v3753_v21 = vmul.f32 1.442695, %v3540_v32  ;;  %v3214_v62 = vmax.f32 %v3212_v11, %v3213_v53  ;;  %v3225_v43 = vrot.slane %v3224_v1, 1  ;;  %v3231_v29 = vrot.slane %v3230_v6, 1 }
 0x453   :  { %8339 = vpow2.f32 %v3751_v59  ;;  %v3755_v10 = vmul.f32 1.442695, %v3541_v51  ;;  %v3220_v17 = vmax.f32 %v3218_v5, %v3219_v40  ;;  %v3237_v0 = vrot.slane %v3236_v45, 1  ;;  %v12698_v5 = vpop.xlane.xlu1 %2595  ;;  %v12701_v32 = vpop.xlane.xlu0 %2598 }
 0x454   :  { %8341 = vpow2.f32 %v3753_v21  ;;  %v3542_v4 = vsub.f32 %v12637_v30, %v3214_v62  ;;  %v3226_v35 = vmax.f32 %v3224_v1, %v3225_v43  ;;  %v3232_v24 = vmax.f32 %v3230_v6, %v3231_v29 }
 0x455   :  { %8343 = vpow2.f32 %v3755_v10  ;;  %v3543_v63 = vsub.f32 %v12656_v54, %v3220_v17  ;;  %v3238_v49 = vmax.f32 %v3236_v45, %v3237_v0  ;;  %v3239_v44 = vrot.slane %v12641_v7, 4 }
 0x456   :  { %v3757_v15 = vmul.f32 1.442695, %v3542_v4  ;;  %v3544_v19 = vsub.f32 %v12611_v20, %v3226_v35  ;;  %v3545_v47 = vsub.f32 %v12623_v37, %v3232_v24  ;;  %v3245_v9 = vrot.slane %v12664_v42, 4 }
 0x457   :  { %v3759_v30 = vmul.f32 1.442695, %v3543_v63  ;;  %v3546_v11 = vsub.f32 %v12635_v22, %v3238_v49  ;;  %v3240_v36 = vmax.f32 %v12641_v7, %v3239_v44  ;;  %v3251_v23 = vrot.slane %v12679_v3, 4  ;;  %v12720_v49 = vpop.xlane.xlu0 %2601 }
 0x458   :  { %8345 = vpow2.f32 %v3757_v15  ;;  %v3761_v54 = vmul.f32 1.442695, %v3544_v19  ;;  %v3763_v26 = vmul.f32 1.442695, %v3545_v47  ;;  %v3246_v34 = vmax.f32 %v12664_v42, %v3245_v9 }
 0x459   :  { %8347 = vpow2.f32 %v3759_v30  ;;  %v3765_v20 = vmul.f32 1.442695, %v3546_v11  ;;  %v3241_v41 = vrot.slane %v3240_v36, 2  ;;  %v3252_v37 = vmax.f32 %v12679_v3, %v3251_v23 }
 0x45a   :  { %8349 = vpow2.f32 %v3761_v54  ;;  %v3247_v22 = vrot.slane %v3246_v34, 2  ;;  %v3257_v53 = vrot.slane %v12685_v28, 4  ;;  %v3263_v1 = vrot.slane %v12689_v14, 4 }
 0x45b   :  { %8351 = vpow2.f32 %v3763_v26  ;;  %v3242_v6 = vmax.f32 %v3240_v36, %v3241_v41  ;;  %v3253_v59 = vrot.slane %v3252_v37, 2  ;;  %v3269_v51 = vrot.slane %v12698_v5, 4 }
 0x45c   :  { %8353 = vpow2.f32 %v3765_v20  ;;  %v3248_v40 = vmax.f32 %v3246_v34, %v3247_v22  ;;  %v3258_v45 = vmax.f32 %v12685_v28, %v3257_v53  ;;  %v3264_v21 = vmax.f32 %v12689_v14, %v3263_v1 }
 0x45d   :  { %v14387_v62 = vrot.slane %v12476_v50, 2  ;;  %8355 = vrcp.f32 %v12521_v56  ;;  %v3243_v29 = vrot.slane %v3242_v6, 1  ;;  %v3254_v10 = vmax.f32 %v3252_v37, %v3253_v59 }
 0x45e   :  { %8357 = vrcp.f32 %v12603_v33  ;;  %v3249_v17 = vrot.slane %v3248_v40, 1  ;;  %v3259_v0 = vrot.slane %v3258_v45, 2  ;;  %v3265_v4 = vrot.slane %v3264_v21, 2 }
 0x45f   :  { %v12711_v43 = vadd.f32 %v14387_v62, %v12476_v50  ;;  %v12717_v35 = vmul.f32 %v12615_v31, %v12528_v27  ;;  %8359 = vrcp.f32 %v12613_v16  ;;  %v3244_v24 = vmax.f32 %v3242_v6, %v3243_v29 }
 0x460   :  { %v3255_v63 = vrot.slane %v3254_v10, 1  ;;  %v12722_v50 = vpop.eup %8339  ;;  %v3250_v56 = vmax.f32 %v3248_v40, %v3249_v17  ;;  %v3260_v44 = vmax.f32 %v3258_v45, %v3259_v0  ;;  %v3266_v15 = vmax.f32 %v3264_v21, %v3265_v4 }
 0x461   :  { %v3270_v33 = vmax.f32 %v12698_v5, %v3269_v51  ;;  %v12725_v19 = vpop.eup %8341  ;;  %v4343_v47 = vrot.slane %v12722_v50, 4  ;;  %v3547_v27 = vsub.f32 %v12641_v7, %v3244_v24  ;;  %v3275_v16 = vrot.slane %v12701_v32, 4 }
 0x462   :  { %v3256_v31 = vmax.f32 %v3254_v10, %v3255_v63  ;;  %v12730_v9 = vpop.eup %8343  ;;  %v4349_v30 = vrot.slane %v12725_v19, 4  ;;  %v3548_v11 = vsub.f32 %v12664_v42, %v3250_v56  ;;  %v3261_v36 = vrot.slane %v3260_v44, 1 }
 0x463   :  { %v3281_v23 = vrot.slane %v12720_v49, 4  ;;  %v4344_v54 = vadd.f32 %v12722_v50, %v4343_v47  ;;  %v4355_v26 = vrot.slane %v12730_v9, 4  ;;  %v3767_v34 = vmul.f32 1.442695, %v3547_v27 }
 0x464   :  { %v3549_v20 = vsub.f32 %v12679_v3, %v3256_v31  ;;  %v4350_v7 = vadd.f32 %v12725_v19, %v4349_v30  ;;  %v3769_v41 = vmul.f32 1.442695, %v3548_v11  ;;  %v3262_v37 = vmax.f32 %v3260_v44, %v3261_v36 }
 0x465   :  { %v3267_v22 = vrot.slane %v3266_v15, 1  ;;  %v12739_v53 = vpop.eup %8345  ;;  %v4345_v1 = vrot.slane %v4344_v54, 2  ;;  %v4356_v42 = vadd.f32 %v12730_v9, %v4355_v26  ;;  %8361 = vpow2.f32 %v3767_v34 }
 0x466   :  { %14388 = vst [vmem:[#allocation20_spill] sm:$0xff] %v12739_v53  ;;  %v3771_v6 = vmul.f32 1.442695, %v3549_v20  ;;  %v12742_v59 = vpop.eup %8347  ;;  %v4351_v51 = vrot.slane %v4350_v7, 2  ;;  %v4361_v40 = vrot.slane %v12739_v53, 4  ;;  %8363 = vpow2.f32 %v3769_v41 }
 0x467   :  { %v3550_v3 = vsub.f32 %v12685_v28, %v3262_v37  ;;  %v12746_v45 = vpop.eup %8349  ;;  %v4346_v21 = vadd.f32 %v4345_v1, %v4344_v54  ;;  %v4357_v62 = vrot.slane %v4356_v42, 2  ;;  %v4367_v29 = vrot.slane %v12742_v59, 4 }
 0x468   :  { %8365 = vpow2.f32 %v3771_v6  ;;  %v12749_v10 = vpop.eup %8351  ;;  %v4352_v17 = vadd.f32 %v4351_v51, %v4350_v7  ;;  %v4362_v0 = vadd.f32 %v12739_v53, %v4361_v40  ;;  %v4373_v4 = vrot.slane %v12746_v45, 4 }
 0x469   :  { %v3271_v24 = vrot.slane %v3270_v33, 2  ;;  %v12753_v63 = vpop.eup %8353  ;;  %v4347_v56 = vrot.slane %v4346_v21, 1  ;;  %v4368_v28 = vadd.f32 %v12742_v59, %v4367_v29  ;;  %v4379_v44 = vrot.slane %v12749_v10, 4 }
 0x46a   :  { %v3268_v47 = vmax.f32 %v3266_v15, %v3267_v22  ;;  %v12757_v27 = vpop.eup %8355  ;;  %v4358_v31 = vadd.f32 %v4357_v62, %v4356_v42  ;;  %v4363_v30 = vrot.slane %v4362_v0, 2  ;;  %v4374_v11 = vadd.f32 %v12746_v45, %v4373_v4 }
 0x46b   :  { %v4385_v36 = vrot.slane %v12753_v63, 4  ;;  %v12761_v54 = vpop.eup %8357  ;;  %v4348_v26 = vadd.f32 %v4347_v56, %v4346_v21  ;;  %v4369_v34 = vrot.slane %v4368_v28, 2  ;;  %v4380_v20 = vadd.f32 %v12749_v10, %v4379_v44 }
 0x46c   :  { %v3773_v7 = vmul.f32 1.442695, %v3550_v3  ;;  %v12764_v41 = vpop.eup %8359  ;;  %v4353_v37 = vrot.slane %v4352_v17, 1  ;;  %v4364_v1 = vadd.f32 %v4363_v30, %v4362_v0  ;;  %v4375_v15 = vrot.slane %v4374_v11, 2 }
 0x46d   :  { %v4386_v22 = vadd.f32 %v12753_v63, %v4385_v36  ;;  %v4370_v42 = vadd.f32 %v4369_v34, %v4368_v28  ;;  %v4381_v6 = vrot.slane %v4380_v20, 2  ;;  %v3272_v51 = vmax.f32 %v3270_v33, %v3271_v24 }
 0x46e   :  { %v3276_v40 = vmax.f32 %v12701_v32, %v3275_v16  ;;  %v4359_v62 = vrot.slane %v4358_v31, 1  ;;  %v4376_v29 = vadd.f32 %v4375_v15, %v4374_v11  ;;  %v3282_v21 = vmax.f32 %v12720_v49, %v3281_v23 }
 0x46f   :  { %v4387_v4 = vrot.slane %v4386_v22, 2  ;;  %8367 = vrcp.f32 %v4348_v26  ;;  %v4371_v56 = vrot.slane %v4370_v42, 1  ;;  %v4382_v3 = vadd.f32 %v4381_v6, %v4380_v20 }
 0x470   :  { %v3551_v44 = vsub.f32 %v12689_v14, %v3268_v47  ;;  %v4354_v48 = vadd.f32 %v4353_v37, %v4352_v17  ;;  %v4365_v0 = vrot.slane %v4364_v1, 1  ;;  %v4377_v30 = vrot.slane %v4376_v29, 1 }
 0x471   :  { %8369 = vpow2.f32 %v3773_v7  ;;  %v4372_v36 = vadd.f32 %v4371_v56, %v4370_v42  ;;  %v4383_v28 = vrot.slane %v4382_v3, 1  ;;  %v4388_v34 = vadd.f32 %v4387_v4, %v4386_v22 }
 0x472   :  { %v3273_v33 = vrot.slane %v3272_v51, 1  ;;  %v12770_v24 = vpop.eup %8361  ;;  %v4360_v16 = vadd.f32 %v4359_v62, %v4358_v31  ;;  %v4378_v11 = vadd.f32 %v4377_v30, %v4376_v29  ;;  %v3775_v15 = vmul.f32 1.442695, %v3551_v44 }
 0x473   :  { %v3277_v53 = vrot.slane %v3276_v40, 2  ;;  %v12772_v23 = vpop.eup %8363  ;;  %8371 = vrcp.f32 %v4372_v36  ;;  %v4384_v26 = vadd.f32 %v4383_v28, %v4382_v3  ;;  %v4391_v14 = vrot.slane %v12770_v24, 4 }
 0x474   :  { %v3274_v17 = vmax.f32 %v3272_v51, %v3273_v33  ;;  %v4366_v20 = vadd.f32 %v4365_v0, %v4364_v1  ;;  %8373 = vrcp.f32 %v4378_v11  ;;  %v4397_v7 = vrot.slane %v12772_v23, 4 }
 0x475   :  { %v12775_v47 = vpop.eup %8365  ;;  %v3278_v37 = vmax.f32 %v3276_v40, %v3277_v53  ;;  %v4389_v22 = vrot.slane %v4388_v34, 1  ;;  %v4392_v31 = vadd.f32 %v12770_v24, %v4391_v14  ;;  %8375 = vrcp.f32 %v4384_v26 }
 0x476   :  { %v4403_v42 = vrot.slane %v12775_v47, 4  ;;  %v3552_v6 = vsub.f32 %v12698_v5, %v3274_v17  ;;  %v4398_v62 = vadd.f32 %v12772_v23, %v4397_v7  ;;  %v3283_v4 = vrot.slane %v3282_v21, 2 }
 0x477   :  { %v3279_v29 = vrot.slane %v3278_v37, 1  ;;  %v4393_v51 = vrot.slane %v4392_v31, 2  ;;  %8377 = vpow2.f32 %v3775_v15  ;;  %v4390_v44 = vadd.f32 %v4389_v22, %v4388_v34 }
 0x478   :  { %v4404_v56 = vadd.f32 %v12775_v47, %v4403_v42  ;;  %v3777_v1 = vmul.f32 1.442695, %v3552_v6  ;;  %8379 = vrcp.f32 %v4354_v48  ;;  %v4399_v3 = vrot.slane %v4398_v62, 2 }
 0x479   :  { %v3280_v53 = vmax.f32 %v3278_v37, %v3279_v29  ;;  %v3284_v40 = vmax.f32 %v3282_v21, %v3283_v4  ;;  %v4394_v0 = vadd.f32 %v4393_v51, %v4392_v31  ;;  %v14389_v15 = vrot.slane %v12472_v25, 2 }
 0x47a   :  { %v4405_v30 = vrot.slane %v4404_v56, 2  ;;  %8381 = vpow2.f32 %v3777_v1  ;;  %v4400_v5 = vadd.f32 %v4399_v3, %v4398_v62  ;;  %v4263_v17 = vrot.slane %v12484_v38, 1 }
 0x47b   :  { %8383 = vrcp.f32 %v4360_v16  ;;  %v3553_v36 = vsub.f32 %v12701_v32, %v3280_v53  ;;  %v3285_v28 = vrot.slane %v3284_v40, 1  ;;  %v4395_v33 = vrot.slane %v4394_v0, 1 }
 0x47c   :  { %8385 = vrcp.f32 %v4366_v20  ;;  %v4406_v11 = vadd.f32 %v4405_v30, %v4404_v56  ;;  %v4268_v26 = vadd.f32 %v14389_v15, %v12472_v25  ;;  %v12787_v48 = vpop.eup %8367  ;;  %v4401_v14 = vrot.slane %v4400_v5, 1  ;;  %v14397_v15 = vld [vmem:[#allocation141_spill] sm:$0xff] }
 0x47d   :  { %v3779_v21 = vmul.f32 1.442695, %v3553_v36  ;;  %v3286_v34 = vmax.f32 %v3284_v40, %v3285_v28  ;;  %8387 = vrcp.f32 %v4390_v44  ;;  %v4396_v16 = vadd.f32 %v4395_v33, %v4394_v0  ;;  %v14391_v40 = vld [vmem:[#allocation31_spill] sm:$0xff]  ;;  %v14395_v36 = vld [vmem:[#allocation120_spill] sm:$0xff]  ;;  %v14396_v33 = vld [vmem:[#allocation134_spill] sm:$0xff] }
 0x47e   :  { %v12790_v7 = vpop.eup %8369  ;;  %v4407_v32 = vrot.slane %v4406_v11, 1  ;;  %v4269_v37 = vrot.slane %v4268_v26, 1  ;;  %v4402_v20 = vadd.f32 %v4401_v14, %v4400_v5  ;;  %v14390_v42 = vrot.slane %v12428_v55, 1 }
 0x47f   :  { %v4409_v22 = vrot.slane %v12790_v7, 4  ;;  %8389 = vpow2.f32 %v3779_v21  ;;  %v3554_v31 = vsub.f32 %v12720_v49, %v3286_v34  ;;  %v4317_v62 = vrot.slane %v12711_v43, 1  ;;  %v14401_v21 = vld [vmem:[#allocation68_spill] sm:$0xff] }
 0x480   :  { %8391 = vrcp.f32 %v4396_v16  ;;  %v4408_v25 = vadd.f32 %v4407_v32, %v4406_v11  ;;  %v4258_v6 = vadd.f32 %v14390_v42, %v12428_v55  ;;  %v8372_v29 = vpop.eup %8371  ;;  %v4264_v56 = vadd.f32 %v4263_v17, %v12484_v38  ;;  %v14402_v17 = vld [vmem:[#allocation32_spill] sm:$0xff] }
 0x481   :  { %8393 = vrcp.f32 %v4402_v20  ;;  %v4410_v4 = vadd.f32 %v12790_v7, %v4409_v22  ;;  %v3781_v51 = vmul.f32 1.442695, %v3554_v31  ;;  %v8374_v1 = vpop.eup %8373  ;;  %v12802_v3 = vmul.f32 %v12757_v27, %v12467_v12 }
 0x482   :  { %v4823_v49 = vmul.f32 %v8372_v29, %v12742_v59  ;;  %8395 = vrcp.f32 %v4408_v25  ;;  %v4270_v53 = vadd.f32 %v4269_v37, %v4268_v26  ;;  %v12807_v55 = vmul.f32 %v12717_v35, %v14391_v40  ;;  %v8376_v38 = vpop.eup %8375  ;;  %v14406_v29 = vld [vmem:[#allocation111_spill] sm:$0xff]  ;;  %v14411_v40 = vld [vmem:[#allocation41_spill] sm:$0xff] }
 0x483   :  { %v4411_v44 = vrot.slane %v4410_v4, 2  ;;  %8397 = vpow2.f32 %v3781_v51  ;;  %v14393_v0 = vrot.slane %v12479_v57, 1  ;;  %v12814_v5 = vmul.f32 %v12761_v54, %v12556_v52 }
 0x484   :  { %14392 = vst [vmem:[#allocation48_spill] sm:$0xff] %v12807_v55  ;;  %v4824_v12 = vmul.f32 %v8374_v1, %v12746_v45  ;;  %v4318_v59 = vadd.f32 %v4317_v62, %v12711_v43  ;;  %8399 = vrcp.f32 %v4258_v6  ;;  %v12818_v27 = vpop.eup %8377  ;;  %v4799_v28 = vmul.f32 %v12439_v46, %v14395_v36  ;;  %v14399_v43 = vld [vmem:[#allocation45_spill] sm:$0xff]  ;;  %v14408_v1 = vld [vmem:[#allocation55_spill] sm:$0xff] }
 0x485   :  { %v4312_v30 = vadd.f32 %v14393_v0, %v12479_v57  ;;  %14394 = vst [vmem:[#allocation66_spill] sm:$0xff] %v12814_v5  ;;  %v4412_v35 = vadd.f32 %v4411_v44, %v4410_v4  ;;  %8401 = vrcp.f32 %v4264_v56  ;;  %v4800_v57 = vmul.f32 %v12446_v58, %v14396_v33  ;;  %v12824_v11 = vpop.eup %8379  ;;  %v14405_v6 = vld [vmem:[#allocation109_spill] sm:$0xff]  ;;  %v14407_v56 = vld [vmem:[#allocation43_spill] sm:$0xff]  ;;  %v14413_v44 = vld [vmem:[#allocation108_spill] sm:$0xff] }
 0x486   :  { %v12827_v52 = vmul.f32 %v4823_v49, %v14397_v15  ;;  %v4415_v45 = vrot.slane %v12818_v27, 4  ;;  %8403 = vrcp.f32 %v4270_v53  ;;  %v4801_v54 = vmul.f32 %v12451_v39, %v14399_v43  ;;  %v14409_v53 = vld [vmem:[#allocation46_spill] sm:$0xff]  ;;  %v14419_v43 = vld [vmem:[#allocation121_spill] sm:$0xff] }
 0x487   :  { %v12832_v26 = vpop.eup %8381  ;;  %v12835_v14 = vmul.f32 %v8376_v38, %v12749_v10  ;;  %v4413_v46 = vrot.slane %v4412_v35, 1  ;;  %8405 = vrcp.f32 %v4312_v30  ;;  %v4802_v58 = vmul.f32 %v12458_v60, %v14401_v21  ;;  %v14404_v60 = vld [vmem:[#allocation25_spill] sm:$0xff]  ;;  %v14417_v33 = vld [vmem:[#allocation110_spill] sm:$0xff] }
 0x488   :  { %14398 = vst [vmem:[#allocation70_spill] sm:$0xff] %v12827_v52  ;;  %v12839_v34 = vpop.eup %8383  ;;  %v12842_v16 = vmul.f32 %v4824_v12, %v14402_v17  ;;  %v4416_v32 = vadd.f32 %v12818_v27, %v4415_v45  ;;  %v4421_v37 = vrot.slane %v12832_v26, 4  ;;  %8407 = vrcp.f32 %v4318_v59  ;;  %v14415_v12 = vld [vmem:[#allocation54_spill] sm:$0xff]  ;;  %v14416_v59 = vld [vmem:[#allocation44_spill] sm:$0xff]  ;;  %v14426_v52 = vld [vmem:[#allocation93_spill] sm:$0xff] }
 0x489   :  { %14400 = vst [vmem:[#allocation15_spill] sm:$0xff] %v12835_v14  ;;  %v12846_v39 = vpop.eup %8385  ;;  %v4414_v20 = vadd.f32 %v4413_v46, %v4412_v35  ;;  %v4803_v10 = vmul.f32 %v12489_v13, %v12374_v61  ;;  %v4807_v22 = vmul.f32 %v12548_v2, %v12405_v8  ;;  %v4808_v31 = vmul.f32 %v14404_v60, %v12413_v18  ;;  %v14410_v61 = vld [vmem:[#allocation27_spill] sm:$0xff]  ;;  %v14418_v15 = vld [vmem:[#allocation114_spill] sm:$0xff] }
 0x48a   :  { %14403 = vst [vmem:[#allocation80_spill] sm:$0xff] %v12842_v16  ;;  %v4417_v25 = vrot.slane %v4416_v32, 2  ;;  %v4422_v42 = vadd.f32 %v12832_v26, %v4421_v37  ;;  %v4927_v62 = vmul.f32 %v4799_v28, %v14405_v6  ;;  %v4928_v4 = vmul.f32 %v4800_v57, %v14406_v29  ;;  %v12857_v51 = vpop.eup %8387  ;;  %v14412_v8 = vld [vmem:[#allocation19_spill] sm:$0xff]  ;;  %v14421_v29 = vld [vmem:[#allocation124_spill] sm:$0xff] }
 0x48b   :  { %v4809_v49 = vmul.f32 %v14408_v1, %v14407_v56  ;;  %v4810_v13 = vmul.f32 %v14410_v61, %v14409_v53  ;;  %v4811_v2 = vmul.f32 %v14412_v8, %v14411_v40  ;;  %v4929_v18 = vmul.f32 %v4801_v54, %v14413_v44  ;;  %v14422_v1 = vld [vmem:[#allocation118_spill] sm:$0xff] }
 0x48c   :  { %v12866_v0 = vpop.eup %8389  ;;  %8409 = vrcp.f32 %v4414_v20  ;;  %v4418_v30 = vadd.f32 %v4417_v25, %v4416_v32  ;;  %v4423_v38 = vrot.slane %v4422_v42, 2  ;;  %v4812_v35 = vmul.f32 %v14416_v59, %v14415_v12  ;;  %v14423_v12 = vld [vmem:[#allocation14_spill] sm:$0xff]  ;;  %v14424_v59 = vld [vmem:[#allocation123_spill] sm:$0xff] }
 0x48d   :  { %14414 = vst [vmem:[#allocation77_spill] sm:$0xff] %v12866_v0  ;;  %v12870_v36 = vpop.eup %8391  ;;  %v4427_v28 = vrot.slane %v12866_v0, 4  ;;  %v4930_v57 = vmul.f32 %v4802_v58, %v14417_v33  ;;  %v4931_v45 = vmul.f32 %v4803_v10, %v14418_v15  ;;  %v12876_v46 = vmul.f32 %v4807_v22, %v14419_v43  ;;  %v14425_v43 = vld [vmem:[#allocation13_spill] sm:$0xff] }
 0x48e   :  { %v12878_v54 = vpop.eup %8393  ;;  %v4419_v21 = vrot.slane %v4418_v30, 1  ;;  %v4424_v17 = vadd.f32 %v4423_v38, %v4422_v42  ;;  %v5439_v32 = vsel %vm2302_vm1, %v4927_v62, 0.0  ;;  %v5446_v37 = vsel %vm2302_vm1, %v4928_v4, 0.0 }
 0x48f   :  { %v12882_v20 = vpop.eup %8395  ;;  %v4428_v60 = vadd.f32 %v12866_v0, %v4427_v28  ;;  %v5440_v25 = vrot.slane %v5439_v32, 4  ;;  %v5447_v6 = vrot.slane %v5446_v37, 4  ;;  %v5453_v58 = vsel %vm2302_vm1, %v4929_v18, 0.0 }
 0x490   :  { %v12886_v10 = vpop.eup %8397  ;;  %v4425_v22 = vrot.slane %v4424_v17, 1  ;;  %v12889_v56 = vmul.f32 %v4808_v31, %v14421_v29  ;;  %v12892_v42 = vmul.f32 %v4809_v49, %v14422_v1  ;;  %v5454_v62 = vrot.slane %v5453_v58, 4 }
 0x491   :  { %14420 = vst [vmem:[#allocation63_spill] sm:$0xff] %v12886_v10  ;;  %v8400_v53 = vpop.eup %8399  ;;  %v4429_v4 = vrot.slane %v4428_v60, 2  ;;  %v4433_v61 = vrot.slane %v12886_v10, 4  ;;  %v5441_v40 = vadd.f32 %v5440_v25, %v5439_v32  ;;  %v5448_v8 = vadd.f32 %v5447_v6, %v5446_v37  ;;  %v14427_v37 = vld [vmem:[#allocation125_spill] sm:$0xff] }
 0x492   :  { %v8402_v44 = vpop.eup %8401  ;;  %v4420_v38 = vadd.f32 %v4419_v21, %v4418_v30  ;;  %v4804_v18 = vmul.f32 %v8400_v53, %v14423_v12  ;;  %v12897_v28 = vmul.f32 %v4810_v13, %v14424_v59  ;;  %v5455_v33 = vadd.f32 %v5454_v62, %v5453_v58  ;;  %v14428_v53 = vld [vmem:[#allocation99_spill] sm:$0xff] }
 0x493   :  { %v8404_v31 = vpop.eup %8403  ;;  %v4430_v15 = vadd.f32 %v4429_v4, %v4428_v60  ;;  %v4434_v49 = vadd.f32 %v12886_v10, %v4433_v61  ;;  %v4805_v29 = vmul.f32 %v8402_v44, %v14425_v43  ;;  %v5442_v1 = vrot.slane %v5441_v40, 2  ;;  %v14429_v62 = vld [vmem:[#allocation83_spill] sm:$0xff] }
 0x494   :  { %v8406_v0 = vpop.eup %8405  ;;  %v4426_v16 = vadd.f32 %v4425_v22, %v4424_v17  ;;  %v4806_v32 = vmul.f32 %v8404_v31, %v14426_v52  ;;  %v12903_v25 = vmul.f32 %v4811_v2, %v14427_v37  ;;  %v5449_v30 = vrot.slane %v5448_v8, 2  ;;  %v14430_v17 = vld [vmem:[#allocation117_spill] sm:$0xff]  ;;  %v14432_v31 = vld [vmem:[#allocation115_spill] sm:$0xff] }
 0x495   :  { %v8408_v21 = vpop.eup %8407  ;;  %v4431_v6 = vrot.slane %v4430_v15, 1  ;;  %v4435_v13 = vrot.slane %v4434_v49, 2  ;;  %v4813_v58 = vmul.f32 %v8406_v0, %v14428_v53  ;;  %v5460_v60 = vsel %vm2302_vm1, %v4930_v57, 0.0  ;;  %v14431_v52 = vld [vmem:[#allocation113_spill] sm:$0xff]  ;;  %v14433_v37 = vld [vmem:[#allocation127_spill] sm:$0xff] }
 0x496   :  { %8411 = vrcp.f32 %v4420_v38  ;;  %v4814_v4 = vmul.f32 %v8408_v21, %v14429_v62  ;;  %v5443_v61 = vadd.f32 %v5442_v1, %v5441_v40  ;;  %v5450_v44 = vadd.f32 %v5449_v30, %v5448_v8  ;;  %v14434_v38 = vld [vmem:[#allocation34_spill] sm:$0xff] }
 0x497   :  { %v4436_v12 = vadd.f32 %v4435_v13, %v4434_v49  ;;  %v4932_v22 = vmul.f32 %v4804_v18, %v14430_v17  ;;  %v4933_v59 = vmul.f32 %v4805_v29, %v14431_v52  ;;  %v5456_v2 = vrot.slane %v5455_v33, 2  ;;  %v14435_v18 = vld [vmem:[#allocation126_spill] sm:$0xff] }
 0x498   :  { %8413 = vrcp.f32 %v4426_v16  ;;  %v4934_v43 = vmul.f32 %v4806_v32, %v14432_v31  ;;  %v12912_v10 = vmul.f32 %v4812_v35, %v14433_v37  ;;  %v5461_v0 = vrot.slane %v5460_v60, 4 }
 0x499   :  { %v12914_v53 = vpop.eup %8409  ;;  %v4432_v57 = vadd.f32 %v4431_v6, %v4430_v15  ;;  %v12917_v21 = vmul.f32 %v4813_v58, %v14434_v38  ;;  %v5444_v40 = vrot.slane %v5443_v61, 1  ;;  %v5467_v8 = vsel %vm2302_vm1, %v4931_v45, 0.0 }
 0x49a   :  { %v12921_v49 = vmul.f32 %v4814_v4, %v14435_v18  ;;  %v5451_v29 = vrot.slane %v5450_v44, 1  ;;  %v5462_v16 = vadd.f32 %v5461_v0, %v5460_v60  ;;  %v5468_v1 = vrot.slane %v5467_v8, 4 }
 0x49b   :  { %v4437_v32 = vrot.slane %v4436_v12, 1  ;;  %v5457_v30 = vadd.f32 %v5456_v2, %v5455_v33  ;;  %v5474_v35 = vsel %vm2302_vm1, %v4932_v22, 0.0  ;;  %v5481_v13 = vsel %vm2302_vm1, %v4933_v59, 0.0 }
 0x49c   :  { %v5463_v62 = vrot.slane %v5462_v16, 2  ;;  %v5469_v15 = vadd.f32 %v5468_v1, %v5467_v8  ;;  %v5475_v6 = vrot.slane %v5474_v35, 4  ;;  %v5482_v58 = vrot.slane %v5481_v13, 4 }
 0x49d   :  { %8415 = vrcp.f32 %v4432_v57  ;;  %v12925_v17 = vadd.f32 %v5444_v40, %v5443_v61  ;;  %v5488_v45 = vsel %vm2302_vm1, %v4934_v43, 0.0  ;;  %v5495_v4 = vsel %vm2302_vm1, %v12876_v46, 0.0  ;;  %v7951_v46 = vld [vmem:[%s13851_s3 + $0x18] sm:$0xff]   ;;  %v7952_v43 = vld [vmem:[%s13851_s3 + $0x10] sm:$0xff]  }
 0x49e   :  { %v5464_v60 = vadd.f32 %v5463_v62, %v5462_v16  ;;  %v5470_v52 = vrot.slane %v5469_v15, 2  ;;  %v5476_v31 = vadd.f32 %v5475_v6, %v5474_v35  ;;  %v5483_v33 = vadd.f32 %v5482_v58, %v5481_v13  ;;  %v12940_v16 = vpop.xlane.xlu0 %2604  ;;  %7899 = vmatprep.subr.bf16.mxu1 %v7951_v46 }
 0x49f   :  { %v4438_v2 = vadd.f32 %v4437_v32, %v4436_v12  ;;  %v5489_v22 = vrot.slane %v5488_v45, 4  ;;  %v5496_v37 = vrot.slane %v5495_v4, 4  ;;  %v5502_v59 = vsel %vm2302_vm1, %v12889_v56, 0.0  ;;  %7900 = vmatpush3.bf16.msra.mxu1 %v7951_v46 }
 0x4a0   :  { %v5458_v0 = vrot.slane %v5457_v30, 1  ;;  %v5471_v38 = vadd.f32 %v5470_v52, %v5469_v15  ;;  %v5477_v57 = vrot.slane %v5476_v31, 2  ;;  %v5509_v61 = vsel %vm2302_vm1, %v12892_v42, 0.0  ;;  %7901 = vmatprep.subr.bf16.mxu1 %v7952_v43 }
 0x4a1   :  { %v5484_v12 = vrot.slane %v5483_v33, 2  ;;  %v5490_v40 = vadd.f32 %v5489_v22, %v5488_v45  ;;  %v5497_v8 = vadd.f32 %v5496_v37, %v5495_v4  ;;  %v5503_v18 = vrot.slane %v5502_v59, 4 }
 0x4a2   :  { %v12942_v56 = vadd.f32 %v5451_v29, %v5450_v44  ;;  %v5465_v1 = vrot.slane %v5464_v60, 1  ;;  %v5472_v32 = vrot.slane %v5471_v38, 1  ;;  %v5478_v35 = vadd.f32 %v5477_v57, %v5476_v31 }
 0x4a3   :  { %v12944_v42 = vpop.eup %8411  ;;  %v5485_v13 = vadd.f32 %v5484_v12, %v5483_v33  ;;  %v5491_v62 = vrot.slane %v5490_v40, 2  ;;  %v5498_v15 = vrot.slane %v5497_v8, 2  ;;  %v5504_v6 = vadd.f32 %v5503_v18, %v5502_v59  ;;  %v12960_v18 = vpop.xlane.xlu0 %2607  ;;  %7902 = vmatpush3.bf16.msra.mxu1 %v7952_v43 }
 0x4a4   :  { %8417 = vrcp.f32 %v4438_v2  ;;  %v5479_v58 = vrot.slane %v5478_v35, 1  ;;  %v5510_v45 = vrot.slane %v5509_v61, 4  ;;  %v5516_v4 = vsel %vm2302_vm1, %v12897_v28, 0.0 }
 0x4a5   :  { %v12948_v44 = vpop.eup %8413  ;;  %v12950_v29 = vadd.f32 %v5458_v0, %v5457_v30  ;;  %v5492_v52 = vadd.f32 %v5491_v62, %v5490_v40  ;;  %v5499_v31 = vadd.f32 %v5498_v15, %v5497_v8  ;;  %v5505_v22 = vrot.slane %v5504_v6, 2 }
 0x4a6   :  { %v12952_v37 = vadd.f32 %v5465_v1, %v5464_v60  ;;  %v5511_v33 = vadd.f32 %v5510_v45, %v5509_v61  ;;  %v5517_v57 = vrot.slane %v5516_v4, 4  ;;  %v5523_v2 = vsel %vm2302_vm1, %v12903_v25, 0.0 }
 0x4a7   :  { %v12956_v59 = vadd.f32 %v5472_v32, %v5471_v38  ;;  %v12958_v46 = vadd.f32 %v5479_v58, %v5478_v35  ;;  %v5486_v28 = vrot.slane %v5485_v13, 1  ;;  %v5506_v12 = vadd.f32 %v5505_v22, %v5504_v6 }
 0x4a8   :  { %v5512_v30 = vrot.slane %v5511_v33, 2  ;;  %v5518_v0 = vadd.f32 %v5517_v57, %v5516_v4  ;;  %v5524_v40 = vrot.slane %v5523_v2, 4  ;;  %v5530_v60 = vsel %vm2302_vm1, %v12912_v10, 0.0 }
 0x4a9   :  { %v5493_v61 = vrot.slane %v5492_v52, 1  ;;  %v5500_v8 = vrot.slane %v5499_v31, 1  ;;  %v5507_v1 = vrot.slane %v5506_v12, 1  ;;  %v5531_v62 = vrot.slane %v5530_v60, 4 }
 0x4aa   :  { %v12964_v25 = vpop.eup %8415  ;;  %v5513_v38 = vadd.f32 %v5512_v30, %v5511_v33  ;;  %v5519_v32 = vrot.slane %v5518_v0, 2  ;;  %v5525_v35 = vadd.f32 %v5524_v40, %v5523_v2  ;;  %v5537_v15 = vsel %vm2302_vm1, %v12917_v21, 0.0  ;;  %v12970_v33 = vpop.xlane.xlu0 %2610 }
 0x4ab   :  { %14436 = vst [vmem:[#allocation22_spill] sm:$0xff] %v12964_v25  ;;  %v5487_v6 = vadd.f32 %v5486_v28, %v5485_v13  ;;  %v5532_v43 = vadd.f32 %v5531_v62, %v5530_v60  ;;  %v5538_v58 = vrot.slane %v5537_v15, 4  ;;  %v5544_v45 = vsel %vm2302_vm1, %v12921_v49, 0.0 }
 0x4ac   :  { %v5514_v4 = vrot.slane %v5513_v38, 1  ;;  %v5520_v10 = vadd.f32 %v5519_v32, %v5518_v0  ;;  %v5526_v22 = vrot.slane %v5525_v35, 2  ;;  %v5545_v57 = vrot.slane %v5544_v45, 4 }
 0x4ad   :  { %v5494_v55 = vadd.f32 %v5493_v61, %v5492_v52  ;;  %v5501_v14 = vadd.f32 %v5500_v8, %v5499_v31  ;;  %v5533_v5 = vrot.slane %v5532_v43, 2  ;;  %v5539_v25 = vadd.f32 %v5538_v58, %v5537_v15 }
 0x4ae   :  { %v5508_v2 = vadd.f32 %v5507_v1, %v5506_v12  ;;  %v5521_v30 = vrot.slane %v5520_v10, 1  ;;  %v5527_v40 = vadd.f32 %v5526_v22, %v5525_v35  ;;  %v5546_v21 = vadd.f32 %v5545_v57, %v5544_v45  ;;  %v12986_v45 = vpop.xlane.xlu0 %2613 }
 0x4af   :  { %v5534_v13 = vadd.f32 %v5533_v5, %v5532_v43  ;;  %v5540_v28 = vrot.slane %v5539_v25, 2  ;;  %v5952_v60 = vpack.c.bf16 %v12925_v17, %v12925_v17  ;;  %v5953_v49 = vpack.c.bf16 %v12942_v56, %v12942_v56 }
 0x4b0   :  { %v5515_v0 = vadd.f32 %v5514_v4, %v5513_v38  ;;  %v5522_v62 = vadd.f32 %v5521_v30, %v5520_v10  ;;  %v5528_v52 = vrot.slane %v5527_v40, 1  ;;  %v5547_v31 = vrot.slane %v5546_v21, 2 }
 0x4b1   :  { %v12976_v61 = vpop.eup %8417  ;;  %v5535_v8 = vrot.slane %v5534_v13, 1  ;;  %v5541_v32 = vadd.f32 %v5540_v28, %v5539_v25  ;;  %v5954_v12 = vpack.c.bf16 %v12950_v29, %v12950_v29  ;;  %v5955_v5 = vpack.c.bf16 %v12952_v37, %v12952_v37 }
 0x4b2   :  { %14437 = vst [vmem:[#allocation62_spill] sm:$0xff] %v12976_v61  ;;  %v5529_v1 = vadd.f32 %v5528_v52, %v5527_v40  ;;  %v5548_v35 = vadd.f32 %v5547_v31, %v5546_v21  ;;  %v5956_v17 = vpack.c.bf16 %v12956_v59, %v12956_v59  ;;  %v5957_v56 = vpack.c.bf16 %v12958_v46, %v12958_v46  ;;  %v12988_v40 = vpop.xlane.xlu1 %2619 }
 0x4b3   :  { %v5536_v38 = vadd.f32 %v5535_v8, %v5534_v13  ;;  %v5542_v15 = vrot.slane %v5541_v32, 1  ;;  %v5958_v43 = vpack.c.bf16 %v5487_v6, %v5487_v6  ;;  %v5960_v58 = vpack.c.bf16 %v5501_v14, %v5501_v14 }
 0x4b4   :  { %v5549_v25 = vrot.slane %v5548_v35, 1  ;;  %v5961_v4 = vpack.c.bf16 %v5508_v2, %v5508_v2  ;;  %v5962_v29 = vpack.c.bf16 %v5515_v0, %v5515_v0  ;;  %v5963_v10 = vpack.c.bf16 %v5522_v62, %v5522_v62 }
 0x4b5   :  { %v5543_v22 = vadd.f32 %v5542_v15, %v5541_v32  ;;  %v5959_v37 = vpack.c.bf16 %v5494_v55, %v5494_v55  ;;  %v5964_v57 = vpack.c.bf16 %v5529_v1, %v5529_v1  ;;  %v6217_v30 = vunpack.c.l.b16 %v5953_v49  ;;  %v12991_v49 = vpop.xlane.xlu0 %2616 }
 0x4b6   :  { %v5550_v59 = vadd.f32 %v5549_v25, %v5548_v35  ;;  %v5965_v21 = vpack.c.bf16 %v5536_v38, %v5536_v38  ;;  %v6216_v28 = vunpack.c.l.b16 %v5952_v60  ;;  %v6218_v46 = vunpack.c.l.b16 %v5954_v12 }
 0x4b7   :  { %v5966_v13 = vpack.c.bf16 %v5543_v22, %v5543_v22  ;;  %v6219_v52 = vunpack.c.l.b16 %v5955_v5  ;;  %v6220_v6 = vunpack.c.l.b16 %v5956_v17  ;;  %v6224_v14 = vunpack.c.l.b16 %v5960_v58 }
 0x4b8   :  { %v5967_v31 = vpack.c.bf16 %v5550_v59, %v5550_v59  ;;  %v6225_v8 = vunpack.c.l.b16 %v5961_v4  ;;  %v6226_v61 = vunpack.c.l.b16 %v5962_v29  ;;  %v6227_v2 = vunpack.c.l.b16 %v5963_v10 }
 0x4b9   :  { %v6221_v0 = vunpack.c.l.b16 %v5957_v56  ;;  %v6222_v62 = vunpack.c.l.b16 %v5958_v43  ;;  %v6228_v32 = vunpack.c.l.b16 %v5964_v57  ;;  %v6343_v55 = vsel %vm6280_vm2, %v6217_v30, %v6216_v28  ;;  %v12998_v56 = vpop.xlane.xlu1 %2622 }
 0x4ba   :  { %v6223_v1 = vunpack.c.l.b16 %v5959_v37  ;;  %v6229_v35 = vunpack.c.l.b16 %v5965_v21  ;;  %v6344_v60 = vsel %vm6282_vm3, %v6218_v46, %v6343_v55  ;;  %v6350_v12 = vsel %vm6280_vm2, %v6225_v8, %v6224_v14 }
 0x4bb   :  { %v6230_v5 = vunpack.c.l.b16 %v5966_v13  ;;  %v6345_v17 = vsel %vm6284_vm4, %v6219_v52, %v6344_v60  ;;  %v6351_v38 = vsel %vm6282_vm3, %v6226_v61, %v6350_v12  ;;  %v3287_v15 = vrot.slane %v12940_v16, 4  ;;  %v13014_v52 = vpop.xlane.xlu0 %2658 }
 0x4bc   :  { %v6231_v43 = vunpack.c.l.b16 %v5967_v31  ;;  %v6346_v58 = vsel %vm6286_vm5, %v6220_v6, %v6345_v17  ;;  %v6352_v25 = vsel %vm6284_vm4, %v6227_v2, %v6351_v38  ;;  %v3293_v4 = vrot.slane %v12960_v18, 4 }
 0x4bd   :  { %v6347_v29 = vsel %vm6288_vm6, %v6221_v0, %v6346_v58  ;;  %v6353_v10 = vsel %vm6286_vm5, %v6228_v32, %v6352_v25  ;;  %v3288_v22 = vmax.f32 %v12940_v16, %v3287_v15  ;;  %v3299_v37 = vrot.slane %v12970_v33, 4  ;;  %v13022_v55 = vpop.xlane.xlu1 %2625 }
 0x4be   :  { %v6348_v61 = vsel %vm6290_vm7, %v6222_v62, %v6347_v29  ;;  %v6354_v57 = vsel %vm6288_vm6, %v6229_v35, %v6353_v10  ;;  %v3294_v30 = vmax.f32 %v12960_v18, %v3293_v4  ;;  %v3305_v59 = vrot.slane %v12986_v45, 4 }
 0x4bf   :  { %v6349_v21 = vsel %vm6292_vm8, %v6223_v1, %v6348_v61  ;;  %v6355_v28 = vsel %vm6290_vm7, %v6230_v5, %v6354_v57  ;;  %v3289_v46 = vrot.slane %v3288_v22, 2  ;;  %v3300_v13 = vmax.f32 %v12970_v33, %v3299_v37 }
 0x4c0   :  { %v6356_v6 = vsel %vm6292_vm8, %v6231_v43, %v6355_v28  ;;  %v3295_v14 = vrot.slane %v3294_v30, 2  ;;  %v3306_v31 = vmax.f32 %v12986_v45, %v3305_v59  ;;  %v3311_v8 = vrot.slane %v12991_v49, 4 }
 0x4c1   :  { %v13019_v2 = vpack.c.b16 %v6356_v6, %v6349_v21  ;;  %v3290_v0 = vmax.f32 %v3288_v22, %v3289_v46  ;;  %v3301_v62 = vrot.slane %v3300_v13, 2  ;;  %v3317_v32 = vrot.slane %v12988_v40, 4  ;;  %v13033_v6 = vpop.xlane.xlu1 %2682 }
 0x4c2   :  { %v3296_v1 = vmax.f32 %v3294_v30, %v3295_v14  ;;  %v3307_v35 = vrot.slane %v3306_v31, 2  ;;  %v3312_v60 = vmax.f32 %v12991_v49, %v3311_v8  ;;  %v3395_v12 = vrot.slane %v13014_v52, 4 }
 0x4c3   :  { %7891 = vmatprep.mubr.msk.bf16.mxu1 %vm2302_vm1, %v13019_v2  ;;  %v3291_v5 = vrot.slane %v3290_v0, 1  ;;  %v3302_v17 = vmax.f32 %v3300_v13, %v3301_v62  ;;  %v3318_v38 = vmax.f32 %v12988_v40, %v3317_v32  ;;  %v3323_v15 = vrot.slane %v12998_v56, 4 }
 0x4c4   :  { %v3297_v43 = vrot.slane %v3296_v1, 1  ;;  %v3308_v58 = vmax.f32 %v3306_v31, %v3307_v35  ;;  %v3313_v25 = vrot.slane %v3312_v60, 2  ;;  %v3396_v4 = vmax.f32 %v13014_v52, %v3395_v12 }
 0x4c5   :  { %v3292_v29 = vmax.f32 %v3290_v0, %v3291_v5  ;;  %v3303_v10 = vrot.slane %v3302_v17, 1  ;;  %v3319_v22 = vrot.slane %v3318_v38, 2  ;;  %v3324_v37 = vmax.f32 %v12998_v56, %v3323_v15 }
 0x4c6   :  { %v3298_v61 = vmax.f32 %v3296_v1, %v3297_v43  ;;  %v3309_v57 = vrot.slane %v3308_v58, 1  ;;  %v3314_v30 = vmax.f32 %v3312_v60, %v3313_v25  ;;  %v3397_v59 = vrot.slane %v3396_v4, 2 }
 0x4c7   :  { %v3555_v21 = vsub.f32 %v12940_v16, %v3292_v29  ;;  %v3304_v28 = vmax.f32 %v3302_v17, %v3303_v10  ;;  %v3320_v46 = vmax.f32 %v3318_v38, %v3319_v22  ;;  %v3325_v13 = vrot.slane %v3324_v37, 2  ;;  %v13038_v17 = vpop.xlane.xlu0 %2661 }
 0x4c8   :  { %v3556_v14 = vsub.f32 %v12960_v18, %v3298_v61  ;;  %v3310_v31 = vmax.f32 %v3308_v58, %v3309_v57  ;;  %v3315_v8 = vrot.slane %v3314_v30, 1  ;;  %v3398_v0 = vmax.f32 %v3396_v4, %v3397_v59 }
 0x4c9   :  { %v3783_v62 = vmul.f32 1.442695, %v3555_v21  ;;  %v3557_v32 = vsub.f32 %v12970_v33, %v3304_v28  ;;  %v3321_v35 = vrot.slane %v3320_v46, 1  ;;  %v3326_v1 = vmax.f32 %v3324_v37, %v3325_v13 }
 0x4ca   :  { %v3785_v12 = vmul.f32 1.442695, %v3556_v14  ;;  %v3558_v60 = vsub.f32 %v12986_v45, %v3310_v31  ;;  %v3316_v5 = vmax.f32 %v3314_v30, %v3315_v8  ;;  %v3399_v16 = vrot.slane %v3398_v0, 1  ;;  %v13043_v45 = vpop.xlane.xlu1 %2685 }
 0x4cb   :  { %8419 = vpow2.f32 %v3783_v62  ;;  %v3787_v38 = vmul.f32 1.442695, %v3557_v32  ;;  %v3322_v15 = vmax.f32 %v3320_v46, %v3321_v35  ;;  %v3327_v43 = vrot.slane %v3326_v1, 1 }
 0x4cc   :  { %8421 = vpow2.f32 %v3785_v12  ;;  %v3789_v18 = vmul.f32 1.442695, %v3558_v60  ;;  %v3559_v58 = vsub.f32 %v12991_v49, %v3316_v5  ;;  %v3400_v25 = vmax.f32 %v3398_v0, %v3399_v16 }
 0x4cd   :  { %8423 = vpow2.f32 %v3787_v38  ;;  %v3560_v33 = vsub.f32 %v12988_v40, %v3322_v15  ;;  %v3328_v4 = vmax.f32 %v3326_v1, %v3327_v43  ;;  %v3401_v29 = vrot.slane %v13038_v17, 4  ;;  %v14438_v1 = vld [vmem:[#allocation53_spill] sm:$0xff] }
 0x4ce   :  { %8425 = vpow2.f32 %v3789_v18  ;;  %v3791_v10 = vmul.f32 1.442695, %v3559_v58  ;;  %v3573_v22 = vsub.f32 %v13014_v52, %v3400_v25  ;;  %v3329_v37 = vrot.slane %v13022_v55, 4  ;;  %v14441_v58 = vld [vmem:[#allocation129_spill] sm:$0xff]  ;;  %v14443_v25 = vld [vmem:[#allocation131_spill] sm:$0xff] }
 0x4cf   :  { %v3793_v61 = vmul.f32 1.442695, %v3560_v33  ;;  %v3561_v57 = vsub.f32 %v12998_v56, %v3328_v4  ;;  %v3402_v49 = vmax.f32 %v13038_v17, %v3401_v29  ;;  %v3443_v30 = vrot.slane %v13033_v6, 4 }
 0x4d0   :  { %8427 = vpow2.f32 %v3791_v10  ;;  %v3819_v40 = vmul.f32 1.442695, %v3573_v22  ;;  %v3330_v59 = vmax.f32 %v13022_v55, %v3329_v37  ;;  %v3449_v21 = vrot.slane %v13043_v45, 4 }
 0x4d1   :  { %8429 = vpow2.f32 %v3793_v61  ;;  %v3795_v28 = vmul.f32 1.442695, %v3561_v57  ;;  %v3403_v46 = vrot.slane %v3402_v49, 2  ;;  %v3444_v52 = vmax.f32 %v13033_v6, %v3443_v30 }
 0x4d2   :  { %v13055_v13 = vmul.f32 %v12857_v51, %v12753_v63  ;;  %8431 = vpow2.f32 %v3819_v40  ;;  %v3331_v56 = vrot.slane %v3330_v59, 2  ;;  %v3450_v14 = vmax.f32 %v13043_v45, %v3449_v21 }
 0x4d3   :  { %v13060_v31 = vmul.f32 %v12944_v42, %v12818_v27  ;;  %8433 = vpow2.f32 %v3795_v28  ;;  %v3404_v8 = vmax.f32 %v3402_v49, %v3403_v46  ;;  %v3445_v0 = vrot.slane %v3444_v52, 2 }
 0x4d4   :  { %v13064_v62 = vmul.f32 %v12948_v44, %v12832_v26  ;;  %v3332_v32 = vmax.f32 %v3330_v59, %v3331_v56  ;;  %v3451_v35 = vrot.slane %v3450_v14, 2  ;;  %v4818_v63 = vmul.f32 %v12764_v41, %v14438_v1  ;;  %v14439_v44 = vld [vmem:[#allocation20_spill] sm:$0xff] }
 0x4d5   :  { %v3405_v51 = vrot.slane %v3404_v8, 1  ;;  %v3446_v12 = vmax.f32 %v3444_v52, %v3445_v0  ;;  %v13070_v60 = vmul.f32 %v12787_v48, %v12722_v50  ;;  %v13074_v27 = vmul.f32 %v12824_v11, %v12725_v19 }
 0x4d6   :  { %v3333_v42 = vrot.slane %v3332_v32, 1  ;;  %v3452_v5 = vmax.f32 %v3450_v14, %v3451_v35  ;;  %v13078_v26 = vmul.f32 %v12839_v34, %v12730_v9  ;;  %v13082_v16 = vmul.f32 %v12846_v39, %v14439_v44 }
 0x4d7   :  { %v3406_v41 = vmax.f32 %v3404_v8, %v3405_v51  ;;  %v3447_v38 = vrot.slane %v3446_v12, 1  ;;  %v13086_v50 = vmul.f32 %v12870_v36, %v12770_v24  ;;  %v13090_v19 = vmul.f32 %v12878_v54, %v12772_v23  ;;  %v14440_v54 = vld [vmem:[#allocation130_spill] sm:$0xff] }
 0x4d8   :  { %v13092_v48 = vpop.eup %8419  ;;  %v3334_v11 = vmax.f32 %v3332_v32, %v3333_v42  ;;  %v3453_v15 = vrot.slane %v3452_v5, 1  ;;  %v13096_v9 = vmul.f32 %v12882_v20, %v12775_v47  ;;  %v13100_v34 = vmul.f32 %v12914_v53, %v12790_v7  ;;  %v14442_v7 = vld [vmem:[#allocation66_spill] sm:$0xff] }
 0x4d9   :  { %v13102_v39 = vpop.eup %8421  ;;  %v4439_v24 = vrot.slane %v13092_v48, 4  ;;  %v3574_v36 = vsub.f32 %v13038_v17, %v3406_v41  ;;  %v3448_v23 = vmax.f32 %v3446_v12, %v3447_v38  ;;  %v13108_v43 = vmul.f32 %v12802_v3, %v14440_v54 }
 0x4da   :  { %v13110_v18 = vpop.eup %8423  ;;  %v4445_v47 = vrot.slane %v13102_v39, 4  ;;  %v3562_v20 = vsub.f32 %v13022_v55, %v3334_v11  ;;  %v13116_v53 = vmul.f32 %v14442_v7, %v14441_v58  ;;  %v13119_v33 = vmul.f32 %v4818_v63, %v14443_v25 }
 0x4db   :  { %v13121_v4 = vpop.eup %8425  ;;  %v4440_v17 = vadd.f32 %v13092_v48, %v4439_v24  ;;  %v4451_v3 = vrot.slane %v13110_v18, 4  ;;  %v3821_v29 = vmul.f32 1.442695, %v3574_v36  ;;  %v3581_v10 = vsub.f32 %v13033_v6, %v3448_v23  ;;  %v14444_v36 = vld [vmem:[#allocation135_spill] sm:$0xff] }
 0x4dc   :  { %v4446_v22 = vadd.f32 %v13102_v39, %v4445_v47  ;;  %v4457_v55 = vrot.slane %v13121_v4, 4  ;;  %v3797_v37 = vmul.f32 1.442695, %v3562_v20  ;;  %v3454_v61 = vmax.f32 %v3452_v5, %v3453_v15 }
 0x4dd   :  { %v13128_v57 = vpop.eup %8427  ;;  %v4441_v49 = vrot.slane %v4440_v17, 2  ;;  %v4452_v30 = vadd.f32 %v13110_v18, %v4451_v3  ;;  %8435 = vpow2.f32 %v3821_v29  ;;  %v3835_v40 = vmul.f32 1.442695, %v3581_v10 }
 0x4de   :  { %v13131_v59 = vpop.eup %8429  ;;  %v4447_v21 = vrot.slane %v4446_v22, 2  ;;  %v4458_v28 = vadd.f32 %v13121_v4, %v4457_v55  ;;  %v4463_v6 = vrot.slane %v13128_v57, 4  ;;  %8437 = vpow2.f32 %v3797_v37 }
 0x4df   :  { %v13135_v46 = vpop.eup %8431  ;;  %v4442_v52 = vadd.f32 %v4441_v49, %v4440_v17  ;;  %v4453_v56 = vrot.slane %v4452_v30, 2  ;;  %v4469_v14 = vrot.slane %v13131_v59, 4  ;;  %8439 = vpow2.f32 %v3835_v40  ;;  %v14445_v17 = vld [vmem:[#allocation33_spill] sm:$0xff]  ;;  %v14447_v40 = vld [vmem:[#allocation136_spill] sm:$0xff] }
 0x4e0   :  { %v13138_v8 = vpop.eup %8433  ;;  %v4448_v0 = vadd.f32 %v4447_v21, %v4446_v22  ;;  %v4464_v32 = vadd.f32 %v13128_v57, %v4463_v6  ;;  %v4547_v35 = vrot.slane %v13135_v46, 4  ;;  %v3582_v1 = vsub.f32 %v13043_v45, %v3454_v61  ;;  %v14448_v6 = vld [vmem:[#allocation137_spill] sm:$0xff] }
 0x4e1   :  { %v4443_v63 = vrot.slane %v4442_v52, 1  ;;  %v4459_v51 = vrot.slane %v4458_v28, 2  ;;  %v4470_v12 = vadd.f32 %v13131_v59, %v4469_v14  ;;  %v4475_v42 = vrot.slane %v13138_v8, 4  ;;  %v14450_v14 = vld [vmem:[#allocation144_spill] sm:$0xff] }
 0x4e2   :  { %v4449_v5 = vrot.slane %v4448_v0, 1  ;;  %v13145_v44 = vadd.f32 %v4453_v56, %v4452_v30  ;;  %v4465_v41 = vrot.slane %v4464_v32, 2  ;;  %v4548_v38 = vadd.f32 %v13135_v46, %v4547_v35 }
 0x4e3   :  { %v4444_v11 = vadd.f32 %v4443_v63, %v4442_v52  ;;  %v4471_v15 = vrot.slane %v4470_v12, 2  ;;  %v4476_v24 = vadd.f32 %v13138_v8, %v4475_v42  ;;  %v4947_v23 = vmul.f32 %v13070_v60, %v14444_v36  ;;  %v14446_v60 = vld [vmem:[#allocation133_spill] sm:$0xff]  ;;  %v14449_v52 = vld [vmem:[#allocation15_spill] sm:$0xff] }
 0x4e4   :  { %v4450_v45 = vadd.f32 %v4449_v5, %v4448_v0  ;;  %v4466_v54 = vadd.f32 %v4465_v41, %v4464_v32  ;;  %v4549_v47 = vrot.slane %v4548_v38, 2  ;;  %v3837_v20 = vmul.f32 1.442695, %v3582_v1  ;;  %v14452_v1 = vld [vmem:[#allocation17_spill] sm:$0xff] }
 0x4e5   :  { %v13151_v58 = vadd.f32 %v4459_v51, %v4458_v28  ;;  %v4472_v7 = vadd.f32 %v4471_v15, %v4470_v12  ;;  %v4477_v25 = vrot.slane %v4476_v24, 2  ;;  %v13155_v3 = vmul.f32 %v13074_v27, %v14445_v17  ;;  %v14453_v12 = vld [vmem:[#allocation35_spill] sm:$0xff] }
 0x4e6   :  { %8441 = vrcp.f32 %v4444_v11  ;;  %v4467_v10 = vrot.slane %v4466_v54, 1  ;;  %v4550_v22 = vadd.f32 %v4549_v47, %v4548_v38  ;;  %v13160_v61 = vmul.f32 %v13078_v26, %v14446_v60  ;;  %v14451_v26 = vld [vmem:[#allocation37_spill] sm:$0xff] }
 0x4e7   :  { %v4473_v55 = vrot.slane %v4472_v7, 1  ;;  %v4478_v37 = vadd.f32 %v4477_v25, %v4476_v24  ;;  %8443 = vpow2.f32 %v3837_v20  ;;  %v13164_v21 = vmul.f32 %v13082_v16, %v14447_v40 }
 0x4e8   :  { %8445 = vrcp.f32 %v4450_v45  ;;  %v4468_v49 = vadd.f32 %v4467_v10, %v4466_v54  ;;  %v4551_v30 = vrot.slane %v4550_v22, 1  ;;  %v13168_v56 = vmul.f32 %v14449_v52, %v14448_v6 }
 0x4e9   :  { %v4474_v27 = vadd.f32 %v4473_v55, %v4472_v7  ;;  %v4479_v28 = vrot.slane %v4478_v37, 1  ;;  %v13172_v0 = vmul.f32 %v13055_v13, %v14450_v14  ;;  %v13178_v35 = vmul.f32 %v13086_v50, %v14451_v26 }
 0x4ea   :  { %v13174_v32 = vpop.eup %8435  ;;  %8447 = vrcp.f32 %v4468_v49  ;;  %v13182_v16 = vmul.f32 %v13090_v19, %v14452_v1  ;;  %v5551_v63 = vsel %vm2302_vm1, %v13108_v43, 0.0  ;;  %v13191_v42 = vmul.f32 %v13096_v9, %v14453_v12  ;;  %v14454_v19 = vld [vmem:[#allocation48_spill] sm:$0xff] }
 0x4eb   :  { %v13186_v51 = vpop.eup %8437  ;;  %8449 = vrcp.f32 %v4474_v27  ;;  %v4553_v13 = vrot.slane %v13174_v32, 4  ;;  %v5552_v5 = vrot.slane %v5551_v63, 4  ;;  %v4552_v50 = vadd.f32 %v4551_v30, %v4550_v22 }
 0x4ec   :  { %v13193_v41 = vpop.eup %8439  ;;  %v4481_v38 = vrot.slane %v13186_v51, 4  ;;  %v5558_v11 = vsel %vm2302_vm1, %v14454_v19, 0.0  ;;  %v5565_v43 = vsel %vm2302_vm1, %v13116_v53, 0.0  ;;  %v4480_v15 = vadd.f32 %v4479_v28, %v4478_v37 }
 0x4ed   :  { %v4554_v24 = vadd.f32 %v13174_v32, %v4553_v13  ;;  %v4595_v36 = vrot.slane %v13193_v41, 4  ;;  %v5553_v45 = vadd.f32 %v5552_v5, %v5551_v63  ;;  %v5559_v54 = vrot.slane %v5558_v11, 4 }
 0x4ee   :  { %v4482_v9 = vadd.f32 %v13186_v51, %v4481_v38  ;;  %v5566_v47 = vrot.slane %v5565_v43, 4  ;;  %v5572_v20 = vsel %vm2302_vm1, %v13119_v33, 0.0  ;;  %v5579_v37 = vsel %vm2302_vm1, %v4947_v23, 0.0 }
 0x4ef   :  { %v4555_v7 = vrot.slane %v4554_v24, 2  ;;  %v4596_v25 = vadd.f32 %v13193_v41, %v4595_v36  ;;  %v5554_v17 = vrot.slane %v5553_v45, 2  ;;  %v5573_v10 = vrot.slane %v5572_v20, 4 }
 0x4f0   :  { %v4483_v22 = vrot.slane %v4482_v9, 2  ;;  %v5560_v53 = vadd.f32 %v5559_v54, %v5558_v11  ;;  %v5567_v55 = vadd.f32 %v5566_v47, %v5565_v43  ;;  %v5580_v52 = vrot.slane %v5579_v37, 4 }
 0x4f1   :  { %v4556_v60 = vadd.f32 %v4555_v7, %v4554_v24  ;;  %v4597_v49 = vrot.slane %v4596_v25, 2  ;;  %v5555_v30 = vadd.f32 %v5554_v17, %v5553_v45  ;;  %v5574_v40 = vadd.f32 %v5573_v10, %v5572_v20  ;;  %v14455_v7 = vld [vmem:[#allocation39_spill] sm:$0xff] }
 0x4f2   :  { %v4484_v27 = vadd.f32 %v4483_v22, %v4482_v9  ;;  %v5561_v28 = vrot.slane %v5560_v53, 2  ;;  %v5568_v6 = vrot.slane %v5567_v55, 2  ;;  %v5581_v23 = vadd.f32 %v5580_v52, %v5579_v37  ;;  %v14456_v52 = vld [vmem:[#allocation70_spill] sm:$0xff] }
 0x4f3   :  { %v13207_v14 = vpop.eup %8441  ;;  %v4557_v33 = vrot.slane %v4556_v60, 1  ;;  %v4598_v26 = vadd.f32 %v4597_v49, %v4596_v25  ;;  %v5556_v1 = vrot.slane %v5555_v30, 1  ;;  %v5575_v63 = vrot.slane %v5574_v40, 2 }
 0x4f4   :  { %v13209_v13 = vpop.eup %8443  ;;  %v4485_v12 = vrot.slane %v4484_v27, 1  ;;  %v5562_v5 = vadd.f32 %v5561_v28, %v5560_v53  ;;  %v5569_v38 = vadd.f32 %v5568_v6, %v5567_v55  ;;  %8451 = vrcp.f32 %v4552_v50 }
 0x4f5   :  { %v13211_v19 = vpop.eup %8445  ;;  %v4558_v11 = vadd.f32 %v4557_v33, %v4556_v60  ;;  %v4599_v43 = vrot.slane %v4598_v26, 1  ;;  %v4601_v24 = vrot.slane %v13209_v13, 4  ;;  %v5576_v54 = vadd.f32 %v5575_v63, %v5574_v40 }
 0x4f6   :  { %v4486_v36 = vadd.f32 %v4485_v12, %v4484_v27  ;;  %v5563_v45 = vrot.slane %v5562_v5, 1  ;;  %v5570_v9 = vrot.slane %v5569_v38, 1  ;;  %8453 = vrcp.f32 %v4480_v15 }
 0x4f7   :  { %v8448_v47 = vpop.eup %8447  ;;  %v4602_v20 = vadd.f32 %v13209_v13, %v4601_v24  ;;  %v13217_v25 = vmul.f32 %v13100_v34, %v14455_v7  ;;  %v5582_v17 = vrot.slane %v5581_v23, 2  ;;  %8455 = vrcp.f32 %v4558_v11 }
 0x4f8   :  { %v8450_v10 = vpop.eup %8449  ;;  %v13220_v50 = vmul.f32 %v8448_v47, %v13128_v57  ;;  %v4600_v22 = vadd.f32 %v4599_v43, %v4598_v26  ;;  %v13222_v53 = vadd.f32 %v5556_v1, %v5555_v30  ;;  %8457 = vrcp.f32 %v4486_v36  ;;  %v14457_v26 = vld [vmem:[#allocation80_spill] sm:$0xff] }
 0x4f9   :  { %v4603_v55 = vrot.slane %v4602_v20, 2  ;;  %v13224_v37 = vadd.f32 %v5563_v45, %v5562_v5  ;;  %v13226_v15 = vadd.f32 %v5570_v9, %v5569_v38  ;;  %v5577_v60 = vrot.slane %v5576_v54, 1 }
 0x4fa   :  { %v5586_v34 = vsel %vm2302_vm1, %v13155_v3, 0.0  ;;  %v5593_v49 = vsel %vm2302_vm1, %v13160_v61, 0.0  ;;  %v5600_v57 = vsel %vm2302_vm1, %v13164_v21, 0.0  ;;  %v13235_v40 = vmul.f32 %v8450_v10, %v13131_v59 }
 0x4fb   :  { %v5583_v30 = vadd.f32 %v5582_v17, %v5581_v23  ;;  %v5587_v27 = vrot.slane %v5586_v34, 4  ;;  %v5594_v28 = vrot.slane %v5593_v49, 4  ;;  %8459 = vrcp.f32 %v4600_v22 }
 0x4fc   :  { %v5601_v6 = vrot.slane %v5600_v57, 4  ;;  %v5607_v33 = vsel %vm2302_vm1, %v14456_v52, 0.0  ;;  %v5614_v3 = vsel %vm2302_vm1, %v14457_v26, 0.0  ;;  %v13241_v1 = vadd.f32 %v4603_v55, %v4602_v20 }
 0x4fd   :  { %v5588_v61 = vadd.f32 %v5587_v27, %v5586_v34  ;;  %v5595_v63 = vadd.f32 %v5594_v28, %v5593_v49  ;;  %v5608_v12 = vrot.slane %v5607_v33, 4  ;;  %v13243_v21 = vadd.f32 %v5577_v60, %v5576_v54 }
 0x4fe   :  { %v5602_v59 = vadd.f32 %v5601_v6, %v5600_v57  ;;  %v5615_v5 = vrot.slane %v5614_v3, 4  ;;  %v5621_v38 = vsel %vm2302_vm1, %v13168_v56, 0.0  ;;  %v5584_v23 = vrot.slane %v5583_v30, 1 }
 0x4ff   :  { %v5589_v11 = vrot.slane %v5588_v61, 2  ;;  %v5596_v43 = vrot.slane %v5595_v63, 2  ;;  %v5609_v24 = vadd.f32 %v5608_v12, %v5607_v33  ;;  %v5622_v9 = vrot.slane %v5621_v38, 4 }
 0x500   :  { %v5603_v36 = vrot.slane %v5602_v59, 2  ;;  %v5616_v45 = vadd.f32 %v5615_v5, %v5614_v3  ;;  %v5628_v47 = vsel %vm2302_vm1, %v13172_v0, 0.0  ;;  %v5635_v27 = vsel %vm2302_vm1, %v13178_v35, 0.0 }
 0x501   :  { %v5590_v7 = vadd.f32 %v5589_v11, %v5588_v61  ;;  %v5597_v54 = vadd.f32 %v5596_v43, %v5595_v63  ;;  %v5610_v17 = vrot.slane %v5609_v24, 2  ;;  %v13250_v10 = vpop.eup %8451  ;;  %v5623_v56 = vadd.f32 %v5622_v9, %v5621_v38 }
 0x502   :  { %v5604_v22 = vadd.f32 %v5603_v36, %v5602_v59  ;;  %v5617_v55 = vrot.slane %v5616_v45, 2  ;;  %v5629_v60 = vrot.slane %v5628_v47, 4  ;;  %v5585_v3 = vadd.f32 %v5584_v23, %v5583_v30 }
 0x503   :  { %v5591_v34 = vrot.slane %v5590_v7, 1  ;;  %v5598_v49 = vrot.slane %v5597_v54, 1  ;;  %v5611_v57 = vadd.f32 %v5610_v17, %v5609_v24  ;;  %v13254_v28 = vpop.eup %8453  ;;  %v5624_v52 = vrot.slane %v5623_v56, 2 }
 0x504   :  { %v5605_v0 = vrot.slane %v5604_v22, 1  ;;  %v5618_v6 = vadd.f32 %v5617_v55, %v5616_v45  ;;  %v5630_v33 = vadd.f32 %v5629_v60, %v5628_v47  ;;  %v13256_v26 = vpop.eup %8455  ;;  %v5636_v12 = vrot.slane %v5635_v27, 4 }
 0x505   :  { %v5592_v61 = vadd.f32 %v5591_v34, %v5590_v7  ;;  %v5612_v63 = vrot.slane %v5611_v57, 1  ;;  %v13258_v59 = vpop.eup %8457  ;;  %v5599_v5 = vadd.f32 %v5598_v49, %v5597_v54  ;;  %v5625_v11 = vadd.f32 %v5624_v52, %v5623_v56 }
 0x506   :  { %v5619_v38 = vrot.slane %v5618_v6, 1  ;;  %v5631_v43 = vrot.slane %v5630_v33, 2  ;;  %v5606_v24 = vadd.f32 %v5605_v0, %v5604_v22  ;;  %v5637_v35 = vadd.f32 %v5636_v12, %v5635_v27 }
 0x507   :  { %v5642_v36 = vsel %vm2302_vm1, %v13182_v16, 0.0  ;;  %v5649_v45 = vsel %vm2302_vm1, %v13191_v42, 0.0  ;;  %v5613_v9 = vadd.f32 %v5612_v63, %v5611_v57  ;;  %v5626_v47 = vrot.slane %v5625_v11, 1 }
 0x508   :  { %v5632_v30 = vadd.f32 %v5631_v43, %v5630_v33  ;;  %v5643_v23 = vrot.slane %v5642_v36, 4  ;;  %v13264_v7 = vpop.eup %8459  ;;  %v5620_v17 = vadd.f32 %v5619_v38, %v5618_v6  ;;  %v5638_v55 = vrot.slane %v5637_v35, 2 }
 0x509   :  { %v5650_v54 = vrot.slane %v5649_v45, 4  ;;  %v5656_v56 = vsel %vm2302_vm1, %v13217_v25, 0.0  ;;  %v5968_v16 = vpack.c.bf16 %v13222_v53, %v13222_v53  ;;  %v5627_v49 = vadd.f32 %v5626_v47, %v5625_v11 }
 0x50a   :  { %v5633_v22 = vrot.slane %v5632_v30, 1  ;;  %v5644_v60 = vadd.f32 %v5643_v23, %v5642_v36  ;;  %v5657_v34 = vrot.slane %v5656_v56, 4  ;;  %v5639_v42 = vadd.f32 %v5638_v55, %v5637_v35 }
 0x50b   :  { %v5651_v57 = vadd.f32 %v5650_v54, %v5649_v45  ;;  %v5969_v27 = vpack.c.bf16 %v13224_v37, %v13224_v37  ;;  %v5970_v33 = vpack.c.bf16 %v13226_v15, %v13226_v15  ;;  %v5971_v12 = vpack.c.bf16 %v13243_v21, %v13243_v21 }
 0x50c   :  { %v5634_v0 = vadd.f32 %v5633_v22, %v5632_v30  ;;  %v5645_v52 = vrot.slane %v5644_v60, 2  ;;  %v5658_v6 = vadd.f32 %v5657_v34, %v5656_v56  ;;  %v5640_v63 = vrot.slane %v5639_v42, 1 }
 0x50d   :  { %v5652_v25 = vrot.slane %v5651_v57, 2  ;;  %v5972_v38 = vpack.c.bf16 %v5585_v3, %v5585_v3  ;;  %v5973_v11 = vpack.c.bf16 %v5592_v61, %v5592_v61  ;;  %v5974_v35 = vpack.c.bf16 %v5599_v5, %v5599_v5 }
 0x50e   :  { %v5646_v43 = vadd.f32 %v5645_v52, %v5644_v60  ;;  %v5659_v53 = vrot.slane %v5658_v6, 2  ;;  %v5641_v36 = vadd.f32 %v5640_v63, %v5639_v42  ;;  %v5975_v47 = vpack.c.bf16 %v5606_v24, %v5606_v24 }
 0x50f   :  { %v5653_v45 = vadd.f32 %v5652_v25, %v5651_v57  ;;  %v5976_v37 = vpack.c.bf16 %v5613_v9, %v5613_v9  ;;  %v5977_v55 = vpack.c.bf16 %v5620_v17, %v5620_v17  ;;  %v5978_v54 = vpack.c.bf16 %v5627_v49, %v5627_v49 }
 0x510   :  { %v5647_v30 = vrot.slane %v5646_v43, 1  ;;  %v5660_v23 = vadd.f32 %v5659_v53, %v5658_v6  ;;  %v5979_v15 = vpack.c.bf16 %v5634_v0, %v5634_v0  ;;  %v5980_v22 = vpack.c.bf16 %v5641_v36, %v5641_v36 }
 0x511   :  { %v5654_v56 = vrot.slane %v5653_v45, 1  ;;  %v6232_v34 = vunpack.c.l.b16 %v5968_v16  ;;  %v6233_v21 = vunpack.c.l.b16 %v5969_v27  ;;  %v6234_v3 = vunpack.c.l.b16 %v5970_v33 }
 0x512   :  { %v5648_v20 = vadd.f32 %v5647_v30, %v5646_v43  ;;  %v5661_v29 = vrot.slane %v5660_v23, 1  ;;  %v6235_v52 = vunpack.c.l.b16 %v5971_v12  ;;  %v6236_v61 = vunpack.c.l.b16 %v5972_v38 }
 0x513   :  { %v5655_v60 = vadd.f32 %v5654_v56, %v5653_v45  ;;  %v6237_v5 = vunpack.c.l.b16 %v5973_v11  ;;  %v6238_v24 = vunpack.c.l.b16 %v5974_v35  ;;  %v6240_v9 = vunpack.c.l.b16 %v5976_v37  ;;  %v14462_v56 = vld [vmem:[#allocation62_spill] sm:$0xff] }
 0x514   :  { %v5662_v42 = vadd.f32 %v5661_v29, %v5660_v23  ;;  %v5981_v57 = vpack.c.bf16 %v5648_v20, %v5648_v20  ;;  %v6241_v6 = vunpack.c.l.b16 %v5977_v55  ;;  %v6242_v17 = vunpack.c.l.b16 %v5978_v54  ;;  %v14459_v23 = vld [vmem:[#allocation77_spill] sm:$0xff]  ;;  %v14460_v55 = vld [vmem:[#allocation22_spill] sm:$0xff]  ;;  %v14461_v54 = vld [vmem:[#allocation63_spill] sm:$0xff] }
 0x515   :  { %v5982_v63 = vpack.c.bf16 %v5655_v60, %v5655_v60  ;;  %v6243_v49 = vunpack.c.l.b16 %v5979_v15  ;;  %v6239_v0 = vunpack.c.l.b16 %v5975_v47  ;;  %v6244_v53 = vunpack.c.l.b16 %v5980_v22 }
 0x516   :  { %v5983_v25 = vpack.c.bf16 %v5662_v42, %v5662_v42  ;;  %v6357_v16 = vsel %vm6280_vm2, %v6233_v21, %v6232_v34  ;;  %v6245_v43 = vunpack.c.l.b16 %v5981_v57  ;;  %v6364_v33 = vsel %vm6280_vm2, %v6241_v6, %v6240_v9  ;;  %v14464_v57 = vld [vmem:[#allocation51_spill] sm:$0xff] }
 0x517   :  { %v6358_v27 = vsel %vm6282_vm3, %v6234_v3, %v6357_v16  ;;  %v14458_v29 = vrot.slane %v13145_v44, 1  ;;  %v6246_v12 = vunpack.c.l.b16 %v5982_v63  ;;  %v6365_v11 = vsel %vm6282_vm3, %v6242_v17, %v6364_v33  ;;  %v14466_v9 = vld [vmem:[#allocation59_spill] sm:$0xff]  ;;  %v14467_v63 = vld [vmem:[#allocation64_spill] sm:$0xff] }
 0x518   :  { %v6359_v38 = vsel %vm6284_vm4, %v6235_v52, %v6358_v27  ;;  %v4461_v35 = vrot.slane %v13151_v58, 1  ;;  %v6247_v36 = vunpack.c.l.b16 %v5983_v25  ;;  %v6366_v47 = vsel %vm6284_vm4, %v6243_v49, %v6365_v11 }
 0x519   :  { %v4456_v20 = vadd.f32 %v14458_v29, %v13145_v44  ;;  %v6360_v45 = vsel %vm6286_vm5, %v6236_v61, %v6359_v38  ;;  %v6367_v37 = vsel %vm6286_vm5, %v6244_v53, %v6366_v47  ;;  %v4833_v44 = vmul.f32 %v14460_v55, %v14459_v23 }
 0x51a   :  { %v4462_v30 = vadd.f32 %v4461_v35, %v13151_v58  ;;  %v4834_v15 = vmul.f32 %v14462_v56, %v14461_v54  ;;  %v6361_v22 = vsel %vm6288_vm6, %v6237_v5, %v6360_v45  ;;  %v6368_v34 = vsel %vm6288_vm6, %v6245_v43, %v6367_v37 }
 0x51b   :  { %8461 = vrcp.f32 %v4456_v20  ;;  %v4835_v21 = vmul.f32 %v13207_v14, %v13092_v48  ;;  %v4836_v3 = vmul.f32 %v13211_v19, %v13102_v39  ;;  %v14463_v60 = vrot.slane %v13241_v1, 1  ;;  %v14465_v14 = vld [vmem:[#allocation87_spill] sm:$0xff] }
 0x51c   :  { %v6362_v52 = vsel %vm6290_vm7, %v6238_v24, %v6361_v22  ;;  %v6369_v61 = vsel %vm6290_vm7, %v6246_v12, %v6368_v34  ;;  %8463 = vrcp.f32 %v4462_v30  ;;  %v4959_v48 = vmul.f32 %v13060_v31, %v14464_v57  ;;  %v14468_v24 = vld [vmem:[#allocation73_spill] sm:$0xff]  ;;  %v14470_v31 = vld [vmem:[#allocation94_spill] sm:$0xff] }
 0x51d   :  { %v13302_v58 = vadd.f32 %v14463_v60, %v13241_v1  ;;  %v6363_v5 = vsel %vm6292_vm8, %v6239_v0, %v6362_v52  ;;  %v6370_v42 = vsel %vm6292_vm8, %v6247_v36, %v6369_v61  ;;  %v4960_v39 = vmul.f32 %v13064_v62, %v14465_v14  ;;  %v14469_v0 = vld [vmem:[#allocation65_spill] sm:$0xff]  ;;  %v14471_v62 = vld [vmem:[#allocation23_spill] sm:$0xff] }
 0x51e   :  { %v13312_v19 = vpack.c.b16 %v6370_v42, %v6363_v5  ;;  %v4961_v1 = vmul.f32 %v4833_v44, %v14466_v9  ;;  %v4962_v6 = vmul.f32 %v4834_v15, %v14467_v63  ;;  %v4963_v17 = vmul.f32 %v4835_v21, %v14468_v24  ;;  %v14472_v15 = vld [vmem:[#allocation21_spill] sm:$0xff] }
 0x51f   :  { %v4841_v49 = vmul.f32 %v13254_v28, %v13138_v8  ;;  %v4842_v25 = vmul.f32 %v13258_v59, %v13186_v51  ;;  %v4964_v53 = vmul.f32 %v4836_v3, %v14469_v0  ;;  %v4967_v16 = vmul.f32 %v13220_v50, %v14470_v31  ;;  %v14473_v9 = vld [vmem:[#allocation69_spill] sm:$0xff] }
 0x520   :  { %7892 = vmatmul.mubr.msk.bf16.gmra.mxu1 %vm2302_vm1, %v13312_v19  ;;  %v4968_v43 = vmul.f32 %v13235_v40, %v14471_v62  ;;  %v5663_v27 = vsel %vm2302_vm1, %v4959_v48, 0.0  ;;  %v5670_v33 = vsel %vm2302_vm1, %v4960_v39, 0.0  ;;  %v5677_v8 = vsel %vm2302_vm1, %v4961_v1, 0.0 }
 0x521   :  { %v5664_v28 = vrot.slane %v5663_v27, 4  ;;  %v5671_v29 = vrot.slane %v5670_v33, 4  ;;  %v5678_v51 = vrot.slane %v5677_v8, 4  ;;  %v5684_v59 = vsel %vm2302_vm1, %v4962_v6, 0.0 }
 0x522   :  { %v5685_v20 = vrot.slane %v5684_v59, 4  ;;  %v5691_v50 = vsel %vm2302_vm1, %v4963_v17, 0.0  ;;  %v5698_v12 = vsel %vm2302_vm1, %v4964_v53, 0.0  ;;  %v5719_v38 = vsel %vm2302_vm1, %v4967_v16, 0.0 }
 0x523   :  { %v5665_v11 = vadd.f32 %v5664_v28, %v5663_v27  ;;  %v5672_v40 = vadd.f32 %v5671_v29, %v5670_v33  ;;  %v5679_v35 = vadd.f32 %v5678_v51, %v5677_v8  ;;  %v5692_v36 = vrot.slane %v5691_v50, 4 }
 0x524   :  { %v5686_v45 = vadd.f32 %v5685_v20, %v5684_v59  ;;  %v5699_v47 = vrot.slane %v5698_v12, 4  ;;  %v5720_v37 = vrot.slane %v5719_v38, 4  ;;  %v5726_v30 = vsel %vm2302_vm1, %v4968_v43, 0.0  ;;  %v14475_v43 = vld [vmem:[#allocation95_spill] sm:$0xff] }
 0x525   :  { %v5666_v23 = vrot.slane %v5665_v11, 2  ;;  %v5673_v55 = vrot.slane %v5672_v40, 2  ;;  %v5680_v44 = vrot.slane %v5679_v35, 2  ;;  %v5693_v54 = vadd.f32 %v5692_v36, %v5691_v50 }
 0x526   :  { %v4969_v22 = vmul.f32 %v4841_v49, %v14472_v15  ;;  %v5687_v34 = vrot.slane %v5686_v45, 2  ;;  %v5700_v21 = vadd.f32 %v5699_v47, %v5698_v12  ;;  %v5721_v3 = vadd.f32 %v5720_v37, %v5719_v38 }
 0x527   :  { %v5667_v52 = vadd.f32 %v5666_v23, %v5665_v11  ;;  %v5674_v61 = vadd.f32 %v5673_v55, %v5672_v40  ;;  %v5681_v5 = vadd.f32 %v5680_v44, %v5679_v35  ;;  %v5694_v57 = vrot.slane %v5693_v54, 2 }
 0x528   :  { %v8462_v56 = vpop.eup %8461  ;;  %v5688_v42 = vadd.f32 %v5687_v34, %v5686_v45  ;;  %v5701_v48 = vrot.slane %v5700_v21, 2  ;;  %v5727_v14 = vrot.slane %v5726_v30, 4  ;;  %v5722_v24 = vrot.slane %v5721_v3, 2 }
 0x529   :  { %v4837_v60 = vmul.f32 %v8462_v56, %v13110_v18  ;;  %v8464_v39 = vpop.eup %8463  ;;  %v5668_v63 = vrot.slane %v5667_v52, 1  ;;  %v5675_v6 = vrot.slane %v5674_v61, 1  ;;  %v5682_v49 = vrot.slane %v5681_v5, 1  ;;  %v14474_v18 = vld [vmem:[#allocation16_spill] sm:$0xff] }
 0x52a   :  { %v4838_v17 = vmul.f32 %v8464_v39, %v13121_v4  ;;  %v5695_v0 = vadd.f32 %v5694_v57, %v5693_v54  ;;  %v5702_v53 = vadd.f32 %v5701_v48, %v5700_v21  ;;  %8465 = vrcp.f32 %v13302_v58 }
 0x52b   :  { %v4965_v1 = vmul.f32 %v4837_v60, %v14473_v9  ;;  %v4970_v31 = vmul.f32 %v4842_v25, %v14474_v18  ;;  %v5689_v16 = vrot.slane %v5688_v42, 1  ;;  %v5669_v33 = vadd.f32 %v5668_v63, %v5667_v52 }
 0x52c   :  { %v4966_v27 = vmul.f32 %v4838_v17, %v14475_v43  ;;  %v5696_v8 = vrot.slane %v5695_v0, 1  ;;  %v5703_v28 = vrot.slane %v5702_v53, 1  ;;  %v5723_v51 = vadd.f32 %v5722_v24, %v5721_v3 }
 0x52d   :  { %v5705_v62 = vsel %vm2302_vm1, %v4965_v1, 0.0  ;;  %v5728_v59 = vadd.f32 %v5727_v14, %v5726_v30  ;;  %v5733_v4 = vsel %vm2302_vm1, %v4969_v22, 0.0  ;;  %v5676_v20 = vadd.f32 %v5675_v6, %v5674_v61 }
 0x52e   :  { %v5706_v29 = vrot.slane %v5705_v62, 4  ;;  %v5683_v50 = vadd.f32 %v5682_v49, %v5681_v5  ;;  %v5712_v12 = vsel %vm2302_vm1, %v4966_v27, 0.0  ;;  %v5734_v58 = vrot.slane %v5733_v4, 4 }
 0x52f   :  { %v5713_v25 = vrot.slane %v5712_v12, 4  ;;  %v5724_v11 = vrot.slane %v5723_v51, 1  ;;  %v5729_v40 = vrot.slane %v5728_v59, 2  ;;  %v5690_v35 = vadd.f32 %v5689_v16, %v5688_v42 }
 0x530   :  { %v5707_v38 = vadd.f32 %v5706_v29, %v5705_v62  ;;  %v5697_v36 = vadd.f32 %v5696_v8, %v5695_v0  ;;  %v5735_v45 = vadd.f32 %v5734_v58, %v5733_v4  ;;  %v5740_v47 = vsel %vm2302_vm1, %v4970_v31, 0.0 }
 0x531   :  { %v5704_v37 = vadd.f32 %v5703_v28, %v5702_v53  ;;  %v5714_v55 = vadd.f32 %v5713_v25, %v5712_v12  ;;  %v5730_v30 = vadd.f32 %v5729_v40, %v5728_v59  ;;  %v5725_v44 = vadd.f32 %v5724_v11, %v5723_v51 }
 0x532   :  { %v5708_v23 = vrot.slane %v5707_v38, 2  ;;  %v5736_v54 = vrot.slane %v5735_v45, 2  ;;  %v5741_v56 = vrot.slane %v5740_v47, 4  ;;  %v5984_v15 = vpack.c.bf16 %v5669_v33, %v5669_v33 }
 0x533   :  { %v5715_v34 = vrot.slane %v5714_v55, 2  ;;  %v5731_v21 = vrot.slane %v5730_v30, 1  ;;  %v5985_v3 = vpack.c.bf16 %v5676_v20, %v5676_v20  ;;  %v5986_v61 = vpack.c.bf16 %v5683_v50, %v5683_v50 }
 0x534   :  { %v5709_v22 = vadd.f32 %v5708_v23, %v5707_v38  ;;  %v5737_v60 = vadd.f32 %v5736_v54, %v5735_v45  ;;  %v5742_v52 = vadd.f32 %v5741_v56, %v5740_v47  ;;  %v5987_v5 = vpack.c.bf16 %v5690_v35, %v5690_v35  ;;  %v14476_v47 = vld [vmem:[#allocation56_spill] sm:$0xff] }
 0x535   :  { %v5716_v57 = vadd.f32 %v5715_v34, %v5714_v55  ;;  %v5732_v48 = vadd.f32 %v5731_v21, %v5730_v30  ;;  %v5988_v14 = vpack.c.bf16 %v5697_v36, %v5697_v36  ;;  %v5989_v1 = vpack.c.bf16 %v5704_v37, %v5704_v37  ;;  %v14477_v55 = vld [vmem:[#allocation145_spill] sm:$0xff] }
 0x536   :  { %v5710_v42 = vrot.slane %v5709_v22, 1  ;;  %v5738_v39 = vrot.slane %v5737_v60, 1  ;;  %v5743_v9 = vrot.slane %v5742_v52, 2  ;;  %v5992_v63 = vpack.c.bf16 %v5725_v44, %v5725_v44  ;;  %v14479_v44 = vld [vmem:[#allocation143_spill] sm:$0xff] }
 0x537   :  { %v5717_v24 = vrot.slane %v5716_v57, 1  ;;  %v5993_v17 = vpack.c.bf16 %v5732_v48, %v5732_v48  ;;  %v6249_v49 = vunpack.c.l.b16 %v5985_v3  ;;  %v8466_v0 = vpop.eup %8465  ;;  %v6248_v31 = vunpack.c.l.b16 %v5984_v15  ;;  %v14481_v48 = vld [vmem:[#allocation47_spill] sm:$0xff] }
 0x538   :  { %v5711_v6 = vadd.f32 %v5710_v42, %v5709_v22  ;;  %v5739_v53 = vadd.f32 %v5738_v39, %v5737_v60  ;;  %v5744_v18 = vadd.f32 %v5743_v9, %v5742_v52  ;;  %v6250_v16 = vunpack.c.l.b16 %v5986_v61  ;;  %v14482_v9 = vld [vmem:[#allocation82_spill] sm:$0xff] }
 0x539   :  { %v5718_v62 = vadd.f32 %v5717_v24, %v5716_v57  ;;  %v6251_v27 = vunpack.c.l.b16 %v5987_v5  ;;  %v6257_v33 = vunpack.c.l.b16 %v5993_v17  ;;  %v6252_v29 = vunpack.c.l.b16 %v5988_v14  ;;  %v14480_v5 = vld [vmem:[#allocation18_spill] sm:$0xff]  ;;  %v14483_v17 = vld [vmem:[#allocation85_spill] sm:$0xff] }
 0x53a   :  { %v5990_v43 = vpack.c.bf16 %v5711_v6, %v5711_v6  ;;  %v5745_v8 = vrot.slane %v5744_v18, 1  ;;  %v5994_v28 = vpack.c.bf16 %v5739_v53, %v5739_v53  ;;  %v4853_v51 = vmul.f32 %v13250_v10, %v13135_v46 }
 0x53b   :  { %v5991_v59 = vpack.c.bf16 %v5718_v62, %v5718_v62  ;;  %v6253_v4 = vunpack.c.l.b16 %v5989_v1  ;;  %v6256_v20 = vunpack.c.l.b16 %v5992_v63  ;;  %v6371_v50 = vsel %vm6280_vm2, %v6249_v49, %v6248_v31  ;;  %v14486_v62 = vld [vmem:[#allocation50_spill] sm:$0xff] }
 0x53c   :  { %v5746_v12 = vadd.f32 %v5745_v8, %v5744_v18  ;;  %v6254_v58 = vunpack.c.l.b16 %v5990_v43  ;;  %v6258_v38 = vunpack.c.l.b16 %v5994_v28  ;;  %v4854_v25 = vmul.f32 %v13256_v26, %v13174_v32  ;;  %v14478_v32 = vld [vmem:[#allocation116_spill] sm:$0xff]  ;;  %v14485_v18 = vld [vmem:[#allocation49_spill] sm:$0xff]  ;;  %v14487_v28 = vld [vmem:[#allocation122_spill] sm:$0xff] }
 0x53d   :  { %v6372_v11 = vsel %vm6282_vm3, %v6250_v16, %v6371_v50  ;;  %v6378_v40 = vsel %vm6280_vm2, %v6257_v33, %v6256_v20  ;;  %v4861_v35 = vmul.f32 %v13264_v7, %v13193_v41  ;;  %v4862_v46 = vmul.f32 %v8466_v0, %v13209_v13 }
 0x53e   :  { %v5995_v10 = vpack.c.bf16 %v5746_v12, %v5746_v12  ;;  %v6255_v36 = vunpack.c.l.b16 %v5991_v59  ;;  %v6373_v45 = vsel %vm6284_vm4, %v6251_v27, %v6372_v11  ;;  %v4981_v37 = vmul.f32 %v4853_v51, %v14476_v47  ;;  %v14489_v59 = vld [vmem:[#allocation140_spill] sm:$0xff] }
 0x53f   :  { %v6374_v23 = vsel %vm6286_vm5, %v6252_v29, %v6373_v45  ;;  %v4982_v30 = vmul.f32 %v4854_v25, %v14477_v55  ;;  %v4989_v26 = vmul.f32 %v4861_v35, %v14478_v32  ;;  %v4990_v54 = vmul.f32 %v4862_v46, %v14479_v44  ;;  %v14488_v29 = vld [vmem:[#allocation36_spill] sm:$0xff]  ;;  %v14493_v46 = vld [vmem:[#allocation29_spill] sm:$0xff]  ;;  %v14495_v45 = vld [vmem:[#allocation30_spill] sm:$0xff] }
 0x540   :  { %v6259_v56 = vunpack.c.l.b16 %v5995_v10  ;;  %v6375_v15 = vsel %vm6288_vm6, %v6253_v4, %v6374_v23  ;;  %v6379_v41 = vsel %vm6282_vm3, %v6258_v38, %v6378_v40  ;;  %v5817_v13 = vsel %vm2302_vm1, %v4981_v37, 0.0  ;;  %v14492_v38 = vld [vmem:[#allocation132_spill] sm:$0xff] }
 0x541   :  { %v5818_v7 = vrot.slane %v5817_v13, 4  ;;  %v5824_v22 = vsel %vm2302_vm1, %v4982_v30, 0.0  ;;  %v5873_v34 = vsel %vm2302_vm1, %v4989_v26, 0.0  ;;  %v5880_v21 = vsel %vm2302_vm1, %v4990_v54, 0.0 }
 0x542   :  { %v6380_v3 = vsel %vm6284_vm4, %v6259_v56, %v6379_v41  ;;  %v5825_v60 = vrot.slane %v5824_v22, 4  ;;  %v5874_v52 = vrot.slane %v5873_v34, 4  ;;  %v5881_v61 = vrot.slane %v5880_v21, 4 }
 0x543   :  { %v6012_v42 = vpack.c.bf16 %v14480_v5, %v14480_v5  ;;  %v6376_v57 = vsel %vm6290_vm7, %v6254_v58, %v6375_v15  ;;  %v6381_v14 = vsel %vm6286_vm5, %v14481_v48, %v6380_v3  ;;  %v5819_v39 = vadd.f32 %v5818_v7, %v5817_v13  ;;  %v14491_v58 = vld [vmem:[#allocation102_spill] sm:$0xff] }
 0x544   :  { %v6382_v1 = vsel %vm6288_vm6, %v14482_v9, %v6381_v14  ;;  %v5826_v63 = vadd.f32 %v5825_v60, %v5824_v22  ;;  %v5875_v6 = vadd.f32 %v5874_v52, %v5873_v34  ;;  %v5882_v24 = vadd.f32 %v5881_v61, %v5880_v21 }
 0x545   :  { %v14484_v49 = vrot.slane %v14483_v17, 1  ;;  %v6377_v53 = vsel %vm6292_vm8, %v6255_v36, %v6376_v57  ;;  %v6383_v31 = vsel %vm6290_vm7, %v14485_v18, %v6382_v1  ;;  %v5820_v16 = vrot.slane %v5819_v39, 2 }
 0x546   :  { %v6384_v43 = vsel %vm6292_vm8, %v14486_v62, %v6383_v31  ;;  %v5827_v27 = vrot.slane %v5826_v63, 2  ;;  %v5876_v33 = vrot.slane %v5875_v6, 2  ;;  %v5883_v8 = vrot.slane %v5882_v24, 2 }
 0x547   :  { %v5872_v0 = vadd.f32 %v14484_v49, %v14483_v17  ;;  %v6387_v51 = vsel %vm6284_vm4, %v14488_v29, %v14487_v28  ;;  %v14490_v4 = vpack.c.bf16 %v14489_v59, %v14489_v59  ;;  %v6405_v50 = vpack.c.b16 %v6384_v43, %v6377_v53  ;;  %v14497_v17 = vld [vmem:[#allocation28_spill] sm:$0xff]  ;;  %v14498_v49 = vld [vmem:[#allocation42_spill] sm:$0xff]  ;;  %v13424_v53 = vpop.f32.mrf.mxu1 }
 0x548   :  { %v5821_v12 = vadd.f32 %v5820_v16, %v5819_v39  ;;  %v6393_v25 = vsel %vm6282_vm3, %v14492_v38, %v14491_v58  ;;  %v5828_v11 = vadd.f32 %v5827_v27, %v5826_v63  ;;  %v5877_v40 = vadd.f32 %v5876_v33, %v5875_v6  ;;  %v13455_v59 = vld [vmem:[%s13852_s4] sm:$0x7f] }
 0x549   :  { %v6275_v20 = vunpack.c.l.b16 %v14490_v4  ;;  %v5884_v35 = vadd.f32 %v5883_v8, %v5882_v24  ;;  %v14494_v10 = vpack.c.bf16 %v14493_v46, %v14493_v46  ;;  %v6005_v47 = vpack.c.bf16 %v14495_v45, %v14495_v45  ;;  %7895 = vmatprep.mubr.msk.bf16.mxu1 %vm2302_vm1, %v6405_v50  ;;  %v14496_v24 = vld [vmem:[#allocation12_spill] sm:$0xff]  ;;  %v13426_v18 = vpop.f32.mrf.mxu1 }
 0x54a   :  { %v6013_v37 = vpack.c.bf16 %v5872_v0, %v5872_v0  ;;  %v5822_v23 = vrot.slane %v5821_v12, 1  ;;  %v6276_v55 = vunpack.c.l.b16 %v6012_v42  ;;  %v5829_v30 = vrot.slane %v5828_v11, 1  ;;  %v14499_v0 = vld [vmem:[#allocation57_spill] sm:$0xff] }
 0x54b   :  { %v6268_v36 = vunpack.c.l.b16 %v14494_v10  ;;  %v5878_v32 = vrot.slane %v5877_v40, 1  ;;  %v5885_v26 = vrot.slane %v5884_v35, 1  ;;  %v6394_v44 = vsel %vm6284_vm4, %v6275_v20, %v6393_v25  ;;  %v13428_v31 = vpop.f32.mrf.mxu1  ;;  %v14500_v20 = vld [vmem:[#allocation5_spill] sm:$0xff] }
 0x54c   :  { %v5823_v54 = vadd.f32 %v5822_v23, %v5821_v12  ;;  %v5830_v56 = vadd.f32 %v5829_v30, %v5828_v11  ;;  %v6269_v7 = vunpack.c.l.b16 %v6005_v47  ;;  %v6277_v22 = vunpack.c.l.b16 %v6013_v37 }
 0x54d   :  { %v5879_v15 = vadd.f32 %v5878_v32, %v5877_v40  ;;  %v5886_v41 = vadd.f32 %v5885_v26, %v5884_v35  ;;  %v6388_v13 = vsel %vm6286_vm5, %v6268_v36, %v6387_v51  ;;  %v6395_v21 = vsel %vm6286_vm5, %v6276_v55, %v6394_v44  ;;  %v13430_v16 = vpop.f32.mrf.mxu1 }
 0x54e   :  { %v6006_v34 = vpack.c.bf16 %v5823_v54, %v5823_v54  ;;  %v6007_v3 = vpack.c.bf16 %v5830_v56, %v5830_v56  ;;  %v6389_v48 = vsel %vm6288_vm6, %v6269_v7, %v6388_v13  ;;  %v6396_v14 = vsel %vm6288_vm6, %v6277_v22, %v6395_v21 }
 0x54f   :  { %v6014_v60 = vpack.c.bf16 %v5879_v15, %v5879_v15  ;;  %v6015_v52 = vpack.c.bf16 %v5886_v41, %v5886_v41  ;;  %v13432_v62 = vpop.f32.mrf.mxu1  ;;  %vm7416_vm2 = vcmask 720512   ;;  %vm7423_vm3 = vcmask 786112  }
 0x550   :  { %v6270_v61 = vunpack.c.l.b16 %v6006_v34  ;;  %v6271_v5 = vunpack.c.l.b16 %v6007_v3  ;;  %vm7430_vm4 = vcmask 851712   ;;  %vm7437_vm5 = vcmask 917312  }
 0x551   :  { %v6278_v42 = vunpack.c.l.b16 %v6014_v60  ;;  %v6279_v57 = vunpack.c.l.b16 %v6015_v52  ;;  %v13434_v43 = vpop.f32.mrf.mxu1  ;;  %vm7444_vm6 = vcmask 982912  }
 0x552   :  { %v6390_v39 = vsel %vm6290_vm7, %v6270_v61, %v6389_v48 }
 0x553   :  { %v6397_v9 = vsel %vm6290_vm7, %v6278_v42, %v6396_v14  ;;  %v6391_v1 = vsel %vm6292_vm8, %v6271_v5, %v6390_v39  ;;  %vm7451_vm7 = vcmask 1048512  }
 0x554   :  { %v6398_v63 = vsel %vm6292_vm8, %v6279_v57, %v6397_v9 }
 0x555   :  { %v6406_v6 = vpack.c.b16 %v6398_v63, %v6391_v1 }
 0x557   :  { %7896 = vmatmul.mubr.msk.bf16.gmra.mxu1 %vm2302_vm1, %v6406_v6 }
 0x558   :  { %7903 = vmatprep.mubr.msk.bf16.mxu1 %vm2302_vm1, %v14496_v24 }
 0x55f   :  { %7904 = vmatmul.mubr.msk.bf16.vlgmr.msra.gmra.mxu1 %vm2302_vm1, %v14497_v17 }
 0x560   :  { %7907 = vmatprep.mubr.msk.bf16.mxu1 %vm2302_vm1, %v14498_v49 }
 0x567   :  { %7908 = vmatmul.mubr.msk.bf16.gmra.mxu1 %vm2302_vm1, %v14499_v0 }
 0x568   :  { %7911 = vmatprep.mubr.msk.bf16.mxu1 %vm2302_vm1, %v13019_v2  ;;  %v13436_v2 = vpop.f32.mrf.mxu1 }
 0x56a   :  { %v13438_v27 = vpop.f32.mrf.mxu1 }
 0x56f   :  { %7912 = vmatmul.mubr.msk.bf16.gmra.mxu1 %vm2302_vm1, %v13312_v19 }
 0x570   :  { %7915 = vmatprep.mubr.msk.bf16.mxu1 %vm2302_vm1, %v6405_v50  ;;  %v14501_v50 = vsub.s32 1, %v14500_v20 }
 0x572   :  { %v13462_v12 = vrot.slane %v13455_v59, %v14501_v50 }
 0x577   :  { %7916 = vmatmul.mubr.msk.bf16.gmra.mxu1 %vm2302_vm1, %v6406_v6 }
 0x5e0   :  { %v13440_v19 = vpop.f32.mrf.mxu1 }
 0x5e2   :  { %v13442_v33 = vpop.f32.mrf.mxu1 }
 0x5e4   :  { %v13444_v8 = vpop.f32.mrf.mxu1 }
 0x5e6   :  { %v13446_v28 = vpop.f32.mrf.mxu1 }
 0x617   :  { %v13448_v29 = vpop.f32.mrf.mxu1 }
 0x619   :  { %v13450_v51 = vpop.f32.mrf.mxu1 }
 0x61b   :  { %v13457_v4 = vpop.f32.mrf.mxu1 }
 0x61d   :  { %v13464_v58 = vpop.f32.mrf.mxu1 }
 0x61f   :  { %v7905_v38 = vpop.f32.mrf.mxu1 }
 0x620   :  { %v6604_v25 = vadd.f32 %v7905_v38, %v13462_v12 }
 0x621   :  { %v6595_v11 = vpop.f32.mrf.mxu1 }
 0x622   :  { %v7626_v40 = vmul.f32 -1.442695, %v6604_v25  ;;  %v6596_v35 = vadd.f32 %v6595_v11, %v13462_v12 }
 0x623   :  { %v7906_v46 = vpop.f32.mrf.mxu1 }
 0x624   :  { %8467 = vpow2.f32 %v7626_v40  ;;  %v7624_v10 = vmul.f32 -1.442695, %v6596_v35  ;;  %v6607_v36 = vadd.f32 %v7906_v46, %v13462_v12 }
 0x625   :  { %v6598_v45 = vpop.f32.mrf.mxu1 }
 0x626   :  { %8469 = vpow2.f32 %v7624_v10  ;;  %v7627_v47 = vmul.f32 -1.442695, %v6607_v36  ;;  %v6599_v37 = vadd.f32 %v6598_v45, %v13462_v12 }
 0x627   :  { %v7909_v23 = vpop.f32.mrf.mxu1 }
 0x628   :  { %8471 = vpow2.f32 %v7627_v47  ;;  %v7625_v55 = vmul.f32 -1.442695, %v6599_v37  ;;  %v6620_v30 = vadd.f32 %v7909_v23, %v13462_v12 }
 0x629   :  { %v6611_v32 = vpop.f32.mrf.mxu1 }
 0x62a   :  { %8473 = vpow2.f32 %v7625_v55  ;;  %v7630_v26 = vmul.f32 -1.442695, %v6620_v30  ;;  %v6612_v44 = vadd.f32 %v6611_v32, %v13462_v12 }
 0x62b   :  { %v7910_v54 = vpop.f32.mrf.mxu1 }
 0x62c   :  { %8475 = vpow2.f32 %v7630_v26  ;;  %v7628_v56 = vmul.f32 -1.442695, %v6612_v44  ;;  %v6623_v15 = vadd.f32 %v7910_v54, %v13462_v12  ;;  %v14502_v54 = vsub.s32 0, %v14500_v20 }
 0x62d   :  { %v6614_v41 = vpop.f32.mrf.mxu1 }
 0x62e   :  { %8477 = vpow2.f32 %v7628_v56  ;;  %v7631_v13 = vmul.f32 -1.442695, %v6623_v15  ;;  %v6615_v7 = vadd.f32 %v6614_v41, %v13462_v12  ;;  %v13485_v56 = vrot.slane %v13455_v59, %v14502_v54 }
 0x62f   :  { %v7913_v22 = vpop.f32.mrf.mxu1 }
 0x630   :  { %8479 = vpow2.f32 %v7631_v13  ;;  %v7629_v34 = vmul.f32 -1.442695, %v6615_v7  ;;  %v6636_v21 = vadd.f32 %v7913_v22, %v13462_v12  ;;  %v6478_v22 = vadd.f32 %v13426_v18, %v13485_v56 }
 0x631   :  { %v8468_v3 = vpop.eup %8467  ;;  %v6627_v60 = vpop.f32.mrf.mxu1  ;;  %v6518_v54 = vadd.f32 %v13440_v19, %v13485_v56  ;;  %v6521_v19 = vadd.f32 %v13444_v8, %v13485_v56  ;;  %v6534_v8 = vadd.f32 %v13448_v29, %v13485_v56  ;;  %v6537_v29 = vadd.f32 %v13457_v4, %v13485_v56 }
 0x632   :  { %v6708_v52 = vadd.f32 1.0, %v8468_v3  ;;  %8481 = vpow2.f32 %v7629_v34  ;;  %v7634_v61 = vmul.f32 -1.442695, %v6636_v21  ;;  %v6628_v5 = vadd.f32 %v6627_v60, %v13462_v12 }
 0x633   :  { %v8470_v42 = vpop.eup %8469  ;;  %v7914_v57 = vpop.f32.mrf.mxu1  ;;  %v6486_v3 = vadd.f32 %v13424_v53, %v13485_v56  ;;  %v6489_v53 = vadd.f32 %v13428_v31, %v13485_v56 }
 0x634   :  { %8483 = vrcp.f32 %v6708_v52  ;;  %v6706_v48 = vadd.f32 1.0, %v8470_v42  ;;  %v7632_v14 = vmul.f32 -1.442695, %v6628_v5  ;;  %v6639_v39 = vadd.f32 %v7914_v57, %v13462_v12 }
 0x635   :  { %v8472_v9 = vpop.eup %8471  ;;  %8485 = vpow2.f32 %v7634_v61  ;;  %v6630_v1 = vpop.f32.mrf.mxu1  ;;  %v6481_v42 = vadd.f32 %v13430_v16, %v13485_v56  ;;  %v6494_v16 = vadd.f32 %v13434_v43, %v13485_v56  ;;  %v6502_v43 = vadd.f32 %v13432_v62, %v13485_v56 }
 0x636   :  { %8487 = vrcp.f32 %v6706_v48  ;;  %v6709_v63 = vadd.f32 1.0, %v8472_v9  ;;  %v7635_v6 = vmul.f32 -1.442695, %v6639_v39  ;;  %v6631_v24 = vadd.f32 %v6630_v1, %v13462_v12 }
 0x637   :  { %v8474_v17 = vpop.eup %8473  ;;  %8489 = vpow2.f32 %v7632_v14  ;;  %v7917_v49 = vpop.f32.mrf.mxu1 }
 0x638   :  { %8491 = vrcp.f32 %v6709_v63  ;;  %v6707_v0 = vadd.f32 1.0, %v8474_v17  ;;  %v7633_v50 = vmul.f32 -1.442695, %v6631_v24  ;;  %v6652_v38 = vadd.f32 %v7917_v49, %v13462_v12 }
 0x639   :  { %v8476_v25 = vpop.eup %8475  ;;  %8493 = vpow2.f32 %v7635_v6  ;;  %v6643_v11 = vpop.f32.mrf.mxu1 }
 0x63a   :  { %8495 = vrcp.f32 %v6707_v0  ;;  %v6712_v40 = vadd.f32 1.0, %v8476_v25  ;;  %v7638_v35 = vmul.f32 -1.442695, %v6652_v38  ;;  %v6644_v46 = vadd.f32 %v6643_v11, %v13462_v12 }
 0x63b   :  { %v8478_v10 = vpop.eup %8477  ;;  %8497 = vpow2.f32 %v7633_v50  ;;  %v7918_v36 = vpop.f32.mrf.mxu1  ;;  %v6497_v11 = vadd.f32 %v13438_v27, %v13485_v56  ;;  %v6505_v27 = vadd.f32 %v13436_v2, %v13485_v56 }
 0x63c   :  { %8499 = vrcp.f32 %v6712_v40  ;;  %v6710_v45 = vadd.f32 1.0, %v8478_v10  ;;  %v7636_v47 = vmul.f32 -1.442695, %v6644_v46  ;;  %v6655_v37 = vadd.f32 %v7918_v36, %v13462_v12 }
 0x63d   :  { %v8480_v23 = vpop.eup %8479  ;;  %8501 = vpow2.f32 %v7638_v35  ;;  %v6646_v55 = vpop.f32.mrf.mxu1 }
 0x63e   :  { %8503 = vrcp.f32 %v6710_v45  ;;  %v6713_v30 = vadd.f32 1.0, %v8480_v23  ;;  %v7639_v32 = vmul.f32 -1.442695, %v6655_v37  ;;  %v6647_v26 = vadd.f32 %v6646_v55, %v13462_v12 }
 0x63f   :  { %v8482_v44 = vpop.eup %8481  ;;  %8505 = vpow2.f32 %v7636_v47 }
 0x640   :  { %8507 = vrcp.f32 %v6713_v30  ;;  %v6711_v15 = vadd.f32 1.0, %v8482_v44  ;;  %v7637_v41 = vmul.f32 -1.442695, %v6647_v26  ;;  %v6510_v44 = vadd.f32 %v13442_v33, %v13485_v56 }
 0x641   :  { %v8484_v13 = vpop.eup %8483  ;;  %8509 = vpow2.f32 %v7639_v32 }
 0x642   :  { %v8486_v7 = vpop.eup %8485  ;;  %8511 = vrcp.f32 %v6711_v15  ;;  %v13497_v57 = vmul.f32 %v8484_v13, %v6486_v3  ;;  %v6526_v3 = vadd.f32 %v13450_v51, %v13485_v56  ;;  %v6529_v51 = vadd.f32 %v13464_v58, %v13485_v56 }
 0x643   :  { %v8488_v34 = vpop.eup %8487  ;;  %v6716_v21 = vadd.f32 1.0, %v8486_v7  ;;  %8513 = vpow2.f32 %v7637_v41  ;;  %v6513_v7 = vadd.f32 %v13446_v28, %v13485_v56 }
 0x644   :  { %v8490_v12 = vpop.eup %8489  ;;  %v13491_v60 = vmul.f32 %v8488_v34, %v6478_v22  ;;  %v6776_v17 = vsel %vm2302_vm1, %v13497_v57, 0.0 }
 0x645   :  { %v8492_v52 = vpop.eup %8491  ;;  %v6714_v61 = vadd.f32 1.0, %v8490_v12  ;;  %8515 = vrcp.f32 %v6716_v21 }
 0x646   :  { %v8494_v5 = vpop.eup %8493  ;;  %v6770_v18 = vsel %vm2302_vm1, %v13491_v60, 0.0  ;;  %v13509_v49 = vmul.f32 %v8492_v52, %v6489_v53 }
 0x647   :  { %v8496_v48 = vpop.eup %8495  ;;  %8517 = vrcp.f32 %v6714_v61  ;;  %v6717_v14 = vadd.f32 1.0, %v8494_v5  ;;  %6771 = vadd.xlane.f32.xlu0 %v6770_v18 }
 0x648   :  { %v8498_v39 = vpop.eup %8497  ;;  %v13501_v9 = vmul.f32 %v8496_v48, %v6481_v42  ;;  %v6779_v46 = vsel %vm2302_vm1, %v13509_v49, 0.0 }
 0x649   :  { %v8500_v1 = vpop.eup %8499  ;;  %v6715_v63 = vadd.f32 1.0, %v8498_v39  ;;  %8519 = vrcp.f32 %v6717_v14 }
 0x64a   :  { %v8502_v6 = vpop.eup %8501  ;;  %v6773_v24 = vsel %vm2302_vm1, %v13501_v9, 0.0  ;;  %v13521_v36 = vmul.f32 %v8500_v1, %v6502_v43 }
 0x64b   :  { %v8504_v0 = vpop.eup %8503  ;;  %8521 = vrcp.f32 %v6715_v63  ;;  %v6720_v31 = vadd.f32 1.0, %v8502_v6  ;;  %6774 = vadd.xlane.f32.xlu1 %v6773_v24  ;;  %6777 = vadd.xlane.f32.xlu0 %v6776_v17 }
 0x64c   :  { %v8506_v50 = vpop.eup %8505  ;;  %v13513_v38 = vmul.f32 %v8504_v0, %v6494_v16  ;;  %v6788_v30 = vsel %vm2302_vm1, %v13521_v36, 0.0 }
 0x64d   :  { %v8508_v25 = vpop.eup %8507  ;;  %v6718_v40 = vadd.f32 1.0, %v8506_v50  ;;  %8523 = vrcp.f32 %v6720_v31 }
 0x64e   :  { %v8510_v35 = vpop.eup %8509  ;;  %v6782_v10 = vsel %vm2302_vm1, %v13513_v38, 0.0  ;;  %v13531_v32 = vmul.f32 %v8508_v25, %v6505_v27 }
 0x64f   :  { %v8512_v45 = vpop.eup %8511  ;;  %8525 = vrcp.f32 %v6718_v40  ;;  %v6721_v62 = vadd.f32 1.0, %v8510_v35  ;;  %6780 = vadd.xlane.f32.xlu1 %v6779_v46  ;;  %6783 = vadd.xlane.f32.xlu0 %v6782_v10 }
 0x650   :  { %v8514_v47 = vpop.eup %8513  ;;  %v13525_v37 = vmul.f32 %v8512_v45, %v6497_v11  ;;  %v6791_v41 = vsel %vm2302_vm1, %v13531_v32, 0.0 }
 0x651   :  { %v6719_v23 = vadd.f32 1.0, %v8514_v47  ;;  %8527 = vrcp.f32 %v6721_v62 }
 0x652   :  { %v6785_v55 = vsel %vm2302_vm1, %v13525_v37, 0.0  ;;  %v8516_v26 = vpop.eup %8515 }
 0x653   :  { %8529 = vrcp.f32 %v6719_v23  ;;  %6786 = vadd.xlane.f32.xlu1 %v6785_v55  ;;  %6789 = vadd.xlane.f32.xlu0 %v6788_v30  ;;  %v13545_v22 = vmul.f32 %v8516_v26, %v6518_v54 }
 0x654   :  { %v8518_v2 = vpop.eup %8517 }
 0x655   :  { %v13537_v15 = vmul.f32 %v8518_v2, %v6510_v44  ;;  %v6800_v52 = vsel %vm2302_vm1, %v13545_v22, 0.0 }
 0x656   :  { %v8520_v13 = vpop.eup %8519 }
 0x657   :  { %6792 = vadd.xlane.f32.xlu1 %v6791_v41  ;;  %v6794_v33 = vsel %vm2302_vm1, %v13537_v15, 0.0  ;;  %v13557_v61 = vmul.f32 %v8520_v13, %v6521_v19 }
 0x658   :  { %v8522_v34 = vpop.eup %8521  ;;  %6795 = vadd.xlane.f32.xlu0 %v6794_v33 }
 0x659   :  { %v13549_v21 = vmul.f32 %v8522_v34, %v6513_v7  ;;  %v6803_v48 = vsel %vm2302_vm1, %v13557_v61, 0.0 }
 0x65a   :  { %v8524_v12 = vpop.eup %8523 }
 0x65b   :  { %v6797_v28 = vsel %vm2302_vm1, %v13549_v21, 0.0  ;;  %v13569_v39 = vmul.f32 %v8524_v12, %v6534_v8 }
 0x65c   :  { %v8526_v5 = vpop.eup %8525  ;;  %6798 = vadd.xlane.f32.xlu1 %v6797_v28  ;;  %6801 = vadd.xlane.f32.xlu0 %v6800_v52 }
 0x65d   :  { %v13561_v42 = vmul.f32 %v8526_v5, %v6526_v3  ;;  %v6812_v58 = vsel %vm2302_vm1, %v13569_v39, 0.0 }
 0x65e   :  { %v8528_v18 = vpop.eup %8527 }
 0x65f   :  { %v6806_v14 = vsel %vm2302_vm1, %v13561_v42, 0.0  ;;  %v13579_v63 = vmul.f32 %v8528_v18, %v6537_v29 }
 0x660   :  { %v8530_v53 = vpop.eup %8529  ;;  %6804 = vadd.xlane.f32.xlu1 %v6803_v48  ;;  %6807 = vadd.xlane.f32.xlu0 %v6806_v14  ;;  %v7953_v48 = vld [vmem:[%s13851_s3 + $0x28] sm:$0xff]  }
 0x661   :  { %v13573_v1 = vmul.f32 %v8530_v53, %v6529_v51  ;;  %v6815_v6 = vsel %vm2302_vm1, %v13579_v63, 0.0  ;;  %7919 = vmatprep.subr.bf16.mxu1 %v7953_v48 }
 0x662   :  { %7920 = vmatpush3.bf16.msra.mxu1 %v7953_v48 }
 0x663   :  { %v6809_v16 = vsel %vm2302_vm1, %v13573_v1, 0.0 }
 0x664   :  { %6810 = vadd.xlane.f32.xlu1 %v6809_v16  ;;  %6813 = vadd.xlane.f32.xlu0 %v6812_v58 }
 0x668   :  { %6816 = vadd.xlane.f32.xlu1 %v6815_v6 }
 0x6d0   :  { %v6772_v24 = vpop.xlane.xlu0 %6771 }
 0x6d1   :  { %v6819_v17 = vmul.f32 0.03125, %v6772_v24 }
 0x6d3   :  { %v13584_v4 = vsub.f32 %v13491_v60, %v6819_v17 }
 0x6d4   :  { %v6775_v56 = vpop.xlane.xlu1 %6774  ;;  %v6778_v0 = vpop.xlane.xlu0 %6777 }
 0x6d5   :  { %v6820_v31 = vmul.f32 0.03125, %v6775_v56  ;;  %v6821_v50 = vmul.f32 0.03125, %v6778_v0  ;;  %v6851_v43 = vmul.f32 %v13584_v4, %v13584_v4 }
 0x6d7   :  { %v13589_v25 = vsub.f32 %v13501_v9, %v6820_v31  ;;  %v13592_v11 = vsub.f32 %v13497_v57, %v6821_v50  ;;  %v6867_v40 = vsel %vm2302_vm1, %v6851_v43, 0.0 }
 0x6d8   :  { %v6781_v35 = vpop.xlane.xlu1 %6780  ;;  %v6784_v46 = vpop.xlane.xlu0 %6783  ;;  %6868 = vadd.xlane.f32.xlu0 %v6867_v40 }
 0x6d9   :  { %v6822_v60 = vmul.f32 0.03125, %v6781_v35  ;;  %v6823_v10 = vmul.f32 0.03125, %v6784_v46  ;;  %v6852_v45 = vmul.f32 %v13589_v25, %v13589_v25  ;;  %v6853_v62 = vmul.f32 %v13592_v11, %v13592_v11 }
 0x6db   :  { %v13600_v47 = vsub.f32 %v13509_v49, %v6822_v60  ;;  %v13603_v9 = vsub.f32 %v13513_v38, %v6823_v10  ;;  %v6870_v57 = vsel %vm2302_vm1, %v6852_v45, 0.0  ;;  %v6873_v27 = vsel %vm2302_vm1, %v6853_v62, 0.0 }
 0x6dc   :  { %v6787_v23 = vpop.xlane.xlu1 %6786  ;;  %v6790_v55 = vpop.xlane.xlu0 %6789  ;;  %6871 = vadd.xlane.f32.xlu1 %v6870_v57  ;;  %6874 = vadd.xlane.f32.xlu0 %v6873_v27 }
 0x6dd   :  { %v6824_v30 = vmul.f32 0.03125, %v6787_v23  ;;  %v6825_v26 = vmul.f32 0.03125, %v6790_v55  ;;  %v6854_v44 = vmul.f32 %v13600_v47, %v13600_v47  ;;  %v6855_v49 = vmul.f32 %v13603_v9, %v13603_v9 }
 0x6df   :  { %v13612_v2 = vsub.f32 %v13525_v37, %v6824_v30  ;;  %v13615_v38 = vsub.f32 %v13521_v36, %v6825_v26  ;;  %v6876_v54 = vsel %vm2302_vm1, %v6854_v44, 0.0  ;;  %v6879_v41 = vsel %vm2302_vm1, %v6855_v49, 0.0  ;;  %v7954_v44 = vld [vmem:[%s13851_s3 + $0x20] sm:$0xff]  }
 0x6e0   :  { %v6793_v13 = vpop.xlane.xlu1 %6792  ;;  %6877 = vadd.xlane.f32.xlu1 %v6876_v54  ;;  %6880 = vadd.xlane.f32.xlu0 %v6879_v41 }
 0x6e1   :  { %v6826_v7 = vmul.f32 0.03125, %v6793_v13  ;;  %v6796_v33 = vpop.xlane.xlu0 %6795  ;;  %v6856_v34 = vmul.f32 %v13612_v2, %v13612_v2  ;;  %v6857_v19 = vmul.f32 %v13615_v38, %v13615_v38  ;;  %7921 = vmatprep.subr.bf16.mxu1 %v7954_v44 }
 0x6e2   :  { %v6827_v37 = vmul.f32 0.03125, %v6796_v33  ;;  %7922 = vmatpush3.bf16.msra.mxu1 %v7954_v44 }
 0x6e3   :  { %v13624_v12 = vsub.f32 %v13531_v32, %v6826_v7  ;;  %v6882_v36 = vsel %vm2302_vm1, %v6856_v34, 0.0  ;;  %v6885_v3 = vsel %vm2302_vm1, %v6857_v19, 0.0 }
 0x6e4   :  { %v13629_v28 = vsub.f32 %v13537_v15, %v6827_v37  ;;  %6883 = vadd.xlane.f32.xlu1 %v6882_v36  ;;  %6886 = vadd.xlane.f32.xlu0 %v6885_v3 }
 0x6e5   :  { %v6799_v52 = vpop.xlane.xlu1 %6798  ;;  %v6802_v5 = vpop.xlane.xlu0 %6801  ;;  %v6858_v8 = vmul.f32 %v13624_v12, %v13624_v12 }
 0x6e6   :  { %v6828_v18 = vmul.f32 0.03125, %v6799_v52  ;;  %v6829_v51 = vmul.f32 0.03125, %v6802_v5  ;;  %v6859_v32 = vmul.f32 %v13629_v28, %v13629_v28 }
 0x6e7   :  { %v6888_v14 = vsel %vm2302_vm1, %v6858_v8, 0.0 }
 0x6e8   :  { %v13640_v15 = vsub.f32 %v13549_v21, %v6828_v18  ;;  %v13643_v53 = vsub.f32 %v13545_v22, %v6829_v51  ;;  %6889 = vadd.xlane.f32.xlu1 %v6888_v14  ;;  %v6891_v29 = vsel %vm2302_vm1, %v6859_v32, 0.0 }
 0x6e9   :  { %v6805_v16 = vpop.xlane.xlu1 %6804  ;;  %6892 = vadd.xlane.f32.xlu0 %v6891_v29  ;;  %v6808_v58 = vpop.xlane.xlu0 %6807 }
 0x6ea   :  { %v6830_v6 = vmul.f32 0.03125, %v6805_v16  ;;  %v6831_v24 = vmul.f32 0.03125, %v6808_v58  ;;  %v6860_v17 = vmul.f32 %v13640_v15, %v13640_v15  ;;  %v6861_v21 = vmul.f32 %v13643_v53, %v13643_v53 }
 0x6eb   :  { %v7001_v58 = vsub.s32 3, %v14500_v20 }
 0x6ec   :  { %v13651_v56 = vsub.f32 %v13557_v61, %v6830_v6  ;;  %v13654_v22 = vsub.f32 %v13561_v42, %v6831_v24  ;;  %v6894_v0 = vsel %vm2302_vm1, %v6860_v17, 0.0  ;;  %v6897_v31 = vsel %vm2302_vm1, %v6861_v21, 0.0 }
 0x6ed   :  { %6895 = vadd.xlane.f32.xlu1 %v6894_v0  ;;  %v6811_v50 = vpop.xlane.xlu1 %6810  ;;  %6898 = vadd.xlane.f32.xlu0 %v6897_v31  ;;  %v6814_v43 = vpop.xlane.xlu0 %6813  ;;  %v14503_v21 = vsub.s32 2, %v14500_v20 }
 0x6ee   :  { %v6832_v40 = vmul.f32 0.03125, %v6811_v50  ;;  %v6833_v35 = vmul.f32 0.03125, %v6814_v43  ;;  %v6862_v46 = vmul.f32 %v13651_v56, %v13651_v56  ;;  %v6863_v61 = vmul.f32 %v13654_v22, %v13654_v22 }
 0x6ef   :  { %v13689_v0 = vrot.slane %v13455_v59, %v14503_v21 }
 0x6f0   :  { %v13663_v60 = vsub.f32 %v13573_v1, %v6832_v40  ;;  %v13666_v42 = vsub.f32 %v13569_v39, %v6833_v35  ;;  %v6900_v10 = vsel %vm2302_vm1, %v6862_v46, 0.0  ;;  %v6903_v45 = vsel %vm2302_vm1, %v6863_v61, 0.0 }
 0x6f1   :  { %6901 = vadd.xlane.f32.xlu1 %v6900_v10  ;;  %v6817_v62 = vpop.xlane.xlu1 %6816  ;;  %6904 = vadd.xlane.f32.xlu0 %v6903_v45  ;;  %v13693_v35 = vrot.slane %v13455_v59, %v7001_v58 }
 0x6f2   :  { %v6834_v57 = vmul.f32 0.03125, %v6817_v62  ;;  %v6864_v27 = vmul.f32 %v13663_v60, %v13663_v60  ;;  %v6865_v23 = vmul.f32 %v13666_v42, %v13666_v42 }
 0x6f4   :  { %v13675_v1 = vsub.f32 %v13579_v63, %v6834_v57  ;;  %v6906_v39 = vsel %vm2302_vm1, %v6864_v27, 0.0  ;;  %v6909_v55 = vsel %vm2302_vm1, %v6865_v23, 0.0 }
 0x6f5   :  { %6907 = vadd.xlane.f32.xlu1 %v6906_v39  ;;  %6910 = vadd.xlane.f32.xlu0 %v6909_v55 }
 0x6f6   :  { %v6866_v30 = vmul.f32 %v13675_v1, %v13675_v1 }
 0x6f8   :  { %v6912_v26 = vsel %vm2302_vm1, %v6866_v30, 0.0 }
 0x6f9   :  { %6913 = vadd.xlane.f32.xlu1 %v6912_v26 }
 0x761   :  { %v6869_v63 = vpop.xlane.xlu0 %6868 }
 0x762   :  { %v6915_v49 = vmul.f32 0.03125, %v6869_v63 }
 0x764   :  { %v6931_v54 = vadd.f32 1e-05, %v6915_v49 }
 0x765   :  { %v6872_v41 = vpop.xlane.xlu1 %6871  ;;  %v6875_v13 = vpop.xlane.xlu0 %6874 }
 0x766   :  { %8531 = vrsqrt.f32 %v6931_v54  ;;  %v6916_v7 = vmul.f32 0.03125, %v6872_v41  ;;  %v6917_v33 = vmul.f32 0.03125, %v6875_v13 }
 0x768   :  { %v6932_v34 = vadd.f32 1e-05, %v6916_v7  ;;  %v6933_v19 = vadd.f32 1e-05, %v6917_v33 }
 0x769   :  { %v6878_v37 = vpop.xlane.xlu1 %6877  ;;  %v6881_v36 = vpop.xlane.xlu0 %6880 }
 0x76a   :  { %8533 = vrsqrt.f32 %v6932_v34  ;;  %v6918_v3 = vmul.f32 0.03125, %v6878_v37  ;;  %v6919_v52 = vmul.f32 0.03125, %v6881_v36 }
 0x76b   :  { %8535 = vrsqrt.f32 %v6933_v19 }
 0x76c   :  { %v6934_v5 = vadd.f32 1e-05, %v6918_v3  ;;  %v6935_v8 = vadd.f32 1e-05, %v6919_v52 }
 0x76d   :  { %v6884_v18 = vpop.xlane.xlu1 %6883  ;;  %v6887_v51 = vpop.xlane.xlu0 %6886 }
 0x76e   :  { %8537 = vrsqrt.f32 %v6934_v5  ;;  %v6920_v32 = vmul.f32 0.03125, %v6884_v18  ;;  %v6921_v48 = vmul.f32 0.03125, %v6887_v51 }
 0x76f   :  { %8539 = vrsqrt.f32 %v6935_v8 }
 0x770   :  { %v6936_v14 = vadd.f32 1e-05, %v6920_v32  ;;  %v6937_v29 = vadd.f32 1e-05, %v6921_v48 }
 0x771   :  { %v6890_v16 = vpop.xlane.xlu1 %6889 }
 0x772   :  { %8541 = vrsqrt.f32 %v6936_v14  ;;  %v6922_v6 = vmul.f32 0.03125, %v6890_v16  ;;  %v6893_v24 = vpop.xlane.xlu0 %6892 }
 0x773   :  { %v8532_v17 = vpop.eup %8531  ;;  %8543 = vrsqrt.f32 %v6937_v29  ;;  %v6923_v31 = vmul.f32 0.03125, %v6893_v24 }
 0x774   :  { %v6938_v50 = vadd.f32 1e-05, %v6922_v6  ;;  %v6963_v43 = vmul.f32 %v8532_v17, %v13584_v4 }
 0x775   :  { %v6939_v40 = vadd.f32 1e-05, %v6923_v31 }
 0x776   :  { %8545 = vrsqrt.f32 %v6938_v50  ;;  %v6896_v46 = vpop.xlane.xlu1 %6895  ;;  %v6899_v61 = vpop.xlane.xlu0 %6898  ;;  %v6983_v57 = vmul.f32 %v13689_v0, %v6963_v43 }
 0x777   :  { %v8534_v10 = vpop.eup %8533  ;;  %8547 = vrsqrt.f32 %v6939_v40  ;;  %v6924_v45 = vmul.f32 0.03125, %v6896_v46  ;;  %v6925_v62 = vmul.f32 0.03125, %v6899_v61 }
 0x778   :  { %v8536_v27 = vpop.eup %8535  ;;  %v6964_v23 = vmul.f32 %v8534_v10, %v13589_v25  ;;  %v7003_v41 = vadd.f32 %v13693_v35, %v6983_v57 }
 0x779   :  { %v6965_v39 = vmul.f32 %v8536_v27, %v13592_v11  ;;  %v6940_v55 = vadd.f32 1e-05, %v6924_v45  ;;  %v6941_v4 = vadd.f32 1e-05, %v6925_v62 }
 0x77a   :  { %v6902_v30 = vpop.xlane.xlu1 %6901  ;;  %v6905_v26 = vpop.xlane.xlu0 %6904  ;;  %v6984_v44 = vmul.f32 %v13689_v0, %v6964_v23 }
 0x77b   :  { %v8538_v63 = vpop.eup %8537  ;;  %8549 = vrsqrt.f32 %v6940_v55  ;;  %v6926_v49 = vmul.f32 0.03125, %v6902_v30  ;;  %v6927_v54 = vmul.f32 0.03125, %v6905_v26  ;;  %v6985_v7 = vmul.f32 %v13689_v0, %v6965_v39 }
 0x77c   :  { %v8540_v13 = vpop.eup %8539  ;;  %v6966_v33 = vmul.f32 %v8538_v63, %v13600_v47  ;;  %8551 = vrsqrt.f32 %v6941_v4  ;;  %v7004_v25 = vadd.f32 %v13693_v35, %v6984_v44 }
 0x77d   :  { %v6942_v11 = vadd.f32 1e-05, %v6926_v49  ;;  %v6943_v34 = vadd.f32 1e-05, %v6927_v54  ;;  %v6967_v19 = vmul.f32 %v8540_v13, %v13603_v9  ;;  %v7005_v47 = vadd.f32 %v13693_v35, %v6985_v7 }
 0x77e   :  { %v6986_v37 = vmul.f32 %v13689_v0, %v6966_v33  ;;  %v6908_v36 = vpop.xlane.xlu1 %6907  ;;  %v6911_v3 = vpop.xlane.xlu0 %6910  ;;  %v7019_v52 = vpack.c.bf16 %v7004_v25, %v7003_v41 }
 0x77f   :  { %v8542_v5 = vpop.eup %8541  ;;  %8553 = vrsqrt.f32 %v6942_v11  ;;  %v6928_v8 = vmul.f32 0.03125, %v6908_v36  ;;  %v6929_v18 = vmul.f32 0.03125, %v6911_v3  ;;  %v6987_v51 = vmul.f32 %v13689_v0, %v6967_v19 }
 0x780   :  { %v8544_v32 = vpop.eup %8543  ;;  %v7006_v48 = vadd.f32 %v13693_v35, %v6986_v37  ;;  %8555 = vrsqrt.f32 %v6943_v34  ;;  %7923 = vmatprep.mubr.msk.bf16.mxu1 %vm2302_vm1, %v7019_v52  ;;  %v6968_v9 = vmul.f32 %v8542_v5, %v13612_v2 }
 0x781   :  { %v6969_v14 = vmul.f32 %v8544_v32, %v13615_v38  ;;  %v6944_v29 = vadd.f32 1e-05, %v6928_v8  ;;  %v6945_v16 = vadd.f32 1e-05, %v6929_v18  ;;  %v7007_v31 = vadd.f32 %v13693_v35, %v6987_v51 }
 0x782   :  { %v7020_v58 = vpack.c.bf16 %v7006_v48, %v7005_v47  ;;  %v6914_v6 = vpop.xlane.xlu1 %6913  ;;  %v6988_v24 = vmul.f32 %v13689_v0, %v6968_v9  ;;  %v7187_v32 = vsub.s32 5, %v14500_v20 }
 0x783   :  { %v8546_v17 = vpop.eup %8545  ;;  %8557 = vrsqrt.f32 %v6944_v29  ;;  %v6930_v21 = vmul.f32 0.03125, %v6914_v6  ;;  %v6989_v38 = vmul.f32 %v13689_v0, %v6969_v14 }
 0x784   :  { %v8548_v50 = vpop.eup %8547  ;;  %v6970_v43 = vmul.f32 %v8546_v17, %v13624_v12  ;;  %8559 = vrsqrt.f32 %v6945_v16  ;;  %7924 = vmatmul.mubr.msk.bf16.vlgmr.msra.gmra.mxu1 %vm2302_vm1, %v7020_v58  ;;  %v7008_v2 = vadd.f32 %v13693_v35, %v6988_v24 }
 0x785   :  { %v6946_v40 = vadd.f32 1e-05, %v6930_v21  ;;  %v6971_v46 = vmul.f32 %v8548_v50, %v13629_v28  ;;  %v7009_v62 = vadd.f32 %v13693_v35, %v6989_v38 }
 0x786   :  { %v7021_v61 = vpack.c.bf16 %v7008_v2, %v7007_v31  ;;  %v6990_v10 = vmul.f32 %v13689_v0, %v6970_v43 }
 0x787   :  { %8561 = vrsqrt.f32 %v6946_v40  ;;  %v6991_v23 = vmul.f32 %v13689_v0, %v6971_v46 }
 0x788   :  { %v8550_v45 = vpop.eup %8549  ;;  %7927 = vmatprep.mubr.msk.bf16.mxu1 %vm2302_vm1, %v7021_v61  ;;  %v7010_v12 = vadd.f32 %v13693_v35, %v6990_v10 }
 0x789   :  { %v8552_v57 = vpop.eup %8551  ;;  %v6972_v27 = vmul.f32 %v8550_v45, %v13640_v15  ;;  %v7011_v44 = vadd.f32 %v13693_v35, %v6991_v23 }
 0x78a   :  { %v6973_v39 = vmul.f32 %v8552_v57, %v13643_v53  ;;  %v7022_v55 = vpack.c.bf16 %v7010_v12, %v7009_v62 }
 0x78b   :  { %v6992_v28 = vmul.f32 %v13689_v0, %v6972_v27 }
 0x78c   :  { %v8554_v4 = vpop.eup %8553  ;;  %7928 = vmatmul.mubr.msk.bf16.gmra.mxu1 %vm2302_vm1, %v7022_v55  ;;  %v6993_v49 = vmul.f32 %v13689_v0, %v6973_v39 }
 0x78d   :  { %v8556_v30 = vpop.eup %8555  ;;  %v6974_v26 = vmul.f32 %v8554_v4, %v13651_v56  ;;  %v7012_v63 = vadd.f32 %v13693_v35, %v6992_v28 }
 0x78e   :  { %v6975_v15 = vmul.f32 %v8556_v30, %v13654_v22  ;;  %v7013_v7 = vadd.f32 %v13693_v35, %v6993_v49 }
 0x78f   :  { %v7023_v54 = vpack.c.bf16 %v7012_v63, %v7011_v44  ;;  %v6994_v53 = vmul.f32 %v13689_v0, %v6974_v26 }
 0x790   :  { %v8558_v41 = vpop.eup %8557  ;;  %v6995_v25 = vmul.f32 %v13689_v0, %v6975_v15 }
 0x791   :  { %v8560_v13 = vpop.eup %8559  ;;  %7931 = vmatprep.mubr.msk.bf16.mxu1 %vm2302_vm1, %v7023_v54  ;;  %v7014_v33 = vadd.f32 %v13693_v35, %v6994_v53  ;;  %v6976_v56 = vmul.f32 %v8558_v41, %v13663_v60 }
 0x792   :  { %v6977_v11 = vmul.f32 %v8560_v13, %v13666_v42  ;;  %v7015_v36 = vadd.f32 %v13693_v35, %v6995_v25 }
 0x793   :  { %v7024_v34 = vpack.c.bf16 %v7014_v33, %v7013_v7  ;;  %v6996_v22 = vmul.f32 %v13689_v0, %v6976_v56 }
 0x794   :  { %v8562_v19 = vpop.eup %8561  ;;  %v6997_v52 = vmul.f32 %v13689_v0, %v6977_v11 }
 0x795   :  { %v6978_v37 = vmul.f32 %v8562_v19, %v13675_v1  ;;  %7932 = vmatmul.mubr.msk.bf16.gmra.mxu1 %vm2302_vm1, %v7024_v34  ;;  %v7016_v3 = vadd.f32 %v13693_v35, %v6996_v22  ;;  %v7034_v1 = vsub.s32 4, %v14500_v20 }
 0x796   :  { %v7017_v42 = vadd.f32 %v13693_v35, %v6997_v52 }
 0x797   :  { %v7025_v5 = vpack.c.bf16 %v7016_v3, %v7015_v36  ;;  %v6998_v60 = vmul.f32 %v13689_v0, %v6978_v37  ;;  %v13752_v51 = vrot.slane %v13455_v59, %v7034_v1  ;;  %v13757_v0 = vrot.slane %v13455_v59, %v7187_v32 }
 0x799   :  { %7935 = vmatprep.mubr.msk.bf16.mxu1 %vm2302_vm1, %v7025_v5  ;;  %v7018_v8 = vadd.f32 %v13693_v35, %v6998_v60 }
 0x79b   :  { %v7026_v18 = vpack.c.bf16 %v7018_v8, %v7017_v42 }
 0x79d   :  { %7936 = vmatmul.mubr.msk.bf16.gmra.mxu1 %vm2302_vm1, %v7026_v18 }
 0x844   :  { %v7925_v47 = vpop.f32.mrf.mxu1 }
 0x845   :  { %v7115_v48 = vadd.f32 %v7925_v47, %v13752_v51 }
 0x846   :  { %v7106_v9 = vpop.f32.mrf.mxu1 }
 0x847   :  { %v7171_v14 = vmax.f32 %v7115_v48, 0.0  ;;  %v7107_v35 = vadd.f32 %v7106_v9, %v13752_v51 }
 0x848   :  { %v7926_v29 = vpop.f32.mrf.mxu1 }
 0x849   :  { %v7191_v16 = vmul.f32 %v13757_v0, %v7171_v14  ;;  %v7169_v58 = vmax.f32 %v7107_v35, 0.0  ;;  %v7118_v6 = vadd.f32 %v7926_v29, %v13752_v51 }
 0x84a   :  { %v7109_v24 = vpop.f32.mrf.mxu1 }
 0x84b   :  { %v7189_v17 = vmul.f32 %v13757_v0, %v7169_v58  ;;  %v7172_v21 = vmax.f32 %v7118_v6, 0.0  ;;  %v7110_v31 = vadd.f32 %v7109_v24, %v13752_v51  ;;  %v7211_v50 = vsel %vm2302_vm1, %v7191_v16, 0.0 }
 0x84c   :  { %7212 = vadd.xlane.f32.xlu0 %v7211_v50  ;;  %v7929_v59 = vpop.f32.mrf.mxu1 }
 0x84d   :  { %v7192_v43 = vmul.f32 %v13757_v0, %v7172_v21  ;;  %v7170_v2 = vmax.f32 %v7110_v31, 0.0  ;;  %v7131_v38 = vadd.f32 %v7929_v59, %v13752_v51  ;;  %v7205_v46 = vsel %vm2302_vm1, %v7189_v17, 0.0  ;;  %v8564_v21 = vld [vmem:[%s13852_s4] sm:$0x7f]  ;;  %s8588_s4 = smov [#allocation2]  }
 0x84e   :  { %v7122_v40 = vpop.f32.mrf.mxu1  ;;  %s7461_s12 = sshll.u32 %s8588_s4, 4  ;;  %s7462_s12 = int_to_ptr.vmem [resolvable:$true] %s7461_s12 }
 0x84f   :  { %v7190_v61 = vmul.f32 %v13757_v0, %v7170_v2  ;;  %v7175_v10 = vmax.f32 %v7131_v38, 0.0  ;;  %v7123_v45 = vadd.f32 %v7122_v40, %v13752_v51  ;;  %v7214_v62 = vsel %vm2302_vm1, %v7192_v43, 0.0  ;;  %s8565_s13 = scalar_lea.vmem %s7462_s12, 16  ;;  %s8569_s14 = scalar_lea.vmem %s7462_s12, 32 }
 0x850   :  { %7215 = vadd.xlane.f32.xlu1 %v7214_v62  ;;  %7206 = vadd.xlane.f32.xlu0 %v7205_v46  ;;  %v7930_v12 = vpop.f32.mrf.mxu1  ;;  %p8566_p0 = scmp.ne.s32.totalorder %s7462_s12, %s8565_s13  ;;  %p8570_p1 = scmp.lt.s32.totalorder %s7462_s12, %s7462_s12 }
 0x851   :  { %v7195_v57 = vmul.f32 %v13757_v0, %v7175_v10  ;;  %v7173_v27 = vmax.f32 %v7123_v45, 0.0  ;;  %v7134_v23 = vadd.f32 %v7930_v12, %v13752_v51  ;;  %v7208_v55 = vsel %vm2302_vm1, %v7190_v61, 0.0  ;;  %p8571_p2 = scmp.lt.s32.totalorder %s8569_s14, %s8565_s13 }
 0x852   :  { %v7125_v39 = vpop.f32.mrf.mxu1 }
 0x853   :  { %v7193_v28 = vmul.f32 %v13757_v0, %v7173_v27  ;;  %v7176_v4 = vmax.f32 %v7134_v23, 0.0  ;;  %v7126_v30 = vadd.f32 %v7125_v39, %v13752_v51  ;;  %v7223_v26 = vsel %vm2302_vm1, %v7195_v57, 0.0  ;;  %p8572_p3 = por %p8571_p2, %p8570_p1 }
 0x854   :  { %7209 = vadd.xlane.f32.xlu1 %v7208_v55  ;;  %7224 = vadd.xlane.f32.xlu0 %v7223_v26  ;;  %v7259_v27 = vsub.s32 6, %v14500_v20 }
 0x855   :  { %v7174_v44 = vmax.f32 %v7126_v30, 0.0  ;;  %v7933_v63 = vpop.f32.mrf.mxu1  ;;  %v7196_v15 = vmul.f32 %v13757_v0, %v7176_v4  ;;  %v7217_v41 = vsel %vm2302_vm1, %v7193_v28, 0.0  ;;  %p8573_p4 = pnand %p8572_p3, %p8566_p0 }
 0x856   :  { %v7147_v49 = vadd.f32 %v7933_v63, %v13752_v51 }
 0x857   :  { %v7194_v54 = vmul.f32 %v13757_v0, %v7174_v44  ;;  %v7138_v53 = vpop.f32.mrf.mxu1  ;;  %v7226_v19 = vsel %vm2302_vm1, %v7196_v15, 0.0 }
 0x858   :  { %v7179_v13 = vmax.f32 %v7147_v49, 0.0  ;;  %v7139_v7 = vadd.f32 %v7138_v53, %v13752_v51  ;;  %7218 = vadd.xlane.f32.xlu0 %v7217_v41 }
 0x859   :  { %v7934_v33 = vpop.f32.mrf.mxu1  ;;  %v7220_v56 = vsel %vm2302_vm1, %v7194_v54, 0.0 }
 0x85a   :  { %v7150_v25 = vadd.f32 %v7934_v33, %v13752_v51  ;;  %7221 = vadd.xlane.f32.xlu1 %v7220_v56  ;;  %v7199_v11 = vmul.f32 %v13757_v0, %v7179_v13  ;;  %v7177_v34 = vmax.f32 %v7139_v7, 0.0 }
 0x85b   :  { %v7141_v22 = vpop.f32.mrf.mxu1 }
 0x85c   :  { %v7180_v37 = vmax.f32 %v7150_v25, 0.0  ;;  %v7142_v36 = vadd.f32 %v7141_v22, %v13752_v51  ;;  %7227 = vadd.xlane.f32.xlu0 %v7226_v19  ;;  %v7197_v5 = vmul.f32 %v13757_v0, %v7177_v34  ;;  %v7235_v18 = vsel %vm2302_vm1, %v7199_v11, 0.0 }
 0x85d   :  { %v7937_v3 = vpop.f32.mrf.mxu1 }
 0x85e   :  { %v7200_v52 = vmul.f32 %v13757_v0, %v7180_v37  ;;  %v7178_v60 = vmax.f32 %v7142_v36, 0.0  ;;  %v7163_v42 = vadd.f32 %v7937_v3, %v13752_v51  ;;  %v7229_v9 = vsel %vm2302_vm1, %v7197_v5, 0.0 }
 0x85f   :  { %v7154_v8 = vpop.f32.mrf.mxu1 }
 0x860   :  { %7236 = vadd.xlane.f32.xlu0 %v7235_v18  ;;  %v7198_v32 = vmul.f32 %v13757_v0, %v7178_v60  ;;  %v7183_v47 = vmax.f32 %v7163_v42, 0.0  ;;  %v7155_v48 = vadd.f32 %v7154_v8, %v13752_v51  ;;  %v7238_v40 = vsel %vm2302_vm1, %v7200_v52, 0.0 }
 0x861   :  { %v7938_v1 = vpop.f32.mrf.mxu1  ;;  %v14504_v42 = vlaneseq }
 0x862   :  { %v7203_v35 = vmul.f32 %v13757_v0, %v7183_v47  ;;  %v7181_v29 = vmax.f32 %v7155_v48, 0.0  ;;  %v7232_v58 = vsel %vm2302_vm1, %v7198_v32, 0.0  ;;  %v7166_v24 = vadd.f32 %v7938_v1, %v13752_v51 }
 0x863   :  { %v7157_v14 = vpop.f32.mrf.mxu1  ;;  %v13811_v8 = vand.u32 127, %v14504_v42 }
 0x864   :  { %7230 = vadd.xlane.f32.xlu0 %v7229_v9  ;;  %v7158_v16 = vadd.f32 %v7157_v14, %v13752_v51  ;;  %v7201_v6 = vmul.f32 %v13757_v0, %v7181_v29  ;;  %v7247_v31 = vsel %vm2302_vm1, %v7203_v35, 0.0  ;;  %v7184_v50 = vmax.f32 %v7166_v24, 0.0 }
 0x865   :  { %v7348_v18 = vadd.s32 4294967288, %v13811_v8  ;;  %v7355_v47 = vadd.s32 4294967280, %v13811_v8  ;;  %v7346_v9 = vsub.s32 %v13811_v8, %v14500_v20  ;;  %v7369_v14 = vadd.s32 4294967264, %v13811_v8 }
 0x866   :  { %v7182_v17 = vmax.f32 %v7158_v16, 0.0  ;;  %v7241_v43 = vsel %vm2302_vm1, %v7201_v6, 0.0  ;;  %v7204_v2 = vmul.f32 %v13757_v0, %v7184_v50  ;;  %v7362_v35 = vadd.s32 4294967272, %v13811_v8 }
 0x867   :  { %v7351_v32 = vsub.s32 %v7348_v18, %v14500_v20  ;;  %v7376_v50 = vadd.s32 4294967256, %v13811_v8 }
 0x868   :  { %7233 = vadd.xlane.f32.xlu0 %v7232_v58  ;;  %v7202_v59 = vmul.f32 %v13757_v0, %v7182_v17  ;;  %v7250_v51 = vsel %vm2302_vm1, %v7204_v2, 0.0  ;;  %v7358_v58 = vsub.s32 %v7355_v47, %v14500_v20  ;;  %v7372_v17 = vsub.s32 %v7369_v14, %v14500_v20 }
 0x86a   :  { %v7244_v38 = vsel %vm2302_vm1, %v7202_v59, 0.0  ;;  %vm7409_vm1 = vcmask 654912  }
 0x86b   :  { %7255 = vperm.xlu1 %7943, %v8564_v21   ;;  %v7365_v21 = vsub.s32 %v7362_v35, %v14500_v20 }
 0x86c   :  { %7248 = vadd.xlane.f32.xlu0 %v7247_v31 }
 0x870   :  { %7242 = vadd.xlane.f32.xlu0 %v7241_v43 }
 0x874   :  { %7245 = vadd.xlane.f32.xlu0 %v7244_v38  ;;  %v7383_v38 = vadd.s32 4294967248, %v13811_v8 }
 0x878   :  { %7251 = vadd.xlane.f32.xlu0 %v7250_v51 }
 0x88f   :  { %7239 = vadd.xlane.f32.xlu1 %v7238_v40 }
 0x8d5   :  { %v7213_v46 = vpop.xlane.xlu0 %7212 }
 0x8d9   :  { %v7216_v61 = vpop.xlane.xlu1 %7215  ;;  %v7207_v10 = vpop.xlane.xlu0 %7206 }
 0x8dd   :  { %v7225_v45 = vpop.xlane.xlu0 %7224  ;;  %v7210_v62 = vpop.xlane.xlu1 %7209 }
 0x8e1   :  { %v7219_v12 = vpop.xlane.xlu0 %7218 }
 0x8e3   :  { %v7222_v57 = vpop.xlane.xlu1 %7221 }
 0x8e5   :  { %v7228_v23 = vpop.xlane.xlu0 %7227 }
 0x8e7   :  { %v7256_v0 = vpop.permute.xlu1 %7255 }
 0x8e8   :  { %v7260_v39 = vrot.slane %v7256_v0, %v7259_v27  ;;  %v7404_v0 = vadd.s32 4294967224, %v13811_v8 }
 0x8e9   :  { %v7237_v4 = vpop.xlane.xlu0 %7236 }
 0x8ea   :  { %v7264_v55 = vadd.f32 %v7260_v39, %v7213_v46  ;;  %v7262_v28 = vadd.f32 %v7260_v39, %v7207_v10  ;;  %v7265_v30 = vadd.f32 %v7260_v39, %v7216_v61  ;;  %v7269_v26 = vadd.f32 %v7260_v39, %v7228_v23 }
 0x8eb   :  { %v7263_v63 = vadd.f32 %v7260_v39, %v7210_v62  ;;  %v7267_v49 = vadd.f32 %v7260_v39, %v7222_v57  ;;  %v7268_v15 = vadd.f32 %v7260_v39, %v7225_v45  ;;  %v7266_v53 = vadd.f32 %v7260_v39, %v7219_v12 }
 0x8ec   :  { %7301 = vperm.xlu1 %7943, %v7264_v55   ;;  %7295 = vperm.xlu0 %7944, %v7262_v28   ;;  %v7272_v13 = vadd.f32 %v7260_v39, %v7237_v4  ;;  %v7379_v46 = vsub.s32 %v7376_v50, %v14500_v20  ;;  %v7397_v10 = vadd.s32 4294967232, %v13811_v8  ;;  %v7390_v45 = vadd.s32 4294967240, %v13811_v8 }
 0x8ed   :  { %v7231_v44 = vpop.xlane.xlu0 %7230  ;;  %v7386_v12 = vsub.s32 %v7383_v38, %v14500_v20 }
 0x8ee   :  { %v7270_v7 = vadd.f32 %v7260_v39, %v7231_v44  ;;  %v7400_v55 = vsub.s32 %v7397_v10, %v14500_v20  ;;  %v7393_v28 = vsub.s32 %v7390_v45, %v14500_v20  ;;  %v7425_v44 = vadd.s32 4294967200, %v13811_v8 }
 0x8f0   :  { %7304 = vperm.xlu1 %7943, %v7265_v30   ;;  %7316 = vperm.xlu0 %7944, %v7269_v26   ;;  %v7418_v30 = vadd.s32 4294967208, %v13811_v8 }
 0x8f1   :  { %v7234_v54 = vpop.xlane.xlu0 %7233 }
 0x8f2   :  { %v7271_v19 = vadd.f32 %v7260_v39, %v7234_v54 }
 0x8f4   :  { %7298 = vperm.xlu1 %7943, %v7263_v63   ;;  %7310 = vperm.xlu0 %7944, %v7267_v49   ;;  %v7407_v49 = vsub.s32 %v7404_v0, %v14500_v20 }
 0x8f5   :  { %v7249_v41 = vpop.xlane.xlu0 %7248 }
 0x8f6   :  { %v7276_v25 = vadd.f32 %v7260_v39, %v7249_v41 }
 0x8f8   :  { %7313 = vperm.xlu1 %7943, %v7268_v15   ;;  %v7432_v15 = vadd.s32 4294967192, %v13811_v8 }
 0x8f9   :  { %v7243_v33 = vpop.xlane.xlu0 %7242 }
 0x8fa   :  { %v7274_v56 = vadd.f32 %v7260_v39, %v7243_v33  ;;  %v7421_v33 = vsub.s32 %v7418_v30, %v14500_v20 }
 0x8fc   :  { %7307 = vperm.xlu1 %7943, %v7266_v53  }
 0x8fd   :  { %v7246_v22 = vpop.xlane.xlu0 %7245 }
 0x8fe   :  { %v7275_v37 = vadd.f32 %v7260_v39, %v7246_v22 }
 0x900   :  { %7325 = vperm.xlu1 %7943, %v7272_v13  }
 0x901   :  { %v7252_v36 = vpop.xlane.xlu0 %7251 }
 0x902   :  { %v7277_v3 = vadd.f32 %v7260_v39, %v7252_v36 }
 0x904   :  { %7319 = vperm.xlu1 %7943, %v7270_v7  }
 0x908   :  { %7331 = vperm.xlu1 %7943, %v7274_v56   ;;  %v7428_v56 = vsub.s32 %v7425_v44, %v14500_v20 }
 0x90c   :  { %7337 = vperm.xlu1 %7943, %v7276_v25   ;;  %v7439_v25 = vadd.s32 4294967184, %v13811_v8 }
 0x90e   :  { %v7442_v42 = vsub.s32 %v7439_v25, %v14500_v20 }
 0x918   :  { %v7240_v11 = vpop.xlane.xlu1 %7239 }
 0x919   :  { %v7273_v34 = vadd.f32 %v7260_v39, %v7240_v11  ;;  %v7411_v39 = vadd.s32 4294967216, %v13811_v8 }
 0x91b   :  { %7328 = vperm.xlu0 %7944, %v7273_v34   ;;  %v7414_v54 = vsub.s32 %v7411_v39, %v14500_v20 }
 0x91f   :  { %7322 = vperm.xlu0 %7944, %v7271_v19   ;;  %v7435_v19 = vsub.s32 %v7432_v15, %v14500_v20 }
 0x923   :  { %7334 = vperm.xlu0 %7944, %v7275_v37   ;;  %v7446_v37 = vadd.s32 4294967176, %v13811_v8 }
 0x927   :  { %7340 = vperm.xlu0 %7944, %v7277_v3  }
 0x967   :  { %v7302_v52 = vpop.permute.xlu1 %7301  ;;  %v7296_v48 = vpop.permute.xlu0 %7295 }
 0x968   :  { %v7347_v6 = vrot.slane %v7296_v48, %v7346_v9  ;;  %v7359_v59 = vrot.slane %v7302_v52, %v7358_v58  ;;  %v7449_v9 = vsub.s32 %v7446_v37, %v14500_v20 }
 0x96b   :  { %v7305_v5 = vpop.permute.xlu1 %7304  ;;  %v7317_v24 = vpop.permute.xlu0 %7316 }
 0x96c   :  { %v7366_v40 = vrot.slane %v7305_v5, %v7365_v21  ;;  %v7394_v13 = vrot.slane %v7317_v24, %v7393_v28 }
 0x96f   :  { %v7299_v60 = vpop.permute.xlu1 %7298  ;;  %v7311_v61 = vpop.permute.xlu0 %7310 }
 0x970   :  { %v7352_v29 = vrot.slane %v7299_v60, %v7351_v32  ;;  %v7380_v27 = vrot.slane %v7311_v61, %v7379_v46 }
 0x972   :  { %v7354_v31 = vsel %vm7353_vm9, %v7352_v29, %v7347_v6 }
 0x973   :  { %v7314_v1 = vpop.permute.xlu1 %7313  ;;  %v7361_v2 = vsel %vm7360_vm10, %v7359_v59, %v7354_v31 }
 0x974   :  { %v7368_v62 = vsel %vm7367_vm11, %v7366_v40, %v7361_v2  ;;  %v7387_v26 = vrot.slane %v7314_v1, %v7386_v12 }
 0x977   :  { %v7308_v16 = vpop.permute.xlu1 %7307 }
 0x978   :  { %v7373_v51 = vrot.slane %v7308_v16, %v7372_v17 }
 0x97a   :  { %v7375_v57 = vsel %vm7374_vm12, %v7373_v51, %v7368_v62 }
 0x97b   :  { %v7326_v43 = vpop.permute.xlu1 %7325  ;;  %v7382_v4 = vsel %vm7381_vm13, %v7380_v27, %v7375_v57 }
 0x97c   :  { %v7389_v53 = vsel %vm7388_vm14, %v7387_v26, %v7382_v4  ;;  %v7415_v36 = vrot.slane %v7326_v43, %v7414_v54 }
 0x97d   :  { %v7396_v34 = vsel %vm7395_vm15, %v7394_v13, %v7389_v53 }
 0x97f   :  { %v7320_v23 = vpop.permute.xlu1 %7319 }
 0x980   :  { %v7401_v41 = vrot.slane %v7320_v23, %v7400_v55 }
 0x982   :  { %v7403_v3 = vsel %vm7402_vm0, %v7401_v41, %v7396_v34 }
 0x983   :  { %v7332_v7 = vpop.permute.xlu1 %7331 }
 0x984   :  { %v7429_v60 = vrot.slane %v7332_v7, %v7428_v56 }
 0x987   :  { %v7338_v32 = vpop.permute.xlu1 %7337 }
 0x988   :  { %v7443_v8 = vrot.slane %v7338_v32, %v7442_v42 }
 0x996   :  { %v7329_v63 = vpop.permute.xlu0 %7328 }
 0x997   :  { %v7422_v52 = vrot.slane %v7329_v63, %v7421_v33 }
 0x99a   :  { %v7323_v11 = vpop.permute.xlu0 %7322 }
 0x99b   :  { %v7408_v22 = vrot.slane %v7323_v11, %v7407_v49 }
 0x99d   :  { %v7410_v5 = vsel %vm7409_vm1, %v7408_v22, %v7403_v3 }
 0x99e   :  { %v7417_v18 = vsel %vm7416_vm2, %v7415_v36, %v7410_v5  ;;  %v7335_v1 = vpop.permute.xlu0 %7334 }
 0x99f   :  { %v7424_v47 = vsel %vm7423_vm3, %v7422_v52, %v7417_v18  ;;  %v7436_v48 = vrot.slane %v7335_v1, %v7435_v19 }
 0x9a0   :  { %v7431_v14 = vsel %vm7430_vm4, %v7429_v60, %v7424_v47 }
 0x9a1   :  { %v7438_v35 = vsel %vm7437_vm5, %v7436_v48, %v7431_v14 }
 0x9a2   :  { %v7341_v29 = vpop.permute.xlu0 %7340  ;;  %v7445_v58 = vsel %vm7444_vm6, %v7443_v8, %v7438_v35 }
 0x9a3   :  { %v7450_v16 = vrot.slane %v7341_v29, %v7449_v9 }
 0x9a5   :  { %v7452_v6 = vsel %vm7451_vm7, %v7450_v16, %v7445_v58 }
 0x9a6   :  { %7454 = vst [vmem:[#allocation2] sm:$0x1] %v7452_v6 }
 0x9a7   :  { %8576 = shalt.err (!%p8573_p4)
}
 0x9a8   :  { %7464 = dma.vmem_to_hbm [thread:$0]  %s7462_s12, 16, %s13853_s5, [#allocation3]  }
 0x9a9   :  { %8585 = dma.done.wait [#allocation3], 16  }
 0x9aa   :  { %8586 = vsyncadd [#allocation3], 4294967280 }
 0x9ab   :  { %7468 = vsyncpa [#allocation3], 1 }

</bundles_post_ra>
